<compile_context>
chip_gen: v6e
topology: v6e:2x2x1
jax: 0.10.0
libtpu: 0.0.40
codegen_flags: <defaults>
</compile_context>

<pallas_src>
import functools
import math

import jax
import jax.numpy as jnp
from jax import lax
from jax.experimental import pallas as pl
from jax.experimental.pallas import tpu as pltpu


# ------------------------------ Pallas kernel -------------------------------

def _fused_lenet_kernel(x_ref, t1_ref, t2_ref, w1e_ref, w2t_ref, w3_ref,
                        bias_ref, out_ref):
    dot = functools.partial(jnp.dot, preferred_element_type=jnp.float32)
    bf16 = jnp.bfloat16

    xb = x_ref[...].astype(bf16)                                   # (BT, 784)

    # conv1 + bias + ReLU as one Toeplitz matmul (bf16 operands, f32 acc).
    # Output lane C = (2*ei+ej)*896 + co*144 + p*12 + q holds
    # conv1[co, 2p+ei, 2q+ej]; inner lanes >= 864 of each block are zero pad.
    z1 = dot(xb, t1_ref[...]) + bias_ref[:, 0:3584]                # (BT, 3584)
    z1 = jnp.maximum(z1, 0.0)

    # 2x2/2 max-pool = 3 element-wise maxes across the four 896-lane parity
    # blocks (every slice offset/width is a multiple of 128 -> no relayout).
    p1 = jnp.maximum(jnp.maximum(z1[:, 0:896],     z1[:, 896:1792]),
                     jnp.maximum(z1[:, 1792:2688], z1[:, 2688:3584]))

    # conv2 + bias + ReLU, same Toeplitz trick on the pooled activations.
    z2 = dot(p1.astype(bf16), t2_ref[...]) + bias_ref[:, 3584:4608]  # (BT, 1024)
    z2 = jnp.maximum(z2, 0.0)

    # second 2x2/2 max-pool (four 256-lane parity blocks).
    p2 = jnp.maximum(jnp.maximum(z2[:, 0:256],   z2[:, 256:512]),
                     jnp.maximum(z2[:, 512:768], z2[:, 768:1024]))   # (BT, 256)
    # p2 lane k (< 192) == PyTorch flatten index ko*16 + a*4 + c.

    # fc1 -> fc2 -> out, all lane-padded to 128, kept in f32.
    y1 = jnp.maximum(dot(p2, w1e_ref[...]) + bias_ref[:, 4608:4736], 0.0)
    y2 = jnp.maximum(dot(y1, w2t_ref[...]) + bias_ref[:, 4736:4864], 0.0)
    out_ref[...] = dot(y2, w3_ref[...]) + bias_ref[:, 4864:4992]     # (BT, 128)


# ----------------------- one-time weight preprocessing ----------------------

def prepare_params(params):
    """Lower PyTorch-layout weights into the kernel operands (runs once)."""
    f32 = jnp.float32
    w1 = params["conv1_w"].astype(f32)        # (6, 1, 5, 5)
    b1 = params["conv1_b"].astype(f32)        # (6,)
    w2 = params["conv2_w"].astype(f32)        # (12, 6, 5, 5)
    b2 = params["conv2_b"].astype(f32)        # (12,)

    # --- conv1 Toeplitz matrix T1: (784, 3584) ------------------------------
    # T1[n*28+m, (2*ei+ej)*896 + co*144 + p*12 + q]
    #   = w1[co, 0, n-(2p+ei), m-(2q+ej)]   (masked to the 5x5 support)
    d1 = (jnp.arange(28)[:, None, None]
          - (2 * jnp.arange(12)[None, :, None] + jnp.arange(2)[None, None, :]))
    m1 = ((d1 >= 0) & (d1 <= 4)).astype(f32)          # (28, 12, 2)
    i1 = jnp.clip(d1, 0, 4)
    g = w1[:, 0][:, i1, :]                            # (6, 28,12,2, 5)
    g = g[:, :, :, :, i1]                             # (6, 28,12,2, 28,12,2)
    g = (g * m1[None, :, :, :, None, None, None]
           * m1[None, None, None, None, :, :, :])
    # axes (co, n, p, ei, m, q, ej) -> (n, m, ei, ej, co, p, q)
    g = g.transpose(1, 4, 3, 6, 0, 2, 5).reshape(784, 4, 864)
    t1 = jnp.pad(g, ((0, 0), (0, 0), (0, 32))).reshape(784, 3584)

    # --- conv2 Toeplitz matrix T2: (896, 1024) ------------------------------
    # T2[ci*144 + u*12 + v, (2*es+et)*256 + ko*16 + a*4 + c]
    #   = w2[ko, ci, u-(2a+es), v-(2c+et)]   (masked)
    d2 = (jnp.arange(12)[:, None, None]
          - (2 * jnp.arange(4)[None, :, None] + jnp.arange(2)[None, None, :]))
    m2 = ((d2 >= 0) & (d2 <= 4)).astype(f32)          # (12, 4, 2)
    i2 = jnp.clip(d2, 0, 4)
    h = w2[:, :, i2, :]                               # (12, 6, 12,4,2, 5)
    h = h[..., i2]                                    # (12, 6, 12,4,2, 12,4,2)
    h = (h * m2[None, None, :, :, :, None, None, None]
           * m2[None, None, None, None, None, :, :, :])
    # axes (ko, ci, u, a, es, v, c, et) -> (ci, u, v, es, et, ko, a, c)
    h = h.transpose(1, 2, 5, 4, 7, 0, 3, 6).reshape(864, 4, 192)
    t2 = jnp.pad(h, ((0, 32), (0, 0), (0, 64))).reshape(896, 1024)

    # --- packed biases: one lane-dense vector with 128-aligned sections -----
    b1row = jnp.tile(jnp.pad(jnp.repeat(b1, 144), (0, 32)), 4)      # (3584,)
    b2row = jnp.tile(jnp.pad(jnp.repeat(b2, 16), (0, 64)), 4)       # (1024,)
    bias = jnp.concatenate([
        b1row, b2row,
        jnp.pad(params["fc1_b"].astype(f32), (0, 8)),               # (128,)
        jnp.pad(params["fc2_b"].astype(f32), (0, 68)),              # (128,)
        jnp.pad(params["out_b"].astype(f32), (0, 118)),             # (128,)
    ]).reshape(1, 4992)

    # --- fc weights, transposed and zero-padded to 128-lane multiples -------
    w1e = jnp.pad(params["fc1_w"].astype(f32).T, ((0, 64), (0, 8)))    # (256,128)
    w2t = jnp.pad(params["fc2_w"].astype(f32).T, ((0, 8), (0, 68)))    # (128,128)
    w3 = jnp.pad(params["out_w"].astype(f32).T, ((0, 68), (0, 118)))   # (128,128)

    return {
        "t1": t1.astype(jnp.bfloat16),   # bf16 MXU operands, f32 accumulation
        "t2": t2.astype(jnp.bfloat16),
        "w1e": w1e, "w2t": w2t, "w3": w3,
        "bias": bias,
    }


# --------------------------------- forward ----------------------------------

def _round_up(x, m):
    return (x + m - 1) // m * m


def network_forward(kp, x, *, batch_block=128):
    """x: (B, 1, 28, 28) float32 -> logits (B, 10)."""
    B = x.shape[0]
    x2 = x.astype(jnp.float32).reshape(B, 28 * 28)

    # Batch tile: multiple of 8 (sublane tile), at most `batch_block`.
    bt = min(batch_block, _round_up(B, 8))
    # Prefer >=2 grid steps for large batches so both v7x TensorCores work.
    if bt >= 128 and _round_up(B, bt) == bt and (bt // 2) % 8 == 0:
        bt //= 2
    bp = _round_up(B, bt)
    if bp != B:
        x2 = jnp.pad(x2, ((0, bp - B), (0, 0)))

    consts = (kp["t1"], kp["t2"], kp["w1e"], kp["w2t"], kp["w3"], kp["bias"])
    grid = (bp // bt,)

    macs = 784 * 3584 + 896 * 1024 + 256 * 128 + 128 * 128 + 128 * 128
    const_bytes = sum(int(c.size) * c.dtype.itemsize for c in consts)
    cost = pl.CostEstimate(
        flops=2 * bp * macs,
        transcendentals=0,
        bytes_accessed=int(x2.size) * 4 + bp * 128 * 4 + const_bytes)

    out = pl.pallas_call(
        _fused_lenet_kernel,
        out_shape=jax.ShapeDtypeStruct((bp, 128), jnp.float32),
        grid=grid,
        in_specs=[pl.BlockSpec((bt, 784), lambda i: (i, 0))]
                 + [pl.BlockSpec(c.shape, lambda i: (0, 0)) for c in consts],
        out_specs=pl.BlockSpec((bt, 128), lambda i: (i, 0)),
        compiler_params=pltpu.CompilerParams(
            dimension_semantics=("parallel",),
            vmem_limit_bytes=40 * 1024 * 1024),
        cost_estimate=cost,
    )(x2, *consts)
    return out[:B, :10]


# ------------------------------- parameters ---------------------------------

def init_params(key):
    """Deterministic PyTorch-style uniform(-1/sqrt(fan_in), 1/sqrt(fan_in))."""
    def u(key, shape, fan_in):
        bound = 1.0 / math.sqrt(fan_in)
        return jax.random.uniform(key, shape, jnp.float32, -bound, bound)

    ks = jax.random.split(key, 10)
    return {
        "conv1_w": u(ks[0], (6, 1, 5, 5), 1 * 5 * 5),
        "conv1_b": u(ks[1], (6,), 1 * 5 * 5),
        "conv2_w": u(ks[2], (12, 6, 5, 5), 6 * 5 * 5),
        "conv2_b": u(ks[3], (12,), 6 * 5 * 5),
        "fc1_w": u(ks[4], (120, 192), 192),
        "fc1_b": u(ks[5], (120,), 192),
        "fc2_w": u(ks[6], (60, 120), 120),
        "fc2_b": u(ks[7], (60,), 120),
        "out_w": u(ks[8], (10, 60), 60),
        "out_b": u(ks[9], (10,), 60),
    }


# ------------------------- pure-JAX reference (check) ------------------------

def network_forward_ref(params, x):
    prec = jax.lax.Precision.HIGHEST

    def conv(x, w, b):
        y = lax.conv_general_dilated(
            x, w, window_strides=(1, 1), padding="VALID",
            dimension_numbers=("NCHW", "OIHW", "NCHW"), precision=prec)
        return jnp.maximum(y + b[None, :, None, None], 0.0)

    def pool(x):
        return lax.reduce_window(
            x, -jnp.inf, lax.max, (1, 1, 2, 2), (1, 1, 2, 2), "VALID")

    t = pool(conv(x, params["conv1_w"], params["conv1_b"]))
    t = pool(conv(t, params["conv2_w"], params["conv2_b"]))
    t = t.reshape(-1, 12 * 4 * 4)
    t = jnp.maximum(jnp.dot(t, params["fc1_w"].T, precision=prec)
                    + params["fc1_b"], 0.0)
    t = jnp.maximum(jnp.dot(t, params["fc2_w"].T, precision=prec)
                    + params["fc2_b"], 0.0)
    return jnp.dot(t, params["out_w"].T, precision=prec) + params["out_b"]


# ----------------------------------- main ------------------------------------

if __name__ == "__main__":
    key = jax.random.PRNGKey(0)
    k_params, k_x = jax.random.split(key)
    params = init_params(k_params)
    kp = prepare_params(params)          # one-time weight lowering (init)

    # MNIST-like input implied by the module (flatten size 12*4*4 => 28x28).
    x = jax.random.normal(k_x, (8, 1, 28, 28), jnp.float32)

    fwd = jax.jit(network_forward)
    out = jax.block_until_ready(fwd(kp, x))
    ref = jax.block_until_ready(network_forward_ref(params, x))

    assert out.shape == (8, 10), out.shape
    # bf16 MXU operands are used for the two conv matmuls (per perf review),
    # which introduces O(1e-3) absolute error on the logits; fc chain is f32.
    assert jnp.allclose(out, ref, atol=2e-2, rtol=2e-2), (
        "Pallas output mismatch vs JAX reference")
    print("KERNEL_OK")
</pallas_src>

<mosaic_0001>
module attributes {stable_mosaic.version = 11 : i64} {
  func.func @_fused_lenet_kernel(%arg0: i32, %arg1: memref<8x784xf32, #tpu.memory_space<vmem>>, %arg2: memref<784x3584xbf16, #tpu.memory_space<vmem>>, %arg3: memref<896x1024xbf16, #tpu.memory_space<vmem>>, %arg4: memref<256x128xf32, #tpu.memory_space<vmem>>, %arg5: memref<128x128xf32, #tpu.memory_space<vmem>>, %arg6: memref<128x128xf32, #tpu.memory_space<vmem>>, %arg7: memref<1x4992xf32, #tpu.memory_space<vmem>>, %arg8: memref<8x128xf32, #tpu.memory_space<vmem>>) attributes {dimension_semantics = [#tpu.dimension_semantics<parallel>], iteration_bounds = array<i64: 1>, scalar_prefetch = 0 : i64, scratch_operands = 0 : i64, tpu.core_type = #tpu.core_type<tc>, window_params = [{transform_indices = @transform_0, window_bounds = array<i64: 8, 784>}, {pipeline_mode = #tpu.pipeline_mode<synchronous>, transform_indices = @transform_1, window_bounds = array<i64: 784, 3584>}, {pipeline_mode = #tpu.pipeline_mode<synchronous>, transform_indices = @transform_2, window_bounds = array<i64: 896, 1024>}, {pipeline_mode = #tpu.pipeline_mode<synchronous>, transform_indices = @transform_3, window_bounds = array<i64: 256, 128>}, {pipeline_mode = #tpu.pipeline_mode<synchronous>, transform_indices = @transform_4, window_bounds = array<i64: 128, 128>}, {pipeline_mode = #tpu.pipeline_mode<synchronous>, transform_indices = @transform_5, window_bounds = array<i64: 128, 128>}, {pipeline_mode = #tpu.pipeline_mode<synchronous>, transform_indices = @transform_6, window_bounds = array<i64: 1, 4992>}, {transform_indices = @transform_7, window_bounds = array<i64: 8, 128>}]} {
    %c0 = arith.constant 0 : index
    %c0_0 = arith.constant 0 : index
    %0 = vector.load %arg1[%c0, %c0_0] : memref<8x784xf32, #tpu.memory_space<vmem>>, vector<8x784xf32>
    %1 = arith.truncf %0 : vector<8x784xf32> to vector<8x784xbf16>
    %c0_1 = arith.constant 0 : index
    %c0_2 = arith.constant 0 : index
    %2 = vector.load %arg2[%c0_1, %c0_2] : memref<784x3584xbf16, #tpu.memory_space<vmem>>, vector<784x3584xbf16>
    %cst = arith.constant dense<0.000000e+00> : vector<8x3584xf32>
    %3 = tpu.matmul %1, %2, %cst {dimension_numbers = #tpu.dot_dimension_numbers<[1], [0], [0], [1], [0, 0, 1, 1], [], []>} : vector<8x784xbf16>, vector<784x3584xbf16>, vector<8x3584xf32> -> vector<8x3584xf32>
    %c0_3 = arith.constant 0 : index
    %c0_4 = arith.constant 0 : index
    %4 = vector.load %arg7[%c0_3, %c0_4] : memref<1x4992xf32, #tpu.memory_space<vmem>>, vector<1x3584xf32>
    %5 = vector.broadcast %4 : vector<1x3584xf32> to vector<8x3584xf32>
    %6 = arith.addf %3, %5 : vector<8x3584xf32>
    %cst_5 = arith.constant 0.000000e+00 : f32
    %7 = vector.broadcast %cst_5 : f32 to vector<8x3584xf32>
    %8 = arith.maximumf %6, %7 : vector<8x3584xf32>
    %9 = vector.extract_strided_slice %8 {offsets = [0, 0], sizes = [8, 896], strides = [1, 1]} : vector<8x3584xf32> to vector<8x896xf32>
    %10 = vector.extract_strided_slice %8 {offsets = [0, 896], sizes = [8, 896], strides = [1, 1]} : vector<8x3584xf32> to vector<8x896xf32>
    %11 = arith.maximumf %9, %10 : vector<8x896xf32>
    %12 = vector.extract_strided_slice %8 {offsets = [0, 1792], sizes = [8, 896], strides = [1, 1]} : vector<8x3584xf32> to vector<8x896xf32>
    %13 = vector.extract_strided_slice %8 {offsets = [0, 2688], sizes = [8, 896], strides = [1, 1]} : vector<8x3584xf32> to vector<8x896xf32>
    %14 = arith.maximumf %12, %13 : vector<8x896xf32>
    %15 = arith.maximumf %11, %14 : vector<8x896xf32>
    %16 = arith.truncf %15 : vector<8x896xf32> to vector<8x896xbf16>
    %c0_6 = arith.constant 0 : index
    %c0_7 = arith.constant 0 : index
    %17 = vector.load %arg3[%c0_6, %c0_7] : memref<896x1024xbf16, #tpu.memory_space<vmem>>, vector<896x1024xbf16>
    %cst_8 = arith.constant dense<0.000000e+00> : vector<8x1024xf32>
    %18 = tpu.matmul %16, %17, %cst_8 {dimension_numbers = #tpu.dot_dimension_numbers<[1], [0], [0], [1], [0, 0, 1, 1], [], []>} : vector<8x896xbf16>, vector<896x1024xbf16>, vector<8x1024xf32> -> vector<8x1024xf32>
    %c0_9 = arith.constant 0 : index
    %c3584 = arith.constant 3584 : index
    %19 = vector.load %arg7[%c0_9, %c3584] : memref<1x4992xf32, #tpu.memory_space<vmem>>, vector<1x1024xf32>
    %20 = vector.broadcast %19 : vector<1x1024xf32> to vector<8x1024xf32>
    %21 = arith.addf %18, %20 : vector<8x1024xf32>
    %cst_10 = arith.constant 0.000000e+00 : f32
    %22 = vector.broadcast %cst_10 : f32 to vector<8x1024xf32>
    %23 = arith.maximumf %21, %22 : vector<8x1024xf32>
    %24 = vector.extract_strided_slice %23 {offsets = [0, 0], sizes = [8, 256], strides = [1, 1]} : vector<8x1024xf32> to vector<8x256xf32>
    %25 = vector.extract_strided_slice %23 {offsets = [0, 256], sizes = [8, 256], strides = [1, 1]} : vector<8x1024xf32> to vector<8x256xf32>
    %26 = arith.maximumf %24, %25 : vector<8x256xf32>
    %27 = vector.extract_strided_slice %23 {offsets = [0, 512], sizes = [8, 256], strides = [1, 1]} : vector<8x1024xf32> to vector<8x256xf32>
    %28 = vector.extract_strided_slice %23 {offsets = [0, 768], sizes = [8, 256], strides = [1, 1]} : vector<8x1024xf32> to vector<8x256xf32>
    %29 = arith.maximumf %27, %28 : vector<8x256xf32>
    %30 = arith.maximumf %26, %29 : vector<8x256xf32>
    %c0_11 = arith.constant 0 : index
    %c0_12 = arith.constant 0 : index
    %31 = vector.load %arg4[%c0_11, %c0_12] : memref<256x128xf32, #tpu.memory_space<vmem>>, vector<256x128xf32>
    %cst_13 = arith.constant dense<0.000000e+00> : vector<8x128xf32>
    %32 = tpu.matmul %30, %31, %cst_13 {dimension_numbers = #tpu.dot_dimension_numbers<[1], [0], [0], [1], [0, 0, 1, 1], [], []>} : vector<8x256xf32>, vector<256x128xf32>, vector<8x128xf32> -> vector<8x128xf32>
    %c0_14 = arith.constant 0 : index
    %c4608 = arith.constant 4608 : index
    %33 = vector.load %arg7[%c0_14, %c4608] : memref<1x4992xf32, #tpu.memory_space<vmem>>, vector<1x128xf32>
    %34 = vector.broadcast %33 : vector<1x128xf32> to vector<8x128xf32>
    %35 = arith.addf %32, %34 : vector<8x128xf32>
    %cst_15 = arith.constant 0.000000e+00 : f32
    %36 = vector.broadcast %cst_15 : f32 to vector<8x128xf32>
    %37 = arith.maximumf %35, %36 : vector<8x128xf32>
    %c0_16 = arith.constant 0 : index
    %c0_17 = arith.constant 0 : index
    %38 = vector.load %arg5[%c0_16, %c0_17] : memref<128x128xf32, #tpu.memory_space<vmem>>, vector<128x128xf32>
    %cst_18 = arith.constant dense<0.000000e+00> : vector<8x128xf32>
    %39 = tpu.matmul %37, %38, %cst_18 {dimension_numbers = #tpu.dot_dimension_numbers<[1], [0], [0], [1], [0, 0, 1, 1], [], []>} : vector<8x128xf32>, vector<128x128xf32>, vector<8x128xf32> -> vector<8x128xf32>
    %c0_19 = arith.constant 0 : index
    %c4736 = arith.constant 4736 : index
    %40 = vector.load %arg7[%c0_19, %c4736] : memref<1x4992xf32, #tpu.memory_space<vmem>>, vector<1x128xf32>
    %41 = vector.broadcast %40 : vector<1x128xf32> to vector<8x128xf32>
    %42 = arith.addf %39, %41 : vector<8x128xf32>
    %cst_20 = arith.constant 0.000000e+00 : f32
    %43 = vector.broadcast %cst_20 : f32 to vector<8x128xf32>
    %44 = arith.maximumf %42, %43 : vector<8x128xf32>
    %c0_21 = arith.constant 0 : index
    %c0_22 = arith.constant 0 : index
    %45 = vector.load %arg6[%c0_21, %c0_22] : memref<128x128xf32, #tpu.memory_space<vmem>>, vector<128x128xf32>
    %cst_23 = arith.constant dense<0.000000e+00> : vector<8x128xf32>
    %46 = tpu.matmul %44, %45, %cst_23 {dimension_numbers = #tpu.dot_dimension_numbers<[1], [0], [0], [1], [0, 0, 1, 1], [], []>} : vector<8x128xf32>, vector<128x128xf32>, vector<8x128xf32> -> vector<8x128xf32>
    %c0_24 = arith.constant 0 : index
    %c4864 = arith.constant 4864 : index
    %47 = vector.load %arg7[%c0_24, %c4864] : memref<1x4992xf32, #tpu.memory_space<vmem>>, vector<1x128xf32>
    %48 = vector.broadcast %47 : vector<1x128xf32> to vector<8x128xf32>
    %49 = arith.addf %46, %48 : vector<8x128xf32>
    %c0_25 = arith.constant 0 : index
    %c0_26 = arith.constant 0 : index
    %50 = vector.load %arg8[%c0_25, %c0_26] : memref<8x128xf32, #tpu.memory_space<vmem>>, vector<8x128xf32>
    tpu.vector_store %arg8[%c0_25, %c0_26], %49 {strides = array<i32>} : memref<8x128xf32, #tpu.memory_space<vmem>>, vector<8x128xf32>,
    return
  }
  func.func @transform_0(%arg0: i32) -> (i32, i32) {
    %c0_i32 = arith.constant 0 : i32
    %c0_i32_0 = arith.constant 0 : i32
    return %arg0, %c0_i32 : i32, i32
  }
  func.func @transform_1(%arg0: i32) -> (i32, i32) {
    %c0_i32 = arith.constant 0 : i32
    %c0_i32_0 = arith.constant 0 : i32
    %c0_i32_1 = arith.constant 0 : i32
    return %c0_i32, %c0_i32_0 : i32, i32
  }
  func.func @transform_2(%arg0: i32) -> (i32, i32) {
    %c0_i32 = arith.constant 0 : i32
    %c0_i32_0 = arith.constant 0 : i32
    %c0_i32_1 = arith.constant 0 : i32
    return %c0_i32, %c0_i32_0 : i32, i32
  }
  func.func @transform_3(%arg0: i32) -> (i32, i32) {
    %c0_i32 = arith.constant 0 : i32
    %c0_i32_0 = arith.constant 0 : i32
    %c0_i32_1 = arith.constant 0 : i32
    return %c0_i32, %c0_i32_0 : i32, i32
  }
  func.func @transform_4(%arg0: i32) -> (i32, i32) {
    %c0_i32 = arith.constant 0 : i32
    %c0_i32_0 = arith.constant 0 : i32
    %c0_i32_1 = arith.constant 0 : i32
    return %c0_i32, %c0_i32_0 : i32, i32
  }
  func.func @transform_5(%arg0: i32) -> (i32, i32) {
    %c0_i32 = arith.constant 0 : i32
    %c0_i32_0 = arith.constant 0 : i32
    %c0_i32_1 = arith.constant 0 : i32
    return %c0_i32, %c0_i32_0 : i32, i32
  }
  func.func @transform_6(%arg0: i32) -> (i32, i32) {
    %c0_i32 = arith.constant 0 : i32
    %c0_i32_0 = arith.constant 0 : i32
    %c0_i32_1 = arith.constant 0 : i32
    return %c0_i32, %c0_i32_0 : i32, i32
  }
  func.func @transform_7(%arg0: i32) -> (i32, i32) {
    %c0_i32 = arith.constant 0 : i32
    %c0_i32_0 = arith.constant 0 : i32
    return %arg0, %c0_i32 : i32, i32
  }
}

</mosaic_0001>

<bundles_post_ra>
// kernel: network_forward.1
= control target key start
LH: loop header
LB: loop body
LE: loop exit
PB: predicated region body
PF: predicated region fallthrough
CT: control target
= control target key end

     0   :  { %12 = vsyncpa [#allocation3], 0  ;;  %s19515_s0 = inlined_call_operand.vmem [shape: f32[8,784], index: 0, kind: input, shape index: {}]   ;;  %s19516_s1 = inlined_call_operand.hbm [shape: bf16[784,3584], index: 1, kind: input, shape index: {}]   ;;  %s19517_s2 = inlined_call_operand.hbm [shape: bf16[896,1024], index: 2, kind: input, shape index: {}]   ;;  %s19518_s3 = inlined_call_operand.hbm [shape: f32[256,128], index: 3, kind: input, shape index: {}]   ;;  %s19519_s4 = inlined_call_operand.hbm [shape: f32[128,128], index: 4, kind: input, shape index: {}]   ;;  %s19520_s5 = inlined_call_operand.hbm [shape: f32[128,128], index: 5, kind: input, shape index: {}]   ;;  %s19521_s6 = inlined_call_operand.hbm [shape: f32[1,4992], index: 6, kind: input, shape index: {}]   ;;  %s19522_s7 = inlined_call_operand.hbm [shape: f32[8,128], index: 7, kind: output, shape index: {}]  }
   0x1   :  { %13 = vsyncpa [#allocation6], 0 }
   0x2   :  { %14 = vsyncpa [#allocation9], 0 }
   0x3   :  { %15 = vsyncpa [#allocation12], 0 }
   0x4   :  { %16 = vsyncpa [#allocation4], 0  ;;  %s18779_s24 = smov [#allocation5]  }
   0x5   :  { %s36_s25 = sshll.u32 %s18779_s24, 4  ;;  %s37_s25 = int_to_ptr.vmem [resolvable:$true] %s36_s25 }
   0x6   :  { %s18637_s26 = scalar_lea.vmem %s37_s25, 57344  ;;  %p18642_p1 = scmp.lt.s32.totalorder %s37_s25, %s37_s25 }
   0x7   :  { %p18638_p0 = scmp.ne.s32.totalorder %s37_s25, %s18637_s26  ;;  %p18643_p2 = scmp.lt.s32.totalorder %s18637_s26, %s18637_s26 }
   0x9   :  { %p18644_p3 = por %p18643_p2, %p18642_p1 }
   0xb   :  { %p18645_p4 = pnand %p18644_p3, %p18638_p0 }
   0xd   :  { %18648 = shalt.err (!%p18645_p4)
}
   0xe   :  { %s18780_s27 = smov 512   ;;  %s18781_s28 = smov 32  }
   0xf   :  { %42 = dma.hbm_to_vmem [thread:$0]  %s19517_s2, 57344, %s37_s25, [#allocation6], %s18780_s27, %s18780_s27, %s18781_s28  }
  0x10   :  { %s18782_s8 = smov [#allocation8]   ;;  %s18783_s10 = smov [#allocation2]  }
  0x11   :  { %s60_s9 = sshll.u32 %s18782_s8, 4  ;;  %s24_s11 = sshll.u32 %s18783_s10, 4  ;;  %s61_s9 = int_to_ptr.vmem [resolvable:$true] %s60_s9  ;;  %s25_s11 = int_to_ptr.vmem [resolvable:$true] %s24_s11 }
  0x12   :  { %s18657_s12 = scalar_lea.vmem %s61_s9, 2048  ;;  %p18662_p6 = scmp.lt.s32.totalorder %s61_s9, %s61_s9 }
  0x13   :  { %p18658_p5 = scmp.ne.s32.totalorder %s61_s9, %s18657_s12  ;;  %p18663_p7 = scmp.lt.s32.totalorder %s18657_s12, %s18657_s12 }
  0x15   :  { %p18664_p8 = por %p18663_p7, %p18662_p6 }
  0x17   :  { %p18665_p9 = pnand %p18664_p8, %p18658_p5 }
  0x19   :  { %18668 = shalt.err (!%p18665_p9)
}
  0x1a   :  { %s18784_s13 = smov 128   ;;  %s18785_s14 = smov 8  }
  0x1b   :  { %66 = dma.hbm_to_vmem [thread:$0]  %s19519_s4, 2048, %s61_s9, [#allocation9], %s18784_s13, %s18784_s13, %s18785_s14  }
  0x1c   :  { %s18677_s2 = scalar_lea.vmem %s25_s11, 175616  ;;  %p18682_p11 = scmp.lt.s32.totalorder %s25_s11, %s25_s11 }
  0x1d   :  { %p18678_p10 = scmp.ne.s32.totalorder %s25_s11, %s18677_s2  ;;  %p18683_p12 = scmp.lt.s32.totalorder %s18677_s2, %s18677_s2 }
  0x1f   :  { %p18684_p13 = por %p18683_p12, %p18682_p11 }
  0x21   :  { %p18685_p0 = pnand %p18684_p13, %p18678_p10 }
  0x23   :  { %18688 = shalt.err (!%p18685_p0)
}
  0x24   :  { %s18786_s17 = smov 1792   ;;  %s18787_s18 = smov 112  }
  0x25   :  { %30 = dma.hbm_to_vmem [thread:$0]  %s19516_s1, 175616, %s25_s11, [#allocation3], %s18786_s17, %s18786_s17, %s18787_s18  }
  0x26   :  { %s18788_s21 = smov [#allocation7]   ;;  %s18789_s23 = smov [#allocation10]  }
  0x27   :  { %s48_s22 = sshll.u32 %s18788_s21, 4  ;;  %s72_s24 = sshll.u32 %s18789_s23, 4  ;;  %s49_s22 = int_to_ptr.vmem [resolvable:$true] %s48_s22  ;;  %s73_s24 = int_to_ptr.vmem [resolvable:$true] %s72_s24 }
  0x28   :  { %s18697_s4 = scalar_lea.vmem %s49_s22, 4096  ;;  %p18702_p2 = scmp.lt.s32.totalorder %s49_s22, %s49_s22 }
  0x29   :  { %p18698_p1 = scmp.ne.s32.totalorder %s49_s22, %s18697_s4  ;;  %p18703_p3 = scmp.lt.s32.totalorder %s18697_s4, %s18697_s4 }
  0x2b   :  { %p18704_p4 = por %p18703_p3, %p18702_p2 }
  0x2d   :  { %p18705_p5 = pnand %p18704_p4, %p18698_p1 }
  0x2f   :  { %18708 = shalt.err (!%p18705_p5)
}
  0x30   :  { %54 = dma.hbm_to_vmem [thread:$0]  %s19518_s3, 4096, %s49_s22, [#allocation6], %s18784_s13, %s18784_s13, %s18785_s14  }
  0x31   :  { %s18717_s1 = scalar_lea.vmem %s73_s24, 2048  ;;  %p18722_p7 = scmp.lt.s32.totalorder %s73_s24, %s73_s24 }
  0x32   :  { %p18718_p6 = scmp.ne.s32.totalorder %s73_s24, %s18717_s1  ;;  %p18723_p8 = scmp.lt.s32.totalorder %s18717_s1, %s18717_s1 }
  0x34   :  { %p18724_p9 = por %p18723_p8, %p18722_p7 }
  0x36   :  { %p18725_p10 = pnand %p18724_p9, %p18718_p6 }
  0x38   :  { %18728 = shalt.err (!%p18725_p10)
}
  0x39   :  { %78 = dma.hbm_to_vmem [thread:$0]  %s19520_s5, 2048, %s73_s24, [#allocation9], %s18784_s13, %s18784_s13, %s18785_s14  }
  0x3a   :  { %s18790_s29 = smov [#allocation11]  }
  0x3b   :  { %s85_s30 = sshll.u32 %s18790_s29, 4  ;;  %s86_s30 = int_to_ptr.vmem [resolvable:$true] %s85_s30 }
  0x3c   :  { %s18737_s8 = scalar_lea.vmem %s86_s30, 624  ;;  %s18741_s3 = scalar_lea.vmem %s86_s30, 640 }
  0x3d   :  { %p18738_p11 = scmp.ne.s32.totalorder %s86_s30, %s18737_s8  ;;  %p18742_p12 = scmp.lt.s32.totalorder %s86_s30, %s86_s30 }
  0x3e   :  { %p18743_p13 = scmp.lt.s32.totalorder %s18741_s3, %s18737_s8 }
  0x40   :  { %p18744_p0 = por %p18743_p13, %p18742_p12 }
  0x42   :  { %p18745_p1 = pnand %p18744_p0, %p18738_p11 }
  0x44   :  { %18748 = shalt.err (!%p18745_p1)
}
  0x45   :  { %88 = dma.hbm_to_vmem [thread:$0]  %s19521_s6, 624, %s86_s30, [#allocation12]  }
  0x46   :  { %18769 = dma.done.wait [#allocation3], 175616  }
  0x47   :  { %18770 = vsyncadd [#allocation3], 4294791680 }
  0x48   :  { %18771 = dma.done.wait [#allocation6], 61440  }
  0x49   :  { %18772 = vsyncadd [#allocation6], 4294905856 }
  0x4a   :  { %18773 = dma.done.wait [#allocation9], 4096  }
  0x4b   :  { %18774 = vsyncadd [#allocation9], 4294963200 }
  0x4c   :  { %18775 = dma.done.wait [#allocation12], 624  }
  0x4d   :  { %18776 = vsyncadd [#allocation12], 4294966672  ;;  %v16566_v0 = vld [vmem:[#allocation2 + $0x624] ss:$112 sps:$4 sm:$0xff]   ;;  %v16570_v2 = vld [vmem:[#allocation2 + $0x620] ss:$112 sps:$4 sm:$0xff]  }
  0x4e   :  { %v16568_v1 = vld [vmem:[#allocation2 + $0x1424] ss:$112 sps:$4 sm:$0xff]   ;;  %8506 = vmatprep.subr.bf16.mxu0 %v16566_v0  ;;  %v16571_v3 = vld [vmem:[#allocation2 + $0x1420] ss:$112 sps:$4 sm:$0xff]   ;;  %v109_v46 = vld [vmem:[%s19515_s0 + $0x8] sm:$0xff]  ;;  %vm8502_vm0 = vcmask 130048  }
  0x4f   :  { %8547 = vmatprep.subr.bf16.mxu1 %v16568_v1  ;;  %v16572_v4 = vld [vmem:[#allocation2 + $0x544] ss:$112 sps:$4 sm:$0xff]   ;;  %8507 = vmatpush1.bf16.msra.mxu0 %v16570_v2  ;;  %v16576_v6 = vld [vmem:[#allocation2 + $0x540] ss:$112 sps:$4 sm:$0xff]   ;;  %v18865_v49 = vpack.c.bf16 %v109_v46, %v109_v46  ;;  %v111_v50 = vld [vmem:[%s19515_s0 + $0x18] sm:$0xff]  ;;  %vm18793_vm1 = vmmov 0  }
  0x50   :  { %8548 = vmatpush1.bf16.msra.mxu1 %v16571_v3  ;;  %v16574_v5 = vld [vmem:[#allocation2 + $0x1344] ss:$112 sps:$4 sm:$0xff]   ;;  %8508 = vmatprep.subr.bf16.mxu0 %v16572_v4  ;;  %v16577_v7 = vld [vmem:[#allocation2 + $0x1340] ss:$112 sps:$4 sm:$0xff]   ;;  %v18870_v52 = vpack.c.bf16 %v111_v50, %v111_v50  ;;  %v16713_v50 = vld [vmem:[#allocation2 + $0x8] ss:$112 sps:$4 sm:$0xff]  }
  0x51   :  { %8549 = vmatprep.subr.bf16.mxu1 %v16574_v5  ;;  %v16578_v8 = vld [vmem:[#allocation2 + $0x464] ss:$112 sps:$4 sm:$0xff]   ;;  %v16582_v10 = vld [vmem:[#allocation2 + $0x460] ss:$112 sps:$4 sm:$0xff]   ;;  %8538 = vmatprep.mubr.bf16.mxu0 %v18865_v49 }
  0x52   :  { %v16580_v9 = vld [vmem:[#allocation2 + $0x1264] ss:$112 sps:$4 sm:$0xff]   ;;  %v16583_v11 = vld [vmem:[#allocation2 + $0x1260] ss:$112 sps:$4 sm:$0xff]   ;;  %8579 = vmatprep.mubr.bf16.mxu1 %v18870_v52 }
  0x53   :  { %8509 = vmatpush1.bf16.msra.mxu0 %v16576_v6  ;;  %v16584_v12 = vld [vmem:[#allocation2 + $0x384] ss:$112 sps:$4 sm:$0xff]   ;;  %v16588_v14 = vld [vmem:[#allocation2 + $0x380] ss:$112 sps:$4 sm:$0xff]  }
  0x54   :  { %8550 = vmatpush1.bf16.msra.mxu1 %v16577_v7  ;;  %8510 = vmatprep.subr.bf16.mxu0 %v16578_v8  ;;  %v16586_v13 = vld [vmem:[#allocation2 + $0x1184] ss:$112 sps:$4 sm:$0xff]   ;;  %v16589_v15 = vld [vmem:[#allocation2 + $0x1180] ss:$112 sps:$4 sm:$0xff]  }
  0x55   :  { %8551 = vmatprep.subr.bf16.mxu1 %v16580_v9  ;;  %v16590_v16 = vld [vmem:[#allocation2 + $0x2a4] ss:$112 sps:$4 sm:$0xff]   ;;  %v16594_v18 = vld [vmem:[#allocation2 + $0x2a0] ss:$112 sps:$4 sm:$0xff]  }
  0x56   :  { %v16592_v17 = vld [vmem:[#allocation2 + $0x10a4] ss:$112 sps:$4 sm:$0xff]   ;;  %v16595_v19 = vld [vmem:[#allocation2 + $0x10a0] ss:$112 sps:$4 sm:$0xff]  }
  0x57   :  { %8511 = vmatpush1.bf16.msra.mxu0 %v16582_v10  ;;  %v16596_v20 = vld [vmem:[#allocation2 + $0x1c4] ss:$112 sps:$4 sm:$0xff]   ;;  %v16600_v22 = vld [vmem:[#allocation2 + $0x1c0] ss:$112 sps:$4 sm:$0xff]  }
  0x58   :  { %8552 = vmatpush1.bf16.msra.mxu1 %v16583_v11  ;;  %8512 = vmatprep.subr.bf16.mxu0 %v16584_v12  ;;  %v16598_v21 = vld [vmem:[#allocation2 + $0xfc4] ss:$112 sps:$4 sm:$0xff]   ;;  %v16601_v23 = vld [vmem:[#allocation2 + $0xfc0] ss:$112 sps:$4 sm:$0xff]  }
  0x59   :  { %8553 = vmatprep.subr.bf16.mxu1 %v16586_v13  ;;  %v16602_v24 = vld [vmem:[#allocation2 + $0xe4] ss:$112 sps:$4 sm:$0xff]   ;;  %v16606_v26 = vld [vmem:[#allocation2 + $0xe0] ss:$112 sps:$4 sm:$0xff]   ;;  %v16673_v13 = vld [vmem:[#allocation2 + $0x62c] ss:$112 sps:$4 sm:$0xff]  }
  0x5a   :  { %v16604_v25 = vld [vmem:[#allocation2 + $0xee4] ss:$112 sps:$4 sm:$0xff]   ;;  %v16607_v27 = vld [vmem:[#allocation2 + $0xee0] ss:$112 sps:$4 sm:$0xff]  }
  0x5b   :  { %8513 = vmatpush1.bf16.msra.mxu0 %v16588_v14  ;;  %v16608_v28 = vld [vmem:[#allocation2 + $0x4] ss:$112 sps:$4 sm:$0xff]   ;;  %v16612_v30 = vld [vmem:[#allocation2] ss:$112 sps:$4 sm:$0xff]  }
  0x5c   :  { %8554 = vmatpush1.bf16.msra.mxu1 %v16589_v15  ;;  %8514 = vmatprep.subr.bf16.mxu0 %v16590_v16  ;;  %v16610_v29 = vld [vmem:[#allocation2 + $0xe04] ss:$112 sps:$4 sm:$0xff]   ;;  %v16613_v31 = vld [vmem:[#allocation2 + $0xe00] ss:$112 sps:$4 sm:$0xff]   ;;  %v18791_v16 = vmov 0  }
  0x5d   :  { %8555 = vmatprep.subr.bf16.mxu1 %v16592_v17  ;;  %v16614_v32 = vld [vmem:[#allocation2 + $0xd24] ss:$112 sps:$4 sm:$0xff]   ;;  %v16618_v34 = vld [vmem:[#allocation2 + $0xd20] ss:$112 sps:$4 sm:$0xff]  }
  0x5e   :  { %v16616_v33 = vld [vmem:[#allocation2 + $0x1b24] ss:$112 sps:$4 sm:$0xff]   ;;  %v16619_v35 = vld [vmem:[#allocation2 + $0x1b20] ss:$112 sps:$4 sm:$0xff]  }
  0x5f   :  { %8515 = vmatpush1.bf16.msra.mxu0 %v16594_v18  ;;  %v16620_v36 = vld [vmem:[#allocation2 + $0xc44] ss:$112 sps:$4 sm:$0xff]   ;;  %v16624_v38 = vld [vmem:[#allocation2 + $0xc40] ss:$112 sps:$4 sm:$0xff]   ;;  %v16671_v18 = vld [vmem:[#allocation2 + $0x628] ss:$112 sps:$4 sm:$0xff]  }
  0x60   :  { %8556 = vmatpush1.bf16.msra.mxu1 %v16595_v19  ;;  %8516 = vmatprep.subr.bf16.mxu0 %v16596_v20  ;;  %v16622_v37 = vld [vmem:[#allocation2 + $0x1a44] ss:$112 sps:$4 sm:$0xff]   ;;  %v16625_v39 = vld [vmem:[#allocation2 + $0x1a40] ss:$112 sps:$4 sm:$0xff]  }
  0x61   :  { %8557 = vmatprep.subr.bf16.mxu1 %v16598_v21  ;;  %v16626_v40 = vld [vmem:[#allocation2 + $0xb64] ss:$112 sps:$4 sm:$0xff]   ;;  %v16630_v42 = vld [vmem:[#allocation2 + $0xb60] ss:$112 sps:$4 sm:$0xff]   ;;  %v16679_v21 = vld [vmem:[#allocation2 + $0x54c] ss:$112 sps:$4 sm:$0xff]  }
  0x62   :  { %v16628_v41 = vld [vmem:[#allocation2 + $0x1964] ss:$112 sps:$4 sm:$0xff]   ;;  %v16631_v43 = vld [vmem:[#allocation2 + $0x1960] ss:$112 sps:$4 sm:$0xff]  }
  0x63   :  { %8517 = vmatpush1.bf16.msra.mxu0 %v16600_v22  ;;  %v16632_v44 = vld [vmem:[#allocation2 + $0xa84] ss:$112 sps:$4 sm:$0xff]   ;;  %v16636_v47 = vld [vmem:[#allocation2 + $0xa80] ss:$112 sps:$4 sm:$0xff]  }
  0x64   :  { %8558 = vmatpush1.bf16.msra.mxu1 %v16601_v23  ;;  %8518 = vmatprep.subr.bf16.mxu0 %v16602_v24  ;;  %v16634_v45 = vld [vmem:[#allocation2 + $0x1884] ss:$112 sps:$4 sm:$0xff]   ;;  %v16637_v48 = vld [vmem:[#allocation2 + $0x1880] ss:$112 sps:$4 sm:$0xff]   ;;  %v16677_v23 = vld [vmem:[#allocation2 + $0x548] ss:$112 sps:$4 sm:$0xff]  }
  0x65   :  { %8559 = vmatprep.subr.bf16.mxu1 %v16604_v25  ;;  %v16638_v51 = vld [vmem:[#allocation2 + $0x9a4] ss:$112 sps:$4 sm:$0xff]   ;;  %v16642_v54 = vld [vmem:[#allocation2 + $0x9a0] ss:$112 sps:$4 sm:$0xff]   ;;  %v16685_v25 = vld [vmem:[#allocation2 + $0x46c] ss:$112 sps:$4 sm:$0xff]  }
  0x66   :  { %v16640_v53 = vld [vmem:[#allocation2 + $0x17a4] ss:$112 sps:$4 sm:$0xff]   ;;  %v16643_v55 = vld [vmem:[#allocation2 + $0x17a0] ss:$112 sps:$4 sm:$0xff]  }
  0x67   :  { %8519 = vmatpush1.bf16.msra.mxu0 %v16606_v26  ;;  %v16644_v56 = vld [vmem:[#allocation2 + $0x8c4] ss:$112 sps:$4 sm:$0xff]   ;;  %v16648_v58 = vld [vmem:[#allocation2 + $0x8c0] ss:$112 sps:$4 sm:$0xff]  }
  0x68   :  { %8560 = vmatpush1.bf16.msra.mxu1 %v16607_v27  ;;  %8520 = vmatprep.subr.bf16.mxu0 %v16608_v28  ;;  %v16646_v57 = vld [vmem:[#allocation2 + $0x16c4] ss:$112 sps:$4 sm:$0xff]   ;;  %v16649_v59 = vld [vmem:[#allocation2 + $0x16c0] ss:$112 sps:$4 sm:$0xff]   ;;  %v16683_v27 = vld [vmem:[#allocation2 + $0x468] ss:$112 sps:$4 sm:$0xff]  }
  0x69   :  { %8561 = vmatprep.subr.bf16.mxu1 %v16610_v29  ;;  %v16650_v60 = vld [vmem:[#allocation2 + $0x7e4] ss:$112 sps:$4 sm:$0xff]   ;;  %v16654_v62 = vld [vmem:[#allocation2 + $0x7e0] ss:$112 sps:$4 sm:$0xff]   ;;  %v16691_v29 = vld [vmem:[#allocation2 + $0x38c] ss:$112 sps:$4 sm:$0xff]  }
  0x6a   :  { %v16652_v61 = vld [vmem:[#allocation2 + $0x15e4] ss:$112 sps:$4 sm:$0xff]   ;;  %v16655_v63 = vld [vmem:[#allocation2 + $0x15e0] ss:$112 sps:$4 sm:$0xff]  }
  0x6b   :  { %8521 = vmatpush1.bf16.msra.mxu0 %v16612_v30  ;;  %v16656_v0 = vld [vmem:[#allocation2 + $0x704] ss:$112 sps:$4 sm:$0xff]   ;;  %v16660_v2 = vld [vmem:[#allocation2 + $0x700] ss:$112 sps:$4 sm:$0xff]  }
  0x6c   :  { %8562 = vmatpush1.bf16.msra.mxu1 %v16613_v31  ;;  %8522 = vmatprep.subr.bf16.mxu0 %v16614_v32  ;;  %v16658_v1 = vld [vmem:[#allocation2 + $0x1504] ss:$112 sps:$4 sm:$0xff]   ;;  %v16661_v3 = vld [vmem:[#allocation2 + $0x1500] ss:$112 sps:$4 sm:$0xff]   ;;  %v16689_v31 = vld [vmem:[#allocation2 + $0x388] ss:$112 sps:$4 sm:$0xff]  }
  0x6d   :  { %8563 = vmatprep.subr.bf16.mxu1 %v16616_v33  ;;  %v108_v4 = vld [vmem:[%s19515_s0] sm:$0xff]  ;;  %v110_v5 = vld [vmem:[%s19515_s0 + $0x10] sm:$0xff]  ;;  %v16697_v33 = vld [vmem:[#allocation2 + $0x2ac] ss:$112 sps:$4 sm:$0xff]  }
  0x6e   :  { %v16664_v6 = vld [vmem:[#allocation2 + $0x2224] ss:$112 sps:$4 sm:$0xff]   ;;  %v18880_v8 = vpack.c.bf16 %v108_v4, %v108_v4  ;;  %v18882_v9 = vpack.c.bf16 %v110_v5, %v110_v5  ;;  %v16662_v10 = vld [vmem:[#allocation2 + $0x2220] ss:$112 sps:$4 sm:$0xff]   ;;  %v16745_v5 = vld [vmem:[#allocation2 + $0x9ac] ss:$112 sps:$4 sm:$0xff]  }
  0x6f   :  { %8523 = vmatpush2.bf16.msra.mxu0 %v16618_v34  ;;  %v16667_v7 = vld [vmem:[#allocation2 + $0x2a04] ss:$112 sps:$4 sm:$0xff]   ;;  %v16665_v11 = vld [vmem:[#allocation2 + $0x2a00] ss:$112 sps:$4 sm:$0xff]  }
  0x70   :  { %8564 = vmatpush2.bf16.msra.mxu1 %v16619_v35  ;;  %8524 = vmatprep.subr.bf16.mxu0 %v16620_v36  ;;  %v16670_v12 = vld [vmem:[#allocation2 + $0x2144] ss:$112 sps:$4 sm:$0xff]   ;;  %v16668_v14 = vld [vmem:[#allocation2 + $0x2140] ss:$112 sps:$4 sm:$0xff]   ;;  %v113_v35 = vld [vmem:[%s19515_s0 + $0x28] sm:$0xff] }
  0x71   :  { %8565 = vmatprep.subr.bf16.mxu1 %v16622_v37  ;;  %v114_v15 = vld [vmem:[%s19515_s0 + $0x30] sm:$0xff]  ;;  %v18898_v36 = vpack.c.bf16 %v113_v35, %v113_v35  ;;  %v16695_v37 = vld [vmem:[#allocation2 + $0x2a8] ss:$112 sps:$4 sm:$0xff]   ;;  %v16781_v35 = vld [vmem:[#allocation2 + $0x206c] ss:$112 sps:$4 sm:$0xff]  }
  0x72   :  { %v16676_v17 = vld [vmem:[#allocation2 + $0x2064] ss:$112 sps:$4 sm:$0xff]   ;;  %v18890_v19 = vpack.c.bf16 %v114_v15, %v114_v15  ;;  %v16674_v20 = vld [vmem:[#allocation2 + $0x2060] ss:$112 sps:$4 sm:$0xff]   ;;  %v16757_v15 = vld [vmem:[#allocation2 + $0x7ec] ss:$112 sps:$4 sm:$0xff]  }
  0x73   :  { %8525 = vmatpush2.bf16.msra.mxu0 %v16624_v38  ;;  %v16682_v22 = vld [vmem:[#allocation2 + $0x1f84] ss:$112 sps:$4 sm:$0xff]   ;;  %v16680_v24 = vld [vmem:[#allocation2 + $0x1f80] ss:$112 sps:$4 sm:$0xff]  }
  0x74   :  { %8566 = vmatpush2.bf16.msra.mxu1 %v16625_v39  ;;  %8526 = vmatprep.subr.bf16.mxu0 %v16626_v40  ;;  %v16688_v26 = vld [vmem:[#allocation2 + $0x1ea4] ss:$112 sps:$4 sm:$0xff]   ;;  %v16686_v28 = vld [vmem:[#allocation2 + $0x1ea0] ss:$112 sps:$4 sm:$0xff]   ;;  %v16703_v39 = vld [vmem:[#allocation2 + $0x1cc] ss:$112 sps:$4 sm:$0xff]  }
  0x75   :  { %8567 = vmatprep.subr.bf16.mxu1 %v16628_v41  ;;  %v16694_v30 = vld [vmem:[#allocation2 + $0x1dc4] ss:$112 sps:$4 sm:$0xff]   ;;  %v16692_v32 = vld [vmem:[#allocation2 + $0x1dc0] ss:$112 sps:$4 sm:$0xff]   ;;  %v16701_v41 = vld [vmem:[#allocation2 + $0x1c8] ss:$112 sps:$4 sm:$0xff]  }
  0x76   :  { %v16700_v34 = vld [vmem:[#allocation2 + $0x1ce4] ss:$112 sps:$4 sm:$0xff]   ;;  %v16698_v38 = vld [vmem:[#allocation2 + $0x1ce0] ss:$112 sps:$4 sm:$0xff]  }
  0x77   :  { %8527 = vmatpush2.bf16.msra.mxu0 %v16630_v42  ;;  %v16706_v40 = vld [vmem:[#allocation2 + $0x1c04] ss:$112 sps:$4 sm:$0xff]   ;;  %v16704_v42 = vld [vmem:[#allocation2 + $0x1c00] ss:$112 sps:$4 sm:$0xff]  }
  0x78   :  { %8568 = vmatpush2.bf16.msra.mxu1 %v16631_v43  ;;  %8528 = vmatprep.subr.bf16.mxu0 %v16632_v44  ;;  %v16709_v43 = vld [vmem:[#allocation2 + $0xec] ss:$112 sps:$4 sm:$0xff]   ;;  %v16712_v44 = vld [vmem:[#allocation2 + $0x2924] ss:$112 sps:$4 sm:$0xff]   ;;  %v16710_v46 = vld [vmem:[#allocation2 + $0x2920] ss:$112 sps:$4 sm:$0xff]  }
  0x79   :  { %8569 = vmatprep.subr.bf16.mxu1 %v16634_v45  ;;  %v16707_v45 = vld [vmem:[#allocation2 + $0xe8] ss:$112 sps:$4 sm:$0xff]   ;;  %v16740_v4 = vld [vmem:[#allocation2 + $0x24c0] ss:$112 sps:$4 sm:$0xff]  }
  0x7b   :  { %8529 = vmatpush2.bf16.msra.mxu0 %v16636_v47  ;;  %v16715_v47 = vld [vmem:[#allocation2 + $0xc] ss:$112 sps:$4 sm:$0xff]  }
  0x7c   :  { %8570 = vmatpush2.bf16.msra.mxu1 %v16637_v48  ;;  %8530 = vmatprep.subr.bf16.mxu0 %v16638_v51  ;;  %v16718_v48 = vld [vmem:[#allocation2 + $0x2844] ss:$112 sps:$4 sm:$0xff]   ;;  %v16716_v51 = vld [vmem:[#allocation2 + $0x2840] ss:$112 sps:$4 sm:$0xff]  }
  0x7d   :  { %8571 = vmatprep.subr.bf16.mxu1 %v16640_v53  ;;  %v16721_v53 = vld [vmem:[#allocation2 + $0xd2c] ss:$112 sps:$4 sm:$0xff]  }
  0x7f   :  { %8531 = vmatpush2.bf16.msra.mxu0 %v16642_v54  ;;  %v16724_v54 = vld [vmem:[#allocation2 + $0x2764] ss:$112 sps:$4 sm:$0xff]  }
  0x80   :  { %8572 = vmatpush2.bf16.msra.mxu1 %v16643_v55  ;;  %8532 = vmatprep.subr.bf16.mxu0 %v16644_v56  ;;  %v16719_v55 = vld [vmem:[#allocation2 + $0xd28] ss:$112 sps:$4 sm:$0xff]   ;;  %v16722_v56 = vld [vmem:[#allocation2 + $0x2760] ss:$112 sps:$4 sm:$0xff]  }
  0x81   :  { %8573 = vmatprep.subr.bf16.mxu1 %v16646_v57  ;;  %v16727_v57 = vld [vmem:[#allocation2 + $0xc4c] ss:$112 sps:$4 sm:$0xff]  }
  0x83   :  { %8533 = vmatpush2.bf16.msra.mxu0 %v16648_v58  ;;  %v16730_v58 = vld [vmem:[#allocation2 + $0x2684] ss:$112 sps:$4 sm:$0xff]  }
  0x84   :  { %8574 = vmatpush2.bf16.msra.mxu1 %v16649_v59  ;;  %8534 = vmatprep.subr.bf16.mxu0 %v16650_v60  ;;  %v16725_v59 = vld [vmem:[#allocation2 + $0xc48] ss:$112 sps:$4 sm:$0xff]   ;;  %v16728_v60 = vld [vmem:[#allocation2 + $0x2680] ss:$112 sps:$4 sm:$0xff]  }
  0x85   :  { %8575 = vmatprep.subr.bf16.mxu1 %v16652_v61  ;;  %v16733_v61 = vld [vmem:[#allocation2 + $0xb6c] ss:$112 sps:$4 sm:$0xff]  }
  0x87   :  { %8535 = vmatpush2.bf16.msra.mxu0 %v16654_v62  ;;  %v16736_v62 = vld [vmem:[#allocation2 + $0x25a4] ss:$112 sps:$4 sm:$0xff]  }
  0x88   :  { %8576 = vmatpush2.bf16.msra.mxu1 %v16655_v63  ;;  %8536 = vmatprep.subr.bf16.mxu0 %v16656_v0  ;;  %v16731_v63 = vld [vmem:[#allocation2 + $0xb68] ss:$112 sps:$4 sm:$0xff]   ;;  %v16734_v0 = vld [vmem:[#allocation2 + $0x25a0] ss:$112 sps:$4 sm:$0xff]  }
  0x89   :  { %8577 = vmatprep.subr.bf16.mxu1 %v16658_v1  ;;  %v16739_v1 = vld [vmem:[#allocation2 + $0xa8c] ss:$112 sps:$4 sm:$0xff]  }
  0x8b   :  { %8537 = vmatpush2.bf16.msra.mxu0 %v16660_v2  ;;  %v16742_v2 = vld [vmem:[#allocation2 + $0x24c4] ss:$112 sps:$4 sm:$0xff]  }
  0x8c   :  { %8578 = vmatpush2.bf16.msra.mxu1 %v16661_v3  ;;  %8588 = vmatprep.subr.bf16.mxu0 %v16664_v6  ;;  %v16737_v3 = vld [vmem:[#allocation2 + $0xa88] ss:$112 sps:$4 sm:$0xff]   ;;  %v16748_v6 = vld [vmem:[#allocation2 + $0x23e4] ss:$112 sps:$4 sm:$0xff]  }
  0x8d   :  { %8643 = vmatprep.subr.bf16.mxu1 %v16667_v7  ;;  %v16743_v7 = vld [vmem:[#allocation2 + $0x9a8] ss:$112 sps:$4 sm:$0xff]  }
  0x8e   :  { %8539 = vmatmul.mubr.bf16.vlgmr.msra.gmra.mxu0 %v18880_v8 }
  0x8f   :  { %8580 = vmatmul.mubr.bf16.vlgmr.msra.gmra.mxu1 %v18882_v9  ;;  %8589 = vmatpush1.bf16.msra.mxu0 %v16662_v10  ;;  %v16746_v10 = vld [vmem:[#allocation2 + $0x23e0] ss:$112 sps:$4 sm:$0xff]  }
  0x90   :  { %8644 = vmatpush1.bf16.msra.mxu1 %v16665_v11  ;;  %8590 = vmatprep.subr.bf16.mxu0 %v16670_v12  ;;  %v16751_v11 = vld [vmem:[#allocation2 + $0x8cc] ss:$112 sps:$4 sm:$0xff]   ;;  %v16754_v12 = vld [vmem:[#allocation2 + $0x2304] ss:$112 sps:$4 sm:$0xff]  }
  0x91   :  { %8661 = vmatprep.mubr.bf16.mxu1 %v18791_v16  ;;  %8670 = vmatprep.subr.bf16.mxu1 %v16673_v13  ;;  %v16749_v13 = vld [vmem:[#allocation2 + $0x8c8] ss:$112 sps:$4 sm:$0xff]  }
  0x92   :  { %8620 = vmatprep.mubr.bf16.mxu0 %v18898_v36 }
  0x93   :  { %8591 = vmatpush1.bf16.msra.mxu0 %v16668_v14  ;;  %v16752_v14 = vld [vmem:[#allocation2 + $0x2300] ss:$112 sps:$4 sm:$0xff]  }
  0x94   :  { %8592 = vmatprep.subr.bf16.mxu0 %v16676_v17  ;;  %v112_v17 = vld [vmem:[%s19515_s0 + $0x20] sm:$0xff]  ;;  %s18794_s0 = smov [#allocation13]  }
  0x95   :  { %s14562_s22 = sshll.u32 %s18794_s0, 4  ;;  %s14563_s22 = int_to_ptr.vmem [resolvable:$true] %s14562_s22 }
  0x96   :  { %s18749_s23 = scalar_lea.vmem %s14563_s22, 128  ;;  %p18754_p3 = scmp.lt.s32.totalorder %s14563_s22, %s14563_s22 }
  0x97   :  { %15946 = vmatmul.mubr.msk.bf16.vlgmr.msra.gmra.mxu1 %vm8502_vm0, %v18890_v19  ;;  %8593 = vmatpush1.bf16.msra.mxu0 %v16674_v20  ;;  %v16755_v20 = vld [vmem:[#allocation2 + $0x7e8] ss:$112 sps:$4 sm:$0xff]   ;;  %p18750_p2 = scmp.ne.s32.totalorder %s14563_s22, %s18749_s23  ;;  %p18755_p4 = scmp.lt.s32.totalorder %s18749_s23, %s18749_s23 }
  0x98   :  { %8671 = vmatpush1.bf16.msra.mxu1 %v16671_v18  ;;  %8594 = vmatprep.subr.bf16.mxu0 %v16682_v22  ;;  %v16760_v18 = vld [vmem:[#allocation2 + $0x142c] ss:$112 sps:$4 sm:$0xff]   ;;  %v16758_v22 = vld [vmem:[#allocation2 + $0x1428] ss:$112 sps:$4 sm:$0xff]  }
  0x99   :  { %8672 = vmatprep.subr.bf16.mxu1 %v16679_v21  ;;  %8702 = vmatprep.mubr.bf16.mxu1 %v18865_v49  ;;  %v18904_v21 = vpack.c.bf16 %v112_v17, %v112_v17  ;;  %v16841_v17 = vld [vmem:[#allocation2 + $0x25ac] ss:$112 sps:$4 sm:$0xff]   ;;  %p18756_p5 = por %p18755_p4, %p18754_p3 }
  0x9b   :  { %8595 = vmatpush1.bf16.msra.mxu0 %v16680_v24  ;;  %v16766_v24 = vld [vmem:[#allocation2 + $0x134c] ss:$112 sps:$4 sm:$0xff]   ;;  %p18757_p6 = pnand %p18756_p5, %p18750_p2 }
  0x9c   :  { %8673 = vmatpush1.bf16.msra.mxu1 %v16677_v23  ;;  %8596 = vmatprep.subr.bf16.mxu0 %v16688_v26  ;;  %v16763_v23 = vld [vmem:[#allocation2 + $0x70c] ss:$112 sps:$4 sm:$0xff]   ;;  %v16764_v26 = vld [vmem:[#allocation2 + $0x1348] ss:$112 sps:$4 sm:$0xff]  }
  0x9d   :  { %8674 = vmatprep.subr.bf16.mxu1 %v16685_v25  ;;  %v16761_v25 = vld [vmem:[#allocation2 + $0x708] ss:$112 sps:$4 sm:$0xff]  }
  0x9f   :  { %8597 = vmatpush1.bf16.msra.mxu0 %v16686_v28  ;;  %v16772_v28 = vld [vmem:[#allocation2 + $0x126c] ss:$112 sps:$4 sm:$0xff]  }
  0xa0   :  { %8675 = vmatpush1.bf16.msra.mxu1 %v16683_v27  ;;  %8598 = vmatprep.subr.bf16.mxu0 %v16694_v30  ;;  %v16769_v27 = vld [vmem:[#allocation2 + $0x222c] ss:$112 sps:$4 sm:$0xff]   ;;  %v16770_v30 = vld [vmem:[#allocation2 + $0x1268] ss:$112 sps:$4 sm:$0xff]  }
  0xa1   :  { %8676 = vmatprep.subr.bf16.mxu1 %v16691_v29  ;;  %v16767_v29 = vld [vmem:[#allocation2 + $0x2228] ss:$112 sps:$4 sm:$0xff]  }
  0xa3   :  { %8599 = vmatpush1.bf16.msra.mxu0 %v16692_v32  ;;  %v16778_v32 = vld [vmem:[#allocation2 + $0x118c] ss:$112 sps:$4 sm:$0xff]  }
  0xa4   :  { %8677 = vmatpush1.bf16.msra.mxu1 %v16689_v31  ;;  %8600 = vmatprep.subr.bf16.mxu0 %v16700_v34  ;;  %v16775_v31 = vld [vmem:[#allocation2 + $0x214c] ss:$112 sps:$4 sm:$0xff]   ;;  %v16776_v34 = vld [vmem:[#allocation2 + $0x1188] ss:$112 sps:$4 sm:$0xff]  }
  0xa5   :  { %8678 = vmatprep.subr.bf16.mxu1 %v16697_v33  ;;  %v16773_v33 = vld [vmem:[#allocation2 + $0x2148] ss:$112 sps:$4 sm:$0xff]  }
  0xa7   :  { %8601 = vmatpush1.bf16.msra.mxu0 %v16698_v38  ;;  %v16779_v38 = vld [vmem:[#allocation2 + $0x2068] ss:$112 sps:$4 sm:$0xff]  }
  0xa8   :  { %8679 = vmatpush1.bf16.msra.mxu1 %v16695_v37  ;;  %8602 = vmatprep.subr.bf16.mxu0 %v16706_v40  ;;  %v16784_v37 = vld [vmem:[#allocation2 + $0x10ac] ss:$112 sps:$4 sm:$0xff]  }
  0xa9   :  { %8680 = vmatprep.subr.bf16.mxu1 %v16703_v39  ;;  %v16782_v39 = vld [vmem:[#allocation2 + $0x10a8] ss:$112 sps:$4 sm:$0xff]   ;;  %v16787_v40 = vld [vmem:[#allocation2 + $0x1f8c] ss:$112 sps:$4 sm:$0xff]  }
  0xab   :  { %8603 = vmatpush1.bf16.msra.mxu0 %v16704_v42  ;;  %v16785_v42 = vld [vmem:[#allocation2 + $0x1f88] ss:$112 sps:$4 sm:$0xff]  }
  0xac   :  { %8681 = vmatpush1.bf16.msra.mxu1 %v16701_v41  ;;  %8604 = vmatprep.subr.bf16.mxu0 %v16712_v44  ;;  %v16790_v41 = vld [vmem:[#allocation2 + $0xfcc] ss:$112 sps:$4 sm:$0xff]  }
  0xad   :  { %8682 = vmatprep.subr.bf16.mxu1 %v16709_v43  ;;  %v16788_v43 = vld [vmem:[#allocation2 + $0xfc8] ss:$112 sps:$4 sm:$0xff]   ;;  %v16793_v44 = vld [vmem:[#allocation2 + $0x1eac] ss:$112 sps:$4 sm:$0xff]  }
  0xaf   :  { %8605 = vmatpush2.bf16.msra.mxu0 %v16710_v46  ;;  %v16791_v46 = vld [vmem:[#allocation2 + $0x1ea8] ss:$112 sps:$4 sm:$0xff]  }
  0xb0   :  { %8683 = vmatpush1.bf16.msra.mxu1 %v16707_v45  ;;  %8606 = vmatprep.subr.bf16.mxu0 %v16718_v48  ;;  %v16796_v45 = vld [vmem:[#allocation2 + $0xeec] ss:$112 sps:$4 sm:$0xff]  }
  0xb1   :  { %8684 = vmatprep.subr.bf16.mxu1 %v16715_v47  ;;  %v16794_v47 = vld [vmem:[#allocation2 + $0xee8] ss:$112 sps:$4 sm:$0xff]   ;;  %v16799_v48 = vld [vmem:[#allocation2 + $0x1dcc] ss:$112 sps:$4 sm:$0xff]  }
  0xb3   :  { %8607 = vmatpush2.bf16.msra.mxu0 %v16716_v51  ;;  %v16797_v51 = vld [vmem:[#allocation2 + $0x1dc8] ss:$112 sps:$4 sm:$0xff]  }
  0xb4   :  { %8685 = vmatpush1.bf16.msra.mxu1 %v16713_v50  ;;  %8608 = vmatprep.subr.bf16.mxu0 %v16724_v54  ;;  %v16802_v50 = vld [vmem:[#allocation2 + $0xe0c] ss:$112 sps:$4 sm:$0xff]  }
  0xb5   :  { %8686 = vmatprep.subr.bf16.mxu1 %v16721_v53  ;;  %v16800_v53 = vld [vmem:[#allocation2 + $0xe08] ss:$112 sps:$4 sm:$0xff]   ;;  %v16805_v54 = vld [vmem:[#allocation2 + $0x1cec] ss:$112 sps:$4 sm:$0xff]  }
  0xb7   :  { %8609 = vmatpush2.bf16.msra.mxu0 %v16722_v56  ;;  %v16803_v56 = vld [vmem:[#allocation2 + $0x1ce8] ss:$112 sps:$4 sm:$0xff]  }
  0xb8   :  { %8687 = vmatpush2.bf16.msra.mxu1 %v16719_v55  ;;  %8610 = vmatprep.subr.bf16.mxu0 %v16730_v58  ;;  %v16808_v55 = vld [vmem:[#allocation2 + $0x1b2c] ss:$112 sps:$4 sm:$0xff]  }
  0xb9   :  { %8688 = vmatprep.subr.bf16.mxu1 %v16727_v57  ;;  %v16806_v57 = vld [vmem:[#allocation2 + $0x1b28] ss:$112 sps:$4 sm:$0xff]   ;;  %v16811_v58 = vld [vmem:[#allocation2 + $0x1c0c] ss:$112 sps:$4 sm:$0xff]  }
  0xbb   :  { %8611 = vmatpush2.bf16.msra.mxu0 %v16728_v60  ;;  %v16809_v60 = vld [vmem:[#allocation2 + $0x1c08] ss:$112 sps:$4 sm:$0xff]  }
  0xbc   :  { %8689 = vmatpush2.bf16.msra.mxu1 %v16725_v59  ;;  %8612 = vmatprep.subr.bf16.mxu0 %v16736_v62  ;;  %v16814_v59 = vld [vmem:[#allocation2 + $0x1a4c] ss:$112 sps:$4 sm:$0xff]  }
  0xbd   :  { %8690 = vmatprep.subr.bf16.mxu1 %v16733_v61  ;;  %v16812_v61 = vld [vmem:[#allocation2 + $0x1a48] ss:$112 sps:$4 sm:$0xff]   ;;  %v16817_v62 = vld [vmem:[#allocation2 + $0x292c] ss:$112 sps:$4 sm:$0xff]  }
  0xbf   :  { %8613 = vmatpush2.bf16.msra.mxu0 %v16734_v0  ;;  %v16815_v0 = vld [vmem:[#allocation2 + $0x2928] ss:$112 sps:$4 sm:$0xff]  }
  0xc0   :  { %8691 = vmatpush2.bf16.msra.mxu1 %v16731_v63  ;;  %8614 = vmatprep.subr.bf16.mxu0 %v16742_v2  ;;  %v16820_v63 = vld [vmem:[#allocation2 + $0x196c] ss:$112 sps:$4 sm:$0xff]  }
  0xc1   :  { %8692 = vmatprep.subr.bf16.mxu1 %v16739_v1  ;;  %v16818_v1 = vld [vmem:[#allocation2 + $0x1968] ss:$112 sps:$4 sm:$0xff]   ;;  %v16823_v2 = vld [vmem:[#allocation2 + $0x284c] ss:$112 sps:$4 sm:$0xff]  }
  0xc3   :  { %8615 = vmatpush2.bf16.msra.mxu0 %v16740_v4  ;;  %v16821_v4 = vld [vmem:[#allocation2 + $0x2848] ss:$112 sps:$4 sm:$0xff]  }
  0xc4   :  { %8693 = vmatpush2.bf16.msra.mxu1 %v16737_v3  ;;  %8616 = vmatprep.subr.bf16.mxu0 %v16748_v6  ;;  %v16826_v3 = vld [vmem:[#allocation2 + $0x188c] ss:$112 sps:$4 sm:$0xff]  }
  0xc5   :  { %8694 = vmatprep.subr.bf16.mxu1 %v16745_v5  ;;  %v16824_v5 = vld [vmem:[#allocation2 + $0x1888] ss:$112 sps:$4 sm:$0xff]   ;;  %v16829_v6 = vld [vmem:[#allocation2 + $0x276c] ss:$112 sps:$4 sm:$0xff]  }
  0xc7   :  { %8617 = vmatpush2.bf16.msra.mxu0 %v16746_v10  ;;  %v16827_v10 = vld [vmem:[#allocation2 + $0x2768] ss:$112 sps:$4 sm:$0xff]  }
  0xc8   :  { %8695 = vmatpush2.bf16.msra.mxu1 %v16743_v7  ;;  %8618 = vmatprep.subr.bf16.mxu0 %v16754_v12  ;;  %v16832_v7 = vld [vmem:[#allocation2 + $0x17ac] ss:$112 sps:$4 sm:$0xff]  }
  0xc9   :  { %8696 = vmatprep.subr.bf16.mxu1 %v16751_v11  ;;  %v16830_v11 = vld [vmem:[#allocation2 + $0x17a8] ss:$112 sps:$4 sm:$0xff]   ;;  %v16835_v12 = vld [vmem:[#allocation2 + $0x268c] ss:$112 sps:$4 sm:$0xff]  }
  0xcb   :  { %8619 = vmatpush2.bf16.msra.mxu0 %v16752_v14  ;;  %v16833_v14 = vld [vmem:[#allocation2 + $0x2688] ss:$112 sps:$4 sm:$0xff]  }
  0xcc   :  { %8697 = vmatpush2.bf16.msra.mxu1 %v16749_v13  ;;  %8711 = vmatprep.subr.bf16.mxu0 %v16760_v18  ;;  %v16838_v13 = vld [vmem:[#allocation2 + $0x16cc] ss:$112 sps:$4 sm:$0xff]  }
  0xcd   :  { %8698 = vmatprep.subr.bf16.mxu1 %v16757_v15  ;;  %v16836_v15 = vld [vmem:[#allocation2 + $0x16c8] ss:$112 sps:$4 sm:$0xff]   ;;  %v16844_v18 = vld [vmem:[#allocation2 + $0x15ec] ss:$112 sps:$4 sm:$0xff]  }
  0xce   :  { %8621 = vmatmul.mubr.bf16.vlgmr.msra.gmra.mxu0 %v18904_v21 }
  0xcf   :  { %8712 = vmatpush1.bf16.msra.mxu0 %v16758_v22  ;;  %8743 = vmatprep.mubr.bf16.mxu0 %v18870_v52  ;;  %v16842_v22 = vld [vmem:[#allocation2 + $0x15e8] ss:$112 sps:$4 sm:$0xff]  }
  0xd0   :  { %8699 = vmatpush2.bf16.msra.mxu1 %v16755_v20  ;;  %8713 = vmatprep.subr.bf16.mxu0 %v16766_v24  ;;  %v16839_v20 = vld [vmem:[#allocation2 + $0x25a8] ss:$112 sps:$4 sm:$0xff]   ;;  %v16850_v24 = vld [vmem:[#allocation2 + $0x150c] ss:$112 sps:$4 sm:$0xff]  }
  0xd1   :  { %8700 = vmatprep.subr.bf16.mxu1 %v16763_v23  ;;  %v16847_v23 = vld [vmem:[#allocation2 + $0x24cc] ss:$112 sps:$4 sm:$0xff]  }
  0xd3   :  { %8714 = vmatpush1.bf16.msra.mxu0 %v16764_v26  ;;  %v16848_v26 = vld [vmem:[#allocation2 + $0x1508] ss:$112 sps:$4 sm:$0xff]  }
  0xd4   :  { %8701 = vmatpush2.bf16.msra.mxu1 %v16761_v25  ;;  %8715 = vmatprep.subr.bf16.mxu0 %v16772_v28  ;;  %v16845_v25 = vld [vmem:[#allocation2 + $0x24c8] ss:$112 sps:$4 sm:$0xff]   ;;  %v16856_v28 = vld [vmem:[#allocation2 + $0x634] ss:$112 sps:$4 sm:$0xff]  }
  0xd5   :  { %8752 = vmatprep.subr.bf16.mxu1 %v16769_v27  ;;  %v16853_v27 = vld [vmem:[#allocation2 + $0x23ec] ss:$112 sps:$4 sm:$0xff]  }
  0xd7   :  { %8703 = vmatmul.mubr.bf16.vlgmr.msra.gmra.mxu1 %v18880_v8  ;;  %8716 = vmatpush1.bf16.msra.mxu0 %v16770_v30  ;;  %v16854_v30 = vld [vmem:[#allocation2 + $0x630] ss:$112 sps:$4 sm:$0xff]  }
  0xd8   :  { %8753 = vmatpush1.bf16.msra.mxu1 %v16767_v29  ;;  %8717 = vmatprep.subr.bf16.mxu0 %v16778_v32  ;;  %v16851_v29 = vld [vmem:[#allocation2 + $0x23e8] ss:$112 sps:$4 sm:$0xff]   ;;  %v16862_v32 = vld [vmem:[#allocation2 + $0x554] ss:$112 sps:$4 sm:$0xff]  }
  0xd9   :  { %8754 = vmatprep.subr.bf16.mxu1 %v16775_v31  ;;  %8784 = vmatprep.mubr.bf16.mxu1 %v18898_v36  ;;  %v16859_v31 = vld [vmem:[#allocation2 + $0x230c] ss:$112 sps:$4 sm:$0xff]  }
  0xdb   :  { %8718 = vmatpush1.bf16.msra.mxu0 %v16776_v34  ;;  %v16860_v34 = vld [vmem:[#allocation2 + $0x550] ss:$112 sps:$4 sm:$0xff]  }
  0xdc   :  { %8755 = vmatpush1.bf16.msra.mxu1 %v16773_v33  ;;  %8719 = vmatprep.subr.bf16.mxu0 %v16784_v37  ;;  %v16857_v33 = vld [vmem:[#allocation2 + $0x2308] ss:$112 sps:$4 sm:$0xff]   ;;  %v16868_v37 = vld [vmem:[#allocation2 + $0x474] ss:$112 sps:$4 sm:$0xff]  }
  0xdd   :  { %8756 = vmatprep.subr.bf16.mxu1 %v16781_v35  ;;  %v16865_v35 = vld [vmem:[#allocation2 + $0x2a0c] ss:$112 sps:$4 sm:$0xff]  }
  0xdf   :  { %8720 = vmatpush1.bf16.msra.mxu0 %v16782_v39  ;;  %v16866_v39 = vld [vmem:[#allocation2 + $0x470] ss:$112 sps:$4 sm:$0xff]  }
  0xe0   :  { %8757 = vmatpush1.bf16.msra.mxu1 %v16779_v38  ;;  %8721 = vmatprep.subr.bf16.mxu0 %v16790_v41  ;;  %v16863_v38 = vld [vmem:[#allocation2 + $0x2a08] ss:$112 sps:$4 sm:$0xff]   ;;  %v16874_v41 = vld [vmem:[#allocation2 + $0x1434] ss:$112 sps:$4 sm:$0xff]  }
  0xe1   :  { %8758 = vmatprep.subr.bf16.mxu1 %v16787_v40  ;;  %v16871_v40 = vld [vmem:[#allocation2 + $0x394] ss:$112 sps:$4 sm:$0xff]  }
  0xe3   :  { %8722 = vmatpush1.bf16.msra.mxu0 %v16788_v43  ;;  %v16877_v43 = vld [vmem:[#allocation2 + $0x2b4] ss:$112 sps:$4 sm:$0xff]  }
  0xe4   :  { %8759 = vmatpush1.bf16.msra.mxu1 %v16785_v42  ;;  %8723 = vmatprep.subr.bf16.mxu0 %v16796_v45  ;;  %v16869_v42 = vld [vmem:[#allocation2 + $0x390] ss:$112 sps:$4 sm:$0xff]  }
  0xe5   :  { %8760 = vmatprep.subr.bf16.mxu1 %v16793_v44  ;;  %v16872_v44 = vld [vmem:[#allocation2 + $0x1430] ss:$112 sps:$4 sm:$0xff]  }
  0xe6   :  { %v16875_v45 = vld [vmem:[#allocation2 + $0x2b0] ss:$112 sps:$4 sm:$0xff]  }
  0xe7   :  { %8724 = vmatpush1.bf16.msra.mxu0 %v16794_v47  ;;  %v16883_v47 = vld [vmem:[#allocation2 + $0x1d4] ss:$112 sps:$4 sm:$0xff]  }
  0xe8   :  { %8761 = vmatpush1.bf16.msra.mxu1 %v16791_v46  ;;  %8725 = vmatprep.subr.bf16.mxu0 %v16802_v50  ;;  %v16880_v46 = vld [vmem:[#allocation2 + $0x1354] ss:$112 sps:$4 sm:$0xff]   ;;  %v16881_v50 = vld [vmem:[#allocation2 + $0x1d0] ss:$112 sps:$4 sm:$0xff]  }
  0xe9   :  { %8762 = vmatprep.subr.bf16.mxu1 %v16799_v48  ;;  %v16878_v48 = vld [vmem:[#allocation2 + $0x1350] ss:$112 sps:$4 sm:$0xff]  }
  0xeb   :  { %8726 = vmatpush1.bf16.msra.mxu0 %v16800_v53  ;;  %v16889_v53 = vld [vmem:[#allocation2 + $0xf4] ss:$112 sps:$4 sm:$0xff]  }
  0xec   :  { %8763 = vmatpush1.bf16.msra.mxu1 %v16797_v51  ;;  %8727 = vmatprep.subr.bf16.mxu0 %v16808_v55  ;;  %v16886_v51 = vld [vmem:[#allocation2 + $0x1274] ss:$112 sps:$4 sm:$0xff]   ;;  %v16887_v55 = vld [vmem:[#allocation2 + $0xf0] ss:$112 sps:$4 sm:$0xff]  }
  0xed   :  { %8764 = vmatprep.subr.bf16.mxu1 %v16805_v54  ;;  %v16884_v54 = vld [vmem:[#allocation2 + $0x1270] ss:$112 sps:$4 sm:$0xff]  }
  0xef   :  { %8728 = vmatpush2.bf16.msra.mxu0 %v16806_v57  ;;  %v16895_v57 = vld [vmem:[#allocation2 + $0x14] ss:$112 sps:$4 sm:$0xff]  }
  0xf0   :  { %8765 = vmatpush1.bf16.msra.mxu1 %v16803_v56  ;;  %8729 = vmatprep.subr.bf16.mxu0 %v16814_v59  ;;  %v16892_v56 = vld [vmem:[#allocation2 + $0x1194] ss:$112 sps:$4 sm:$0xff]   ;;  %v16893_v59 = vld [vmem:[#allocation2 + $0x10] ss:$112 sps:$4 sm:$0xff]  }
  0xf1   :  { %8766 = vmatprep.subr.bf16.mxu1 %v16811_v58  ;;  %v16890_v58 = vld [vmem:[#allocation2 + $0x1190] ss:$112 sps:$4 sm:$0xff]  }
  0xf3   :  { %8730 = vmatpush2.bf16.msra.mxu0 %v16812_v61  ;;  %v16901_v61 = vld [vmem:[#allocation2 + $0xd34] ss:$112 sps:$4 sm:$0xff]  }
  0xf4   :  { %8767 = vmatpush1.bf16.msra.mxu1 %v16809_v60  ;;  %8731 = vmatprep.subr.bf16.mxu0 %v16820_v63  ;;  %v16898_v60 = vld [vmem:[#allocation2 + $0x10b4] ss:$112 sps:$4 sm:$0xff]   ;;  %v16899_v63 = vld [vmem:[#allocation2 + $0xd30] ss:$112 sps:$4 sm:$0xff]  }
  0xf5   :  { %8768 = vmatprep.subr.bf16.mxu1 %v16817_v62  ;;  %v16896_v62 = vld [vmem:[#allocation2 + $0x10b0] ss:$112 sps:$4 sm:$0xff]  }
  0xf7   :  { %8732 = vmatpush2.bf16.msra.mxu0 %v16818_v1  ;;  %v16907_v1 = vld [vmem:[#allocation2 + $0xc54] ss:$112 sps:$4 sm:$0xff]  }
  0xf8   :  { %8769 = vmatpush2.bf16.msra.mxu1 %v16815_v0  ;;  %8733 = vmatprep.subr.bf16.mxu0 %v16826_v3  ;;  %v16904_v0 = vld [vmem:[#allocation2 + $0xfd4] ss:$112 sps:$4 sm:$0xff]   ;;  %v16905_v3 = vld [vmem:[#allocation2 + $0xc50] ss:$112 sps:$4 sm:$0xff]  }
  0xf9   :  { %8770 = vmatprep.subr.bf16.mxu1 %v16823_v2  ;;  %v16902_v2 = vld [vmem:[#allocation2 + $0xfd0] ss:$112 sps:$4 sm:$0xff]  }
  0xfb   :  { %8734 = vmatpush2.bf16.msra.mxu0 %v16824_v5  ;;  %v16913_v5 = vld [vmem:[#allocation2 + $0xb74] ss:$112 sps:$4 sm:$0xff]  }
  0xfc   :  { %8771 = vmatpush2.bf16.msra.mxu1 %v16821_v4  ;;  %8735 = vmatprep.subr.bf16.mxu0 %v16832_v7  ;;  %v16910_v4 = vld [vmem:[#allocation2 + $0xef4] ss:$112 sps:$4 sm:$0xff]   ;;  %v16911_v7 = vld [vmem:[#allocation2 + $0xb70] ss:$112 sps:$4 sm:$0xff]  }
  0xfd   :  { %8772 = vmatprep.subr.bf16.mxu1 %v16829_v6  ;;  %v16908_v6 = vld [vmem:[#allocation2 + $0xef0] ss:$112 sps:$4 sm:$0xff]  }
  0xff   :  { %8736 = vmatpush2.bf16.msra.mxu0 %v16830_v11  ;;  %v16919_v11 = vld [vmem:[#allocation2 + $0xa94] ss:$112 sps:$4 sm:$0xff]  }
 0x100   :  { %8773 = vmatpush2.bf16.msra.mxu1 %v16827_v10  ;;  %8737 = vmatprep.subr.bf16.mxu0 %v16838_v13  ;;  %v16916_v10 = vld [vmem:[#allocation2 + $0xe14] ss:$112 sps:$4 sm:$0xff]   ;;  %v16917_v13 = vld [vmem:[#allocation2 + $0xa90] ss:$112 sps:$4 sm:$0xff]  }
 0x101   :  { %8774 = vmatprep.subr.bf16.mxu1 %v16835_v12  ;;  %v16914_v12 = vld [vmem:[#allocation2 + $0xe10] ss:$112 sps:$4 sm:$0xff]  }
 0x103   :  { %8738 = vmatpush2.bf16.msra.mxu0 %v16836_v15  ;;  %v16925_v15 = vld [vmem:[#allocation2 + $0x9b4] ss:$112 sps:$4 sm:$0xff]  }
 0x104   :  { %8775 = vmatpush2.bf16.msra.mxu1 %v16833_v14  ;;  %8739 = vmatprep.subr.bf16.mxu0 %v16844_v18  ;;  %v16922_v14 = vld [vmem:[#allocation2 + $0x1b34] ss:$112 sps:$4 sm:$0xff]   ;;  %v16923_v18 = vld [vmem:[#allocation2 + $0x9b0] ss:$112 sps:$4 sm:$0xff]  }
 0x105   :  { %8776 = vmatprep.subr.bf16.mxu1 %v16841_v17  ;;  %v16920_v17 = vld [vmem:[#allocation2 + $0x1b30] ss:$112 sps:$4 sm:$0xff]  }
 0x107   :  { %8740 = vmatpush2.bf16.msra.mxu0 %v16842_v22  ;;  %v16931_v22 = vld [vmem:[#allocation2 + $0x8d4] ss:$112 sps:$4 sm:$0xff]  }
 0x108   :  { %8777 = vmatpush2.bf16.msra.mxu1 %v16839_v20  ;;  %8741 = vmatprep.subr.bf16.mxu0 %v16850_v24  ;;  %v16928_v20 = vld [vmem:[#allocation2 + $0x1a54] ss:$112 sps:$4 sm:$0xff]   ;;  %v16929_v24 = vld [vmem:[#allocation2 + $0x8d0] ss:$112 sps:$4 sm:$0xff]  }
 0x109   :  { %8778 = vmatprep.subr.bf16.mxu1 %v16847_v23  ;;  %v16926_v23 = vld [vmem:[#allocation2 + $0x1a50] ss:$112 sps:$4 sm:$0xff]  }
 0x10b   :  { %8742 = vmatpush2.bf16.msra.mxu0 %v16848_v26  ;;  %v1502_v26 = vlaneseq }
 0x10c   :  { %8779 = vmatpush2.bf16.msra.mxu1 %v16845_v25  ;;  %8834 = vmatprep.subr.bf16.mxu0 %v16856_v28  ;;  %v16934_v25 = vld [vmem:[#allocation2 + $0x1974] ss:$112 sps:$4 sm:$0xff]   ;;  %v16932_v28 = vld [vmem:[#allocation2 + $0x1970] ss:$112 sps:$4 sm:$0xff]  }
 0x10d   :  { %8780 = vmatprep.subr.bf16.mxu1 %v16853_v27  ;;  %v16937_v27 = vld [vmem:[#allocation2 + $0x7f4] ss:$112 sps:$4 sm:$0xff]  }
 0x10e   :  { %8744 = vmatmul.mubr.bf16.vlgmr.msra.gmra.mxu0 %v18882_v9 }
 0x10f   :  { %8835 = vmatpush1.bf16.msra.mxu0 %v16854_v30  ;;  %8866 = vmatprep.mubr.bf16.mxu0 %v18865_v49  ;;  %v16940_v30 = vld [vmem:[#allocation2 + $0x1894] ss:$112 sps:$4 sm:$0xff]  }
 0x110   :  { %8781 = vmatpush2.bf16.msra.mxu1 %v16851_v29  ;;  %8836 = vmatprep.subr.bf16.mxu0 %v16862_v32  ;;  %v16935_v29 = vld [vmem:[#allocation2 + $0x7f0] ss:$112 sps:$4 sm:$0xff]   ;;  %v16943_v32 = vld [vmem:[#allocation2 + $0x714] ss:$112 sps:$4 sm:$0xff]  }
 0x111   :  { %8782 = vmatprep.subr.bf16.mxu1 %v16859_v31  ;;  %v18917_v31 = vshrl.u32 %v1502_v26, 7  ;;  %v16985_v26 = vld [vmem:[#allocation2 + $0x55c] ss:$112 sps:$4 sm:$0xff]  }
 0x113   :  { %8837 = vmatpush1.bf16.msra.mxu0 %v16860_v34  ;;  %v16941_v34 = vld [vmem:[#allocation2 + $0x710] ss:$112 sps:$4 sm:$0xff]  }
 0x114   :  { %8783 = vmatpush2.bf16.msra.mxu1 %v16857_v33  ;;  %8838 = vmatprep.subr.bf16.mxu0 %v16868_v37  ;;  %v16938_v33 = vld [vmem:[#allocation2 + $0x1890] ss:$112 sps:$4 sm:$0xff]  }
 0x115   :  { %8807 = vmatprep.subr.bf16.mxu1 %v16865_v35  ;;  %v16946_v35 = vld [vmem:[#allocation2 + $0x17b4] ss:$112 sps:$4 sm:$0xff]  }
 0x116   :  { %v1494_v37 = vld [vmem:[#allocation11] sm:$0xff] }
 0x117   :  { %8785 = vmatmul.mubr.bf16.vlgmr.msra.gmra.mxu1 %v18904_v21  ;;  %8839 = vmatpush1.bf16.msra.mxu0 %v16866_v39  ;;  %v16949_v39 = vld [vmem:[#allocation2 + $0x2234] ss:$112 sps:$4 sm:$0xff]  }
 0x118   :  { %8808 = vmatpush1.bf16.msra.mxu1 %v16863_v38  ;;  %8840 = vmatprep.subr.bf16.mxu0 %v16871_v40  ;;  %v18920_v38 = vsub.s32 0, %v18917_v31  ;;  %v18923_v40 = vsub.s32 1, %v18917_v31 }
 0x119   :  { %8825 = vmatprep.mubr.bf16.mxu1 %v18791_v16  ;;  %8875 = vmatprep.subr.bf16.mxu1 %v16874_v41  ;;  %v16944_v41 = vld [vmem:[#allocation2 + $0x17b0] ss:$112 sps:$4 sm:$0xff]  }
 0x11b   :  { %8841 = vmatpush1.bf16.msra.mxu0 %v16869_v42  ;;  %v1505_v42 = vrot.slane %v1494_v37, %v18920_v38 }
 0x11c   :  { %8842 = vmatprep.subr.bf16.mxu0 %v16877_v43  ;;  %v16947_v43 = vld [vmem:[#allocation2 + $0x2230] ss:$112 sps:$4 sm:$0xff]  }
 0x11f   :  { %15947 = vmatmul.mubr.msk.bf16.vlgmr.msra.gmra.mxu1 %vm8502_vm0, %v18890_v19  ;;  %8843 = vmatpush1.bf16.msra.mxu0 %v16875_v45  ;;  %v16955_v45 = vld [vmem:[#allocation2 + $0x2154] ss:$112 sps:$4 sm:$0xff]  }
 0x120   :  { %8876 = vmatpush1.bf16.msra.mxu1 %v16872_v44  ;;  %8844 = vmatprep.subr.bf16.mxu0 %v16883_v47  ;;  %v16952_v44 = vld [vmem:[#allocation2 + $0x16d4] ss:$112 sps:$4 sm:$0xff]  }
 0x121   :  { %8877 = vmatprep.subr.bf16.mxu1 %v16880_v46  ;;  %8907 = vmatprep.mubr.bf16.mxu1 %v18870_v52  ;;  %v1509_v46 = vrot.slane %v1494_v37, %v18923_v40  ;;  %v17000_v37 = vld [vmem:[#allocation2 + $0x2854] ss:$112 sps:$4 sm:$0xff]  }
 0x123   :  { %8845 = vmatpush1.bf16.msra.mxu0 %v16881_v50 }
 0x124   :  { %8878 = vmatpush1.bf16.msra.mxu1 %v16878_v48  ;;  %8846 = vmatprep.subr.bf16.mxu0 %v16889_v53  ;;  %v16953_v53 = vld [vmem:[#allocation2 + $0x2150] ss:$112 sps:$4 sm:$0xff]  }
 0x125   :  { %8879 = vmatprep.subr.bf16.mxu1 %v16886_v51  ;;  %v16950_v51 = vld [vmem:[#allocation2 + $0x16d0] ss:$112 sps:$4 sm:$0xff]  }
 0x127   :  { %8847 = vmatpush1.bf16.msra.mxu0 %v16887_v55 }
 0x128   :  { %8880 = vmatpush1.bf16.msra.mxu1 %v16884_v54  ;;  %8848 = vmatprep.subr.bf16.mxu0 %v16895_v57  ;;  %v16958_v54 = vld [vmem:[#allocation2 + $0x15f4] ss:$112 sps:$4 sm:$0xff]  }
 0x129   :  { %8881 = vmatprep.subr.bf16.mxu1 %v16892_v56  ;;  %v16961_v57 = vld [vmem:[#allocation2 + $0x2074] ss:$112 sps:$4 sm:$0xff]  }
 0x12b   :  { %8849 = vmatpush1.bf16.msra.mxu0 %v16893_v59 }
 0x12c   :  { %8882 = vmatpush1.bf16.msra.mxu1 %v16890_v58  ;;  %8850 = vmatprep.subr.bf16.mxu0 %v16901_v61 }
 0x12d   :  { %8883 = vmatprep.subr.bf16.mxu1 %v16898_v60 }
 0x12f   :  { %8851 = vmatpush2.bf16.msra.mxu0 %v16899_v63  ;;  %v16956_v63 = vld [vmem:[#allocation2 + $0x15f0] ss:$112 sps:$4 sm:$0xff]  }
 0x130   :  { %8884 = vmatpush1.bf16.msra.mxu1 %v16896_v62  ;;  %8852 = vmatprep.subr.bf16.mxu0 %v16907_v1  ;;  %v16964_v1 = vld [vmem:[#allocation2 + $0x1514] ss:$112 sps:$4 sm:$0xff]  }
 0x131   :  { %8885 = vmatprep.subr.bf16.mxu1 %v16904_v0  ;;  %v16959_v0 = vld [vmem:[#allocation2 + $0x2070] ss:$112 sps:$4 sm:$0xff]  }
 0x133   :  { %8853 = vmatpush2.bf16.msra.mxu0 %v16905_v3  ;;  %v16967_v3 = vld [vmem:[#allocation2 + $0x1f94] ss:$112 sps:$4 sm:$0xff]  }
 0x134   :  { %8886 = vmatpush1.bf16.msra.mxu1 %v16902_v2  ;;  %8854 = vmatprep.subr.bf16.mxu0 %v16913_v5  ;;  %v16962_v5 = vld [vmem:[#allocation2 + $0x1510] ss:$112 sps:$4 sm:$0xff]  }
 0x135   :  { %8887 = vmatprep.subr.bf16.mxu1 %v16910_v4 }
 0x137   :  { %8855 = vmatpush2.bf16.msra.mxu0 %v16911_v7  ;;  %v16965_v7 = vld [vmem:[#allocation2 + $0x1f90] ss:$112 sps:$4 sm:$0xff]  }
 0x138   :  { %8888 = vmatpush1.bf16.msra.mxu1 %v16908_v6  ;;  %8856 = vmatprep.subr.bf16.mxu0 %v16919_v11 }
 0x139   :  { %8889 = vmatprep.subr.bf16.mxu1 %v16916_v10  ;;  %v16970_v10 = vld [vmem:[#allocation2 + $0x2a14] ss:$112 sps:$4 sm:$0xff]  }
 0x13b   :  { %8857 = vmatpush2.bf16.msra.mxu0 %v16917_v13 }
 0x13c   :  { %8890 = vmatpush1.bf16.msra.mxu1 %v16914_v12  ;;  %8858 = vmatprep.subr.bf16.mxu0 %v16925_v15  ;;  %v16973_v12 = vld [vmem:[#allocation2 + $0x1eb4] ss:$112 sps:$4 sm:$0xff]   ;;  %v16971_v15 = vld [vmem:[#allocation2 + $0x1eb0] ss:$112 sps:$4 sm:$0xff]  }
 0x13d   :  { %8891 = vmatprep.subr.bf16.mxu1 %v16922_v14  ;;  %v16968_v14 = vld [vmem:[#allocation2 + $0x2a10] ss:$112 sps:$4 sm:$0xff]  }
 0x13f   :  { %8859 = vmatpush2.bf16.msra.mxu0 %v16923_v18  ;;  %v16976_v18 = vld [vmem:[#allocation2 + $0x1dd4] ss:$112 sps:$4 sm:$0xff]  }
 0x140   :  { %8892 = vmatpush2.bf16.msra.mxu1 %v16920_v17  ;;  %8860 = vmatprep.subr.bf16.mxu0 %v16931_v22  ;;  %v16974_v22 = vld [vmem:[#allocation2 + $0x1dd0] ss:$112 sps:$4 sm:$0xff]  }
 0x141   :  { %8893 = vmatprep.subr.bf16.mxu1 %v16928_v20  ;;  %v16979_v20 = vld [vmem:[#allocation2 + $0x63c] ss:$112 sps:$4 sm:$0xff]  }
 0x143   :  { %8861 = vmatpush2.bf16.msra.mxu0 %v16929_v24  ;;  %v16977_v24 = vld [vmem:[#allocation2 + $0x638] ss:$112 sps:$4 sm:$0xff]  }
 0x144   :  { %8894 = vmatpush2.bf16.msra.mxu1 %v16926_v23  ;;  %8862 = vmatprep.subr.bf16.mxu0 %v16937_v27  ;;  %v16982_v23 = vld [vmem:[#allocation2 + $0x1cf4] ss:$112 sps:$4 sm:$0xff]  }
 0x145   :  { %8895 = vmatprep.subr.bf16.mxu1 %v16934_v25  ;;  %v16980_v25 = vld [vmem:[#allocation2 + $0x1cf0] ss:$112 sps:$4 sm:$0xff]   ;;  %v16988_v27 = vld [vmem:[#allocation2 + $0x1c14] ss:$112 sps:$4 sm:$0xff]  }
 0x147   :  { %8863 = vmatpush2.bf16.msra.mxu0 %v16935_v29  ;;  %v16986_v29 = vld [vmem:[#allocation2 + $0x1c10] ss:$112 sps:$4 sm:$0xff]  }
 0x148   :  { %8896 = vmatpush2.bf16.msra.mxu1 %v16932_v28  ;;  %8864 = vmatprep.subr.bf16.mxu0 %v16943_v32  ;;  %v16983_v28 = vld [vmem:[#allocation2 + $0x558] ss:$112 sps:$4 sm:$0xff]   ;;  %v16994_v32 = vld [vmem:[#allocation2 + $0x2934] ss:$112 sps:$4 sm:$0xff]  }
 0x149   :  { %8897 = vmatprep.subr.bf16.mxu1 %v16940_v30  ;;  %v16991_v30 = vld [vmem:[#allocation2 + $0x47c] ss:$112 sps:$4 sm:$0xff]  }
 0x14b   :  { %8865 = vmatpush2.bf16.msra.mxu0 %v16941_v34  ;;  %v16992_v34 = vld [vmem:[#allocation2 + $0x2930] ss:$112 sps:$4 sm:$0xff]  }
 0x14c   :  { %8898 = vmatpush2.bf16.msra.mxu1 %v16938_v33  ;;  %8916 = vmatprep.subr.bf16.mxu0 %v16949_v39  ;;  %v16989_v33 = vld [vmem:[#allocation2 + $0x478] ss:$112 sps:$4 sm:$0xff]  }
 0x14d   :  { %8899 = vmatprep.subr.bf16.mxu1 %v16946_v35  ;;  %v16997_v35 = vld [vmem:[#allocation2 + $0x39c] ss:$112 sps:$4 sm:$0xff]   ;;  %v16995_v39 = vld [vmem:[#allocation2 + $0x398] ss:$112 sps:$4 sm:$0xff]  }
 0x14e   :  { %v8540_v47 = vpop.f32.mrf.mxu0  ;;  %8867 = vmatmul.mubr.bf16.vlgmr.msra.gmra.mxu0 %v18880_v8 }
 0x14f   :  { %v8581_v48 = vpop.f32.mrf.mxu1  ;;  %v8541_v50 = vadd.f32 %v8540_v47, %v1505_v42  ;;  %8917 = vmatpush1.bf16.msra.mxu0 %v16947_v43  ;;  %8948 = vmatprep.mubr.bf16.mxu0 %v18898_v36  ;;  %v17003_v42 = vld [vmem:[#allocation2 + $0x2bc] ss:$112 sps:$4 sm:$0xff]   ;;  %v17006_v43 = vld [vmem:[#allocation2 + $0x2774] ss:$112 sps:$4 sm:$0xff]  }
 0x150   :  { %8900 = vmatpush2.bf16.msra.mxu1 %v16944_v41  ;;  %v8542_v55 = vpop.f32.mrf.mxu0  ;;  %8918 = vmatprep.subr.bf16.mxu0 %v16955_v45  ;;  %v16998_v41 = vld [vmem:[#allocation2 + $0x2850] ss:$112 sps:$4 sm:$0xff]   ;;  %v17012_v47 = vld [vmem:[#allocation2 + $0x2694] ss:$112 sps:$4 sm:$0xff]  }
 0x151   :  { %v8583_v56 = vpop.f32.mrf.mxu1  ;;  %8901 = vmatprep.subr.bf16.mxu1 %v16952_v44  ;;  %v18928_v58 = vadd.f32 %v8581_v48, %v8541_v50  ;;  %v8543_v59 = vadd.f32 %v8542_v55, %v1509_v46  ;;  %v17001_v44 = vld [vmem:[#allocation2 + $0x2b8] ss:$112 sps:$4 sm:$0xff]   ;;  %v17004_v45 = vld [vmem:[#allocation2 + $0x2770] ss:$112 sps:$4 sm:$0xff]   ;;  %v17009_v46 = vld [vmem:[#allocation2 + $0x1dc] ss:$112 sps:$4 sm:$0xff]  }
 0x152   :  { %v8544_v61 = vpop.f32.mrf.mxu0  ;;  %v17007_v48 = vld [vmem:[#allocation2 + $0x1d8] ss:$112 sps:$4 sm:$0xff]   ;;  %v17010_v50 = vld [vmem:[#allocation2 + $0x2690] ss:$112 sps:$4 sm:$0xff]  }
 0x153   :  { %v8585_v60 = vpop.f32.mrf.mxu1  ;;  %v18931_v62 = vadd.f32 %v8583_v56, %v8543_v59  ;;  %8919 = vmatpush1.bf16.msra.mxu0 %v16953_v53  ;;  %v17018_v53 = vld [vmem:[#allocation2 + $0x25b4] ss:$112 sps:$4 sm:$0xff]   ;;  %v17016_v55 = vld [vmem:[#allocation2 + $0x25b0] ss:$112 sps:$4 sm:$0xff]   ;;  %v17021_v56 = vld [vmem:[#allocation2 + $0x1c] ss:$112 sps:$4 sm:$0xff]  }
 0x154   :  { %8902 = vmatpush2.bf16.msra.mxu1 %v16950_v51  ;;  %8920 = vmatprep.subr.bf16.mxu0 %v16961_v57  ;;  %v8545_v4 = vpop.f32.mrf.mxu0  ;;  %v17015_v51 = vld [vmem:[#allocation2 + $0xfc] ss:$112 sps:$4 sm:$0xff]   ;;  %v17024_v57 = vld [vmem:[#allocation2 + $0x24d4] ss:$112 sps:$4 sm:$0xff]   ;;  %v17019_v59 = vld [vmem:[#allocation2 + $0x18] ss:$112 sps:$4 sm:$0xff]  }
 0x155   :  { %v8586_v2 = vpop.f32.mrf.mxu1  ;;  %8903 = vmatprep.subr.bf16.mxu1 %v16958_v54  ;;  %v17013_v54 = vld [vmem:[#allocation2 + $0xf8] ss:$112 sps:$4 sm:$0xff]   ;;  %v17022_v60 = vld [vmem:[#allocation2 + $0x24d0] ss:$112 sps:$4 sm:$0xff]   ;;  %v17027_v61 = vld [vmem:[#allocation2 + $0xd3c] ss:$112 sps:$4 sm:$0xff]  }
 0x156   :  { %v17033_v2 = vld [vmem:[#allocation2 + $0xc5c] ss:$112 sps:$4 sm:$0xff]   ;;  %v17031_v4 = vld [vmem:[#allocation2 + $0xc58] ss:$112 sps:$4 sm:$0xff]  }
 0x157   :  { %v18933_v6 = vpop.f32.mrf.mxu1  ;;  %8921 = vmatpush1.bf16.msra.mxu0 %v16959_v0  ;;  %v17025_v0 = vld [vmem:[#allocation2 + $0xd38] ss:$112 sps:$4 sm:$0xff]  }
 0x158   :  { %8904 = vmatpush2.bf16.msra.mxu1 %v16956_v63  ;;  %8922 = vmatprep.subr.bf16.mxu0 %v16967_v3  ;;  %v17030_v63 = vld [vmem:[#allocation2 + $0x23f4] ss:$112 sps:$4 sm:$0xff]  }
 0x159   :  { %v18935_v11 = vpop.f32.mrf.mxu1  ;;  %8905 = vmatprep.subr.bf16.mxu1 %v16964_v1  ;;  %v17028_v1 = vld [vmem:[#allocation2 + $0x23f0] ss:$112 sps:$4 sm:$0xff]   ;;  %v17036_v3 = vld [vmem:[#allocation2 + $0x2314] ss:$112 sps:$4 sm:$0xff]  }
 0x15b   :  { %v8667_v13 = vpop.f32.mrf.mxu1  ;;  %8923 = vmatpush1.bf16.msra.mxu0 %v16965_v7  ;;  %v17039_v7 = vld [vmem:[#allocation2 + $0xb7c] ss:$112 sps:$4 sm:$0xff]  }
 0x15c   :  { %8906 = vmatpush2.bf16.msra.mxu1 %v16962_v5  ;;  %8924 = vmatprep.subr.bf16.mxu0 %v16973_v12  ;;  %v17034_v5 = vld [vmem:[#allocation2 + $0x2310] ss:$112 sps:$4 sm:$0xff]   ;;  %v17037_v12 = vld [vmem:[#allocation2 + $0xb78] ss:$112 sps:$4 sm:$0xff]  }
 0x15d   :  { %v8668_v17 = vpop.f32.mrf.mxu1  ;;  %8971 = vmatprep.subr.bf16.mxu1 %v16970_v10  ;;  %v17042_v10 = vld [vmem:[#allocation2 + $0x143c] ss:$112 sps:$4 sm:$0xff]   ;;  %v17040_v13 = vld [vmem:[#allocation2 + $0x1438] ss:$112 sps:$4 sm:$0xff]  }
 0x15f   :  { %8908 = vmatmul.mubr.bf16.vlgmr.msra.gmra.mxu1 %v18882_v9  ;;  %8925 = vmatpush1.bf16.msra.mxu0 %v16971_v15  ;;  %v17048_v15 = vld [vmem:[#allocation2 + $0x135c] ss:$112 sps:$4 sm:$0xff]  }
 0x160   :  { %8972 = vmatpush1.bf16.msra.mxu1 %v16968_v14  ;;  %8926 = vmatprep.subr.bf16.mxu0 %v16976_v18  ;;  %v17045_v14 = vld [vmem:[#allocation2 + $0xa9c] ss:$112 sps:$4 sm:$0xff]  }
 0x161   :  { %8989 = vmatprep.mubr.bf16.mxu1 %v18791_v16  ;;  %8998 = vmatprep.subr.bf16.mxu1 %v16979_v20  ;;  %v17043_v20 = vld [vmem:[#allocation2 + $0xa98] ss:$112 sps:$4 sm:$0xff]  }
 0x163   :  { %8927 = vmatpush1.bf16.msra.mxu0 %v16974_v22  ;;  %v17046_v22 = vld [vmem:[#allocation2 + $0x1358] ss:$112 sps:$4 sm:$0xff]  }
 0x164   :  { %8928 = vmatprep.subr.bf16.mxu0 %v16982_v23 }
 0x167   :  { %15948 = vmatmul.mubr.msk.bf16.vlgmr.msra.gmra.mxu1 %vm8502_vm0, %v18890_v19  ;;  %8929 = vmatpush1.bf16.msra.mxu0 %v16980_v25  ;;  %v17054_v25 = vld [vmem:[#allocation2 + $0x127c] ss:$112 sps:$4 sm:$0xff]  }
 0x168   :  { %8999 = vmatpush1.bf16.msra.mxu1 %v16977_v24  ;;  %8930 = vmatprep.subr.bf16.mxu0 %v16988_v27  ;;  %v17051_v24 = vld [vmem:[#allocation2 + $0x9bc] ss:$112 sps:$4 sm:$0xff]  }
 0x169   :  { %9000 = vmatprep.subr.bf16.mxu1 %v16985_v26  ;;  %9030 = vmatprep.mubr.bf16.mxu1 %v18865_v49 }
 0x16b   :  { %8931 = vmatpush1.bf16.msra.mxu0 %v16986_v29 }
 0x16c   :  { %9001 = vmatpush1.bf16.msra.mxu1 %v16983_v28  ;;  %8932 = vmatprep.subr.bf16.mxu0 %v16994_v32  ;;  %v17057_v32 = vld [vmem:[#allocation2 + $0x8dc] ss:$112 sps:$4 sm:$0xff]  }
 0x16d   :  { %9002 = vmatprep.subr.bf16.mxu1 %v16991_v30  ;;  %v17052_v30 = vld [vmem:[#allocation2 + $0x1278] ss:$112 sps:$4 sm:$0xff]  }
 0x16f   :  { %8933 = vmatpush2.bf16.msra.mxu0 %v16992_v34 }
 0x170   :  { %9003 = vmatpush1.bf16.msra.mxu1 %v16989_v33  ;;  %8934 = vmatprep.subr.bf16.mxu0 %v17000_v37  ;;  %v17060_v33 = vld [vmem:[#allocation2 + $0x119c] ss:$112 sps:$4 sm:$0xff]  }
 0x171   :  { %9004 = vmatprep.subr.bf16.mxu1 %v16997_v35 }
 0x173   :  { %8935 = vmatpush2.bf16.msra.mxu0 %v16998_v41 }
 0x174   :  { %9005 = vmatpush1.bf16.msra.mxu1 %v16995_v39  ;;  %8936 = vmatprep.subr.bf16.mxu0 %v17006_v43  ;;  %v17066_v39 = vld [vmem:[#allocation2 + $0x10bc] ss:$112 sps:$4 sm:$0xff]   ;;  %v17064_v43 = vld [vmem:[#allocation2 + $0x10b8] ss:$112 sps:$4 sm:$0xff]  }
 0x175   :  { %9006 = vmatprep.subr.bf16.mxu1 %v17003_v42  ;;  %v17061_v42 = vld [vmem:[#allocation2 + $0x7f8] ss:$112 sps:$4 sm:$0xff]  }
 0x177   :  { %8937 = vmatpush2.bf16.msra.mxu0 %v17004_v45  ;;  %v17069_v45 = vld [vmem:[#allocation2 + $0x71c] ss:$112 sps:$4 sm:$0xff]  }
 0x178   :  { %9007 = vmatpush1.bf16.msra.mxu1 %v17001_v44  ;;  %8938 = vmatprep.subr.bf16.mxu0 %v17012_v47  ;;  %v17067_v47 = vld [vmem:[#allocation2 + $0x718] ss:$112 sps:$4 sm:$0xff]  }
 0x179   :  { %9008 = vmatprep.subr.bf16.mxu1 %v17009_v46  ;;  %v17072_v46 = vld [vmem:[#allocation2 + $0xfdc] ss:$112 sps:$4 sm:$0xff]  }
 0x17b   :  { %8939 = vmatpush2.bf16.msra.mxu0 %v17010_v50  ;;  %v17075_v50 = vld [vmem:[#allocation2 + $0x223c] ss:$112 sps:$4 sm:$0xff]  }
 0x17c   :  { %9009 = vmatpush1.bf16.msra.mxu1 %v17007_v48  ;;  %8940 = vmatprep.subr.bf16.mxu0 %v17018_v53  ;;  %v17070_v48 = vld [vmem:[#allocation2 + $0xfd8] ss:$112 sps:$4 sm:$0xff]  }
 0x17d   :  { %9010 = vmatprep.subr.bf16.mxu1 %v17015_v51  ;;  %v17078_v51 = vld [vmem:[#allocation2 + $0xefc] ss:$112 sps:$4 sm:$0xff]   ;;  %v17073_v53 = vld [vmem:[#allocation2 + $0x2238] ss:$112 sps:$4 sm:$0xff]  }
 0x17f   :  { %8941 = vmatpush2.bf16.msra.mxu0 %v17016_v55  ;;  %v17081_v55 = vld [vmem:[#allocation2 + $0x215c] ss:$112 sps:$4 sm:$0xff]  }
 0x180   :  { %9011 = vmatpush1.bf16.msra.mxu1 %v17013_v54  ;;  %8942 = vmatprep.subr.bf16.mxu0 %v17024_v57  ;;  %v17076_v54 = vld [vmem:[#allocation2 + $0xef8] ss:$112 sps:$4 sm:$0xff]  }
 0x181   :  { %9012 = vmatprep.subr.bf16.mxu1 %v17021_v56  ;;  %v17084_v56 = vld [vmem:[#allocation2 + $0xe1c] ss:$112 sps:$4 sm:$0xff]   ;;  %v17079_v57 = vld [vmem:[#allocation2 + $0x2158] ss:$112 sps:$4 sm:$0xff]  }
 0x183   :  { %8943 = vmatpush2.bf16.msra.mxu0 %v17022_v60  ;;  %v17087_v60 = vld [vmem:[#allocation2 + $0x207c] ss:$112 sps:$4 sm:$0xff]  }
 0x184   :  { %9013 = vmatpush1.bf16.msra.mxu1 %v17019_v59  ;;  %8944 = vmatprep.subr.bf16.mxu0 %v17030_v63  ;;  %v17082_v59 = vld [vmem:[#allocation2 + $0xe18] ss:$112 sps:$4 sm:$0xff]  }
 0x185   :  { %9014 = vmatprep.subr.bf16.mxu1 %v17027_v61  ;;  %v17090_v61 = vld [vmem:[#allocation2 + $0x1b3c] ss:$112 sps:$4 sm:$0xff]   ;;  %v17085_v63 = vld [vmem:[#allocation2 + $0x2078] ss:$112 sps:$4 sm:$0xff]  }
 0x187   :  { %8945 = vmatpush2.bf16.msra.mxu0 %v17028_v1  ;;  %v17093_v1 = vld [vmem:[#allocation2 + $0x1f9c] ss:$112 sps:$4 sm:$0xff]  }
 0x188   :  { %9015 = vmatpush2.bf16.msra.mxu1 %v17025_v0  ;;  %8946 = vmatprep.subr.bf16.mxu0 %v17036_v3  ;;  %v17088_v0 = vld [vmem:[#allocation2 + $0x1b38] ss:$112 sps:$4 sm:$0xff]  }
 0x189   :  { %9016 = vmatprep.subr.bf16.mxu1 %v17033_v2  ;;  %v17096_v2 = vld [vmem:[#allocation2 + $0x1a5c] ss:$112 sps:$4 sm:$0xff]   ;;  %v17091_v3 = vld [vmem:[#allocation2 + $0x1f98] ss:$112 sps:$4 sm:$0xff]  }
 0x18b   :  { %8947 = vmatpush2.bf16.msra.mxu0 %v17034_v5  ;;  %v17099_v5 = vld [vmem:[#allocation2 + $0x1ebc] ss:$112 sps:$4 sm:$0xff]  }
 0x18c   :  { %9017 = vmatpush2.bf16.msra.mxu1 %v17031_v4  ;;  %9039 = vmatprep.subr.bf16.mxu0 %v17042_v10  ;;  %v17094_v4 = vld [vmem:[#allocation2 + $0x1a58] ss:$112 sps:$4 sm:$0xff]  }
 0x18d   :  { %9018 = vmatprep.subr.bf16.mxu1 %v17039_v7  ;;  %v17102_v7 = vld [vmem:[#allocation2 + $0x197c] ss:$112 sps:$4 sm:$0xff]   ;;  %v17097_v10 = vld [vmem:[#allocation2 + $0x1eb8] ss:$112 sps:$4 sm:$0xff]  }
 0x18e   :  { %v8622_v17 = vpop.f32.mrf.mxu0  ;;  %8949 = vmatmul.mubr.bf16.vlgmr.msra.gmra.mxu0 %v18904_v21 }
 0x18f   :  { %v8623_v18 = vadd.f32 %v8622_v17, %v18928_v58  ;;  %9040 = vmatpush1.bf16.msra.mxu0 %v17040_v13  ;;  %9071 = vmatprep.mubr.bf16.mxu0 %v18870_v52  ;;  %v17049_v58 = vld [vmem:[#allocation2 + $0x9b8] ss:$112 sps:$4 sm:$0xff]   ;;  %v17105_v13 = vld [vmem:[#allocation2 + $0x1ddc] ss:$112 sps:$4 sm:$0xff]  }
 0x190   :  { %9019 = vmatpush2.bf16.msra.mxu1 %v17037_v12  ;;  %v8624_v23 = vpop.f32.mrf.mxu0  ;;  %9041 = vmatprep.subr.bf16.mxu0 %v17048_v15  ;;  %v17100_v12 = vld [vmem:[#allocation2 + $0x1978] ss:$112 sps:$4 sm:$0xff]  }
 0x191   :  { %9020 = vmatprep.subr.bf16.mxu1 %v17045_v14  ;;  %v18945_v26 = vadd.f32 %v18933_v6, %v8623_v18  ;;  %v8625_v27 = vadd.f32 %v8624_v23, %v18931_v62  ;;  %v17055_v6 = vld [vmem:[#allocation2 + $0x8d8] ss:$112 sps:$4 sm:$0xff]   ;;  %v17108_v14 = vld [vmem:[#allocation2 + $0x189c] ss:$112 sps:$4 sm:$0xff]  }
 0x192   :  { %v8626_v28 = vpop.f32.mrf.mxu0  ;;  %v17058_v62 = vld [vmem:[#allocation2 + $0x1198] ss:$112 sps:$4 sm:$0xff]   ;;  %v17111_v18 = vld [vmem:[#allocation2 + $0x1cfc] ss:$112 sps:$4 sm:$0xff]  }
 0x193   :  { %v18950_v29 = vadd.f32 %v18935_v11, %v8625_v27  ;;  %9042 = vmatpush1.bf16.msra.mxu0 %v17046_v22  ;;  %v17063_v11 = vld [vmem:[#allocation2 + $0x7fc] ss:$112 sps:$4 sm:$0xff]   ;;  %v17103_v15 = vld [vmem:[#allocation2 + $0x1dd8] ss:$112 sps:$4 sm:$0xff]  }
 0x194   :  { %9021 = vmatpush2.bf16.msra.mxu1 %v17043_v20  ;;  %9043 = vmatprep.subr.bf16.mxu0 %v17054_v25  ;;  %v8627_v34 = vpop.f32.mrf.mxu0  ;;  %v17106_v17 = vld [vmem:[#allocation2 + $0x1898] ss:$112 sps:$4 sm:$0xff]   ;;  %v17114_v20 = vld [vmem:[#allocation2 + $0x17bc] ss:$112 sps:$4 sm:$0xff]  }
 0x195   :  { %9022 = vmatprep.subr.bf16.mxu1 %v17051_v24  ;;  %v17109_v22 = vld [vmem:[#allocation2 + $0x1cf8] ss:$112 sps:$4 sm:$0xff]   ;;  %v17117_v24 = vld [vmem:[#allocation2 + $0x1c1c] ss:$112 sps:$4 sm:$0xff]  }
 0x196   :  { %v17112_v23 = vld [vmem:[#allocation2 + $0x17b8] ss:$112 sps:$4 sm:$0xff]   ;;  %v17120_v25 = vld [vmem:[#allocation2 + $0x16dc] ss:$112 sps:$4 sm:$0xff]  }
 0x197   :  { %v18952_v35 = vpop.f32.mrf.mxu1  ;;  %9044 = vmatpush1.bf16.msra.mxu0 %v17052_v30  ;;  %v17115_v27 = vld [vmem:[#allocation2 + $0x1c18] ss:$112 sps:$4 sm:$0xff]   ;;  %v17126_v30 = vld [vmem:[#allocation2 + $0x15fc] ss:$112 sps:$4 sm:$0xff]  }
 0x198   :  { %9023 = vmatpush2.bf16.msra.mxu1 %v17049_v58  ;;  %9045 = vmatprep.subr.bf16.mxu0 %v17060_v33  ;;  %v17118_v28 = vld [vmem:[#allocation2 + $0x16d8] ss:$112 sps:$4 sm:$0xff]   ;;  %v17123_v58 = vld [vmem:[#allocation2 + $0x293c] ss:$112 sps:$4 sm:$0xff]  }
 0x199   :  { %v18954_v37 = vpop.f32.mrf.mxu1  ;;  %9024 = vmatprep.subr.bf16.mxu1 %v17057_v32  ;;  %v17121_v32 = vld [vmem:[#allocation2 + $0x2938] ss:$112 sps:$4 sm:$0xff]   ;;  %v17129_v34 = vld [vmem:[#allocation2 + $0x285c] ss:$112 sps:$4 sm:$0xff]  }
 0x19a   :  { %v17124_v33 = vld [vmem:[#allocation2 + $0x15f8] ss:$112 sps:$4 sm:$0xff]  }
 0x19b   :  { %v8708_v41 = vpop.f32.mrf.mxu1  ;;  %9046 = vmatpush1.bf16.msra.mxu0 %v17058_v62  ;;  %v18959_v62 = vsub.s32 2, %v18917_v31 }
 0x19c   :  { %9025 = vmatpush2.bf16.msra.mxu1 %v17055_v6  ;;  %9047 = vmatprep.subr.bf16.mxu0 %v17066_v39  ;;  %v17132_v6 = vld [vmem:[#allocation2 + $0x151c] ss:$112 sps:$4 sm:$0xff]   ;;  %v17127_v39 = vld [vmem:[#allocation2 + $0x2858] ss:$112 sps:$4 sm:$0xff]  }
 0x19d   :  { %v8709_v44 = vpop.f32.mrf.mxu1  ;;  %9026 = vmatprep.subr.bf16.mxu1 %v17063_v11  ;;  %v18962_v11 = vsub.s32 3, %v18917_v31  ;;  %v17130_v41 = vld [vmem:[#allocation2 + $0x1518] ss:$112 sps:$4 sm:$0xff]  }
 0x19e   :  { %v18964_v44 = vld [vmem:[#allocation11] sm:$0xff] }
 0x19f   :  { %9048 = vmatpush1.bf16.msra.mxu0 %v17064_v43  ;;  %v17138_v43 = vld [vmem:[#allocation2 + $0x644] ss:$112 sps:$4 sm:$0xff]  }
 0x1a0   :  { %9027 = vmatpush2.bf16.msra.mxu1 %v17061_v42  ;;  %9049 = vmatprep.subr.bf16.mxu0 %v17072_v46  ;;  %v17135_v42 = vld [vmem:[#allocation2 + $0x277c] ss:$112 sps:$4 sm:$0xff]   ;;  %v1517_v46 = vrot.slane %v18964_v44, %v18962_v11 }
 0x1a1   :  { %9028 = vmatprep.subr.bf16.mxu1 %v17069_v45  ;;  %v1513_v45 = vrot.slane %v18964_v44, %v18959_v62 }
 0x1a3   :  { %9050 = vmatpush1.bf16.msra.mxu0 %v17070_v48  ;;  %v17136_v48 = vld [vmem:[#allocation2 + $0x640] ss:$112 sps:$4 sm:$0xff]  }
 0x1a4   :  { %9029 = vmatpush2.bf16.msra.mxu1 %v17067_v47  ;;  %9051 = vmatprep.subr.bf16.mxu0 %v17078_v51  ;;  %v17133_v47 = vld [vmem:[#allocation2 + $0x2778] ss:$112 sps:$4 sm:$0xff]   ;;  %v17144_v51 = vld [vmem:[#allocation2 + $0x564] ss:$112 sps:$4 sm:$0xff]  }
 0x1a5   :  { %9080 = vmatprep.subr.bf16.mxu1 %v17075_v50  ;;  %v17141_v50 = vld [vmem:[#allocation2 + $0x269c] ss:$112 sps:$4 sm:$0xff]  }
 0x1a7   :  { %9031 = vmatmul.mubr.bf16.vlgmr.msra.gmra.mxu1 %v18880_v8  ;;  %9052 = vmatpush1.bf16.msra.mxu0 %v17076_v54  ;;  %v17139_v54 = vld [vmem:[#allocation2 + $0x2698] ss:$112 sps:$4 sm:$0xff]  }
 0x1a8   :  { %9081 = vmatpush1.bf16.msra.mxu1 %v17073_v53  ;;  %9053 = vmatprep.subr.bf16.mxu0 %v17084_v56  ;;  %v8705_v53 = vadd.f32 %v18952_v35, %v1513_v45  ;;  %v17153_v35 = vld [vmem:[#allocation2 + $0x24dc] ss:$112 sps:$4 sm:$0xff]  }
 0x1a9   :  { %9082 = vmatprep.subr.bf16.mxu1 %v17081_v55  ;;  %9112 = vmatprep.mubr.bf16.mxu1 %v18898_v36  ;;  %v17142_v55 = vld [vmem:[#allocation2 + $0x560] ss:$112 sps:$4 sm:$0xff]  }
 0x1ab   :  { %9054 = vmatpush1.bf16.msra.mxu0 %v17082_v59 }
 0x1ac   :  { %9083 = vmatpush1.bf16.msra.mxu1 %v17079_v57  ;;  %9055 = vmatprep.subr.bf16.mxu0 %v17090_v61  ;;  %v8707_v57 = vadd.f32 %v18954_v37, %v1517_v46  ;;  %v17150_v61 = vld [vmem:[#allocation2 + $0x484] ss:$112 sps:$4 sm:$0xff]  }
 0x1ad   :  { %9084 = vmatprep.subr.bf16.mxu1 %v17087_v60  ;;  %v17147_v60 = vld [vmem:[#allocation2 + $0x25bc] ss:$112 sps:$4 sm:$0xff]   ;;  %v17156_v37 = vld [vmem:[#allocation2 + $0x3a4] ss:$112 sps:$4 sm:$0xff]  }
 0x1ae   :  { %v17180_v46 = vld [vmem:[#allocation2 + $0x1444] ss:$112 sps:$4 sm:$0xff]  }
 0x1af   :  { %9056 = vmatpush2.bf16.msra.mxu0 %v17088_v0 }
 0x1b0   :  { %9085 = vmatpush1.bf16.msra.mxu1 %v17085_v63  ;;  %9057 = vmatprep.subr.bf16.mxu0 %v17096_v2  ;;  %v17148_v2 = vld [vmem:[#allocation2 + $0x480] ss:$112 sps:$4 sm:$0xff]  }
 0x1b1   :  { %9086 = vmatprep.subr.bf16.mxu1 %v17093_v1  ;;  %v17145_v1 = vld [vmem:[#allocation2 + $0x25b8] ss:$112 sps:$4 sm:$0xff]  }
 0x1b3   :  { %9058 = vmatpush2.bf16.msra.mxu0 %v17094_v4 }
 0x1b4   :  { %9087 = vmatpush1.bf16.msra.mxu1 %v17091_v3  ;;  %9059 = vmatprep.subr.bf16.mxu0 %v17102_v7 }
 0x1b5   :  { %9088 = vmatprep.subr.bf16.mxu1 %v17099_v5  ;;  %v17151_v5 = vld [vmem:[#allocation2 + $0x24d8] ss:$112 sps:$4 sm:$0xff]  }
 0x1b7   :  { %9060 = vmatpush2.bf16.msra.mxu0 %v17100_v12 }
 0x1b8   :  { %9089 = vmatpush1.bf16.msra.mxu1 %v17097_v10  ;;  %9061 = vmatprep.subr.bf16.mxu0 %v17108_v14  ;;  %v17154_v10 = vld [vmem:[#allocation2 + $0x3a0] ss:$112 sps:$4 sm:$0xff]   ;;  %v17162_v14 = vld [vmem:[#allocation2 + $0x2c4] ss:$112 sps:$4 sm:$0xff]  }
 0x1b9   :  { %9090 = vmatprep.subr.bf16.mxu1 %v17105_v13  ;;  %v17159_v13 = vld [vmem:[#allocation2 + $0x23fc] ss:$112 sps:$4 sm:$0xff]  }
 0x1bb   :  { %9062 = vmatpush2.bf16.msra.mxu0 %v17106_v17 }
 0x1bc   :  { %9091 = vmatpush1.bf16.msra.mxu1 %v17103_v15  ;;  %9063 = vmatprep.subr.bf16.mxu0 %v17114_v20 }
 0x1bd   :  { %9092 = vmatprep.subr.bf16.mxu1 %v17111_v18  ;;  %v17157_v18 = vld [vmem:[#allocation2 + $0x23f8] ss:$112 sps:$4 sm:$0xff]  }
 0x1bf   :  { %9064 = vmatpush2.bf16.msra.mxu0 %v17112_v23  ;;  %v17165_v23 = vld [vmem:[#allocation2 + $0x231c] ss:$112 sps:$4 sm:$0xff]  }
 0x1c0   :  { %9093 = vmatpush1.bf16.msra.mxu1 %v17109_v22  ;;  %9065 = vmatprep.subr.bf16.mxu0 %v17120_v25  ;;  %v17160_v22 = vld [vmem:[#allocation2 + $0x2c0] ss:$112 sps:$4 sm:$0xff]  }
 0x1c1   :  { %9094 = vmatprep.subr.bf16.mxu1 %v17117_v24  ;;  %v17168_v24 = vld [vmem:[#allocation2 + $0x1e4] ss:$112 sps:$4 sm:$0xff]  }
 0x1c3   :  { %9066 = vmatpush2.bf16.msra.mxu0 %v17118_v28 }
 0x1c4   :  { %9095 = vmatpush1.bf16.msra.mxu1 %v17115_v27  ;;  %9067 = vmatprep.subr.bf16.mxu0 %v17126_v30  ;;  %v17163_v27 = vld [vmem:[#allocation2 + $0x2318] ss:$112 sps:$4 sm:$0xff]  }
 0x1c5   :  { %9096 = vmatprep.subr.bf16.mxu1 %v17123_v58  ;;  %v17166_v58 = vld [vmem:[#allocation2 + $0x1e0] ss:$112 sps:$4 sm:$0xff]  }
 0x1c7   :  { %9068 = vmatpush2.bf16.msra.mxu0 %v17124_v33  ;;  %v17174_v33 = vld [vmem:[#allocation2 + $0x104] ss:$112 sps:$4 sm:$0xff]  }
 0x1c8   :  { %9097 = vmatpush2.bf16.msra.mxu1 %v17121_v32  ;;  %9069 = vmatprep.subr.bf16.mxu0 %v17132_v6  ;;  %v17171_v32 = vld [vmem:[#allocation2 + $0x2a1c] ss:$112 sps:$4 sm:$0xff]  }
 0x1c9   :  { %9098 = vmatprep.subr.bf16.mxu1 %v17129_v34 }
 0x1cb   :  { %9070 = vmatpush2.bf16.msra.mxu0 %v17130_v41  ;;  %v17169_v41 = vld [vmem:[#allocation2 + $0x2a18] ss:$112 sps:$4 sm:$0xff]  }
 0x1cc   :  { %9099 = vmatpush2.bf16.msra.mxu1 %v17127_v39  ;;  %9162 = vmatprep.subr.bf16.mxu0 %v17138_v43  ;;  %v17177_v43 = vld [vmem:[#allocation2 + $0x24] ss:$112 sps:$4 sm:$0xff]  }
 0x1cd   :  { %9100 = vmatprep.subr.bf16.mxu1 %v17135_v42  ;;  %v17172_v42 = vld [vmem:[#allocation2 + $0x100] ss:$112 sps:$4 sm:$0xff]  }
 0x1ce   :  { %v8745_v56 = vpop.f32.mrf.mxu0  ;;  %9072 = vmatmul.mubr.bf16.vlgmr.msra.gmra.mxu0 %v18882_v9 }
 0x1cf   :  { %v8746_v59 = vadd.f32 %v8745_v56, %v8705_v53  ;;  %9163 = vmatpush1.bf16.msra.mxu0 %v17136_v48  ;;  %9194 = vmatprep.mubr.bf16.mxu0 %v18865_v49  ;;  %v17183_v48 = vld [vmem:[#allocation2 + $0xd44] ss:$112 sps:$4 sm:$0xff]   ;;  %v17187_v56 = vld [vmem:[#allocation2 + $0xc60] ss:$112 sps:$4 sm:$0xff]  }
 0x1d0   :  { %9101 = vmatpush2.bf16.msra.mxu1 %v17133_v47  ;;  %v8747_v63 = vpop.f32.mrf.mxu0  ;;  %9164 = vmatprep.subr.bf16.mxu0 %v17144_v51  ;;  %v17175_v47 = vld [vmem:[#allocation2 + $0x20] ss:$112 sps:$4 sm:$0xff]   ;;  %v17186_v53 = vld [vmem:[#allocation2 + $0x1364] ss:$112 sps:$4 sm:$0xff]  }
 0x1d1   :  { %9102 = vmatprep.subr.bf16.mxu1 %v17141_v50  ;;  %v8748_v0 = vadd.f32 %v8747_v63, %v8707_v57  ;;  %v17178_v50 = vld [vmem:[#allocation2 + $0x1440] ss:$112 sps:$4 sm:$0xff]   ;;  %v17192_v57 = vld [vmem:[#allocation2 + $0x1284] ss:$112 sps:$4 sm:$0xff]  }
 0x1d2   :  { %v8749_v3 = vpop.f32.mrf.mxu0  ;;  %v17181_v51 = vld [vmem:[#allocation2 + $0xd40] ss:$112 sps:$4 sm:$0xff]   ;;  %v17198_v63 = vld [vmem:[#allocation2 + $0x11a4] ss:$112 sps:$4 sm:$0xff]  }
 0x1d3   :  { %9165 = vmatpush1.bf16.msra.mxu0 %v17142_v55  ;;  %v17184_v55 = vld [vmem:[#allocation2 + $0x1360] ss:$112 sps:$4 sm:$0xff]   ;;  %v17207_v3 = vld [vmem:[#allocation2 + $0x9c4] ss:$112 sps:$4 sm:$0xff]  }
 0x1d4   :  { %9103 = vmatpush2.bf16.msra.mxu1 %v17139_v54  ;;  %9166 = vmatprep.subr.bf16.mxu0 %v17150_v61  ;;  %v8750_v4 = vpop.f32.mrf.mxu0  ;;  %v17189_v54 = vld [vmem:[#allocation2 + $0xc64] ss:$112 sps:$4 sm:$0xff]   ;;  %v17193_v61 = vld [vmem:[#allocation2 + $0xb80] ss:$112 sps:$4 sm:$0xff]  }
 0x1d5   :  { %9104 = vmatprep.subr.bf16.mxu1 %v17147_v60  ;;  %v17190_v60 = vld [vmem:[#allocation2 + $0x1280] ss:$112 sps:$4 sm:$0xff]  }
 0x1d6   :  { %v17205_v4 = vld [vmem:[#allocation2 + $0x9c0] ss:$112 sps:$4 sm:$0xff]  }
 0x1d7   :  { %v8786_v7 = vpop.f32.mrf.mxu1  ;;  %9167 = vmatpush1.bf16.msra.mxu0 %v17148_v2  ;;  %v17199_v2 = vld [vmem:[#allocation2 + $0xaa0] ss:$112 sps:$4 sm:$0xff]  }
 0x1d8   :  { %9105 = vmatpush2.bf16.msra.mxu1 %v17145_v1  ;;  %v8787_v12 = vadd.f32 %v8786_v7, %v8746_v59  ;;  %9168 = vmatprep.subr.bf16.mxu0 %v17156_v37  ;;  %v17195_v59 = vld [vmem:[#allocation2 + $0xb84] ss:$112 sps:$4 sm:$0xff]   ;;  %v17196_v1 = vld [vmem:[#allocation2 + $0x11a0] ss:$112 sps:$4 sm:$0xff]  }
 0x1d9   :  { %v8788_v15 = vpop.f32.mrf.mxu1  ;;  %9106 = vmatprep.subr.bf16.mxu1 %v17153_v35  ;;  %v17204_v35 = vld [vmem:[#allocation2 + $0x10c4] ss:$112 sps:$4 sm:$0xff]   ;;  %v17202_v37 = vld [vmem:[#allocation2 + $0x10c0] ss:$112 sps:$4 sm:$0xff]  }
 0x1da   :  { %v8789_v17 = vadd.f32 %v8788_v15, %v8748_v0  ;;  %v17201_v0 = vld [vmem:[#allocation2 + $0xaa4] ss:$112 sps:$4 sm:$0xff]   ;;  %v17214_v15 = vld [vmem:[#allocation2 + $0xf00] ss:$112 sps:$4 sm:$0xff]  }
 0x1db   :  { %v8790_v20 = vpop.f32.mrf.mxu1  ;;  %9169 = vmatpush1.bf16.msra.mxu0 %v17154_v10  ;;  %v17213_v7 = vld [vmem:[#allocation2 + $0x8e4] ss:$112 sps:$4 sm:$0xff]   ;;  %v17208_v10 = vld [vmem:[#allocation2 + $0xfe0] ss:$112 sps:$4 sm:$0xff]  }
 0x1dc   :  { %9107 = vmatpush2.bf16.msra.mxu1 %v17151_v5  ;;  %9170 = vmatprep.subr.bf16.mxu0 %v17162_v14  ;;  %v17210_v5 = vld [vmem:[#allocation2 + $0xfe4] ss:$112 sps:$4 sm:$0xff]  }
 0x1dd   :  { %v8791_v25 = vpop.f32.mrf.mxu1  ;;  %9108 = vmatprep.subr.bf16.mxu1 %v17159_v13  ;;  %v17216_v13 = vld [vmem:[#allocation2 + $0xf04] ss:$112 sps:$4 sm:$0xff]  }
 0x1de   :  { %v17219_v14 = vld [vmem:[#allocation2 + $0x804] ss:$112 sps:$4 sm:$0xff]  }
 0x1df   :  { %v8827_v28 = vpop.f32.mrf.mxu1  ;;  %9171 = vmatpush1.bf16.msra.mxu0 %v17160_v22  ;;  %v17225_v20 = vld [vmem:[#allocation2 + $0x724] ss:$112 sps:$4 sm:$0xff]   ;;  %v17220_v22 = vld [vmem:[#allocation2 + $0xe20] ss:$112 sps:$4 sm:$0xff]  }
 0x1e0   :  { %9109 = vmatpush2.bf16.msra.mxu1 %v17157_v18  ;;  %v18974_v30 = vadd.f32 %v8827_v28, %v8787_v12  ;;  %9172 = vmatprep.subr.bf16.mxu0 %v17168_v24  ;;  %v17211_v12 = vld [vmem:[#allocation2 + $0x8e0] ss:$112 sps:$4 sm:$0xff]   ;;  %v17222_v18 = vld [vmem:[#allocation2 + $0xe24] ss:$112 sps:$4 sm:$0xff]  }
 0x1e1   :  { %v8829_v34 = vpop.f32.mrf.mxu1  ;;  %9110 = vmatprep.subr.bf16.mxu1 %v17165_v23  ;;  %v17223_v23 = vld [vmem:[#allocation2 + $0x720] ss:$112 sps:$4 sm:$0xff]   ;;  %v17228_v24 = vld [vmem:[#allocation2 + $0x1b44] ss:$112 sps:$4 sm:$0xff]  }
 0x1e2   :  { %v18976_v6 = vadd.f32 %v8829_v34, %v8789_v17  ;;  %v17217_v17 = vld [vmem:[#allocation2 + $0x800] ss:$112 sps:$4 sm:$0xff]   ;;  %v17234_v25 = vld [vmem:[#allocation2 + $0x2244] ss:$112 sps:$4 sm:$0xff]  }
 0x1e3   :  { %v8831_v39 = vpop.f32.mrf.mxu1  ;;  %9173 = vmatpush1.bf16.msra.mxu0 %v17166_v58  ;;  %v17232_v28 = vld [vmem:[#allocation2 + $0x2240] ss:$112 sps:$4 sm:$0xff]   ;;  %v17231_v58 = vld [vmem:[#allocation2 + $0x1a64] ss:$112 sps:$4 sm:$0xff]  }
 0x1e4   :  { %9111 = vmatpush2.bf16.msra.mxu1 %v17163_v27  ;;  %9174 = vmatprep.subr.bf16.mxu0 %v17174_v33  ;;  %v17226_v27 = vld [vmem:[#allocation2 + $0x1b40] ss:$112 sps:$4 sm:$0xff]   ;;  %v17237_v34 = vld [vmem:[#allocation2 + $0x1984] ss:$112 sps:$4 sm:$0xff]  }
 0x1e5   :  { %v8832_v45 = vpop.f32.mrf.mxu1  ;;  %9135 = vmatprep.subr.bf16.mxu1 %v17171_v32  ;;  %v17240_v32 = vld [vmem:[#allocation2 + $0x2164] ss:$112 sps:$4 sm:$0xff]   ;;  %v17229_v33 = vld [vmem:[#allocation2 + $0x1a60] ss:$112 sps:$4 sm:$0xff]  }
 0x1e7   :  { %9113 = vmatmul.mubr.bf16.vlgmr.msra.gmra.mxu1 %v18904_v21  ;;  %9175 = vmatpush1.bf16.msra.mxu0 %v17172_v42  ;;  %v17246_v42 = vld [vmem:[#allocation2 + $0x2084] ss:$112 sps:$4 sm:$0xff]  }
 0x1e8   :  { %9136 = vmatpush1.bf16.msra.mxu1 %v17169_v41  ;;  %9153 = vmatprep.mubr.bf16.mxu1 %v18791_v16  ;;  %v17238_v41 = vld [vmem:[#allocation2 + $0x2160] ss:$112 sps:$4 sm:$0xff]  }
 0x1e9   :  { %9176 = vmatprep.subr.bf16.mxu0 %v17177_v43  ;;  %9203 = vmatprep.subr.bf16.mxu1 %v17180_v46  ;;  %v17235_v46 = vld [vmem:[#allocation2 + $0x1980] ss:$112 sps:$4 sm:$0xff]  }
 0x1eb   :  { %9177 = vmatpush1.bf16.msra.mxu0 %v17175_v47  ;;  %v17244_v47 = vld [vmem:[#allocation2 + $0x2080] ss:$112 sps:$4 sm:$0xff]  }
 0x1ec   :  { %9178 = vmatprep.subr.bf16.mxu0 %v17183_v48  ;;  %v18986_v48 = vsub.s32 4, %v18917_v31 }
 0x1ef   :  { %15949 = vmatmul.mubr.msk.bf16.vlgmr.msra.gmra.mxu1 %vm8502_vm0, %v18890_v19  ;;  %9179 = vmatpush2.bf16.msra.mxu0 %v17181_v51  ;;  %v17252_v51 = vld [vmem:[#allocation2 + $0x1fa4] ss:$112 sps:$4 sm:$0xff]  }
 0x1f0   :  { %9204 = vmatpush1.bf16.msra.mxu1 %v17178_v50  ;;  %9180 = vmatprep.subr.bf16.mxu0 %v17189_v54  ;;  %v17243_v50 = vld [vmem:[#allocation2 + $0x18a4] ss:$112 sps:$4 sm:$0xff]   ;;  %v18989_v54 = vsub.s32 5, %v18917_v31 }
 0x1f1   :  { %9205 = vmatprep.subr.bf16.mxu1 %v17186_v53  ;;  %9235 = vmatprep.mubr.bf16.mxu1 %v18870_v52 }
 0x1f3   :  { %9181 = vmatpush2.bf16.msra.mxu0 %v17187_v56  ;;  %v1521_v56 = vrot.slane %v18964_v44, %v18986_v48 }
 0x1f4   :  { %9206 = vmatpush1.bf16.msra.mxu1 %v17184_v55  ;;  %9182 = vmatprep.subr.bf16.mxu0 %v17195_v59  ;;  %v17241_v55 = vld [vmem:[#allocation2 + $0x18a0] ss:$112 sps:$4 sm:$0xff]   ;;  %v17249_v59 = vld [vmem:[#allocation2 + $0x17c4] ss:$112 sps:$4 sm:$0xff]  }
 0x1f5   :  { %9207 = vmatprep.subr.bf16.mxu1 %v17192_v57  ;;  %v17250_v57 = vld [vmem:[#allocation2 + $0x1fa0] ss:$112 sps:$4 sm:$0xff]  }
 0x1f7   :  { %9183 = vmatpush2.bf16.msra.mxu0 %v17193_v61  ;;  %v1525_v61 = vrot.slane %v18964_v44, %v18989_v54  ;;  %v17261_v44 = vld [vmem:[#allocation2 + $0x1604] ss:$112 sps:$4 sm:$0xff]  }
 0x1f8   :  { %9208 = vmatpush1.bf16.msra.mxu1 %v17190_v60  ;;  %9184 = vmatprep.subr.bf16.mxu0 %v17201_v0  ;;  %v17258_v60 = vld [vmem:[#allocation2 + $0x1ec4] ss:$112 sps:$4 sm:$0xff]   ;;  %v17247_v0 = vld [vmem:[#allocation2 + $0x17c0] ss:$112 sps:$4 sm:$0xff]  }
 0x1f9   :  { %9209 = vmatprep.subr.bf16.mxu1 %v17198_v63 }
 0x1fb   :  { %9185 = vmatpush2.bf16.msra.mxu0 %v17199_v2  ;;  %v17255_v2 = vld [vmem:[#allocation2 + $0x16e4] ss:$112 sps:$4 sm:$0xff]  }
 0x1fc   :  { %9210 = vmatpush1.bf16.msra.mxu1 %v17196_v1  ;;  %9186 = vmatprep.subr.bf16.mxu0 %v17207_v3  ;;  %v17256_v1 = vld [vmem:[#allocation2 + $0x1ec0] ss:$112 sps:$4 sm:$0xff]  }
 0x1fd   :  { %9211 = vmatprep.subr.bf16.mxu1 %v17204_v35  ;;  %v17264_v35 = vld [vmem:[#allocation2 + $0x1de4] ss:$112 sps:$4 sm:$0xff]  }
 0x1ff   :  { %9187 = vmatpush2.bf16.msra.mxu0 %v17205_v4 }
 0x200   :  { %9212 = vmatpush1.bf16.msra.mxu1 %v17202_v37  ;;  %9188 = vmatprep.subr.bf16.mxu0 %v17213_v7  ;;  %v17262_v7 = vld [vmem:[#allocation2 + $0x1de0] ss:$112 sps:$4 sm:$0xff]  }
 0x201   :  { %9213 = vmatprep.subr.bf16.mxu1 %v17210_v5  ;;  %v17253_v5 = vld [vmem:[#allocation2 + $0x16e0] ss:$112 sps:$4 sm:$0xff]  }
 0x203   :  { %9189 = vmatpush2.bf16.msra.mxu0 %v17211_v12  ;;  %v17270_v12 = vld [vmem:[#allocation2 + $0x1d04] ss:$112 sps:$4 sm:$0xff]  }
 0x204   :  { %9214 = vmatpush1.bf16.msra.mxu1 %v17208_v10  ;;  %9190 = vmatprep.subr.bf16.mxu0 %v17219_v14 }
 0x205   :  { %9215 = vmatprep.subr.bf16.mxu1 %v17216_v13 }
 0x207   :  { %9191 = vmatpush2.bf16.msra.mxu0 %v17217_v17  ;;  %v17268_v17 = vld [vmem:[#allocation2 + $0x1d00] ss:$112 sps:$4 sm:$0xff]  }
 0x208   :  { %9216 = vmatpush1.bf16.msra.mxu1 %v17214_v15  ;;  %9192 = vmatprep.subr.bf16.mxu0 %v17225_v20  ;;  %v17259_v15 = vld [vmem:[#allocation2 + $0x1600] ss:$112 sps:$4 sm:$0xff]   ;;  %v17267_v20 = vld [vmem:[#allocation2 + $0x1524] ss:$112 sps:$4 sm:$0xff]  }
 0x209   :  { %9217 = vmatprep.subr.bf16.mxu1 %v17222_v18 }
 0x20b   :  { %9193 = vmatpush2.bf16.msra.mxu0 %v17223_v23  ;;  %v17265_v23 = vld [vmem:[#allocation2 + $0x1520] ss:$112 sps:$4 sm:$0xff]  }
 0x20c   :  { %9218 = vmatpush1.bf16.msra.mxu1 %v17220_v22  ;;  %9244 = vmatprep.subr.bf16.mxu0 %v17234_v25  ;;  %v17273_v22 = vld [vmem:[#allocation2 + $0x1c24] ss:$112 sps:$4 sm:$0xff]  }
 0x20d   :  { %9219 = vmatprep.subr.bf16.mxu1 %v17228_v24  ;;  %v17271_v24 = vld [vmem:[#allocation2 + $0x1c20] ss:$112 sps:$4 sm:$0xff]  }
 0x20e   :  { %9195 = vmatmul.mubr.bf16.vlgmr.msra.gmra.mxu0 %v18880_v8  ;;  %v8868_v39 = vpop.f32.mrf.mxu0 }
 0x20f   :  { %9245 = vmatpush1.bf16.msra.mxu0 %v17232_v28  ;;  %9276 = vmatprep.mubr.bf16.mxu0 %v18898_v36  ;;  %v8869_v63 = vadd.f32 %v8868_v39, %v1521_v56  ;;  %v17276_v28 = vld [vmem:[#allocation2 + $0x2a24] ss:$112 sps:$4 sm:$0xff]   ;;  %v17295_v56 = vld [vmem:[#allocation2 + $0x26a0] ss:$112 sps:$4 sm:$0xff]  }
 0x210   :  { %9220 = vmatpush2.bf16.msra.mxu1 %v17226_v27  ;;  %9246 = vmatprep.subr.bf16.mxu0 %v17240_v32  ;;  %v8870_v43 = vpop.f32.mrf.mxu0  ;;  %v17274_v32 = vld [vmem:[#allocation2 + $0x2a20] ss:$112 sps:$4 sm:$0xff]  }
 0x211   :  { %9221 = vmatprep.subr.bf16.mxu1 %v17231_v58  ;;  %v8871_v3 = vadd.f32 %v8870_v43, %v1525_v61  ;;  %v17279_v58 = vld [vmem:[#allocation2 + $0x2944] ss:$112 sps:$4 sm:$0xff]   ;;  %v17301_v61 = vld [vmem:[#allocation2 + $0x25c0] ss:$112 sps:$4 sm:$0xff]  }
 0x212   :  { %v8872_v45 = vpop.f32.mrf.mxu0  ;;  %v17285_v43 = vld [vmem:[#allocation2 + $0x2864] ss:$112 sps:$4 sm:$0xff]  }
 0x213   :  { %9247 = vmatpush1.bf16.msra.mxu0 %v17238_v41  ;;  %v17282_v41 = vld [vmem:[#allocation2 + $0x64c] ss:$112 sps:$4 sm:$0xff]   ;;  %v17291_v45 = vld [vmem:[#allocation2 + $0x2784] ss:$112 sps:$4 sm:$0xff]  }
 0x214   :  { %9222 = vmatpush2.bf16.msra.mxu1 %v17229_v33  ;;  %9248 = vmatprep.subr.bf16.mxu0 %v17246_v42  ;;  %v8873_v53 = vpop.f32.mrf.mxu0  ;;  %v17277_v33 = vld [vmem:[#allocation2 + $0x2940] ss:$112 sps:$4 sm:$0xff]  }
 0x215   :  { %9223 = vmatprep.subr.bf16.mxu1 %v17237_v34  ;;  %v17283_v42 = vld [vmem:[#allocation2 + $0x2860] ss:$112 sps:$4 sm:$0xff]   ;;  %v17286_v53 = vld [vmem:[#allocation2 + $0x568] ss:$112 sps:$4 sm:$0xff]  }
 0x217   :  { %9249 = vmatpush1.bf16.msra.mxu0 %v17244_v47  ;;  %v17289_v47 = vld [vmem:[#allocation2 + $0x2780] ss:$112 sps:$4 sm:$0xff]  }
 0x218   :  { %9224 = vmatpush2.bf16.msra.mxu1 %v17235_v46  ;;  %9250 = vmatprep.subr.bf16.mxu0 %v17252_v51  ;;  %v17280_v46 = vld [vmem:[#allocation2 + $0x648] ss:$112 sps:$4 sm:$0xff]   ;;  %v17297_v51 = vld [vmem:[#allocation2 + $0x26a4] ss:$112 sps:$4 sm:$0xff]  }
 0x219   :  { %9225 = vmatprep.subr.bf16.mxu1 %v17243_v50  ;;  %v17288_v50 = vld [vmem:[#allocation2 + $0x56c] ss:$112 sps:$4 sm:$0xff]  }
 0x21b   :  { %9251 = vmatpush1.bf16.msra.mxu0 %v17250_v57  ;;  %v17303_v57 = vld [vmem:[#allocation2 + $0x25c4] ss:$112 sps:$4 sm:$0xff]  }
 0x21c   :  { %9226 = vmatpush2.bf16.msra.mxu1 %v17241_v55  ;;  %9252 = vmatprep.subr.bf16.mxu0 %v17258_v60  ;;  %v17294_v55 = vld [vmem:[#allocation2 + $0x48c] ss:$112 sps:$4 sm:$0xff]  }
 0x21d   :  { %9227 = vmatprep.subr.bf16.mxu1 %v17249_v59  ;;  %v17292_v59 = vld [vmem:[#allocation2 + $0x488] ss:$112 sps:$4 sm:$0xff]   ;;  %v17300_v60 = vld [vmem:[#allocation2 + $0x3ac] ss:$112 sps:$4 sm:$0xff]  }
 0x21f   :  { %v8909_v37 = vpop.f32.mrf.mxu1  ;;  %9253 = vmatpush1.bf16.msra.mxu0 %v17256_v1  ;;  %v17306_v1 = vld [vmem:[#allocation2 + $0x2cc] ss:$112 sps:$4 sm:$0xff]  }
 0x220   :  { %9228 = vmatpush2.bf16.msra.mxu1 %v17247_v0  ;;  %v18995_v4 = vadd.f32 %v8909_v37, %v8869_v63  ;;  %9254 = vmatprep.subr.bf16.mxu0 %v17264_v35  ;;  %v17309_v63 = vld [vmem:[#allocation2 + $0x24e4] ss:$112 sps:$4 sm:$0xff]   ;;  %v17298_v0 = vld [vmem:[#allocation2 + $0x3a8] ss:$112 sps:$4 sm:$0xff]   ;;  %v17312_v37 = vld [vmem:[#allocation2 + $0x1ec] ss:$112 sps:$4 sm:$0xff]  }
 0x221   :  { %v8911_v10 = vpop.f32.mrf.mxu1  ;;  %9229 = vmatprep.subr.bf16.mxu1 %v17255_v2  ;;  %v17307_v2 = vld [vmem:[#allocation2 + $0x24e0] ss:$112 sps:$4 sm:$0xff]   ;;  %v17315_v35 = vld [vmem:[#allocation2 + $0x2404] ss:$112 sps:$4 sm:$0xff]  }
 0x222   :  { %v18997_v13 = vadd.f32 %v8911_v10, %v8871_v3  ;;  %v17304_v3 = vld [vmem:[#allocation2 + $0x2c8] ss:$112 sps:$4 sm:$0xff]  }
 0x223   :  { %v8913_v14 = vpop.f32.mrf.mxu1  ;;  %9255 = vmatpush1.bf16.msra.mxu0 %v17262_v7  ;;  %v17321_v7 = vld [vmem:[#allocation2 + $0x2324] ss:$112 sps:$4 sm:$0xff]   ;;  %v17310_v10 = vld [vmem:[#allocation2 + $0x1e8] ss:$112 sps:$4 sm:$0xff]  }
 0x224   :  { %9230 = vmatpush2.bf16.msra.mxu1 %v17253_v5  ;;  %9256 = vmatprep.subr.bf16.mxu0 %v17270_v12  ;;  %v17313_v5 = vld [vmem:[#allocation2 + $0x2400] ss:$112 sps:$4 sm:$0xff]   ;;  %v17327_v14 = vld [vmem:[#allocation2 + $0x144c] ss:$112 sps:$4 sm:$0xff]  }
 0x225   :  { %v8914_v18 = vpop.f32.mrf.mxu1  ;;  %9231 = vmatprep.subr.bf16.mxu1 %v17261_v44  ;;  %v17318_v44 = vld [vmem:[#allocation2 + $0x10c] ss:$112 sps:$4 sm:$0xff]   ;;  %v17319_v12 = vld [vmem:[#allocation2 + $0x2320] ss:$112 sps:$4 sm:$0xff]  }
 0x226   :  { %v17325_v18 = vld [vmem:[#allocation2 + $0x1448] ss:$112 sps:$4 sm:$0xff]  }
 0x227   :  { %v18999_v25 = vpop.f32.mrf.mxu1  ;;  %9257 = vmatpush1.bf16.msra.mxu0 %v17268_v17  ;;  %v17324_v17 = vld [vmem:[#allocation2 + $0x2c] ss:$112 sps:$4 sm:$0xff]  }
 0x228   :  { %9232 = vmatpush2.bf16.msra.mxu1 %v17259_v15  ;;  %9258 = vmatprep.subr.bf16.mxu0 %v17273_v22  ;;  %v17316_v15 = vld [vmem:[#allocation2 + $0x108] ss:$112 sps:$4 sm:$0xff]  }
 0x229   :  { %v19001_v27 = vpop.f32.mrf.mxu1  ;;  %9233 = vmatprep.subr.bf16.mxu1 %v17267_v20  ;;  %v17333_v20 = vld [vmem:[#allocation2 + $0x136c] ss:$112 sps:$4 sm:$0xff]  }
 0x22b   :  { %v8995_v34 = vpop.f32.mrf.mxu1  ;;  %9259 = vmatpush1.bf16.msra.mxu0 %v17271_v24 }
 0x22c   :  { %9234 = vmatpush2.bf16.msra.mxu1 %v17265_v23  ;;  %9260 = vmatprep.subr.bf16.mxu0 %v17279_v58  ;;  %v17322_v23 = vld [vmem:[#allocation2 + $0x28] ss:$112 sps:$4 sm:$0xff]  }
 0x22d   :  { %v8996_v39 = vpop.f32.mrf.mxu1  ;;  %9299 = vmatprep.subr.bf16.mxu1 %v17276_v28  ;;  %v17330_v28 = vld [vmem:[#allocation2 + $0xd4c] ss:$112 sps:$4 sm:$0xff]   ;;  %v17331_v58 = vld [vmem:[#allocation2 + $0x1368] ss:$112 sps:$4 sm:$0xff]  }
 0x22f   :  { %9236 = vmatmul.mubr.bf16.vlgmr.msra.gmra.mxu1 %v18882_v9  ;;  %9261 = vmatpush2.bf16.msra.mxu0 %v17277_v33  ;;  %v17339_v33 = vld [vmem:[#allocation2 + $0x128c] ss:$112 sps:$4 sm:$0xff]  }
 0x230   :  { %9300 = vmatpush1.bf16.msra.mxu1 %v17274_v32  ;;  %9317 = vmatprep.mubr.bf16.mxu1 %v18791_v16 }
 0x231   :  { %9326 = vmatprep.subr.bf16.mxu1 %v17282_v41  ;;  %9262 = vmatprep.subr.bf16.mxu0 %v17285_v43  ;;  %v17337_v43 = vld [vmem:[#allocation2 + $0x1288] ss:$112 sps:$4 sm:$0xff]  }
 0x233   :  { %9263 = vmatpush2.bf16.msra.mxu0 %v17283_v42 }
 0x234   :  { %9264 = vmatprep.subr.bf16.mxu0 %v17291_v45  ;;  %v17336_v45 = vld [vmem:[#allocation2 + $0xc6c] ss:$112 sps:$4 sm:$0xff]  }
 0x237   :  { %15950 = vmatmul.mubr.msk.bf16.vlgmr.msra.gmra.mxu1 %vm8502_vm0, %v18890_v19  ;;  %9265 = vmatpush2.bf16.msra.mxu0 %v17289_v47 }
 0x238   :  { %9327 = vmatpush1.bf16.msra.mxu1 %v17280_v46  ;;  %9266 = vmatprep.subr.bf16.mxu0 %v17297_v51  ;;  %v17345_v46 = vld [vmem:[#allocation2 + $0x11ac] ss:$112 sps:$4 sm:$0xff]  }
 0x239   :  { %9328 = vmatprep.subr.bf16.mxu1 %v17288_v50  ;;  %9358 = vmatprep.mubr.bf16.mxu1 %v18865_v49  ;;  %v17343_v50 = vld [vmem:[#allocation2 + $0x11a8] ss:$112 sps:$4 sm:$0xff]   ;;  %v17351_v51 = vld [vmem:[#allocation2 + $0x10cc] ss:$112 sps:$4 sm:$0xff]  }
 0x23b   :  { %9267 = vmatpush2.bf16.msra.mxu0 %v17295_v56  ;;  %v17357_v56 = vld [vmem:[#allocation2 + $0xfec] ss:$112 sps:$4 sm:$0xff]  }
 0x23c   :  { %9329 = vmatpush1.bf16.msra.mxu1 %v17286_v53  ;;  %9268 = vmatprep.subr.bf16.mxu0 %v17303_v57  ;;  %v17340_v53 = vld [vmem:[#allocation2 + $0xb88] ss:$112 sps:$4 sm:$0xff]  }
 0x23d   :  { %9330 = vmatprep.subr.bf16.mxu1 %v17294_v55  ;;  %v17348_v55 = vld [vmem:[#allocation2 + $0xaac] ss:$112 sps:$4 sm:$0xff]   ;;  %v17346_v57 = vld [vmem:[#allocation2 + $0xaa8] ss:$112 sps:$4 sm:$0xff]  }
 0x23f   :  { %9269 = vmatpush2.bf16.msra.mxu0 %v17301_v61  ;;  %v17363_v61 = vld [vmem:[#allocation2 + $0xf0c] ss:$112 sps:$4 sm:$0xff]  }
 0x240   :  { %9331 = vmatpush1.bf16.msra.mxu1 %v17292_v59  ;;  %9270 = vmatprep.subr.bf16.mxu0 %v17309_v63  ;;  %v17355_v59 = vld [vmem:[#allocation2 + $0xfe8] ss:$112 sps:$4 sm:$0xff]  }
 0x241   :  { %9332 = vmatprep.subr.bf16.mxu1 %v17300_v60  ;;  %v17354_v60 = vld [vmem:[#allocation2 + $0x9cc] ss:$112 sps:$4 sm:$0xff]   ;;  %v17352_v63 = vld [vmem:[#allocation2 + $0x9c8] ss:$112 sps:$4 sm:$0xff]  }
 0x243   :  { %9271 = vmatpush2.bf16.msra.mxu0 %v17307_v2  ;;  %v17369_v2 = vld [vmem:[#allocation2 + $0xe2c] ss:$112 sps:$4 sm:$0xff]  }
 0x244   :  { %9333 = vmatpush1.bf16.msra.mxu1 %v17298_v0  ;;  %9272 = vmatprep.subr.bf16.mxu0 %v17315_v35  ;;  %v17361_v0 = vld [vmem:[#allocation2 + $0xf08] ss:$112 sps:$4 sm:$0xff]  }
 0x245   :  { %9334 = vmatprep.subr.bf16.mxu1 %v17306_v1  ;;  %v17360_v1 = vld [vmem:[#allocation2 + $0x8ec] ss:$112 sps:$4 sm:$0xff]  }
 0x247   :  { %9273 = vmatpush2.bf16.msra.mxu0 %v17313_v5 }
 0x248   :  { %9335 = vmatpush1.bf16.msra.mxu1 %v17304_v3  ;;  %9274 = vmatprep.subr.bf16.mxu0 %v17321_v7  ;;  %v17358_v3 = vld [vmem:[#allocation2 + $0x8e8] ss:$112 sps:$4 sm:$0xff]   ;;  %v17366_v7 = vld [vmem:[#allocation2 + $0x80c] ss:$112 sps:$4 sm:$0xff]  }
 0x249   :  { %9336 = vmatprep.subr.bf16.mxu1 %v17312_v37  ;;  %v17367_v37 = vld [vmem:[#allocation2 + $0xe28] ss:$112 sps:$4 sm:$0xff]  }
 0x24b   :  { %9275 = vmatpush2.bf16.msra.mxu0 %v17319_v12  ;;  %v17364_v12 = vld [vmem:[#allocation2 + $0x808] ss:$112 sps:$4 sm:$0xff]  }
 0x24c   :  { %9337 = vmatpush1.bf16.msra.mxu1 %v17310_v10  ;;  %9367 = vmatprep.subr.bf16.mxu0 %v17327_v14  ;;  %v17375_v10 = vld [vmem:[#allocation2 + $0x1b4c] ss:$112 sps:$4 sm:$0xff]   ;;  %v17373_v14 = vld [vmem:[#allocation2 + $0x1b48] ss:$112 sps:$4 sm:$0xff]  }
 0x24d   :  { %9338 = vmatprep.subr.bf16.mxu1 %v17318_v44 }
 0x24e   :  { %v8950_v22 = vpop.f32.mrf.mxu0  ;;  %9277 = vmatmul.mubr.bf16.vlgmr.msra.gmra.mxu0 %v18904_v21 }
 0x24f   :  { %v8951_v24 = vadd.f32 %v8950_v22, %v18995_v4  ;;  %9368 = vmatpush1.bf16.msra.mxu0 %v17325_v18  ;;  %9399 = vmatprep.mubr.bf16.mxu0 %v18870_v52  ;;  %v17328_v4 = vld [vmem:[#allocation2 + $0xd48] ss:$112 sps:$4 sm:$0xff]   ;;  %v17381_v18 = vld [vmem:[#allocation2 + $0x1a6c] ss:$112 sps:$4 sm:$0xff]  }
 0x250   :  { %9339 = vmatpush1.bf16.msra.mxu1 %v17316_v15  ;;  %v8952_v32 = vpop.f32.mrf.mxu0  ;;  %9369 = vmatprep.subr.bf16.mxu0 %v17333_v20  ;;  %v17370_v20 = vld [vmem:[#allocation2 + $0x728] ss:$112 sps:$4 sm:$0xff]  }
 0x251   :  { %9340 = vmatprep.subr.bf16.mxu1 %v17324_v17  ;;  %v19011_v34 = vadd.f32 %v18999_v25, %v8951_v24  ;;  %v8953_v39 = vadd.f32 %v8952_v32, %v18997_v13  ;;  %v17334_v25 = vld [vmem:[#allocation2 + $0xc68] ss:$112 sps:$4 sm:$0xff]   ;;  %v17342_v13 = vld [vmem:[#allocation2 + $0xb8c] ss:$112 sps:$4 sm:$0xff]  }
 0x252   :  { %v8954_v41 = vpop.f32.mrf.mxu0  ;;  %v17372_v17 = vld [vmem:[#allocation2 + $0x72c] ss:$112 sps:$4 sm:$0xff]   ;;  %v17379_v22 = vld [vmem:[#allocation2 + $0x1a68] ss:$112 sps:$4 sm:$0xff]  }
 0x253   :  { %v19016_v42 = vadd.f32 %v19001_v27, %v8953_v39  ;;  %9370 = vmatpush1.bf16.msra.mxu0 %v17331_v58  ;;  %v17349_v27 = vld [vmem:[#allocation2 + $0x10c8] ss:$112 sps:$4 sm:$0xff]   ;;  %v17387_v24 = vld [vmem:[#allocation2 + $0x198c] ss:$112 sps:$4 sm:$0xff]  }
 0x254   :  { %9341 = vmatpush1.bf16.msra.mxu1 %v17322_v23  ;;  %9371 = vmatprep.subr.bf16.mxu0 %v17339_v33  ;;  %v8955_v47 = vpop.f32.mrf.mxu0  ;;  %v17378_v23 = vld [vmem:[#allocation2 + $0x224c] ss:$112 sps:$4 sm:$0xff]   ;;  %v17385_v58 = vld [vmem:[#allocation2 + $0x1988] ss:$112 sps:$4 sm:$0xff]  }
 0x255   :  { %9342 = vmatprep.subr.bf16.mxu1 %v17330_v28  ;;  %v17376_v28 = vld [vmem:[#allocation2 + $0x2248] ss:$112 sps:$4 sm:$0xff]   ;;  %v17384_v32 = vld [vmem:[#allocation2 + $0x216c] ss:$112 sps:$4 sm:$0xff]  }
 0x256   :  { %v17393_v33 = vld [vmem:[#allocation2 + $0x18ac] ss:$112 sps:$4 sm:$0xff]   ;;  %v17382_v39 = vld [vmem:[#allocation2 + $0x2168] ss:$112 sps:$4 sm:$0xff]  }
 0x257   :  { %9372 = vmatpush1.bf16.msra.mxu0 %v17337_v43  ;;  %v17391_v41 = vld [vmem:[#allocation2 + $0x18a8] ss:$112 sps:$4 sm:$0xff]   ;;  %v17399_v43 = vld [vmem:[#allocation2 + $0x17cc] ss:$112 sps:$4 sm:$0xff]  }
 0x258   :  { %9343 = vmatpush2.bf16.msra.mxu1 %v17328_v4  ;;  %9373 = vmatprep.subr.bf16.mxu0 %v17345_v46  ;;  %v17390_v4 = vld [vmem:[#allocation2 + $0x208c] ss:$112 sps:$4 sm:$0xff]   ;;  %v17397_v46 = vld [vmem:[#allocation2 + $0x17c8] ss:$112 sps:$4 sm:$0xff]  }
 0x259   :  { %9344 = vmatprep.subr.bf16.mxu1 %v17336_v45  ;;  %v17388_v45 = vld [vmem:[#allocation2 + $0x2088] ss:$112 sps:$4 sm:$0xff]   ;;  %v17396_v47 = vld [vmem:[#allocation2 + $0x1fac] ss:$112 sps:$4 sm:$0xff]  }
 0x25b   :  { %9374 = vmatpush1.bf16.msra.mxu0 %v17343_v50  ;;  %v17394_v50 = vld [vmem:[#allocation2 + $0x1fa8] ss:$112 sps:$4 sm:$0xff]  }
 0x25c   :  { %9345 = vmatpush2.bf16.msra.mxu1 %v17334_v25  ;;  %9375 = vmatprep.subr.bf16.mxu0 %v17351_v51  ;;  %v17405_v25 = vld [vmem:[#allocation2 + $0x16ec] ss:$112 sps:$4 sm:$0xff]  }
 0x25d   :  { %9346 = vmatprep.subr.bf16.mxu1 %v17342_v13  ;;  %v17403_v13 = vld [vmem:[#allocation2 + $0x16e8] ss:$112 sps:$4 sm:$0xff]   ;;  %v17402_v51 = vld [vmem:[#allocation2 + $0x1ecc] ss:$112 sps:$4 sm:$0xff]  }
 0x25f   :  { %9376 = vmatpush1.bf16.msra.mxu0 %v17349_v27  ;;  %v17400_v27 = vld [vmem:[#allocation2 + $0x1ec8] ss:$112 sps:$4 sm:$0xff]  }
 0x260   :  { %9347 = vmatpush2.bf16.msra.mxu1 %v17340_v53  ;;  %9377 = vmatprep.subr.bf16.mxu0 %v17357_v56  ;;  %v17411_v53 = vld [vmem:[#allocation2 + $0x160c] ss:$112 sps:$4 sm:$0xff]  }
 0x261   :  { %9348 = vmatprep.subr.bf16.mxu1 %v17348_v55  ;;  %v17409_v55 = vld [vmem:[#allocation2 + $0x1608] ss:$112 sps:$4 sm:$0xff]   ;;  %v17408_v56 = vld [vmem:[#allocation2 + $0x1dec] ss:$112 sps:$4 sm:$0xff]  }
 0x263   :  { %9378 = vmatpush1.bf16.msra.mxu0 %v17355_v59  ;;  %v19025_v59 = vsub.s32 6, %v18917_v31 }
 0x264   :  { %9349 = vmatpush2.bf16.msra.mxu1 %v17346_v57  ;;  %9379 = vmatprep.subr.bf16.mxu0 %v17363_v61  ;;  %v17417_v57 = vld [vmem:[#allocation2 + $0x152c] ss:$112 sps:$4 sm:$0xff]   ;;  %v17406_v61 = vld [vmem:[#allocation2 + $0x1de8] ss:$112 sps:$4 sm:$0xff]  }
 0x265   :  { %9350 = vmatprep.subr.bf16.mxu1 %v17354_v60  ;;  %v19028_v60 = vsub.s32 7, %v18917_v31  ;;  %v17420_v31 = vld [vmem:[#allocation2 + $0x1c2c] ss:$112 sps:$4 sm:$0xff]  }
 0x267   :  { %v19018_v35 = vpop.f32.mrf.mxu1  ;;  %9380 = vmatpush1.bf16.msra.mxu0 %v17361_v0  ;;  %v17414_v0 = vld [vmem:[#allocation2 + $0x1d0c] ss:$112 sps:$4 sm:$0xff]  }
 0x268   :  { %9351 = vmatpush2.bf16.msra.mxu1 %v17352_v63  ;;  %9381 = vmatprep.subr.bf16.mxu0 %v17369_v2  ;;  %v17415_v63 = vld [vmem:[#allocation2 + $0x1528] ss:$112 sps:$4 sm:$0xff]   ;;  %v18625_v2 = vld [vmem:[#allocation11] sm:$0xff] }
 0x269   :  { %v19020_v5 = vpop.f32.mrf.mxu1  ;;  %9352 = vmatprep.subr.bf16.mxu1 %v17360_v1  ;;  %v17426_v1 = vld [vmem:[#allocation2 + $0x2a2c] ss:$112 sps:$4 sm:$0xff]  }
 0x26b   :  { %v9036_v44 = vpop.f32.mrf.mxu1  ;;  %9382 = vmatpush1.bf16.msra.mxu0 %v17367_v37  ;;  %v1533_v37 = vrot.slane %v18625_v2, %v19028_v60 }
 0x26c   :  { %9353 = vmatpush2.bf16.msra.mxu1 %v17358_v3  ;;  %9383 = vmatprep.subr.bf16.mxu0 %v17375_v10  ;;  %v1529_v3 = vrot.slane %v18625_v2, %v19025_v59  ;;  %v17424_v10 = vld [vmem:[#allocation2 + $0x2a28] ss:$112 sps:$4 sm:$0xff]   ;;  %v17432_v44 = vld [vmem:[#allocation2 + $0x654] ss:$112 sps:$4 sm:$0xff]  }
 0x26d   :  { %v9037_v15 = vpop.f32.mrf.mxu1  ;;  %9354 = vmatprep.subr.bf16.mxu1 %v17366_v7  ;;  %v17412_v7 = vld [vmem:[#allocation2 + $0x1d08] ss:$112 sps:$4 sm:$0xff]   ;;  %v17468_v2 = vld [vmem:[#allocation2 + $0x114] ss:$112 sps:$4 sm:$0xff]  }
 0x26e   :  { %v9035_v15 = vadd.f32 %v19020_v5, %v1533_v37  ;;  %v17427_v5 = vld [vmem:[#allocation2 + $0x2868] ss:$112 sps:$4 sm:$0xff]  }
 0x26f   :  { %9384 = vmatpush2.bf16.msra.mxu0 %v17373_v14 }
 0x270   :  { %9355 = vmatpush2.bf16.msra.mxu1 %v17364_v12  ;;  %9385 = vmatprep.subr.bf16.mxu0 %v17381_v18  ;;  %v9033_v12 = vadd.f32 %v19018_v35, %v1529_v3 }
 0x271   :  { %9356 = vmatprep.subr.bf16.mxu1 %v17372_v17  ;;  %v17418_v17 = vld [vmem:[#allocation2 + $0x1c28] ss:$112 sps:$4 sm:$0xff]  }
 0x273   :  { %9386 = vmatpush2.bf16.msra.mxu0 %v17379_v22  ;;  %v17423_v22 = vld [vmem:[#allocation2 + $0x294c] ss:$112 sps:$4 sm:$0xff]  }
 0x274   :  { %9357 = vmatpush2.bf16.msra.mxu1 %v17370_v20  ;;  %9387 = vmatprep.subr.bf16.mxu0 %v17387_v24  ;;  %v17421_v24 = vld [vmem:[#allocation2 + $0x2948] ss:$112 sps:$4 sm:$0xff]  }
 0x275   :  { %9408 = vmatprep.subr.bf16.mxu1 %v17378_v23 }
 0x277   :  { %9359 = vmatmul.mubr.bf16.vlgmr.msra.gmra.mxu1 %v18880_v8  ;;  %9388 = vmatpush2.bf16.msra.mxu0 %v17385_v58  ;;  %v17429_v58 = vld [vmem:[#allocation2 + $0x286c] ss:$112 sps:$4 sm:$0xff]  }
 0x278   :  { %9409 = vmatpush1.bf16.msra.mxu1 %v17376_v28  ;;  %9389 = vmatprep.subr.bf16.mxu0 %v17393_v33  ;;  %v17430_v28 = vld [vmem:[#allocation2 + $0x650] ss:$112 sps:$4 sm:$0xff]  }
 0x279   :  { %9410 = vmatprep.subr.bf16.mxu1 %v17384_v32  ;;  %9440 = vmatprep.mubr.bf16.mxu1 %v18898_v36  ;;  %v17438_v32 = vld [vmem:[#allocation2 + $0x574] ss:$112 sps:$4 sm:$0xff]  }
 0x27b   :  { %9390 = vmatpush2.bf16.msra.mxu0 %v17391_v41  ;;  %v17436_v41 = vld [vmem:[#allocation2 + $0x570] ss:$112 sps:$4 sm:$0xff]  }
 0x27c   :  { %9411 = vmatpush1.bf16.msra.mxu1 %v17382_v39  ;;  %9391 = vmatprep.subr.bf16.mxu0 %v17399_v43  ;;  %v17435_v39 = vld [vmem:[#allocation2 + $0x278c] ss:$112 sps:$4 sm:$0xff]   ;;  %v17433_v43 = vld [vmem:[#allocation2 + $0x2788] ss:$112 sps:$4 sm:$0xff]  }
 0x27d   :  { %9412 = vmatprep.subr.bf16.mxu1 %v17390_v4  ;;  %v17444_v4 = vld [vmem:[#allocation2 + $0x494] ss:$112 sps:$4 sm:$0xff]  }
 0x27f   :  { %9392 = vmatpush2.bf16.msra.mxu0 %v17397_v46  ;;  %v17442_v46 = vld [vmem:[#allocation2 + $0x490] ss:$112 sps:$4 sm:$0xff]  }
 0x280   :  { %9413 = vmatpush1.bf16.msra.mxu1 %v17388_v45  ;;  %9393 = vmatprep.subr.bf16.mxu0 %v17405_v25  ;;  %v17441_v45 = vld [vmem:[#allocation2 + $0x26ac] ss:$112 sps:$4 sm:$0xff]   ;;  %v17439_v25 = vld [vmem:[#allocation2 + $0x26a8] ss:$112 sps:$4 sm:$0xff]  }
 0x281   :  { %9414 = vmatprep.subr.bf16.mxu1 %v17396_v47  ;;  %v17450_v47 = vld [vmem:[#allocation2 + $0x3b4] ss:$112 sps:$4 sm:$0xff]  }
 0x283   :  { %9394 = vmatpush2.bf16.msra.mxu0 %v17403_v13  ;;  %v17448_v13 = vld [vmem:[#allocation2 + $0x3b0] ss:$112 sps:$4 sm:$0xff]  }
 0x284   :  { %9415 = vmatpush1.bf16.msra.mxu1 %v17394_v50  ;;  %9395 = vmatprep.subr.bf16.mxu0 %v17411_v53  ;;  %v17447_v50 = vld [vmem:[#allocation2 + $0x25cc] ss:$112 sps:$4 sm:$0xff]   ;;  %v17445_v53 = vld [vmem:[#allocation2 + $0x25c8] ss:$112 sps:$4 sm:$0xff]  }
 0x285   :  { %9416 = vmatprep.subr.bf16.mxu1 %v17402_v51  ;;  %v17456_v51 = vld [vmem:[#allocation2 + $0x2d4] ss:$112 sps:$4 sm:$0xff]  }
 0x287   :  { %9396 = vmatpush2.bf16.msra.mxu0 %v17409_v55  ;;  %v17454_v55 = vld [vmem:[#allocation2 + $0x2d0] ss:$112 sps:$4 sm:$0xff]  }
 0x288   :  { %9417 = vmatpush1.bf16.msra.mxu1 %v17400_v27  ;;  %9397 = vmatprep.subr.bf16.mxu0 %v17417_v57  ;;  %v17453_v27 = vld [vmem:[#allocation2 + $0x24ec] ss:$112 sps:$4 sm:$0xff]   ;;  %v17451_v57 = vld [vmem:[#allocation2 + $0x24e8] ss:$112 sps:$4 sm:$0xff]  }
 0x289   :  { %9418 = vmatprep.subr.bf16.mxu1 %v17408_v56  ;;  %v17462_v56 = vld [vmem:[#allocation2 + $0x1f4] ss:$112 sps:$4 sm:$0xff]  }
 0x28b   :  { %9398 = vmatpush2.bf16.msra.mxu0 %v17415_v63  ;;  %v17459_v63 = vld [vmem:[#allocation2 + $0x240c] ss:$112 sps:$4 sm:$0xff]  }
 0x28c   :  { %9419 = vmatpush1.bf16.msra.mxu1 %v17406_v61  ;;  %9463 = vmatprep.subr.bf16.mxu0 %v17426_v1  ;;  %v17460_v1 = vld [vmem:[#allocation2 + $0x1f0] ss:$112 sps:$4 sm:$0xff]  }
 0x28d   :  { %9420 = vmatprep.subr.bf16.mxu1 %v17414_v0 }
 0x28e   :  { %v9073_v14 = vpop.f32.mrf.mxu0  ;;  %9400 = vmatmul.mubr.bf16.vlgmr.msra.gmra.mxu0 %v18882_v9 }
 0x28f   :  { %v9074_v18 = vadd.f32 %v9073_v14, %v9033_v12  ;;  %9464 = vmatpush1.bf16.msra.mxu0 %v17424_v10  ;;  %9481 = vmatprep.mubr.bf16.mxu0 %v18791_v16  ;;  %v17471_v12 = vld [vmem:[#allocation2 + $0x34] ss:$112 sps:$4 sm:$0xff]  }
 0x290   :  { %9421 = vmatpush1.bf16.msra.mxu1 %v17412_v7  ;;  %v9075_v20 = vpop.f32.mrf.mxu0  ;;  %9490 = vmatprep.subr.bf16.mxu0 %v17432_v44  ;;  %v17457_v7 = vld [vmem:[#allocation2 + $0x2408] ss:$112 sps:$4 sm:$0xff]   ;;  %v17466_v44 = vld [vmem:[#allocation2 + $0x110] ss:$112 sps:$4 sm:$0xff]  }
 0x291   :  { %9422 = vmatprep.subr.bf16.mxu1 %v17420_v31  ;;  %v9076_v23 = vadd.f32 %v9075_v20, %v9035_v15  ;;  %v17465_v31 = vld [vmem:[#allocation2 + $0x232c] ss:$112 sps:$4 sm:$0xff]   ;;  %v17463_v15 = vld [vmem:[#allocation2 + $0x2328] ss:$112 sps:$4 sm:$0xff]  }
 0x292   :  { %v9077_v35 = vpop.f32.mrf.mxu0 }
 0x293   :  { %v10802_v35 = vmax.f32 %v18945_v26, 0.0  ;;  %v17489_v26 = vld [vmem:[#allocation2 + $0xb94] ss:$112 sps:$4 sm:$0xff]  }
 0x294   :  { %9423 = vmatpush1.bf16.msra.mxu1 %v17418_v17  ;;  %v9078_v33 = vpop.f32.mrf.mxu0 }
 0x295   :  { %9424 = vmatprep.subr.bf16.mxu1 %v17423_v22  ;;  %v17469_v22 = vld [vmem:[#allocation2 + $0x30] ss:$112 sps:$4 sm:$0xff]  }
 0x296   :  { %15951 = vmatmul.mubr.msk.bf16.vlgmr.msra.gmra.mxu0 %vm8502_vm0, %v18890_v19  ;;  %v17475_v33 = vld [vmem:[#allocation2 + $0xd50] ss:$112 sps:$4 sm:$0xff]  }
 0x297   :  { %9491 = vmatpush1.bf16.msra.mxu0 %v17430_v28  ;;  %9522 = vmatprep.mubr.bf16.mxu0 %v18865_v49 }
 0x298   :  { %9425 = vmatpush2.bf16.msra.mxu1 %v17421_v24  ;;  %9492 = vmatprep.subr.bf16.mxu0 %v17438_v32  ;;  %v17477_v24 = vld [vmem:[#allocation2 + $0xd54] ss:$112 sps:$4 sm:$0xff]  }
 0x299   :  { %9426 = vmatprep.subr.bf16.mxu1 %v17429_v58  ;;  %v17472_v58 = vld [vmem:[#allocation2 + $0x1450] ss:$112 sps:$4 sm:$0xff]  }
 0x29b   :  { %9493 = vmatpush1.bf16.msra.mxu0 %v17436_v41  ;;  %v17483_v41 = vld [vmem:[#allocation2 + $0xc74] ss:$112 sps:$4 sm:$0xff]  }
 0x29c   :  { %9427 = vmatpush2.bf16.msra.mxu1 %v17427_v5  ;;  %9494 = vmatprep.subr.bf16.mxu0 %v17444_v4 }
 0x29d   :  { %9428 = vmatprep.subr.bf16.mxu1 %v17435_v39  ;;  %v17480_v39 = vld [vmem:[#allocation2 + $0x1374] ss:$112 sps:$4 sm:$0xff]  }
 0x29f   :  { %9495 = vmatpush1.bf16.msra.mxu0 %v17442_v46  ;;  %v17481_v46 = vld [vmem:[#allocation2 + $0xc70] ss:$112 sps:$4 sm:$0xff]  }
 0x2a0   :  { %9429 = vmatpush2.bf16.msra.mxu1 %v17433_v43  ;;  %9496 = vmatprep.subr.bf16.mxu0 %v17450_v47  ;;  %v17486_v47 = vld [vmem:[#allocation2 + $0x1294] ss:$112 sps:$4 sm:$0xff]  }
 0x2a1   :  { %9430 = vmatprep.subr.bf16.mxu1 %v17441_v45  ;;  %v17478_v45 = vld [vmem:[#allocation2 + $0x1370] ss:$112 sps:$4 sm:$0xff]  }
 0x2a3   :  { %9497 = vmatpush1.bf16.msra.mxu0 %v17448_v13  ;;  %v17492_v13 = vld [vmem:[#allocation2 + $0x11b4] ss:$112 sps:$4 sm:$0xff]  }
 0x2a4   :  { %9431 = vmatpush2.bf16.msra.mxu1 %v17439_v25  ;;  %9498 = vmatprep.subr.bf16.mxu0 %v17456_v51  ;;  %v17484_v25 = vld [vmem:[#allocation2 + $0x1290] ss:$112 sps:$4 sm:$0xff]   ;;  %v17495_v51 = vld [vmem:[#allocation2 + $0xab4] ss:$112 sps:$4 sm:$0xff]  }
 0x2a5   :  { %9432 = vmatprep.subr.bf16.mxu1 %v17447_v50  ;;  %v17487_v50 = vld [vmem:[#allocation2 + $0xb90] ss:$112 sps:$4 sm:$0xff]  }
 0x2a7   :  { %v9114_v61 = vpop.f32.mrf.mxu1  ;;  %9499 = vmatpush1.bf16.msra.mxu0 %v17454_v55  ;;  %v17498_v55 = vld [vmem:[#allocation2 + $0x10d4] ss:$112 sps:$4 sm:$0xff]  }
 0x2a8   :  { %9433 = vmatpush2.bf16.msra.mxu1 %v17445_v53  ;;  %v9115_v0 = vadd.f32 %v9114_v61, %v9074_v18  ;;  %9500 = vmatprep.subr.bf16.mxu0 %v17462_v56  ;;  %v17474_v18 = vld [vmem:[#allocation2 + $0x1454] ss:$112 sps:$4 sm:$0xff]   ;;  %v17490_v53 = vld [vmem:[#allocation2 + $0x11b0] ss:$112 sps:$4 sm:$0xff]  }
 0x2a9   :  { %v9116_v3 = vpop.f32.mrf.mxu1  ;;  %9434 = vmatprep.subr.bf16.mxu1 %v17453_v27  ;;  %v17493_v27 = vld [vmem:[#allocation2 + $0xab0] ss:$112 sps:$4 sm:$0xff]   ;;  %v17501_v56 = vld [vmem:[#allocation2 + $0x9d4] ss:$112 sps:$4 sm:$0xff]  }
 0x2aa   :  { %v9117_v37 = vadd.f32 %v9116_v3, %v9076_v23  ;;  %v17499_v61 = vld [vmem:[#allocation2 + $0x9d0] ss:$112 sps:$4 sm:$0xff]   ;;  %v17510_v3 = vld [vmem:[#allocation2 + $0xf14] ss:$112 sps:$4 sm:$0xff]  }
 0x2ab   :  { %v9118_v10 = vpop.f32.mrf.mxu1  ;;  %9501 = vmatpush1.bf16.msra.mxu0 %v17460_v1  ;;  %v17502_v1 = vld [vmem:[#allocation2 + $0xff0] ss:$112 sps:$4 sm:$0xff]  }
 0x2ac   :  { %9435 = vmatpush2.bf16.msra.mxu1 %v17451_v57  ;;  %9502 = vmatprep.subr.bf16.mxu0 %v17468_v2  ;;  %v17496_v57 = vld [vmem:[#allocation2 + $0x10d0] ss:$112 sps:$4 sm:$0xff]  }
 0x2ad   :  { %v9119_v14 = vpop.f32.mrf.mxu1  ;;  %9436 = vmatprep.subr.bf16.mxu1 %v17459_v63  ;;  %v17504_v63 = vld [vmem:[#allocation2 + $0xff4] ss:$112 sps:$4 sm:$0xff]   ;;  %v17505_v2 = vld [vmem:[#allocation2 + $0x8f0] ss:$112 sps:$4 sm:$0xff]  }
 0x2ae   :  { %v17511_v10 = vld [vmem:[#allocation2 + $0x810] ss:$112 sps:$4 sm:$0xff]  }
 0x2af   :  { %v9155_v17 = vpop.f32.mrf.mxu1  ;;  %9503 = vmatpush1.bf16.msra.mxu0 %v17466_v44  ;;  %v17519_v44 = vld [vmem:[#allocation2 + $0x734] ss:$112 sps:$4 sm:$0xff]   ;;  %v17514_v14 = vld [vmem:[#allocation2 + $0xe30] ss:$112 sps:$4 sm:$0xff]  }
 0x2b0   :  { %9437 = vmatpush2.bf16.msra.mxu1 %v17457_v7  ;;  %v19039_v20 = vadd.f32 %v9155_v17, %v9115_v0  ;;  %9504 = vmatprep.subr.bf16.mxu0 %v17471_v12  ;;  %v17507_v0 = vld [vmem:[#allocation2 + $0x8f4] ss:$112 sps:$4 sm:$0xff]   ;;  %v17508_v7 = vld [vmem:[#allocation2 + $0xf10] ss:$112 sps:$4 sm:$0xff]  }
 0x2b1   :  { %v9157_v23 = vpop.f32.mrf.mxu1  ;;  %9438 = vmatprep.subr.bf16.mxu1 %v17465_v31  ;;  %v17516_v31 = vld [vmem:[#allocation2 + $0xe34] ss:$112 sps:$4 sm:$0xff]  }
 0x2b2   :  { %v9158_v28 = vadd.f32 %v9157_v23, %v9117_v37  ;;  %v17513_v37 = vld [vmem:[#allocation2 + $0x814] ss:$112 sps:$4 sm:$0xff]   ;;  %v17520_v23 = vld [vmem:[#allocation2 + $0x1b50] ss:$112 sps:$4 sm:$0xff]  }
 0x2b3   :  { %v9159_v32 = vpop.f32.mrf.mxu1  ;;  %9505 = vmatpush1.bf16.msra.mxu0 %v17469_v22  ;;  %v17522_v17 = vld [vmem:[#allocation2 + $0x1b54] ss:$112 sps:$4 sm:$0xff]  }
 0x2b4   :  { %v10809_v5 = vmax.f32 %v9158_v28, 0.0  ;;  %9439 = vmatpush2.bf16.msra.mxu1 %v17463_v15  ;;  %9506 = vmatprep.subr.bf16.mxu0 %v17477_v24  ;;  %v17517_v15 = vld [vmem:[#allocation2 + $0x730] ss:$112 sps:$4 sm:$0xff]  }
 0x2b5   :  { %v9160_v4 = vpop.f32.mrf.mxu1  ;;  %9531 = vmatprep.subr.bf16.mxu1 %v17474_v18  ;;  %v17528_v18 = vld [vmem:[#allocation2 + $0x2254] ss:$112 sps:$4 sm:$0xff]   ;;  %v17526_v28 = vld [vmem:[#allocation2 + $0x2250] ss:$112 sps:$4 sm:$0xff]  }
 0x2b6   :  { %v19042_v43 = vmax.f32 %v10802_v35, %v10809_v5  ;;  %v17534_v35 = vld [vmem:[#allocation2 + $0x2174] ss:$112 sps:$4 sm:$0xff]   ;;  %v17529_v4 = vld [vmem:[#allocation2 + $0x1990] ss:$112 sps:$4 sm:$0xff]  }
 0x2b7   :  { %9441 = vmatmul.mubr.bf16.vlgmr.msra.gmra.mxu1 %v18904_v21  ;;  %9507 = vmatpush2.bf16.msra.mxu0 %v17475_v33  ;;  %v17523_v33 = vld [vmem:[#allocation2 + $0x1a70] ss:$112 sps:$4 sm:$0xff]   ;;  %v17531_v5 = vld [vmem:[#allocation2 + $0x1994] ss:$112 sps:$4 sm:$0xff]  }
 0x2b8   :  { %9532 = vmatpush1.bf16.msra.mxu1 %v17472_v58  ;;  %9508 = vmatprep.subr.bf16.mxu0 %v17483_v41  ;;  %v17525_v58 = vld [vmem:[#allocation2 + $0x1a74] ss:$112 sps:$4 sm:$0xff]  }
 0x2b9   :  { %9533 = vmatprep.subr.bf16.mxu1 %v17480_v39  ;;  %9563 = vmatprep.mubr.bf16.mxu1 %v18870_v52  ;;  %v17532_v39 = vld [vmem:[#allocation2 + $0x2170] ss:$112 sps:$4 sm:$0xff]   ;;  %v17540_v41 = vld [vmem:[#allocation2 + $0x2094] ss:$112 sps:$4 sm:$0xff]  }
 0x2bb   :  { %9509 = vmatpush2.bf16.msra.mxu0 %v17481_v46  ;;  %v17537_v46 = vld [vmem:[#allocation2 + $0x18b4] ss:$112 sps:$4 sm:$0xff]  }
 0x2bc   :  { %9534 = vmatpush1.bf16.msra.mxu1 %v17478_v45  ;;  %9510 = vmatprep.subr.bf16.mxu0 %v17489_v26  ;;  %v17538_v45 = vld [vmem:[#allocation2 + $0x2090] ss:$112 sps:$4 sm:$0xff]  }
 0x2bd   :  { %9535 = vmatprep.subr.bf16.mxu1 %v17486_v47  ;;  %v17546_v47 = vld [vmem:[#allocation2 + $0x1fb4] ss:$112 sps:$4 sm:$0xff]   ;;  %v17535_v26 = vld [vmem:[#allocation2 + $0x18b0] ss:$112 sps:$4 sm:$0xff]  }
 0x2bf   :  { %9511 = vmatpush2.bf16.msra.mxu0 %v17487_v50  ;;  %v17543_v50 = vld [vmem:[#allocation2 + $0x17d4] ss:$112 sps:$4 sm:$0xff]  }
 0x2c0   :  { %9536 = vmatpush1.bf16.msra.mxu1 %v17484_v25  ;;  %9512 = vmatprep.subr.bf16.mxu0 %v17495_v51  ;;  %v17544_v25 = vld [vmem:[#allocation2 + $0x1fb0] ss:$112 sps:$4 sm:$0xff]  }
 0x2c1   :  { %9537 = vmatprep.subr.bf16.mxu1 %v17492_v13  ;;  %v17552_v13 = vld [vmem:[#allocation2 + $0x1ed4] ss:$112 sps:$4 sm:$0xff]   ;;  %v17541_v51 = vld [vmem:[#allocation2 + $0x17d0] ss:$112 sps:$4 sm:$0xff]  }
 0x2c3   :  { %9513 = vmatpush2.bf16.msra.mxu0 %v17493_v27  ;;  %v17550_v27 = vld [vmem:[#allocation2 + $0x1ed0] ss:$112 sps:$4 sm:$0xff]  }
 0x2c4   :  { %9538 = vmatpush1.bf16.msra.mxu1 %v17490_v53  ;;  %9514 = vmatprep.subr.bf16.mxu0 %v17501_v56  ;;  %v17549_v53 = vld [vmem:[#allocation2 + $0x16f4] ss:$112 sps:$4 sm:$0xff]  }
 0x2c5   :  { %9539 = vmatprep.subr.bf16.mxu1 %v17498_v55  ;;  %v19052_v55 = vld [vmem:[#allocation11 + $0x8] sm:$0xff]  ;;  %v17558_v56 = vld [vmem:[#allocation2 + $0x1df4] ss:$112 sps:$4 sm:$0xff]  }
 0x2c7   :  { %9515 = vmatpush2.bf16.msra.mxu0 %v17499_v61  ;;  %v1537_v61 = vrot.slane %v19052_v55, %v18920_v38 }
 0x2c8   :  { %9540 = vmatpush1.bf16.msra.mxu1 %v17496_v57  ;;  %9516 = vmatprep.subr.bf16.mxu0 %v17507_v0  ;;  %v17547_v57 = vld [vmem:[#allocation2 + $0x16f0] ss:$112 sps:$4 sm:$0xff]   ;;  %v17555_v0 = vld [vmem:[#allocation2 + $0x1614] ss:$112 sps:$4 sm:$0xff]  }
 0x2c9   :  { %9541 = vmatprep.subr.bf16.mxu1 %v17504_v63  ;;  %v17556_v63 = vld [vmem:[#allocation2 + $0x1df0] ss:$112 sps:$4 sm:$0xff]  }
 0x2cb   :  { %9517 = vmatpush2.bf16.msra.mxu0 %v17505_v2 }
 0x2cc   :  { %9542 = vmatpush1.bf16.msra.mxu1 %v17502_v1  ;;  %9518 = vmatprep.subr.bf16.mxu0 %v17513_v37  ;;  %v17564_v1 = vld [vmem:[#allocation2 + $0x1d14] ss:$112 sps:$4 sm:$0xff]   ;;  %v17562_v37 = vld [vmem:[#allocation2 + $0x1d10] ss:$112 sps:$4 sm:$0xff]  }
 0x2cd   :  { %9543 = vmatprep.subr.bf16.mxu1 %v17510_v3  ;;  %v17553_v3 = vld [vmem:[#allocation2 + $0x1610] ss:$112 sps:$4 sm:$0xff]  }
 0x2ce   :  { %v19046_v12 = vpop.f32.mrf.mxu0 }
 0x2cf   :  { %9519 = vmatpush2.bf16.msra.mxu0 %v17511_v10  ;;  %v9197_v2 = vadd.f32 %v19046_v12, %v1537_v61  ;;  %v17567_v10 = vld [vmem:[#allocation2 + $0x1c34] ss:$112 sps:$4 sm:$0xff]  }
 0x2d0   :  { %9544 = vmatpush1.bf16.msra.mxu1 %v17508_v7  ;;  %9520 = vmatprep.subr.bf16.mxu0 %v17519_v44  ;;  %v19048_v22 = vpop.f32.mrf.mxu0  ;;  %v17561_v7 = vld [vmem:[#allocation2 + $0x1534] ss:$112 sps:$4 sm:$0xff]  }
 0x2d1   :  { %9545 = vmatprep.subr.bf16.mxu1 %v17516_v31  ;;  %v17570_v12 = vld [vmem:[#allocation2 + $0x2a34] ss:$112 sps:$4 sm:$0xff]  }
 0x2d2   :  { %v9200_v24 = vpop.f32.mrf.mxu0  ;;  %v17603_v61 = vld [vmem:[#allocation2 + $0x24f4] ss:$112 sps:$4 sm:$0xff]  }
 0x2d3   :  { %9521 = vmatpush2.bf16.msra.mxu0 %v17517_v15  ;;  %v17565_v15 = vld [vmem:[#allocation2 + $0x1c30] ss:$112 sps:$4 sm:$0xff]  }
 0x2d4   :  { %9546 = vmatpush1.bf16.msra.mxu1 %v17514_v14  ;;  %9572 = vmatprep.subr.bf16.mxu0 %v17528_v18  ;;  %v9201_v32 = vpop.f32.mrf.mxu0  ;;  %v17559_v14 = vld [vmem:[#allocation2 + $0x1530] ss:$112 sps:$4 sm:$0xff]   ;;  %v17573_v18 = vld [vmem:[#allocation2 + $0x2954] ss:$112 sps:$4 sm:$0xff]  }
 0x2d5   :  { %9547 = vmatprep.subr.bf16.mxu1 %v17522_v17  ;;  %v17579_v32 = vld [vmem:[#allocation2 + $0x2874] ss:$112 sps:$4 sm:$0xff]  }
 0x2d6   :  { %9523 = vmatmul.mubr.bf16.vlgmr.msra.gmra.mxu0 %v18880_v8 }
 0x2d7   :  { %9573 = vmatpush1.bf16.msra.mxu0 %v17526_v28  ;;  %9604 = vmatprep.mubr.bf16.mxu0 %v18898_v36  ;;  %v17571_v28 = vld [vmem:[#allocation2 + $0x2950] ss:$112 sps:$4 sm:$0xff]  }
 0x2d8   :  { %9548 = vmatpush2.bf16.msra.mxu1 %v17520_v23  ;;  %9574 = vmatprep.subr.bf16.mxu0 %v17534_v35  ;;  %v17568_v23 = vld [vmem:[#allocation2 + $0x2a30] ss:$112 sps:$4 sm:$0xff]   ;;  %v17576_v35 = vld [vmem:[#allocation2 + $0x65c] ss:$112 sps:$4 sm:$0xff]  }
 0x2d9   :  { %9549 = vmatprep.subr.bf16.mxu1 %v17525_v58 }
 0x2db   :  { %9575 = vmatpush1.bf16.msra.mxu0 %v17532_v39 }
 0x2dc   :  { %9550 = vmatpush2.bf16.msra.mxu1 %v17523_v33  ;;  %9576 = vmatprep.subr.bf16.mxu0 %v17540_v41  ;;  %v17577_v33 = vld [vmem:[#allocation2 + $0x2870] ss:$112 sps:$4 sm:$0xff]   ;;  %v17585_v41 = vld [vmem:[#allocation2 + $0x2794] ss:$112 sps:$4 sm:$0xff]  }
 0x2dd   :  { %9551 = vmatprep.subr.bf16.mxu1 %v17531_v5 }
 0x2df   :  { %9577 = vmatpush1.bf16.msra.mxu0 %v17538_v45  ;;  %v17583_v45 = vld [vmem:[#allocation2 + $0x2790] ss:$112 sps:$4 sm:$0xff]  }
 0x2e0   :  { %9552 = vmatpush2.bf16.msra.mxu1 %v17529_v4  ;;  %9578 = vmatprep.subr.bf16.mxu0 %v17546_v47  ;;  %v17574_v4 = vld [vmem:[#allocation2 + $0x658] ss:$112 sps:$4 sm:$0xff]  }
 0x2e1   :  { %9553 = vmatprep.subr.bf16.mxu1 %v17537_v46 }
 0x2e3   :  { %9579 = vmatpush1.bf16.msra.mxu0 %v17544_v25  ;;  %v17591_v25 = vld [vmem:[#allocation2 + $0x26b4] ss:$112 sps:$4 sm:$0xff]  }
 0x2e4   :  { %9554 = vmatpush2.bf16.msra.mxu1 %v17535_v26  ;;  %9580 = vmatprep.subr.bf16.mxu0 %v17552_v13  ;;  %v17582_v26 = vld [vmem:[#allocation2 + $0x57c] ss:$112 sps:$4 sm:$0xff]  }
 0x2e5   :  { %9555 = vmatprep.subr.bf16.mxu1 %v17543_v50  ;;  %v17580_v50 = vld [vmem:[#allocation2 + $0x578] ss:$112 sps:$4 sm:$0xff]   ;;  %v17588_v13 = vld [vmem:[#allocation2 + $0x49c] ss:$112 sps:$4 sm:$0xff]  }
 0x2e7   :  { %9581 = vmatpush1.bf16.msra.mxu0 %v17550_v27  ;;  %v17586_v27 = vld [vmem:[#allocation2 + $0x498] ss:$112 sps:$4 sm:$0xff]  }
 0x2e8   :  { %9556 = vmatpush2.bf16.msra.mxu1 %v17541_v51  ;;  %9582 = vmatprep.subr.bf16.mxu0 %v17558_v56  ;;  %v17589_v51 = vld [vmem:[#allocation2 + $0x26b0] ss:$112 sps:$4 sm:$0xff]   ;;  %v17594_v56 = vld [vmem:[#allocation2 + $0x3bc] ss:$112 sps:$4 sm:$0xff]  }
 0x2e9   :  { %9557 = vmatprep.subr.bf16.mxu1 %v17549_v53  ;;  %v17597_v53 = vld [vmem:[#allocation2 + $0x25d4] ss:$112 sps:$4 sm:$0xff]  }
 0x2eb   :  { %9583 = vmatpush1.bf16.msra.mxu0 %v17556_v63  ;;  %v1541_v63 = vrot.slane %v19052_v55, %v18923_v40 }
 0x2ec   :  { %9558 = vmatpush2.bf16.msra.mxu1 %v17547_v57  ;;  %9584 = vmatprep.subr.bf16.mxu0 %v17564_v1  ;;  %v17595_v57 = vld [vmem:[#allocation2 + $0x25d0] ss:$112 sps:$4 sm:$0xff]   ;;  %v17600_v1 = vld [vmem:[#allocation2 + $0x2dc] ss:$112 sps:$4 sm:$0xff]  }
 0x2ed   :  { %9559 = vmatprep.subr.bf16.mxu1 %v17555_v0  ;;  %v17592_v0 = vld [vmem:[#allocation2 + $0x3b8] ss:$112 sps:$4 sm:$0xff]  }
 0x2ef   :  { %v9237_v31 = vpop.f32.mrf.mxu1  ;;  %9585 = vmatpush1.bf16.msra.mxu0 %v17562_v37  ;;  %v9199_v37 = vadd.f32 %v19048_v22, %v1541_v63  ;;  %v17637_v63 = vld [vmem:[#allocation2 + $0x11b8] ss:$112 sps:$4 sm:$0xff]  }
 0x2f0   :  { %v19057_v44 = vadd.f32 %v9237_v31, %v9197_v2  ;;  %9560 = vmatpush2.bf16.msra.mxu1 %v17553_v3  ;;  %9586 = vmatprep.subr.bf16.mxu0 %v17567_v10  ;;  %v17601_v2 = vld [vmem:[#allocation2 + $0x24f0] ss:$112 sps:$4 sm:$0xff]   ;;  %v17609_v3 = vld [vmem:[#allocation2 + $0x2414] ss:$112 sps:$4 sm:$0xff]   ;;  %v17606_v10 = vld [vmem:[#allocation2 + $0x1fc] ss:$112 sps:$4 sm:$0xff]  }
 0x2f1   :  { %v19059_v17 = vpop.f32.mrf.mxu1  ;;  %9561 = vmatprep.subr.bf16.mxu1 %v17561_v7  ;;  %v17598_v7 = vld [vmem:[#allocation2 + $0x2d8] ss:$112 sps:$4 sm:$0xff]   ;;  %v17607_v31 = vld [vmem:[#allocation2 + $0x2410] ss:$112 sps:$4 sm:$0xff]  }
 0x2f3   :  { %v9241_v24 = vpop.f32.mrf.mxu1  ;;  %9587 = vmatpush1.bf16.msra.mxu0 %v17565_v15 }
 0x2f4   :  { %9562 = vmatpush2.bf16.msra.mxu1 %v17559_v14  ;;  %9588 = vmatprep.subr.bf16.mxu0 %v17573_v18  ;;  %v17615_v14 = vld [vmem:[#allocation2 + $0x2334] ss:$112 sps:$4 sm:$0xff]   ;;  %v17604_v18 = vld [vmem:[#allocation2 + $0x1f8] ss:$112 sps:$4 sm:$0xff]  }
 0x2f5   :  { %v9242_v58 = vpop.f32.mrf.mxu1  ;;  %9627 = vmatprep.subr.bf16.mxu1 %v17570_v12  ;;  %v9240_v12 = vadd.f32 %v19059_v17, %v9199_v37  ;;  %v17642_v37 = vld [vmem:[#allocation2 + $0xabc] ss:$112 sps:$4 sm:$0xff]  }
 0x2f6   :  { %v17621_v58 = vld [vmem:[#allocation2 + $0x145c] ss:$112 sps:$4 sm:$0xff]  }
 0x2f7   :  { %9564 = vmatmul.mubr.bf16.vlgmr.msra.gmra.mxu1 %v18882_v9  ;;  %v19062_v5 = vpop.f32.mrf.mxu1  ;;  %9589 = vmatpush2.bf16.msra.mxu0 %v17571_v28  ;;  %v17613_v28 = vld [vmem:[#allocation2 + $0x2330] ss:$112 sps:$4 sm:$0xff]  }
 0x2f8   :  { %9628 = vmatpush1.bf16.msra.mxu1 %v17568_v23  ;;  %9645 = vmatprep.mubr.bf16.mxu1 %v18791_v16  ;;  %v17612_v23 = vld [vmem:[#allocation2 + $0x11c] ss:$112 sps:$4 sm:$0xff]  }
 0x2f9   :  { %v19064_v39 = vpop.f32.mrf.mxu1  ;;  %9654 = vmatprep.subr.bf16.mxu1 %v17576_v35  ;;  %9590 = vmatprep.subr.bf16.mxu0 %v17579_v32 }
 0x2fb   :  { %v9323_v46 = vpop.f32.mrf.mxu1  ;;  %9591 = vmatpush2.bf16.msra.mxu0 %v17577_v33  ;;  %v10803_v33 = vmax.f32 %v18950_v29, 0.0 }
 0x2fc   :  { %9592 = vmatprep.subr.bf16.mxu0 %v17585_v41  ;;  %v17618_v46 = vld [vmem:[#allocation2 + $0x3c] ss:$112 sps:$4 sm:$0xff]  }
 0x2fd   :  { %v9324_v47 = vpop.f32.mrf.mxu1 }
 0x2fe   :  { %v17627_v47 = vld [vmem:[#allocation2 + $0x137c] ss:$112 sps:$4 sm:$0xff]  }
 0x2ff   :  { %15952 = vmatmul.mubr.msk.bf16.vlgmr.msra.gmra.mxu1 %vm8502_vm0, %v18890_v19  ;;  %9593 = vmatpush2.bf16.msra.mxu0 %v17583_v45  ;;  %v17610_v45 = vld [vmem:[#allocation2 + $0x118] ss:$112 sps:$4 sm:$0xff]  }
 0x300   :  { %9655 = vmatpush1.bf16.msra.mxu1 %v17574_v4  ;;  %9594 = vmatprep.subr.bf16.mxu0 %v17591_v25  ;;  %v10804_v25 = vmax.f32 %v18974_v30, 0.0  ;;  %v17630_v30 = vld [vmem:[#allocation2 + $0xc7c] ss:$112 sps:$4 sm:$0xff]  }
 0x301   :  { %9656 = vmatprep.subr.bf16.mxu1 %v17582_v26  ;;  %9686 = vmatprep.mubr.bf16.mxu1 %v18865_v49 }
 0x303   :  { %9595 = vmatpush2.bf16.msra.mxu0 %v17589_v51  ;;  %v17625_v51 = vld [vmem:[#allocation2 + $0x1378] ss:$112 sps:$4 sm:$0xff]  }
 0x304   :  { %9657 = vmatpush1.bf16.msra.mxu1 %v17580_v50  ;;  %9596 = vmatprep.subr.bf16.mxu0 %v17597_v53  ;;  %v17633_v53 = vld [vmem:[#allocation2 + $0x129c] ss:$112 sps:$4 sm:$0xff]  }
 0x305   :  { %9658 = vmatprep.subr.bf16.mxu1 %v17588_v13  ;;  %v17616_v13 = vld [vmem:[#allocation2 + $0x38] ss:$112 sps:$4 sm:$0xff]  }
 0x307   :  { %9597 = vmatpush2.bf16.msra.mxu0 %v17595_v57  ;;  %v17639_v57 = vld [vmem:[#allocation2 + $0x11bc] ss:$112 sps:$4 sm:$0xff]  }
 0x308   :  { %9659 = vmatpush1.bf16.msra.mxu1 %v17586_v27  ;;  %9598 = vmatprep.subr.bf16.mxu0 %v17603_v61  ;;  %v17622_v27 = vld [vmem:[#allocation2 + $0xd58] ss:$112 sps:$4 sm:$0xff]  }
 0x309   :  { %9660 = vmatprep.subr.bf16.mxu1 %v17594_v56  ;;  %v17631_v56 = vld [vmem:[#allocation2 + $0x1298] ss:$112 sps:$4 sm:$0xff]  }
 0x30a   :  { %v17628_v61 = vld [vmem:[#allocation2 + $0xc78] ss:$112 sps:$4 sm:$0xff]  }
 0x30b   :  { %9599 = vmatpush2.bf16.msra.mxu0 %v17601_v2  ;;  %v17634_v2 = vld [vmem:[#allocation2 + $0xb98] ss:$112 sps:$4 sm:$0xff]  }
 0x30c   :  { %9661 = vmatpush1.bf16.msra.mxu1 %v17592_v0  ;;  %9600 = vmatprep.subr.bf16.mxu0 %v17609_v3  ;;  %v17636_v0 = vld [vmem:[#allocation2 + $0xb9c] ss:$112 sps:$4 sm:$0xff]   ;;  %v17643_v3 = vld [vmem:[#allocation2 + $0x10d8] ss:$112 sps:$4 sm:$0xff]  }
 0x30d   :  { %9662 = vmatprep.subr.bf16.mxu1 %v17600_v1  ;;  %v17645_v1 = vld [vmem:[#allocation2 + $0x10dc] ss:$112 sps:$4 sm:$0xff]  }
 0x30e   :  { %v9278_v15 = vpop.f32.mrf.mxu0 }
 0x30f   :  { %v9279_v24 = vadd.f32 %v9278_v15, %v19057_v44  ;;  %9601 = vmatpush2.bf16.msra.mxu0 %v17607_v31  ;;  %v17619_v44 = vld [vmem:[#allocation2 + $0x1458] ss:$112 sps:$4 sm:$0xff]   ;;  %v17657_v15 = vld [vmem:[#allocation2 + $0xf1c] ss:$112 sps:$4 sm:$0xff]  }
 0x310   :  { %9663 = vmatpush1.bf16.msra.mxu1 %v17598_v7  ;;  %v9280_v22 = vpop.f32.mrf.mxu0  ;;  %9602 = vmatprep.subr.bf16.mxu0 %v17615_v14  ;;  %v17651_v7 = vld [vmem:[#allocation2 + $0xffc] ss:$112 sps:$4 sm:$0xff]   ;;  %v17649_v31 = vld [vmem:[#allocation2 + $0xff8] ss:$112 sps:$4 sm:$0xff]  }
 0x311   :  { %9664 = vmatprep.subr.bf16.mxu1 %v17606_v10  ;;  %v9320_v35 = vadd.f32 %v19062_v5, %v9279_v24  ;;  %v9281_v32 = vadd.f32 %v9280_v22, %v9240_v12  ;;  %v17640_v10 = vld [vmem:[#allocation2 + $0xab8] ss:$112 sps:$4 sm:$0xff]   ;;  %v17648_v14 = vld [vmem:[#allocation2 + $0x9dc] ss:$112 sps:$4 sm:$0xff]  }
 0x312   :  { %v9282_v41 = vpop.f32.mrf.mxu0  ;;  %v17646_v12 = vld [vmem:[#allocation2 + $0x9d8] ss:$112 sps:$4 sm:$0xff]   ;;  %v17654_v24 = vld [vmem:[#allocation2 + $0x8fc] ss:$112 sps:$4 sm:$0xff]  }
 0x313   :  { %v10810_v4 = vmax.f32 %v9320_v35, 0.0  ;;  %v9322_v17 = vadd.f32 %v19064_v39, %v9281_v32  ;;  %9603 = vmatpush2.bf16.msra.mxu0 %v17613_v28  ;;  %v17624_v39 = vld [vmem:[#allocation2 + $0xd5c] ss:$112 sps:$4 sm:$0xff]   ;;  %v17652_v28 = vld [vmem:[#allocation2 + $0x8f8] ss:$112 sps:$4 sm:$0xff]  }
 0x314   :  { %9665 = vmatpush1.bf16.msra.mxu1 %v17604_v18  ;;  %9695 = vmatprep.subr.bf16.mxu0 %v17621_v58  ;;  %v9283_v26 = vpop.f32.mrf.mxu0  ;;  %v17655_v18 = vld [vmem:[#allocation2 + $0xf18] ss:$112 sps:$4 sm:$0xff]   ;;  %v17660_v58 = vld [vmem:[#allocation2 + $0x81c] ss:$112 sps:$4 sm:$0xff]  }
 0x315   :  { %9666 = vmatprep.subr.bf16.mxu1 %v17612_v23  ;;  %v19079_v50 = vmax.f32 %v10803_v33, %v10810_v4  ;;  %v10811_v5 = vmax.f32 %v9322_v17, 0.0  ;;  %v17663_v23 = vld [vmem:[#allocation2 + $0xe3c] ss:$112 sps:$4 sm:$0xff]   ;;  %v17661_v22 = vld [vmem:[#allocation2 + $0xe38] ss:$112 sps:$4 sm:$0xff]  }
 0x316   :  { %9605 = vmatmul.mubr.bf16.vlgmr.msra.gmra.mxu0 %v18904_v21  ;;  %v17669_v35 = vld [vmem:[#allocation2 + $0x1b5c] ss:$112 sps:$4 sm:$0xff]   ;;  %v17658_v32 = vld [vmem:[#allocation2 + $0x818] ss:$112 sps:$4 sm:$0xff]  }
 0x317   :  { %v19082_v29 = vmax.f32 %v10804_v25, %v10811_v5  ;;  %9696 = vmatpush1.bf16.msra.mxu0 %v17619_v44  ;;  %9727 = vmatprep.mubr.bf16.mxu0 %v18870_v52  ;;  %v17667_v33 = vld [vmem:[#allocation2 + $0x1b58] ss:$112 sps:$4 sm:$0xff]   ;;  %v17666_v41 = vld [vmem:[#allocation2 + $0x73c] ss:$112 sps:$4 sm:$0xff]  }
 0x318   :  { %9667 = vmatpush1.bf16.msra.mxu1 %v17610_v45  ;;  %9697 = vmatprep.subr.bf16.mxu0 %v17627_v47  ;;  %v17675_v4 = vld [vmem:[#allocation2 + $0x1a7c] ss:$112 sps:$4 sm:$0xff]   ;;  %v17664_v45 = vld [vmem:[#allocation2 + $0x738] ss:$112 sps:$4 sm:$0xff]  }
 0x319   :  { %9668 = vmatprep.subr.bf16.mxu1 %v17618_v46  ;;  %v17673_v44 = vld [vmem:[#allocation2 + $0x1a78] ss:$112 sps:$4 sm:$0xff]   ;;  %v17672_v47 = vld [vmem:[#allocation2 + $0x225c] ss:$112 sps:$4 sm:$0xff]  }
 0x31a   :  { %v17681_v26 = vld [vmem:[#allocation2 + $0x199c] ss:$112 sps:$4 sm:$0xff]   ;;  %v17670_v5 = vld [vmem:[#allocation2 + $0x2258] ss:$112 sps:$4 sm:$0xff]  }
 0x31b   :  { %9698 = vmatpush1.bf16.msra.mxu0 %v17625_v51  ;;  %v17678_v51 = vld [vmem:[#allocation2 + $0x217c] ss:$112 sps:$4 sm:$0xff]  }
 0x31c   :  { %9669 = vmatpush1.bf16.msra.mxu1 %v17616_v13  ;;  %9699 = vmatprep.subr.bf16.mxu0 %v17633_v53  ;;  %v17679_v13 = vld [vmem:[#allocation2 + $0x1998] ss:$112 sps:$4 sm:$0xff]   ;;  %v17687_v53 = vld [vmem:[#allocation2 + $0x18bc] ss:$112 sps:$4 sm:$0xff]  }
 0x31d   :  { %9670 = vmatprep.subr.bf16.mxu1 %v17624_v39 }
 0x31f   :  { %9700 = vmatpush1.bf16.msra.mxu0 %v17631_v56  ;;  %v17684_v56 = vld [vmem:[#allocation2 + $0x209c] ss:$112 sps:$4 sm:$0xff]  }
 0x320   :  { %9671 = vmatpush2.bf16.msra.mxu1 %v17622_v27  ;;  %9701 = vmatprep.subr.bf16.mxu0 %v17639_v57  ;;  %v17676_v27 = vld [vmem:[#allocation2 + $0x2178] ss:$112 sps:$4 sm:$0xff]   ;;  %v17693_v57 = vld [vmem:[#allocation2 + $0x17dc] ss:$112 sps:$4 sm:$0xff]  }
 0x321   :  { %9672 = vmatprep.subr.bf16.mxu1 %v17630_v30  ;;  %v17685_v30 = vld [vmem:[#allocation2 + $0x18b8] ss:$112 sps:$4 sm:$0xff]  }
 0x323   :  { %9702 = vmatpush1.bf16.msra.mxu0 %v17637_v63  ;;  %v17691_v63 = vld [vmem:[#allocation2 + $0x17d8] ss:$112 sps:$4 sm:$0xff]  }
 0x324   :  { %9673 = vmatpush2.bf16.msra.mxu1 %v17628_v61  ;;  %9703 = vmatprep.subr.bf16.mxu0 %v17645_v1  ;;  %v17682_v61 = vld [vmem:[#allocation2 + $0x2098] ss:$112 sps:$4 sm:$0xff]   ;;  %v17699_v1 = vld [vmem:[#allocation2 + $0x16fc] ss:$112 sps:$4 sm:$0xff]  }
 0x325   :  { %9674 = vmatprep.subr.bf16.mxu1 %v17636_v0  ;;  %v17690_v0 = vld [vmem:[#allocation2 + $0x1fbc] ss:$112 sps:$4 sm:$0xff]  }
 0x327   :  { %9704 = vmatpush1.bf16.msra.mxu0 %v17643_v3  ;;  %v17697_v3 = vld [vmem:[#allocation2 + $0x16f8] ss:$112 sps:$4 sm:$0xff]  }
 0x328   :  { %9675 = vmatpush2.bf16.msra.mxu1 %v17634_v2  ;;  %9705 = vmatprep.subr.bf16.mxu0 %v17651_v7  ;;  %v17688_v2 = vld [vmem:[#allocation2 + $0x1fb8] ss:$112 sps:$4 sm:$0xff]   ;;  %v17705_v7 = vld [vmem:[#allocation2 + $0x161c] ss:$112 sps:$4 sm:$0xff]  }
 0x329   :  { %9676 = vmatprep.subr.bf16.mxu1 %v17642_v37  ;;  %v17696_v37 = vld [vmem:[#allocation2 + $0x1edc] ss:$112 sps:$4 sm:$0xff]  }
 0x32b   :  { %9706 = vmatpush1.bf16.msra.mxu0 %v17649_v31  ;;  %v1549_v31 = vrot.slane %v19052_v55, %v18962_v11 }
 0x32c   :  { %9677 = vmatpush2.bf16.msra.mxu1 %v17640_v10  ;;  %9707 = vmatprep.subr.bf16.mxu0 %v17657_v15  ;;  %v1545_v10 = vrot.slane %v19052_v55, %v18959_v62  ;;  %v17703_v15 = vld [vmem:[#allocation2 + $0x1618] ss:$112 sps:$4 sm:$0xff]   ;;  %v17708_v55 = vld [vmem:[#allocation2 + $0x1d1c] ss:$112 sps:$4 sm:$0xff]  }
 0x32d   :  { %9678 = vmatprep.subr.bf16.mxu1 %v17648_v14  ;;  %v17694_v14 = vld [vmem:[#allocation2 + $0x1ed8] ss:$112 sps:$4 sm:$0xff]  }
 0x32f   :  { %9708 = vmatpush1.bf16.msra.mxu0 %v17655_v18  ;;  %v17711_v18 = vld [vmem:[#allocation2 + $0x153c] ss:$112 sps:$4 sm:$0xff]  }
 0x330   :  { %9679 = vmatpush2.bf16.msra.mxu1 %v17646_v12  ;;  %9709 = vmatprep.subr.bf16.mxu0 %v17663_v23  ;;  %v17702_v12 = vld [vmem:[#allocation2 + $0x1dfc] ss:$112 sps:$4 sm:$0xff]  }
 0x331   :  { %9680 = vmatprep.subr.bf16.mxu1 %v17654_v24 }
 0x333   :  { %9710 = vmatpush1.bf16.msra.mxu0 %v17661_v22  ;;  %v17700_v22 = vld [vmem:[#allocation2 + $0x1df8] ss:$112 sps:$4 sm:$0xff]  }
 0x334   :  { %9681 = vmatpush2.bf16.msra.mxu1 %v17652_v28  ;;  %9711 = vmatprep.subr.bf16.mxu0 %v17669_v35  ;;  %v17709_v35 = vld [vmem:[#allocation2 + $0x1538] ss:$112 sps:$4 sm:$0xff]  }
 0x335   :  { %9682 = vmatprep.subr.bf16.mxu1 %v17660_v58 }
 0x337   :  { %v9360_v17 = vpop.f32.mrf.mxu1  ;;  %9712 = vmatpush2.bf16.msra.mxu0 %v17667_v33  ;;  %v17720_v33 = vld [vmem:[#allocation2 + $0x2a3c] ss:$112 sps:$4 sm:$0xff]  }
 0x338   :  { %9683 = vmatpush2.bf16.msra.mxu1 %v17658_v32  ;;  %9713 = vmatprep.subr.bf16.mxu0 %v17675_v4  ;;  %v9361_v24 = vadd.f32 %v9360_v17, %v1545_v10  ;;  %v17718_v17 = vld [vmem:[#allocation2 + $0x2a38] ss:$112 sps:$4 sm:$0xff]   ;;  %v17742_v10 = vld [vmem:[#allocation2 + $0x3c0] ss:$112 sps:$4 sm:$0xff]  }
 0x339   :  { %v9362_v46 = vpop.f32.mrf.mxu1  ;;  %9684 = vmatprep.subr.bf16.mxu1 %v17666_v41 }
 0x33a   :  { %v9363_v28 = vadd.f32 %v9362_v46, %v1549_v31  ;;  %v17741_v31 = vld [vmem:[#allocation2 + $0x25dc] ss:$112 sps:$4 sm:$0xff]  }
 0x33b   :  { %v9364_v25 = vpop.f32.mrf.mxu1  ;;  %9714 = vmatpush2.bf16.msra.mxu0 %v17673_v44  ;;  %v17714_v44 = vld [vmem:[#allocation2 + $0x1c3c] ss:$112 sps:$4 sm:$0xff]  }
 0x33c   :  { %9685 = vmatpush2.bf16.msra.mxu1 %v17664_v45  ;;  %9715 = vmatprep.subr.bf16.mxu0 %v17681_v26  ;;  %v17706_v45 = vld [vmem:[#allocation2 + $0x1d18] ss:$112 sps:$4 sm:$0xff]  }
 0x33d   :  { %v9365_v39 = vpop.f32.mrf.mxu1  ;;  %9736 = vmatprep.subr.bf16.mxu1 %v17672_v47  ;;  %v17726_v47 = vld [vmem:[#allocation2 + $0x664] ss:$112 sps:$4 sm:$0xff]   ;;  %v17712_v25 = vld [vmem:[#allocation2 + $0x1c38] ss:$112 sps:$4 sm:$0xff]  }
 0x33f   :  { %9687 = vmatmul.mubr.bf16.vlgmr.msra.gmra.mxu1 %v18880_v8  ;;  %9716 = vmatpush2.bf16.msra.mxu0 %v17679_v13 }
 0x340   :  { %9737 = vmatpush1.bf16.msra.mxu1 %v17670_v5  ;;  %9717 = vmatprep.subr.bf16.mxu0 %v17687_v53  ;;  %v17717_v5 = vld [vmem:[#allocation2 + $0x295c] ss:$112 sps:$4 sm:$0xff]   ;;  %v17724_v53 = vld [vmem:[#allocation2 + $0x660] ss:$112 sps:$4 sm:$0xff]  }
 0x341   :  { %9738 = vmatprep.subr.bf16.mxu1 %v17678_v51  ;;  %9768 = vmatprep.mubr.bf16.mxu1 %v18898_v36  ;;  %v17715_v51 = vld [vmem:[#allocation2 + $0x2958] ss:$112 sps:$4 sm:$0xff]  }
 0x343   :  { %9718 = vmatpush2.bf16.msra.mxu0 %v17685_v30  ;;  %v17732_v30 = vld [vmem:[#allocation2 + $0x584] ss:$112 sps:$4 sm:$0xff]  }
 0x344   :  { %9739 = vmatpush1.bf16.msra.mxu1 %v17676_v27  ;;  %9719 = vmatprep.subr.bf16.mxu0 %v17693_v57  ;;  %v17723_v27 = vld [vmem:[#allocation2 + $0x287c] ss:$112 sps:$4 sm:$0xff]   ;;  %v17721_v57 = vld [vmem:[#allocation2 + $0x2878] ss:$112 sps:$4 sm:$0xff]  }
 0x345   :  { %9740 = vmatprep.subr.bf16.mxu1 %v17684_v56 }
 0x347   :  { %9720 = vmatpush2.bf16.msra.mxu0 %v17691_v63  ;;  %v17729_v63 = vld [vmem:[#allocation2 + $0x279c] ss:$112 sps:$4 sm:$0xff]  }
 0x348   :  { %9741 = vmatpush1.bf16.msra.mxu1 %v17682_v61  ;;  %9721 = vmatprep.subr.bf16.mxu0 %v17699_v1  ;;  %v17730_v61 = vld [vmem:[#allocation2 + $0x580] ss:$112 sps:$4 sm:$0xff]   ;;  %v17727_v1 = vld [vmem:[#allocation2 + $0x2798] ss:$112 sps:$4 sm:$0xff]  }
 0x349   :  { %9742 = vmatprep.subr.bf16.mxu1 %v17690_v0  ;;  %v17738_v0 = vld [vmem:[#allocation2 + $0x4a4] ss:$112 sps:$4 sm:$0xff]  }
 0x34b   :  { %9722 = vmatpush2.bf16.msra.mxu0 %v17697_v3  ;;  %v17735_v3 = vld [vmem:[#allocation2 + $0x26bc] ss:$112 sps:$4 sm:$0xff]  }
 0x34c   :  { %9743 = vmatpush1.bf16.msra.mxu1 %v17688_v2  ;;  %9723 = vmatprep.subr.bf16.mxu0 %v17705_v7  ;;  %v17736_v2 = vld [vmem:[#allocation2 + $0x4a0] ss:$112 sps:$4 sm:$0xff]   ;;  %v17733_v7 = vld [vmem:[#allocation2 + $0x26b8] ss:$112 sps:$4 sm:$0xff]  }
 0x34d   :  { %9744 = vmatprep.subr.bf16.mxu1 %v17696_v37  ;;  %v17744_v37 = vld [vmem:[#allocation2 + $0x3c4] ss:$112 sps:$4 sm:$0xff]  }
 0x34e   :  { %v9401_v23 = vpop.f32.mrf.mxu0 }
 0x34f   :  { %v19091_v58 = vadd.f32 %v9401_v23, %v9361_v24  ;;  %9724 = vmatpush2.bf16.msra.mxu0 %v17703_v15  ;;  %v17739_v15 = vld [vmem:[#allocation2 + $0x25d8] ss:$112 sps:$4 sm:$0xff]   ;;  %v17756_v24 = vld [vmem:[#allocation2 + $0x204] ss:$112 sps:$4 sm:$0xff]  }
 0x350   :  { %9745 = vmatpush1.bf16.msra.mxu1 %v17694_v14  ;;  %v9403_v32 = vpop.f32.mrf.mxu0  ;;  %9725 = vmatprep.subr.bf16.mxu0 %v17711_v18  ;;  %v17750_v14 = vld [vmem:[#allocation2 + $0x2e4] ss:$112 sps:$4 sm:$0xff]   ;;  %v17747_v18 = vld [vmem:[#allocation2 + $0x24fc] ss:$112 sps:$4 sm:$0xff]   ;;  %v17745_v23 = vld [vmem:[#allocation2 + $0x24f8] ss:$112 sps:$4 sm:$0xff]  }
 0x351   :  { %9746 = vmatprep.subr.bf16.mxu1 %v17702_v12  ;;  %v19093_v41 = vadd.f32 %v9403_v32, %v9363_v28  ;;  %v17748_v12 = vld [vmem:[#allocation2 + $0x2e0] ss:$112 sps:$4 sm:$0xff]   ;;  %v17751_v32 = vld [vmem:[#allocation2 + $0x2418] ss:$112 sps:$4 sm:$0xff]  }
 0x352   :  { %v9405_v4 = vpop.f32.mrf.mxu0  ;;  %v17754_v28 = vld [vmem:[#allocation2 + $0x200] ss:$112 sps:$4 sm:$0xff]  }
 0x353   :  { %9726 = vmatpush2.bf16.msra.mxu0 %v17709_v35  ;;  %v17762_v35 = vld [vmem:[#allocation2 + $0x124] ss:$112 sps:$4 sm:$0xff]  }
 0x354   :  { %9747 = vmatpush1.bf16.msra.mxu1 %v17700_v22  ;;  %9791 = vmatprep.subr.bf16.mxu0 %v17720_v33  ;;  %v9406_v46 = vpop.f32.mrf.mxu0  ;;  %v17753_v22 = vld [vmem:[#allocation2 + $0x241c] ss:$112 sps:$4 sm:$0xff]   ;;  %v17765_v4 = vld [vmem:[#allocation2 + $0x44] ss:$112 sps:$4 sm:$0xff]  }
 0x355   :  { %9748 = vmatprep.subr.bf16.mxu1 %v17708_v55  ;;  %v17760_v55 = vld [vmem:[#allocation2 + $0x120] ss:$112 sps:$4 sm:$0xff]   ;;  %v17759_v33 = vld [vmem:[#allocation2 + $0x233c] ss:$112 sps:$4 sm:$0xff]  }
 0x356   :  { %9728 = vmatmul.mubr.bf16.vlgmr.msra.gmra.mxu0 %v18882_v9  ;;  %v19096_v26 = vpop.f32.mrf.mxu0  ;;  %v17763_v46 = vld [vmem:[#allocation2 + $0x40] ss:$112 sps:$4 sm:$0xff]  }
 0x357   :  { %9792 = vmatpush1.bf16.msra.mxu0 %v17718_v17  ;;  %9809 = vmatprep.mubr.bf16.mxu0 %v18791_v16 }
 0x358   :  { %9749 = vmatpush1.bf16.msra.mxu1 %v17706_v45  ;;  %v19099_v13 = vpop.f32.mrf.mxu0  ;;  %9818 = vmatprep.subr.bf16.mxu0 %v17726_v47 }
 0x359   :  { %9750 = vmatprep.subr.bf16.mxu1 %v17714_v44  ;;  %v17757_v44 = vld [vmem:[#allocation2 + $0x2338] ss:$112 sps:$4 sm:$0xff]  }
 0x35a   :  { %v9487_v39 = vpop.f32.mrf.mxu0 }
 0x35c   :  { %9751 = vmatpush1.bf16.msra.mxu1 %v17712_v25  ;;  %v9488_v56 = vpop.f32.mrf.mxu0  ;;  %v17768_v25 = vld [vmem:[#allocation2 + $0x1464] ss:$112 sps:$4 sm:$0xff]  }
 0x35d   :  { %9752 = vmatprep.subr.bf16.mxu1 %v17717_v5  ;;  %v17771_v5 = vld [vmem:[#allocation2 + $0xd64] ss:$112 sps:$4 sm:$0xff]  }
 0x35e   :  { %15953 = vmatmul.mubr.msk.bf16.vlgmr.msra.gmra.mxu0 %vm8502_vm0, %v18890_v19 }
 0x35f   :  { %9819 = vmatpush1.bf16.msra.mxu0 %v17724_v53  ;;  %9850 = vmatprep.mubr.bf16.mxu0 %v18865_v49 }
 0x360   :  { %9753 = vmatpush2.bf16.msra.mxu1 %v17715_v51  ;;  %9820 = vmatprep.subr.bf16.mxu0 %v17732_v30 }
 0x361   :  { %9754 = vmatprep.subr.bf16.mxu1 %v17723_v27  ;;  %v10805_v27 = vmax.f32 %v18976_v6, 0.0 }
 0x363   :  { %9821 = vmatpush1.bf16.msra.mxu0 %v17730_v61 }
 0x364   :  { %9755 = vmatpush2.bf16.msra.mxu1 %v17721_v57  ;;  %9822 = vmatprep.subr.bf16.mxu0 %v17738_v0  ;;  %v17769_v57 = vld [vmem:[#allocation2 + $0xd60] ss:$112 sps:$4 sm:$0xff]   ;;  %v17777_v0 = vld [vmem:[#allocation2 + $0xc84] ss:$112 sps:$4 sm:$0xff]  }
 0x365   :  { %9756 = vmatprep.subr.bf16.mxu1 %v17729_v63  ;;  %v17774_v63 = vld [vmem:[#allocation2 + $0x1384] ss:$112 sps:$4 sm:$0xff]  }
 0x367   :  { %9823 = vmatpush1.bf16.msra.mxu0 %v17736_v2  ;;  %v17775_v2 = vld [vmem:[#allocation2 + $0xc80] ss:$112 sps:$4 sm:$0xff]  }
 0x368   :  { %9757 = vmatpush2.bf16.msra.mxu1 %v17727_v1  ;;  %9824 = vmatprep.subr.bf16.mxu0 %v17744_v37  ;;  %v10806_v1 = vmax.f32 %v19011_v34, 0.0  ;;  %v17783_v37 = vld [vmem:[#allocation2 + $0xba4] ss:$112 sps:$4 sm:$0xff]   ;;  %v17781_v34 = vld [vmem:[#allocation2 + $0xba0] ss:$112 sps:$4 sm:$0xff]  }
 0x369   :  { %9758 = vmatprep.subr.bf16.mxu1 %v17735_v3  ;;  %v17780_v3 = vld [vmem:[#allocation2 + $0x12a4] ss:$112 sps:$4 sm:$0xff]  }
 0x36b   :  { %9825 = vmatpush1.bf16.msra.mxu0 %v17742_v10  ;;  %v17786_v10 = vld [vmem:[#allocation2 + $0x11c4] ss:$112 sps:$4 sm:$0xff]  }
 0x36c   :  { %9759 = vmatpush2.bf16.msra.mxu1 %v17733_v7  ;;  %9826 = vmatprep.subr.bf16.mxu0 %v17750_v14  ;;  %v17778_v7 = vld [vmem:[#allocation2 + $0x12a0] ss:$112 sps:$4 sm:$0xff]  }
 0x36d   :  { %9760 = vmatprep.subr.bf16.mxu1 %v17741_v31  ;;  %v17789_v31 = vld [vmem:[#allocation2 + $0xac4] ss:$112 sps:$4 sm:$0xff]   ;;  %v17784_v14 = vld [vmem:[#allocation2 + $0x11c0] ss:$112 sps:$4 sm:$0xff]  }
 0x36f   :  { %9827 = vmatpush1.bf16.msra.mxu0 %v17748_v12  ;;  %v17792_v12 = vld [vmem:[#allocation2 + $0x10e4] ss:$112 sps:$4 sm:$0xff]  }
 0x370   :  { %9761 = vmatpush2.bf16.msra.mxu1 %v17739_v15  ;;  %9828 = vmatprep.subr.bf16.mxu0 %v17756_v24  ;;  %v17787_v15 = vld [vmem:[#allocation2 + $0xac0] ss:$112 sps:$4 sm:$0xff]  }
 0x371   :  { %9762 = vmatprep.subr.bf16.mxu1 %v17747_v18  ;;  %v17795_v18 = vld [vmem:[#allocation2 + $0x9e4] ss:$112 sps:$4 sm:$0xff]   ;;  %v17790_v24 = vld [vmem:[#allocation2 + $0x10e0] ss:$112 sps:$4 sm:$0xff]  }
 0x373   :  { %9829 = vmatpush1.bf16.msra.mxu0 %v17754_v28  ;;  %v17798_v28 = vld [vmem:[#allocation2 + $0x1004] ss:$112 sps:$4 sm:$0xff]  }
 0x374   :  { %9763 = vmatpush2.bf16.msra.mxu1 %v17745_v23  ;;  %9830 = vmatprep.subr.bf16.mxu0 %v17762_v35  ;;  %v17793_v23 = vld [vmem:[#allocation2 + $0x9e0] ss:$112 sps:$4 sm:$0xff]  }
 0x375   :  { %9764 = vmatprep.subr.bf16.mxu1 %v17753_v22  ;;  %v17801_v22 = vld [vmem:[#allocation2 + $0x904] ss:$112 sps:$4 sm:$0xff]   ;;  %v17796_v35 = vld [vmem:[#allocation2 + $0x1000] ss:$112 sps:$4 sm:$0xff]  }
 0x377   :  { %v9442_v45 = vpop.f32.mrf.mxu1  ;;  %9831 = vmatpush1.bf16.msra.mxu0 %v17760_v55  ;;  %v17804_v55 = vld [vmem:[#allocation2 + $0xf24] ss:$112 sps:$4 sm:$0xff]  }
 0x378   :  { %v9443_v17 = vadd.f32 %v9442_v45, %v19091_v58  ;;  %9765 = vmatpush2.bf16.msra.mxu1 %v17751_v32  ;;  %9832 = vmatprep.subr.bf16.mxu0 %v17765_v4  ;;  %v17766_v58 = vld [vmem:[#allocation2 + $0x1460] ss:$112 sps:$4 sm:$0xff]  }
 0x379   :  { %v9444_v47 = vpop.f32.mrf.mxu1  ;;  %9766 = vmatprep.subr.bf16.mxu1 %v17759_v33  ;;  %v17799_v32 = vld [vmem:[#allocation2 + $0x900] ss:$112 sps:$4 sm:$0xff]   ;;  %v17807_v33 = vld [vmem:[#allocation2 + $0x824] ss:$112 sps:$4 sm:$0xff]  }
 0x37a   :  { %v9484_v39 = vadd.f32 %v19096_v26, %v9443_v17  ;;  %v9445_v51 = vadd.f32 %v9444_v47, %v19093_v41  ;;  %v17802_v4 = vld [vmem:[#allocation2 + $0xf20] ss:$112 sps:$4 sm:$0xff]   ;;  %v17810_v17 = vld [vmem:[#allocation2 + $0xe44] ss:$112 sps:$4 sm:$0xff]  }
 0x37b   :  { %v9446_v53 = vpop.f32.mrf.mxu1  ;;  %9833 = vmatpush1.bf16.msra.mxu0 %v17763_v46  ;;  %v17805_v45 = vld [vmem:[#allocation2 + $0x820] ss:$112 sps:$4 sm:$0xff]  }
 0x37c   :  { %v10812_v30 = vmax.f32 %v9484_v39, 0.0  ;;  %v9486_v56 = vadd.f32 %v19099_v13, %v9445_v51  ;;  %9767 = vmatpush2.bf16.msra.mxu1 %v17757_v44  ;;  %9834 = vmatprep.subr.bf16.mxu0 %v17771_v5  ;;  %v17772_v13 = vld [vmem:[#allocation2 + $0x1380] ss:$112 sps:$4 sm:$0xff]   ;;  %v17813_v44 = vld [vmem:[#allocation2 + $0x744] ss:$112 sps:$4 sm:$0xff]  }
 0x37d   :  { %v9447_v61 = vpop.f32.mrf.mxu1  ;;  %9859 = vmatprep.subr.bf16.mxu1 %v17768_v25  ;;  %v17808_v47 = vld [vmem:[#allocation2 + $0xe40] ss:$112 sps:$4 sm:$0xff]   ;;  %v17816_v5 = vld [vmem:[#allocation2 + $0x1b64] ss:$112 sps:$4 sm:$0xff]  }
 0x37e   :  { %v19110_v26 = vmax.f32 %v10805_v27, %v10812_v30  ;;  %v10813_v41 = vmax.f32 %v9486_v56, 0.0  ;;  %v17811_v25 = vld [vmem:[#allocation2 + $0x740] ss:$112 sps:$4 sm:$0xff]   ;;  %v17822_v39 = vld [vmem:[#allocation2 + $0x2264] ss:$112 sps:$4 sm:$0xff]  }
 0x37f   :  { %9769 = vmatmul.mubr.bf16.vlgmr.msra.gmra.mxu1 %v18904_v21  ;;  %9835 = vmatpush2.bf16.msra.mxu0 %v17769_v57  ;;  %v17814_v27 = vld [vmem:[#allocation2 + $0x1b60] ss:$112 sps:$4 sm:$0xff]   ;;  %v17819_v56 = vld [vmem:[#allocation2 + $0x1a84] ss:$112 sps:$4 sm:$0xff]  }
 0x380   :  { %v19113_v6 = vmax.f32 %v10806_v1, %v10813_v41  ;;  %9860 = vmatpush1.bf16.msra.mxu1 %v17766_v58  ;;  %9836 = vmatprep.subr.bf16.mxu0 %v17777_v0  ;;  %v17820_v30 = vld [vmem:[#allocation2 + $0x2260] ss:$112 sps:$4 sm:$0xff]   ;;  %v17828_v58 = vld [vmem:[#allocation2 + $0x2184] ss:$112 sps:$4 sm:$0xff]  }
 0x381   :  { %9861 = vmatprep.subr.bf16.mxu1 %v17774_v63  ;;  %9891 = vmatprep.mubr.bf16.mxu1 %v18870_v52  ;;  %v17817_v61 = vld [vmem:[#allocation2 + $0x1a80] ss:$112 sps:$4 sm:$0xff]   ;;  %v17825_v0 = vld [vmem:[#allocation2 + $0x19a4] ss:$112 sps:$4 sm:$0xff]  }
 0x382   :  { %v17826_v63 = vld [vmem:[#allocation2 + $0x2180] ss:$112 sps:$4 sm:$0xff]   ;;  %v17834_v1 = vld [vmem:[#allocation2 + $0x20a4] ss:$112 sps:$4 sm:$0xff]  }
 0x383   :  { %9837 = vmatpush2.bf16.msra.mxu0 %v17775_v2  ;;  %v17823_v41 = vld [vmem:[#allocation2 + $0x19a0] ss:$112 sps:$4 sm:$0xff]   ;;  %v17831_v2 = vld [vmem:[#allocation2 + $0x18c4] ss:$112 sps:$4 sm:$0xff]  }
 0x384   :  { %9862 = vmatpush1.bf16.msra.mxu1 %v17772_v13  ;;  %9838 = vmatprep.subr.bf16.mxu0 %v17783_v37  ;;  %v17832_v13 = vld [vmem:[#allocation2 + $0x20a0] ss:$112 sps:$4 sm:$0xff]  }
 0x385   :  { %9863 = vmatprep.subr.bf16.mxu1 %v17780_v3  ;;  %v17840_v3 = vld [vmem:[#allocation2 + $0x1fc4] ss:$112 sps:$4 sm:$0xff]   ;;  %v17829_v37 = vld [vmem:[#allocation2 + $0x18c0] ss:$112 sps:$4 sm:$0xff]  }
 0x387   :  { %9839 = vmatpush2.bf16.msra.mxu0 %v17781_v34  ;;  %v17837_v34 = vld [vmem:[#allocation2 + $0x17e4] ss:$112 sps:$4 sm:$0xff]  }
 0x388   :  { %9864 = vmatpush1.bf16.msra.mxu1 %v17778_v7  ;;  %9840 = vmatprep.subr.bf16.mxu0 %v17789_v31  ;;  %v17838_v7 = vld [vmem:[#allocation2 + $0x1fc0] ss:$112 sps:$4 sm:$0xff]  }
 0x389   :  { %9865 = vmatprep.subr.bf16.mxu1 %v17786_v10  ;;  %v17846_v10 = vld [vmem:[#allocation2 + $0x1ee4] ss:$112 sps:$4 sm:$0xff]   ;;  %v17835_v31 = vld [vmem:[#allocation2 + $0x17e0] ss:$112 sps:$4 sm:$0xff]  }
 0x38b   :  { %9841 = vmatpush2.bf16.msra.mxu0 %v17787_v15  ;;  %v17843_v15 = vld [vmem:[#allocation2 + $0x1704] ss:$112 sps:$4 sm:$0xff]  }
 0x38c   :  { %9866 = vmatpush1.bf16.msra.mxu1 %v17784_v14  ;;  %9842 = vmatprep.subr.bf16.mxu0 %v17795_v18  ;;  %v17844_v14 = vld [vmem:[#allocation2 + $0x1ee0] ss:$112 sps:$4 sm:$0xff]  }
 0x38d   :  { %9867 = vmatprep.subr.bf16.mxu1 %v17792_v12  ;;  %v17852_v12 = vld [vmem:[#allocation2 + $0x1e04] ss:$112 sps:$4 sm:$0xff]   ;;  %v17841_v18 = vld [vmem:[#allocation2 + $0x1700] ss:$112 sps:$4 sm:$0xff]  }
 0x38f   :  { %9843 = vmatpush2.bf16.msra.mxu0 %v17793_v23 }
 0x390   :  { %9868 = vmatpush1.bf16.msra.mxu1 %v17790_v24  ;;  %9844 = vmatprep.subr.bf16.mxu0 %v17801_v22  ;;  %v19122_v24 = vld [vmem:[#allocation11 + $0x8] sm:$0xff]  ;;  %v17849_v22 = vld [vmem:[#allocation2 + $0x1624] ss:$112 sps:$4 sm:$0xff]  }
 0x391   :  { %9869 = vmatprep.subr.bf16.mxu1 %v17798_v28  ;;  %v1553_v23 = vrot.slane %v19122_v24, %v18986_v48  ;;  %v17850_v28 = vld [vmem:[#allocation2 + $0x1e00] ss:$112 sps:$4 sm:$0xff]  }
 0x393   :  { %9845 = vmatpush2.bf16.msra.mxu0 %v17799_v32  ;;  %v1557_v32 = vrot.slane %v19122_v24, %v18989_v54 }
 0x394   :  { %9870 = vmatpush1.bf16.msra.mxu1 %v17796_v35  ;;  %9846 = vmatprep.subr.bf16.mxu0 %v17807_v33  ;;  %v17858_v35 = vld [vmem:[#allocation2 + $0x1d24] ss:$112 sps:$4 sm:$0xff]   ;;  %v17847_v33 = vld [vmem:[#allocation2 + $0x1620] ss:$112 sps:$4 sm:$0xff]  }
 0x395   :  { %9871 = vmatprep.subr.bf16.mxu1 %v17804_v55 }
 0x396   :  { %v19116_v46 = vpop.f32.mrf.mxu0 }
 0x397   :  { %9847 = vmatpush2.bf16.msra.mxu0 %v17805_v45  ;;  %v9525_v55 = vadd.f32 %v19116_v46, %v1553_v23  ;;  %v17855_v45 = vld [vmem:[#allocation2 + $0x1544] ss:$112 sps:$4 sm:$0xff]   ;;  %v17889_v23 = vld [vmem:[#allocation2 + $0x25e0] ss:$112 sps:$4 sm:$0xff]  }
 0x398   :  { %9872 = vmatpush1.bf16.msra.mxu1 %v17802_v4  ;;  %9848 = vmatprep.subr.bf16.mxu0 %v17813_v44  ;;  %v19118_v51 = vpop.f32.mrf.mxu0  ;;  %v17856_v4 = vld [vmem:[#allocation2 + $0x1d20] ss:$112 sps:$4 sm:$0xff]   ;;  %v17864_v46 = vld [vmem:[#allocation2 + $0x2a44] ss:$112 sps:$4 sm:$0xff]  }
 0x399   :  { %9873 = vmatprep.subr.bf16.mxu1 %v17810_v17  ;;  %v17861_v17 = vld [vmem:[#allocation2 + $0x1c44] ss:$112 sps:$4 sm:$0xff]   ;;  %v9527_v44 = vadd.f32 %v19118_v51, %v1557_v32  ;;  %v17895_v32 = vld [vmem:[#allocation2 + $0x2500] ss:$112 sps:$4 sm:$0xff]  }
 0x39a   :  { %v9528_v53 = vpop.f32.mrf.mxu0 }
 0x39b   :  { %9849 = vmatpush2.bf16.msra.mxu0 %v17811_v25 }
 0x39c   :  { %9874 = vmatpush1.bf16.msra.mxu1 %v17808_v47  ;;  %9900 = vmatprep.subr.bf16.mxu0 %v17822_v39  ;;  %v9529_v57 = vpop.f32.mrf.mxu0  ;;  %v17859_v39 = vld [vmem:[#allocation2 + $0x1c40] ss:$112 sps:$4 sm:$0xff]  }
 0x39d   :  { %9875 = vmatprep.subr.bf16.mxu1 %v17816_v5  ;;  %v17853_v5 = vld [vmem:[#allocation2 + $0x1540] ss:$112 sps:$4 sm:$0xff]  }
 0x39e   :  { %9851 = vmatmul.mubr.bf16.vlgmr.msra.gmra.mxu0 %v18880_v8  ;;  %v17865_v57 = vld [vmem:[#allocation2 + $0x2960] ss:$112 sps:$4 sm:$0xff]  }
 0x39f   :  { %9901 = vmatpush1.bf16.msra.mxu0 %v17820_v30  ;;  %9932 = vmatprep.mubr.bf16.mxu0 %v18898_v36 }
 0x3a0   :  { %9876 = vmatpush2.bf16.msra.mxu1 %v17814_v27  ;;  %9902 = vmatprep.subr.bf16.mxu0 %v17828_v58  ;;  %v17867_v27 = vld [vmem:[#allocation2 + $0x2964] ss:$112 sps:$4 sm:$0xff]   ;;  %v17862_v58 = vld [vmem:[#allocation2 + $0x2a40] ss:$112 sps:$4 sm:$0xff]  }
 0x3a1   :  { %9877 = vmatprep.subr.bf16.mxu1 %v17819_v56 }
 0x3a3   :  { %9903 = vmatpush1.bf16.msra.mxu0 %v17826_v63  ;;  %v17873_v63 = vld [vmem:[#allocation2 + $0x2884] ss:$112 sps:$4 sm:$0xff]  }
 0x3a4   :  { %9878 = vmatpush2.bf16.msra.mxu1 %v17817_v61  ;;  %9904 = vmatprep.subr.bf16.mxu0 %v17834_v1  ;;  %v17870_v61 = vld [vmem:[#allocation2 + $0x66c] ss:$112 sps:$4 sm:$0xff]   ;;  %v17871_v1 = vld [vmem:[#allocation2 + $0x2880] ss:$112 sps:$4 sm:$0xff]  }
 0x3a5   :  { %9879 = vmatprep.subr.bf16.mxu1 %v17825_v0 }
 0x3a7   :  { %9905 = vmatpush1.bf16.msra.mxu0 %v17832_v13  ;;  %v17879_v13 = vld [vmem:[#allocation2 + $0x27a4] ss:$112 sps:$4 sm:$0xff]  }
 0x3a8   :  { %9880 = vmatpush2.bf16.msra.mxu1 %v17823_v41  ;;  %9906 = vmatprep.subr.bf16.mxu0 %v17840_v3  ;;  %v17868_v3 = vld [vmem:[#allocation2 + $0x668] ss:$112 sps:$4 sm:$0xff]  }
 0x3a9   :  { %9881 = vmatprep.subr.bf16.mxu1 %v17831_v2 }
 0x3ab   :  { %9907 = vmatpush1.bf16.msra.mxu0 %v17838_v7 }
 0x3ac   :  { %9882 = vmatpush2.bf16.msra.mxu1 %v17829_v37  ;;  %9908 = vmatprep.subr.bf16.mxu0 %v17846_v10  ;;  %v17877_v37 = vld [vmem:[#allocation2 + $0x27a0] ss:$112 sps:$4 sm:$0xff]   ;;  %v17885_v10 = vld [vmem:[#allocation2 + $0x26c4] ss:$112 sps:$4 sm:$0xff]  }
 0x3ad   :  { %9883 = vmatprep.subr.bf16.mxu1 %v17837_v34  ;;  %v17876_v34 = vld [vmem:[#allocation2 + $0x58c] ss:$112 sps:$4 sm:$0xff]  }
 0x3af   :  { %9909 = vmatpush1.bf16.msra.mxu0 %v17844_v14  ;;  %v17883_v14 = vld [vmem:[#allocation2 + $0x26c0] ss:$112 sps:$4 sm:$0xff]  }
 0x3b0   :  { %9884 = vmatpush2.bf16.msra.mxu1 %v17835_v31  ;;  %9910 = vmatprep.subr.bf16.mxu0 %v17852_v12  ;;  %v17874_v31 = vld [vmem:[#allocation2 + $0x588] ss:$112 sps:$4 sm:$0xff]   ;;  %v17891_v12 = vld [vmem:[#allocation2 + $0x25e4] ss:$112 sps:$4 sm:$0xff]  }
 0x3b1   :  { %9885 = vmatprep.subr.bf16.mxu1 %v17843_v15  ;;  %v17882_v15 = vld [vmem:[#allocation2 + $0x4ac] ss:$112 sps:$4 sm:$0xff]  }
 0x3b3   :  { %9911 = vmatpush1.bf16.msra.mxu0 %v17850_v28  ;;  %v17888_v28 = vld [vmem:[#allocation2 + $0x3cc] ss:$112 sps:$4 sm:$0xff]  }
 0x3b4   :  { %9886 = vmatpush2.bf16.msra.mxu1 %v17841_v18  ;;  %9912 = vmatprep.subr.bf16.mxu0 %v17858_v35  ;;  %v17880_v18 = vld [vmem:[#allocation2 + $0x4a8] ss:$112 sps:$4 sm:$0xff]  }
 0x3b5   :  { %9887 = vmatprep.subr.bf16.mxu1 %v17849_v22  ;;  %v17897_v22 = vld [vmem:[#allocation2 + $0x2504] ss:$112 sps:$4 sm:$0xff]   ;;  %v17886_v35 = vld [vmem:[#allocation2 + $0x3c8] ss:$112 sps:$4 sm:$0xff]  }
 0x3b7   :  { %v9565_v47 = vpop.f32.mrf.mxu1  ;;  %9913 = vmatpush1.bf16.msra.mxu0 %v17856_v4  ;;  %v17892_v4 = vld [vmem:[#allocation2 + $0x2e8] ss:$112 sps:$4 sm:$0xff]  }
 0x3b8   :  { %v19130_v25 = vadd.f32 %v9565_v47, %v9525_v55  ;;  %9888 = vmatpush2.bf16.msra.mxu1 %v17847_v33  ;;  %9914 = vmatprep.subr.bf16.mxu0 %v17861_v17  ;;  %v17894_v55 = vld [vmem:[#allocation2 + $0x2ec] ss:$112 sps:$4 sm:$0xff]   ;;  %v17903_v33 = vld [vmem:[#allocation2 + $0x2424] ss:$112 sps:$4 sm:$0xff]  }
 0x3b9   :  { %v9567_v53 = vpop.f32.mrf.mxu1  ;;  %9889 = vmatprep.subr.bf16.mxu1 %v17855_v45  ;;  %v17901_v45 = vld [vmem:[#allocation2 + $0x2420] ss:$112 sps:$4 sm:$0xff]   ;;  %v17900_v17 = vld [vmem:[#allocation2 + $0x20c] ss:$112 sps:$4 sm:$0xff]  }
 0x3ba   :  { %v19132_v30 = vadd.f32 %v9567_v53, %v9527_v44  ;;  %v17909_v44 = vld [vmem:[#allocation2 + $0x2344] ss:$112 sps:$4 sm:$0xff]   ;;  %v17907_v53 = vld [vmem:[#allocation2 + $0x2340] ss:$112 sps:$4 sm:$0xff]  }
 0x3bb   :  { %v9569_v56 = vpop.f32.mrf.mxu1  ;;  %9915 = vmatpush1.bf16.msra.mxu0 %v17859_v39 }
 0x3bc   :  { %9890 = vmatpush2.bf16.msra.mxu1 %v17853_v5  ;;  %9916 = vmatprep.subr.bf16.mxu0 %v17867_v27  ;;  %v17898_v5 = vld [vmem:[#allocation2 + $0x208] ss:$112 sps:$4 sm:$0xff]   ;;  %v17906_v27 = vld [vmem:[#allocation2 + $0x12c] ss:$112 sps:$4 sm:$0xff]  }
 0x3bd   :  { %v9570_v51 = vpop.f32.mrf.mxu1  ;;  %9955 = vmatprep.subr.bf16.mxu1 %v17864_v46  ;;  %v17915_v56 = vld [vmem:[#allocation2 + $0x146c] ss:$112 sps:$4 sm:$0xff]  }
 0x3bf   :  { %9892 = vmatmul.mubr.bf16.vlgmr.msra.gmra.mxu1 %v18882_v9  ;;  %v9647_v0 = vpop.f32.mrf.mxu1  ;;  %9917 = vmatpush2.bf16.msra.mxu0 %v17865_v57 }
 0x3c0   :  { %9956 = vmatpush1.bf16.msra.mxu1 %v17862_v58  ;;  %9973 = vmatprep.mubr.bf16.mxu1 %v18791_v16 }
 0x3c1   :  { %v19135_v41 = vpop.f32.mrf.mxu1  ;;  %9982 = vmatprep.subr.bf16.mxu1 %v17870_v61  ;;  %9918 = vmatprep.subr.bf16.mxu0 %v17873_v63  ;;  %v10807_v61 = vmax.f32 %v19016_v42, 0.0 }
 0x3c3   :  { %v9651_v2 = vpop.f32.mrf.mxu1  ;;  %9919 = vmatpush2.bf16.msra.mxu0 %v17871_v1 }
 0x3c4   :  { %9920 = vmatprep.subr.bf16.mxu0 %v17879_v13  ;;  %v17904_v13 = vld [vmem:[#allocation2 + $0x128] ss:$112 sps:$4 sm:$0xff]   ;;  %v17912_v2 = vld [vmem:[#allocation2 + $0x4c] ss:$112 sps:$4 sm:$0xff]  }
 0x3c5   :  { %v9652_v7 = vpop.f32.mrf.mxu1 }
 0x3c6   :  { %v10808_v7 = vmax.f32 %v19039_v20, 0.0  ;;  %v17925_v20 = vld [vmem:[#allocation2 + $0x12a8] ss:$112 sps:$4 sm:$0xff]  }
 0x3c7   :  { %15954 = vmatmul.mubr.msk.bf16.vlgmr.msra.gmra.mxu1 %vm8502_vm0, %v18890_v19  ;;  %9921 = vmatpush2.bf16.msra.mxu0 %v17877_v37 }
 0x3c8   :  { %9983 = vmatpush1.bf16.msra.mxu1 %v17868_v3  ;;  %9922 = vmatprep.subr.bf16.mxu0 %v17885_v10  ;;  %v17921_v3 = vld [vmem:[#allocation2 + $0x138c] ss:$112 sps:$4 sm:$0xff]  }
 0x3c9   :  { %9984 = vmatprep.subr.bf16.mxu1 %v17876_v34  ;;  %10014 = vmatprep.mubr.bf16.mxu1 %v18865_v49  ;;  %v17910_v34 = vld [vmem:[#allocation2 + $0x48] ss:$112 sps:$4 sm:$0xff]   ;;  %v17918_v10 = vld [vmem:[#allocation2 + $0xd6c] ss:$112 sps:$4 sm:$0xff]  }
 0x3cb   :  { %9923 = vmatpush2.bf16.msra.mxu0 %v17883_v14  ;;  %v17916_v14 = vld [vmem:[#allocation2 + $0xd68] ss:$112 sps:$4 sm:$0xff]  }
 0x3cc   :  { %9985 = vmatpush1.bf16.msra.mxu1 %v17874_v31  ;;  %9924 = vmatprep.subr.bf16.mxu0 %v17891_v12  ;;  %v17927_v31 = vld [vmem:[#allocation2 + $0x12ac] ss:$112 sps:$4 sm:$0xff]  }
 0x3cd   :  { %9986 = vmatprep.subr.bf16.mxu1 %v17882_v15  ;;  %v17924_v15 = vld [vmem:[#allocation2 + $0xc8c] ss:$112 sps:$4 sm:$0xff]  }
 0x3ce   :  { %v17933_v12 = vld [vmem:[#allocation2 + $0x11cc] ss:$112 sps:$4 sm:$0xff]  }
 0x3cf   :  { %9925 = vmatpush2.bf16.msra.mxu0 %v17889_v23  ;;  %v17931_v23 = vld [vmem:[#allocation2 + $0x11c8] ss:$112 sps:$4 sm:$0xff]  }
 0x3d0   :  { %9987 = vmatpush1.bf16.msra.mxu1 %v17880_v18  ;;  %9926 = vmatprep.subr.bf16.mxu0 %v17897_v22  ;;  %v17922_v18 = vld [vmem:[#allocation2 + $0xc88] ss:$112 sps:$4 sm:$0xff]   ;;  %v17939_v22 = vld [vmem:[#allocation2 + $0x10ec] ss:$112 sps:$4 sm:$0xff]  }
 0x3d1   :  { %9988 = vmatprep.subr.bf16.mxu1 %v17888_v28  ;;  %v17930_v28 = vld [vmem:[#allocation2 + $0xbac] ss:$112 sps:$4 sm:$0xff]  }
 0x3d3   :  { %9927 = vmatpush2.bf16.msra.mxu0 %v17895_v32  ;;  %v17937_v32 = vld [vmem:[#allocation2 + $0x10e8] ss:$112 sps:$4 sm:$0xff]  }
 0x3d4   :  { %9989 = vmatpush1.bf16.msra.mxu1 %v17886_v35  ;;  %9928 = vmatprep.subr.bf16.mxu0 %v17903_v33  ;;  %v17928_v35 = vld [vmem:[#allocation2 + $0xba8] ss:$112 sps:$4 sm:$0xff]   ;;  %v17945_v33 = vld [vmem:[#allocation2 + $0x100c] ss:$112 sps:$4 sm:$0xff]  }
 0x3d5   :  { %9990 = vmatprep.subr.bf16.mxu1 %v17894_v55  ;;  %v17936_v55 = vld [vmem:[#allocation2 + $0xacc] ss:$112 sps:$4 sm:$0xff]  }
 0x3d6   :  { %v9606_v47 = vpop.f32.mrf.mxu0 }
 0x3d7   :  { %v9607_v39 = vadd.f32 %v9606_v47, %v19130_v25  ;;  %9929 = vmatpush2.bf16.msra.mxu0 %v17901_v45  ;;  %v17913_v25 = vld [vmem:[#allocation2 + $0x1468] ss:$112 sps:$4 sm:$0xff]  }
 0x3d8   :  { %9991 = vmatpush1.bf16.msra.mxu1 %v17892_v4  ;;  %v9608_v46 = vpop.f32.mrf.mxu0  ;;  %9930 = vmatprep.subr.bf16.mxu0 %v17909_v44  ;;  %v17934_v4 = vld [vmem:[#allocation2 + $0xac8] ss:$112 sps:$4 sm:$0xff]   ;;  %v17951_v44 = vld [vmem:[#allocation2 + $0xf2c] ss:$112 sps:$4 sm:$0xff]  }
 0x3d9   :  { %9992 = vmatprep.subr.bf16.mxu1 %v17900_v17  ;;  %v9648_v58 = vadd.f32 %v9647_v0, %v9607_v39  ;;  %v9609_v57 = vadd.f32 %v9608_v46, %v19132_v30  ;;  %v17943_v45 = vld [vmem:[#allocation2 + $0x1008] ss:$112 sps:$4 sm:$0xff]   ;;  %v17942_v17 = vld [vmem:[#allocation2 + $0x9ec] ss:$112 sps:$4 sm:$0xff]  }
 0x3da   :  { %v9610_v51 = vpop.f32.mrf.mxu0  ;;  %v17940_v47 = vld [vmem:[#allocation2 + $0x9e8] ss:$112 sps:$4 sm:$0xff]   ;;  %v17948_v39 = vld [vmem:[#allocation2 + $0x90c] ss:$112 sps:$4 sm:$0xff]  }
 0x3db   :  { %v10814_v63 = vmax.f32 %v9648_v58, 0.0  ;;  %v9650_v1 = vadd.f32 %v19135_v41, %v9609_v57  ;;  %9931 = vmatpush2.bf16.msra.mxu0 %v17907_v53  ;;  %v17919_v41 = vld [vmem:[#allocation2 + $0x1388] ss:$112 sps:$4 sm:$0xff]   ;;  %v17957_v53 = vld [vmem:[#allocation2 + $0xe4c] ss:$112 sps:$4 sm:$0xff]  }
 0x3dc   :  { %9993 = vmatpush1.bf16.msra.mxu1 %v17898_v5  ;;  %10023 = vmatprep.subr.bf16.mxu0 %v17915_v56  ;;  %v9611_v37 = vpop.f32.mrf.mxu0  ;;  %v17949_v5 = vld [vmem:[#allocation2 + $0xf28] ss:$112 sps:$4 sm:$0xff]   ;;  %v17954_v56 = vld [vmem:[#allocation2 + $0x82c] ss:$112 sps:$4 sm:$0xff]  }
 0x3dd   :  { %9994 = vmatprep.subr.bf16.mxu1 %v17906_v27  ;;  %v19146_v0 = vmax.f32 %v10807_v61, %v10814_v63  ;;  %v10815_v30 = vmax.f32 %v9650_v1, 0.0  ;;  %v17946_v46 = vld [vmem:[#allocation2 + $0x908] ss:$112 sps:$4 sm:$0xff]   ;;  %v17963_v58 = vld [vmem:[#allocation2 + $0x1b6c] ss:$112 sps:$4 sm:$0xff]  }
 0x3de   :  { %9933 = vmatmul.mubr.bf16.vlgmr.msra.gmra.mxu0 %v18904_v21  ;;  %v17955_v27 = vld [vmem:[#allocation2 + $0xe48] ss:$112 sps:$4 sm:$0xff]   ;;  %v17960_v61 = vld [vmem:[#allocation2 + $0x74c] ss:$112 sps:$4 sm:$0xff]  }
 0x3df   :  { %v19149_v42 = vmax.f32 %v10808_v7, %v10815_v30  ;;  %10024 = vmatpush1.bf16.msra.mxu0 %v17913_v25  ;;  %10055 = vmatprep.mubr.bf16.mxu0 %v18870_v52  ;;  %v17952_v57 = vld [vmem:[#allocation2 + $0x828] ss:$112 sps:$4 sm:$0xff]   ;;  %v17969_v63 = vld [vmem:[#allocation2 + $0x1a8c] ss:$112 sps:$4 sm:$0xff]  }
 0x3e0   :  { %9995 = vmatpush1.bf16.msra.mxu1 %v17904_v13  ;;  %10025 = vmatprep.subr.bf16.mxu0 %v17921_v3  ;;  %v17961_v51 = vld [vmem:[#allocation2 + $0x1b68] ss:$112 sps:$4 sm:$0xff]   ;;  %v17966_v3 = vld [vmem:[#allocation2 + $0x226c] ss:$112 sps:$4 sm:$0xff]  }
 0x3e1   :  { %9996 = vmatprep.subr.bf16.mxu1 %v17912_v2  ;;  %v17958_v13 = vld [vmem:[#allocation2 + $0x748] ss:$112 sps:$4 sm:$0xff]   ;;  %v17975_v37 = vld [vmem:[#allocation2 + $0x19ac] ss:$112 sps:$4 sm:$0xff]  }
 0x3e2   :  { %v17967_v25 = vld [vmem:[#allocation2 + $0x1a88] ss:$112 sps:$4 sm:$0xff]  }
 0x3e3   :  { %10026 = vmatpush1.bf16.msra.mxu0 %v17919_v41  ;;  %v17964_v30 = vld [vmem:[#allocation2 + $0x2268] ss:$112 sps:$4 sm:$0xff]  }
 0x3e4   :  { %9997 = vmatpush1.bf16.msra.mxu1 %v17910_v34  ;;  %10027 = vmatprep.subr.bf16.mxu0 %v17927_v31  ;;  %v17973_v34 = vld [vmem:[#allocation2 + $0x19a8] ss:$112 sps:$4 sm:$0xff]   ;;  %v17981_v31 = vld [vmem:[#allocation2 + $0x18cc] ss:$112 sps:$4 sm:$0xff]  }
 0x3e5   :  { %9998 = vmatprep.subr.bf16.mxu1 %v17918_v10  ;;  %v17972_v10 = vld [vmem:[#allocation2 + $0x218c] ss:$112 sps:$4 sm:$0xff]  }
 0x3e7   :  { %10028 = vmatpush1.bf16.msra.mxu0 %v17925_v20  ;;  %v17979_v20 = vld [vmem:[#allocation2 + $0x18c8] ss:$112 sps:$4 sm:$0xff]  }
 0x3e8   :  { %9999 = vmatpush2.bf16.msra.mxu1 %v17916_v14  ;;  %10029 = vmatprep.subr.bf16.mxu0 %v17933_v12  ;;  %v17970_v14 = vld [vmem:[#allocation2 + $0x2188] ss:$112 sps:$4 sm:$0xff]   ;;  %v17987_v12 = vld [vmem:[#allocation2 + $0x17ec] ss:$112 sps:$4 sm:$0xff]  }
 0x3e9   :  { %10000 = vmatprep.subr.bf16.mxu1 %v17924_v15  ;;  %v17978_v15 = vld [vmem:[#allocation2 + $0x20ac] ss:$112 sps:$4 sm:$0xff]  }
 0x3eb   :  { %10030 = vmatpush1.bf16.msra.mxu0 %v17931_v23  ;;  %v17985_v23 = vld [vmem:[#allocation2 + $0x17e8] ss:$112 sps:$4 sm:$0xff]  }
 0x3ec   :  { %10001 = vmatpush2.bf16.msra.mxu1 %v17922_v18  ;;  %10031 = vmatprep.subr.bf16.mxu0 %v17939_v22  ;;  %v17976_v18 = vld [vmem:[#allocation2 + $0x20a8] ss:$112 sps:$4 sm:$0xff]   ;;  %v17993_v22 = vld [vmem:[#allocation2 + $0x170c] ss:$112 sps:$4 sm:$0xff]  }
 0x3ed   :  { %10002 = vmatprep.subr.bf16.mxu1 %v17930_v28  ;;  %v17984_v28 = vld [vmem:[#allocation2 + $0x1fcc] ss:$112 sps:$4 sm:$0xff]  }
 0x3ef   :  { %10032 = vmatpush1.bf16.msra.mxu0 %v17937_v32  ;;  %v17991_v32 = vld [vmem:[#allocation2 + $0x1708] ss:$112 sps:$4 sm:$0xff]  }
 0x3f0   :  { %10003 = vmatpush2.bf16.msra.mxu1 %v17928_v35  ;;  %10033 = vmatprep.subr.bf16.mxu0 %v17945_v33  ;;  %v17982_v35 = vld [vmem:[#allocation2 + $0x1fc8] ss:$112 sps:$4 sm:$0xff]   ;;  %v17999_v33 = vld [vmem:[#allocation2 + $0x162c] ss:$112 sps:$4 sm:$0xff]  }
 0x3f1   :  { %10004 = vmatprep.subr.bf16.mxu1 %v17936_v55  ;;  %v17990_v55 = vld [vmem:[#allocation2 + $0x1eec] ss:$112 sps:$4 sm:$0xff]  }
 0x3f3   :  { %10034 = vmatpush1.bf16.msra.mxu0 %v17943_v45  ;;  %v1565_v45 = vrot.slane %v19122_v24, %v19028_v60 }
 0x3f4   :  { %10005 = vmatpush2.bf16.msra.mxu1 %v17934_v4  ;;  %10035 = vmatprep.subr.bf16.mxu0 %v17951_v44  ;;  %v1561_v4 = vrot.slane %v19122_v24, %v19025_v59  ;;  %v17997_v44 = vld [vmem:[#allocation2 + $0x1628] ss:$112 sps:$4 sm:$0xff]   ;;  %v18002_v24 = vld [vmem:[#allocation2 + $0x1d2c] ss:$112 sps:$4 sm:$0xff]  }
 0x3f5   :  { %10006 = vmatprep.subr.bf16.mxu1 %v17942_v17  ;;  %v17988_v17 = vld [vmem:[#allocation2 + $0x1ee8] ss:$112 sps:$4 sm:$0xff]  }
 0x3f7   :  { %10036 = vmatpush1.bf16.msra.mxu0 %v17949_v5  ;;  %v18005_v5 = vld [vmem:[#allocation2 + $0x154c] ss:$112 sps:$4 sm:$0xff]  }
 0x3f8   :  { %10007 = vmatpush2.bf16.msra.mxu1 %v17940_v47  ;;  %10037 = vmatprep.subr.bf16.mxu0 %v17957_v53  ;;  %v17996_v47 = vld [vmem:[#allocation2 + $0x1e0c] ss:$112 sps:$4 sm:$0xff]  }
 0x3f9   :  { %10008 = vmatprep.subr.bf16.mxu1 %v17948_v39 }
 0x3fb   :  { %10038 = vmatpush1.bf16.msra.mxu0 %v17955_v27  ;;  %v17994_v27 = vld [vmem:[#allocation2 + $0x1e08] ss:$112 sps:$4 sm:$0xff]  }
 0x3fc   :  { %10009 = vmatpush2.bf16.msra.mxu1 %v17946_v46  ;;  %10039 = vmatprep.subr.bf16.mxu0 %v17963_v58  ;;  %v18003_v58 = vld [vmem:[#allocation2 + $0x1548] ss:$112 sps:$4 sm:$0xff]  }
 0x3fd   :  { %10010 = vmatprep.subr.bf16.mxu1 %v17954_v56 }
 0x3ff   :  { %v9688_v1 = vpop.f32.mrf.mxu1  ;;  %10040 = vmatpush2.bf16.msra.mxu0 %v17961_v51  ;;  %v18014_v51 = vld [vmem:[#allocation2 + $0x2a4c] ss:$112 sps:$4 sm:$0xff]  }
 0x400   :  { %10011 = vmatpush2.bf16.msra.mxu1 %v17952_v57  ;;  %10041 = vmatprep.subr.bf16.mxu0 %v17969_v63  ;;  %v9689_v39 = vadd.f32 %v9688_v1, %v1561_v4  ;;  %v18012_v1 = vld [vmem:[#allocation2 + $0x2a48] ss:$112 sps:$4 sm:$0xff]   ;;  %v18036_v4 = vld [vmem:[#allocation2 + $0x3d0] ss:$112 sps:$4 sm:$0xff]  }
 0x401   :  { %v9690_v2 = vpop.f32.mrf.mxu1  ;;  %10012 = vmatprep.subr.bf16.mxu1 %v17960_v61 }
 0x402   :  { %v9691_v46 = vadd.f32 %v9690_v2, %v1565_v45  ;;  %v18035_v45 = vld [vmem:[#allocation2 + $0x25ec] ss:$112 sps:$4 sm:$0xff]  }
 0x403   :  { %v9692_v7 = vpop.f32.mrf.mxu1  ;;  %10042 = vmatpush2.bf16.msra.mxu0 %v17967_v25  ;;  %v18008_v25 = vld [vmem:[#allocation2 + $0x1c4c] ss:$112 sps:$4 sm:$0xff]  }
 0x404   :  { %10013 = vmatpush2.bf16.msra.mxu1 %v17958_v13  ;;  %10043 = vmatprep.subr.bf16.mxu0 %v17975_v37  ;;  %v18000_v13 = vld [vmem:[#allocation2 + $0x1d28] ss:$112 sps:$4 sm:$0xff]  }
 0x405   :  { %v9693_v41 = vpop.f32.mrf.mxu1  ;;  %10064 = vmatprep.subr.bf16.mxu1 %v17966_v3  ;;  %v18020_v3 = vld [vmem:[#allocation2 + $0x674] ss:$112 sps:$4 sm:$0xff]   ;;  %v18006_v7 = vld [vmem:[#allocation2 + $0x1c48] ss:$112 sps:$4 sm:$0xff]  }
 0x407   :  { %10015 = vmatmul.mubr.bf16.vlgmr.msra.gmra.mxu1 %v18880_v8  ;;  %10044 = vmatpush2.bf16.msra.mxu0 %v17973_v34 }
 0x408   :  { %10065 = vmatpush1.bf16.msra.mxu1 %v17964_v30  ;;  %10045 = vmatprep.subr.bf16.mxu0 %v17981_v31  ;;  %v18011_v30 = vld [vmem:[#allocation2 + $0x296c] ss:$112 sps:$4 sm:$0xff]   ;;  %v18018_v31 = vld [vmem:[#allocation2 + $0x670] ss:$112 sps:$4 sm:$0xff]  }
 0x409   :  { %10066 = vmatprep.subr.bf16.mxu1 %v17972_v10  ;;  %10096 = vmatprep.mubr.bf16.mxu1 %v18898_v36  ;;  %v18009_v10 = vld [vmem:[#allocation2 + $0x2968] ss:$112 sps:$4 sm:$0xff]  }
 0x40b   :  { %10046 = vmatpush2.bf16.msra.mxu0 %v17979_v20  ;;  %v18026_v20 = vld [vmem:[#allocation2 + $0x594] ss:$112 sps:$4 sm:$0xff]  }
 0x40c   :  { %10067 = vmatpush1.bf16.msra.mxu1 %v17970_v14  ;;  %10047 = vmatprep.subr.bf16.mxu0 %v17987_v12  ;;  %v18017_v14 = vld [vmem:[#allocation2 + $0x288c] ss:$112 sps:$4 sm:$0xff]   ;;  %v18015_v12 = vld [vmem:[#allocation2 + $0x2888] ss:$112 sps:$4 sm:$0xff]  }
 0x40d   :  { %10068 = vmatprep.subr.bf16.mxu1 %v17978_v15 }
 0x40f   :  { %10048 = vmatpush2.bf16.msra.mxu0 %v17985_v23  ;;  %v18023_v23 = vld [vmem:[#allocation2 + $0x27ac] ss:$112 sps:$4 sm:$0xff]  }
 0x410   :  { %10069 = vmatpush1.bf16.msra.mxu1 %v17976_v18  ;;  %10049 = vmatprep.subr.bf16.mxu0 %v17993_v22  ;;  %v18024_v18 = vld [vmem:[#allocation2 + $0x590] ss:$112 sps:$4 sm:$0xff]   ;;  %v18021_v22 = vld [vmem:[#allocation2 + $0x27a8] ss:$112 sps:$4 sm:$0xff]  }
 0x411   :  { %10070 = vmatprep.subr.bf16.mxu1 %v17984_v28  ;;  %v18032_v28 = vld [vmem:[#allocation2 + $0x4b4] ss:$112 sps:$4 sm:$0xff]  }
 0x413   :  { %10050 = vmatpush2.bf16.msra.mxu0 %v17991_v32  ;;  %v18029_v32 = vld [vmem:[#allocation2 + $0x26cc] ss:$112 sps:$4 sm:$0xff]  }
 0x414   :  { %10071 = vmatpush1.bf16.msra.mxu1 %v17982_v35  ;;  %10051 = vmatprep.subr.bf16.mxu0 %v17999_v33  ;;  %v18030_v35 = vld [vmem:[#allocation2 + $0x4b0] ss:$112 sps:$4 sm:$0xff]   ;;  %v18027_v33 = vld [vmem:[#allocation2 + $0x26c8] ss:$112 sps:$4 sm:$0xff]  }
 0x415   :  { %10072 = vmatprep.subr.bf16.mxu1 %v17990_v55  ;;  %v18038_v55 = vld [vmem:[#allocation2 + $0x3d4] ss:$112 sps:$4 sm:$0xff]  }
 0x416   :  { %v9729_v53 = vpop.f32.mrf.mxu0 }
 0x417   :  { %v19158_v56 = vadd.f32 %v9729_v53, %v9689_v39  ;;  %10052 = vmatpush2.bf16.msra.mxu0 %v17997_v44  ;;  %v18033_v44 = vld [vmem:[#allocation2 + $0x25e8] ss:$112 sps:$4 sm:$0xff]   ;;  %v18050_v39 = vld [vmem:[#allocation2 + $0x214] ss:$112 sps:$4 sm:$0xff]  }
 0x418   :  { %10073 = vmatpush1.bf16.msra.mxu1 %v17988_v17  ;;  %v9731_v57 = vpop.f32.mrf.mxu0  ;;  %10053 = vmatprep.subr.bf16.mxu0 %v18005_v5  ;;  %v18044_v17 = vld [vmem:[#allocation2 + $0x2f4] ss:$112 sps:$4 sm:$0xff]   ;;  %v18041_v5 = vld [vmem:[#allocation2 + $0x250c] ss:$112 sps:$4 sm:$0xff]   ;;  %v18039_v53 = vld [vmem:[#allocation2 + $0x2508] ss:$112 sps:$4 sm:$0xff]  }
 0x419   :  { %10074 = vmatprep.subr.bf16.mxu1 %v17996_v47  ;;  %v19160_v61 = vadd.f32 %v9731_v57, %v9691_v46  ;;  %v18042_v47 = vld [vmem:[#allocation2 + $0x2f0] ss:$112 sps:$4 sm:$0xff]   ;;  %v18045_v57 = vld [vmem:[#allocation2 + $0x2428] ss:$112 sps:$4 sm:$0xff]  }
 0x41a   :  { %v9733_v63 = vpop.f32.mrf.mxu0  ;;  %v18048_v46 = vld [vmem:[#allocation2 + $0x210] ss:$112 sps:$4 sm:$0xff]  }
 0x41b   :  { %10054 = vmatpush2.bf16.msra.mxu0 %v18003_v58  ;;  %v18056_v58 = vld [vmem:[#allocation2 + $0x134] ss:$112 sps:$4 sm:$0xff]  }
 0x41c   :  { %10075 = vmatpush1.bf16.msra.mxu1 %v17994_v27  ;;  %10119 = vmatprep.subr.bf16.mxu0 %v18014_v51  ;;  %v9734_v2 = vpop.f32.mrf.mxu0  ;;  %v18047_v27 = vld [vmem:[#allocation2 + $0x242c] ss:$112 sps:$4 sm:$0xff]   ;;  %v18059_v63 = vld [vmem:[#allocation2 + $0x54] ss:$112 sps:$4 sm:$0xff]  }
 0x41d   :  { %10076 = vmatprep.subr.bf16.mxu1 %v18002_v24  ;;  %v18054_v24 = vld [vmem:[#allocation2 + $0x130] ss:$112 sps:$4 sm:$0xff]   ;;  %v18053_v51 = vld [vmem:[#allocation2 + $0x234c] ss:$112 sps:$4 sm:$0xff]  }
 0x41e   :  { %10056 = vmatmul.mubr.bf16.vlgmr.msra.gmra.mxu0 %v18882_v9  ;;  %v19163_v37 = vpop.f32.mrf.mxu0  ;;  %v18057_v2 = vld [vmem:[#allocation2 + $0x50] ss:$112 sps:$4 sm:$0xff]  }
 0x41f   :  { %10120 = vmatpush1.bf16.msra.mxu0 %v18012_v1  ;;  %10137 = vmatprep.mubr.bf16.mxu0 %v18791_v16 }
 0x420   :  { %10077 = vmatpush1.bf16.msra.mxu1 %v18000_v13  ;;  %v19166_v34 = vpop.f32.mrf.mxu0  ;;  %10146 = vmatprep.subr.bf16.mxu0 %v18020_v3 }
 0x421   :  { %10078 = vmatprep.subr.bf16.mxu1 %v18008_v25  ;;  %v18051_v25 = vld [vmem:[#allocation2 + $0x2348] ss:$112 sps:$4 sm:$0xff]  }
 0x422   :  { %v9815_v41 = vpop.f32.mrf.mxu0 }
 0x424   :  { %10079 = vmatpush1.bf16.msra.mxu1 %v18006_v7  ;;  %v9816_v15 = vpop.f32.mrf.mxu0  ;;  %v18062_v7 = vld [vmem:[#allocation2 + $0x1474] ss:$112 sps:$4 sm:$0xff]  }
 0x425   :  { %10080 = vmatprep.subr.bf16.mxu1 %v18011_v30  ;;  %v18065_v30 = vld [vmem:[#allocation2 + $0xd74] ss:$112 sps:$4 sm:$0xff]  }
 0x426   :  { %15955 = vmatmul.mubr.msk.bf16.vlgmr.msra.gmra.mxu0 %vm8502_vm0, %v18890_v19 }
 0x427   :  { %10147 = vmatpush1.bf16.msra.mxu0 %v18018_v31  ;;  %10178 = vmatprep.mubr.bf16.mxu0 %v18865_v49 }
 0x428   :  { %10081 = vmatpush2.bf16.msra.mxu1 %v18009_v10  ;;  %10148 = vmatprep.subr.bf16.mxu0 %v18026_v20  ;;  %v18063_v20 = vld [vmem:[#allocation2 + $0xd70] ss:$112 sps:$4 sm:$0xff]  }
 0x429   :  { %10082 = vmatprep.subr.bf16.mxu1 %v18017_v14 }
 0x42b   :  { %10149 = vmatpush1.bf16.msra.mxu0 %v18024_v18  ;;  %v18071_v18 = vld [vmem:[#allocation2 + $0xc94] ss:$112 sps:$4 sm:$0xff]  }
 0x42c   :  { %10083 = vmatpush2.bf16.msra.mxu1 %v18015_v12  ;;  %10150 = vmatprep.subr.bf16.mxu0 %v18032_v28  ;;  %v18068_v12 = vld [vmem:[#allocation2 + $0x1394] ss:$112 sps:$4 sm:$0xff]   ;;  %v18072_v28 = vld [vmem:[#allocation2 + $0x12b0] ss:$112 sps:$4 sm:$0xff]  }
 0x42d   :  { %10084 = vmatprep.subr.bf16.mxu1 %v18023_v23  ;;  %v18069_v23 = vld [vmem:[#allocation2 + $0xc90] ss:$112 sps:$4 sm:$0xff]  }
 0x42f   :  { %10151 = vmatpush1.bf16.msra.mxu0 %v18030_v35  ;;  %v18080_v35 = vld [vmem:[#allocation2 + $0x11d4] ss:$112 sps:$4 sm:$0xff]  }
 0x430   :  { %10085 = vmatpush2.bf16.msra.mxu1 %v18021_v22  ;;  %10152 = vmatprep.subr.bf16.mxu0 %v18038_v55  ;;  %v18075_v22 = vld [vmem:[#allocation2 + $0xbb0] ss:$112 sps:$4 sm:$0xff]  }
 0x431   :  { %10086 = vmatprep.subr.bf16.mxu1 %v18029_v32  ;;  %v18083_v32 = vld [vmem:[#allocation2 + $0xad4] ss:$112 sps:$4 sm:$0xff]   ;;  %v18078_v55 = vld [vmem:[#allocation2 + $0x11d0] ss:$112 sps:$4 sm:$0xff]  }
 0x433   :  { %10153 = vmatpush1.bf16.msra.mxu0 %v18036_v4  ;;  %v18086_v4 = vld [vmem:[#allocation2 + $0x10f4] ss:$112 sps:$4 sm:$0xff]  }
 0x434   :  { %10087 = vmatpush2.bf16.msra.mxu1 %v18027_v33  ;;  %10154 = vmatprep.subr.bf16.mxu0 %v18044_v17  ;;  %v18081_v33 = vld [vmem:[#allocation2 + $0xad0] ss:$112 sps:$4 sm:$0xff]  }
 0x435   :  { %10088 = vmatprep.subr.bf16.mxu1 %v18035_v45  ;;  %v18089_v45 = vld [vmem:[#allocation2 + $0x9f4] ss:$112 sps:$4 sm:$0xff]   ;;  %v18084_v17 = vld [vmem:[#allocation2 + $0x10f0] ss:$112 sps:$4 sm:$0xff]  }
 0x437   :  { %10155 = vmatpush1.bf16.msra.mxu0 %v18042_v47  ;;  %v18092_v47 = vld [vmem:[#allocation2 + $0x1014] ss:$112 sps:$4 sm:$0xff]  }
 0x438   :  { %10089 = vmatpush2.bf16.msra.mxu1 %v18033_v44  ;;  %10156 = vmatprep.subr.bf16.mxu0 %v18050_v39  ;;  %v18087_v44 = vld [vmem:[#allocation2 + $0x9f0] ss:$112 sps:$4 sm:$0xff]  }
 0x439   :  { %10090 = vmatprep.subr.bf16.mxu1 %v18041_v5  ;;  %v18095_v5 = vld [vmem:[#allocation2 + $0x914] ss:$112 sps:$4 sm:$0xff]   ;;  %v18090_v39 = vld [vmem:[#allocation2 + $0x1010] ss:$112 sps:$4 sm:$0xff]  }
 0x43b   :  { %10157 = vmatpush1.bf16.msra.mxu0 %v18048_v46  ;;  %v18098_v46 = vld [vmem:[#allocation2 + $0xf34] ss:$112 sps:$4 sm:$0xff]  }
 0x43c   :  { %10091 = vmatpush2.bf16.msra.mxu1 %v18039_v53  ;;  %10158 = vmatprep.subr.bf16.mxu0 %v18056_v58  ;;  %v18093_v53 = vld [vmem:[#allocation2 + $0x910] ss:$112 sps:$4 sm:$0xff]  }
 0x43d   :  { %10092 = vmatprep.subr.bf16.mxu1 %v18047_v27  ;;  %v18101_v27 = vld [vmem:[#allocation2 + $0x834] ss:$112 sps:$4 sm:$0xff]   ;;  %v18096_v58 = vld [vmem:[#allocation2 + $0xf30] ss:$112 sps:$4 sm:$0xff]  }
 0x43f   :  { %v9770_v13 = vpop.f32.mrf.mxu1  ;;  %10159 = vmatpush1.bf16.msra.mxu0 %v18054_v24  ;;  %v18104_v24 = vld [vmem:[#allocation2 + $0xe54] ss:$112 sps:$4 sm:$0xff]  }
 0x440   :  { %v9771_v1 = vadd.f32 %v9770_v13, %v19158_v56  ;;  %10093 = vmatpush2.bf16.msra.mxu1 %v18045_v57  ;;  %10160 = vmatprep.subr.bf16.mxu0 %v18059_v63  ;;  %v18060_v56 = vld [vmem:[#allocation2 + $0x1470] ss:$112 sps:$4 sm:$0xff]  }
 0x441   :  { %v9772_v3 = vpop.f32.mrf.mxu1  ;;  %10094 = vmatprep.subr.bf16.mxu1 %v18053_v51  ;;  %v18099_v57 = vld [vmem:[#allocation2 + $0x830] ss:$112 sps:$4 sm:$0xff]   ;;  %v18107_v51 = vld [vmem:[#allocation2 + $0x754] ss:$112 sps:$4 sm:$0xff]  }
 0x442   :  { %v19173_v41 = vadd.f32 %v19163_v37, %v9771_v1  ;;  %v9773_v10 = vadd.f32 %v9772_v3, %v19160_v61  ;;  %v18066_v37 = vld [vmem:[#allocation2 + $0x1390] ss:$112 sps:$4 sm:$0xff]   ;;  %v18074_v61 = vld [vmem:[#allocation2 + $0x12b4] ss:$112 sps:$4 sm:$0xff]  }
 0x443   :  { %v9774_v31 = vpop.f32.mrf.mxu1  ;;  %10161 = vmatpush1.bf16.msra.mxu0 %v18057_v2  ;;  %v18102_v13 = vld [vmem:[#allocation2 + $0xe50] ss:$112 sps:$4 sm:$0xff]   ;;  %v18116_v2 = vld [vmem:[#allocation2 + $0x2274] ss:$112 sps:$4 sm:$0xff]  }
 0x444   :  { %v19177_v14 = vadd.f32 %v19166_v34, %v9773_v10  ;;  %10095 = vmatpush2.bf16.msra.mxu1 %v18051_v25  ;;  %10162 = vmatprep.subr.bf16.mxu0 %v18065_v30  ;;  %v18077_v34 = vld [vmem:[#allocation2 + $0xbb4] ss:$112 sps:$4 sm:$0xff]   ;;  %v18105_v1 = vld [vmem:[#allocation2 + $0x750] ss:$112 sps:$4 sm:$0xff]  }
 0x445   :  { %v9775_v15 = vpop.f32.mrf.mxu1  ;;  %10187 = vmatprep.subr.bf16.mxu1 %v18062_v7  ;;  %v18110_v25 = vld [vmem:[#allocation2 + $0x1b74] ss:$112 sps:$4 sm:$0xff]   ;;  %v18108_v30 = vld [vmem:[#allocation2 + $0x1b70] ss:$112 sps:$4 sm:$0xff]  }
 0x446   :  { %v18114_v10 = vld [vmem:[#allocation2 + $0x2270] ss:$112 sps:$4 sm:$0xff]   ;;  %v18113_v31 = vld [vmem:[#allocation2 + $0x1a94] ss:$112 sps:$4 sm:$0xff]  }
 0x447   :  { %10097 = vmatmul.mubr.bf16.vlgmr.msra.gmra.mxu1 %v18904_v21  ;;  %10163 = vmatpush2.bf16.msra.mxu0 %v18063_v20  ;;  %v18111_v15 = vld [vmem:[#allocation2 + $0x1a90] ss:$112 sps:$4 sm:$0xff]  }
 0x448   :  { %10188 = vmatpush1.bf16.msra.mxu1 %v18060_v56  ;;  %10164 = vmatprep.subr.bf16.mxu0 %v18071_v18  ;;  %v18122_v56 = vld [vmem:[#allocation2 + $0x2194] ss:$112 sps:$4 sm:$0xff]  }
 0x449   :  { %10189 = vmatprep.subr.bf16.mxu1 %v18068_v12  ;;  %10219 = vmatprep.mubr.bf16.mxu1 %v18870_v52  ;;  %v18120_v12 = vld [vmem:[#allocation2 + $0x2190] ss:$112 sps:$4 sm:$0xff]   ;;  %v18119_v18 = vld [vmem:[#allocation2 + $0x19b4] ss:$112 sps:$4 sm:$0xff]  }
 0x44b   :  { %10165 = vmatpush2.bf16.msra.mxu0 %v18069_v23  ;;  %v18117_v23 = vld [vmem:[#allocation2 + $0x19b0] ss:$112 sps:$4 sm:$0xff]  }
 0x44c   :  { %10190 = vmatpush1.bf16.msra.mxu1 %v18066_v37  ;;  %10166 = vmatprep.subr.bf16.mxu0 %v18077_v34  ;;  %v18128_v37 = vld [vmem:[#allocation2 + $0x20b4] ss:$112 sps:$4 sm:$0xff]  }
 0x44d   :  { %10191 = vmatprep.subr.bf16.mxu1 %v18074_v61  ;;  %v18126_v61 = vld [vmem:[#allocation2 + $0x20b0] ss:$112 sps:$4 sm:$0xff]   ;;  %v18125_v34 = vld [vmem:[#allocation2 + $0x18d4] ss:$112 sps:$4 sm:$0xff]  }
 0x44f   :  { %10167 = vmatpush2.bf16.msra.mxu0 %v18075_v22  ;;  %v18123_v22 = vld [vmem:[#allocation2 + $0x18d0] ss:$112 sps:$4 sm:$0xff]  }
 0x450   :  { %10192 = vmatpush1.bf16.msra.mxu1 %v18072_v28  ;;  %10168 = vmatprep.subr.bf16.mxu0 %v18083_v32  ;;  %v18134_v28 = vld [vmem:[#allocation2 + $0x1fd4] ss:$112 sps:$4 sm:$0xff]  }
 0x451   :  { %10193 = vmatprep.subr.bf16.mxu1 %v18080_v35  ;;  %v18132_v35 = vld [vmem:[#allocation2 + $0x1fd0] ss:$112 sps:$4 sm:$0xff]   ;;  %v18131_v32 = vld [vmem:[#allocation2 + $0x17f4] ss:$112 sps:$4 sm:$0xff]  }
 0x453   :  { %10169 = vmatpush2.bf16.msra.mxu0 %v18081_v33  ;;  %v18129_v33 = vld [vmem:[#allocation2 + $0x17f0] ss:$112 sps:$4 sm:$0xff]  }
 0x454   :  { %10194 = vmatpush1.bf16.msra.mxu1 %v18078_v55  ;;  %10170 = vmatprep.subr.bf16.mxu0 %v18089_v45  ;;  %v18140_v55 = vld [vmem:[#allocation2 + $0x1ef4] ss:$112 sps:$4 sm:$0xff]  }
 0x455   :  { %10195 = vmatprep.subr.bf16.mxu1 %v18086_v4  ;;  %v18138_v4 = vld [vmem:[#allocation2 + $0x1ef0] ss:$112 sps:$4 sm:$0xff]   ;;  %v18137_v45 = vld [vmem:[#allocation2 + $0x1714] ss:$112 sps:$4 sm:$0xff]  }
 0x457   :  { %10171 = vmatpush2.bf16.msra.mxu0 %v18087_v44  ;;  %v18146_v44 = vld [vmem:[#allocation2 + $0x1e14] ss:$112 sps:$4 sm:$0xff]  }
 0x458   :  { %10196 = vmatpush1.bf16.msra.mxu1 %v18084_v17  ;;  %10172 = vmatprep.subr.bf16.mxu0 %v18095_v5  ;;  %v19187_v17 = vld [vmem:[#allocation11 + $0x10] sm:$0xff] }
 0x459   :  { %10197 = vmatprep.subr.bf16.mxu1 %v18092_v47  ;;  %v18135_v47 = vld [vmem:[#allocation2 + $0x1710] ss:$112 sps:$4 sm:$0xff]   ;;  %v1569_v5 = vrot.slane %v19187_v17, %v18920_v38 }
 0x45b   :  { %10173 = vmatpush2.bf16.msra.mxu0 %v18093_v53  ;;  %v18143_v53 = vld [vmem:[#allocation2 + $0x1634] ss:$112 sps:$4 sm:$0xff]  }
 0x45c   :  { %10198 = vmatpush1.bf16.msra.mxu1 %v18090_v39  ;;  %10174 = vmatprep.subr.bf16.mxu0 %v18101_v27  ;;  %v18144_v39 = vld [vmem:[#allocation2 + $0x1e10] ss:$112 sps:$4 sm:$0xff]   ;;  %v1573_v27 = vrot.slane %v19187_v17, %v18923_v40 }
 0x45d   :  { %10199 = vmatprep.subr.bf16.mxu1 %v18098_v46  ;;  %v18152_v46 = vld [vmem:[#allocation2 + $0x1d34] ss:$112 sps:$4 sm:$0xff]  }
 0x45e   :  { %v19181_v63 = vpop.f32.mrf.mxu0 }
 0x45f   :  { %10175 = vmatpush2.bf16.msra.mxu0 %v18099_v57  ;;  %v18141_v57 = vld [vmem:[#allocation2 + $0x1630] ss:$112 sps:$4 sm:$0xff]  }
 0x460   :  { %10200 = vmatpush1.bf16.msra.mxu1 %v18096_v58  ;;  %10176 = vmatprep.subr.bf16.mxu0 %v18107_v51  ;;  %v19183_v3 = vpop.f32.mrf.mxu0  ;;  %v9853_v58 = vadd.f32 %v19181_v63, %v1569_v5  ;;  %v18149_v51 = vld [vmem:[#allocation2 + $0x1554] ss:$112 sps:$4 sm:$0xff]  }
 0x461   :  { %10201 = vmatprep.subr.bf16.mxu1 %v18104_v24  ;;  %v18150_v24 = vld [vmem:[#allocation2 + $0x1d30] ss:$112 sps:$4 sm:$0xff]   ;;  %v18158_v63 = vld [vmem:[#allocation2 + $0x2a54] ss:$112 sps:$4 sm:$0xff]  }
 0x462   :  { %v9856_v7 = vpop.f32.mrf.mxu0  ;;  %v18185_v5 = vld [vmem:[#allocation2 + $0x25f4] ss:$112 sps:$4 sm:$0xff]  }
 0x463   :  { %10177 = vmatpush2.bf16.msra.mxu0 %v18105_v1  ;;  %v9855_v1 = vadd.f32 %v19183_v3, %v1573_v27  ;;  %v18147_v7 = vld [vmem:[#allocation2 + $0x1550] ss:$112 sps:$4 sm:$0xff]   ;;  %v18191_v27 = vld [vmem:[#allocation2 + $0x2514] ss:$112 sps:$4 sm:$0xff]  }
 0x464   :  { %10202 = vmatpush1.bf16.msra.mxu1 %v18102_v13  ;;  %10228 = vmatprep.subr.bf16.mxu0 %v18116_v2  ;;  %v9857_v20 = vpop.f32.mrf.mxu0  ;;  %v18155_v13 = vld [vmem:[#allocation2 + $0x1c54] ss:$112 sps:$4 sm:$0xff]  }
 0x465   :  { %10203 = vmatprep.subr.bf16.mxu1 %v18110_v25 }
 0x466   :  { %10179 = vmatmul.mubr.bf16.vlgmr.msra.gmra.mxu0 %v18880_v8 }
 0x467   :  { %10229 = vmatpush1.bf16.msra.mxu0 %v18114_v10  ;;  %10260 = vmatprep.mubr.bf16.mxu0 %v18898_v36 }
 0x468   :  { %10204 = vmatpush2.bf16.msra.mxu1 %v18108_v30  ;;  %10230 = vmatprep.subr.bf16.mxu0 %v18122_v56  ;;  %v18153_v30 = vld [vmem:[#allocation2 + $0x1c50] ss:$112 sps:$4 sm:$0xff]  }
 0x469   :  { %10205 = vmatprep.subr.bf16.mxu1 %v18113_v31  ;;  %v18161_v31 = vld [vmem:[#allocation2 + $0x2974] ss:$112 sps:$4 sm:$0xff]  }
 0x46b   :  { %10231 = vmatpush1.bf16.msra.mxu0 %v18120_v12  ;;  %v18159_v12 = vld [vmem:[#allocation2 + $0x2970] ss:$112 sps:$4 sm:$0xff]  }
 0x46c   :  { %10206 = vmatpush2.bf16.msra.mxu1 %v18111_v15  ;;  %10232 = vmatprep.subr.bf16.mxu0 %v18128_v37  ;;  %v18156_v15 = vld [vmem:[#allocation2 + $0x2a50] ss:$112 sps:$4 sm:$0xff]   ;;  %v18167_v37 = vld [vmem:[#allocation2 + $0x2894] ss:$112 sps:$4 sm:$0xff]  }
 0x46d   :  { %10207 = vmatprep.subr.bf16.mxu1 %v18119_v18  ;;  %v18164_v18 = vld [vmem:[#allocation2 + $0x67c] ss:$112 sps:$4 sm:$0xff]  }
 0x46f   :  { %10233 = vmatpush1.bf16.msra.mxu0 %v18126_v61  ;;  %v18165_v61 = vld [vmem:[#allocation2 + $0x2890] ss:$112 sps:$4 sm:$0xff]  }
 0x470   :  { %10208 = vmatpush2.bf16.msra.mxu1 %v18117_v23  ;;  %10234 = vmatprep.subr.bf16.mxu0 %v18134_v28  ;;  %v18173_v28 = vld [vmem:[#allocation2 + $0x27b4] ss:$112 sps:$4 sm:$0xff]  }
 0x471   :  { %10209 = vmatprep.subr.bf16.mxu1 %v18125_v34 }
 0x473   :  { %10235 = vmatpush1.bf16.msra.mxu0 %v18132_v35  ;;  %v18162_v35 = vld [vmem:[#allocation2 + $0x678] ss:$112 sps:$4 sm:$0xff]  }
 0x474   :  { %10210 = vmatpush2.bf16.msra.mxu1 %v18123_v22  ;;  %10236 = vmatprep.subr.bf16.mxu0 %v18140_v55 }
 0x475   :  { %10211 = vmatprep.subr.bf16.mxu1 %v18131_v32  ;;  %v18171_v32 = vld [vmem:[#allocation2 + $0x27b0] ss:$112 sps:$4 sm:$0xff]  }
 0x477   :  { %10237 = vmatpush1.bf16.msra.mxu0 %v18138_v4  ;;  %v18179_v4 = vld [vmem:[#allocation2 + $0x26d4] ss:$112 sps:$4 sm:$0xff]  }
 0x478   :  { %10212 = vmatpush2.bf16.msra.mxu1 %v18129_v33  ;;  %10238 = vmatprep.subr.bf16.mxu0 %v18146_v44  ;;  %v18170_v33 = vld [vmem:[#allocation2 + $0x59c] ss:$112 sps:$4 sm:$0xff]   ;;  %v18177_v44 = vld [vmem:[#allocation2 + $0x26d0] ss:$112 sps:$4 sm:$0xff]  }
 0x479   :  { %10213 = vmatprep.subr.bf16.mxu1 %v18137_v45  ;;  %v18168_v45 = vld [vmem:[#allocation2 + $0x598] ss:$112 sps:$4 sm:$0xff]  }
 0x47b   :  { %10239 = vmatpush1.bf16.msra.mxu0 %v18144_v39  ;;  %v18174_v39 = vld [vmem:[#allocation2 + $0x4b8] ss:$112 sps:$4 sm:$0xff]  }
 0x47c   :  { %10214 = vmatpush2.bf16.msra.mxu1 %v18135_v47  ;;  %10240 = vmatprep.subr.bf16.mxu0 %v18152_v46  ;;  %v18176_v47 = vld [vmem:[#allocation2 + $0x4bc] ss:$112 sps:$4 sm:$0xff]  }
 0x47d   :  { %10215 = vmatprep.subr.bf16.mxu1 %v18143_v53  ;;  %v18183_v53 = vld [vmem:[#allocation2 + $0x25f0] ss:$112 sps:$4 sm:$0xff]   ;;  %v18182_v46 = vld [vmem:[#allocation2 + $0x3dc] ss:$112 sps:$4 sm:$0xff]  }
 0x47f   :  { %v9893_v25 = vpop.f32.mrf.mxu1  ;;  %10241 = vmatpush1.bf16.msra.mxu0 %v18150_v24  ;;  %v18188_v24 = vld [vmem:[#allocation2 + $0x2fc] ss:$112 sps:$4 sm:$0xff]  }
 0x480   :  { %v19195_v2 = vadd.f32 %v9893_v25, %v9853_v58  ;;  %10216 = vmatpush2.bf16.msra.mxu1 %v18141_v57  ;;  %10242 = vmatprep.subr.bf16.mxu0 %v18155_v13  ;;  %v18180_v58 = vld [vmem:[#allocation2 + $0x3d8] ss:$112 sps:$4 sm:$0xff]   ;;  %v18189_v57 = vld [vmem:[#allocation2 + $0x2510] ss:$112 sps:$4 sm:$0xff]   ;;  %v18194_v25 = vld [vmem:[#allocation2 + $0x21c] ss:$112 sps:$4 sm:$0xff]  }
 0x481   :  { %v9895_v10 = vpop.f32.mrf.mxu1  ;;  %10217 = vmatprep.subr.bf16.mxu1 %v18149_v51  ;;  %v18197_v51 = vld [vmem:[#allocation2 + $0x2434] ss:$112 sps:$4 sm:$0xff]   ;;  %v18186_v13 = vld [vmem:[#allocation2 + $0x2f8] ss:$112 sps:$4 sm:$0xff]  }
 0x482   :  { %v19197_v56 = vadd.f32 %v9895_v10, %v9855_v1  ;;  %v18195_v1 = vld [vmem:[#allocation2 + $0x2430] ss:$112 sps:$4 sm:$0xff]   ;;  %v18192_v10 = vld [vmem:[#allocation2 + $0x218] ss:$112 sps:$4 sm:$0xff]  }
 0x483   :  { %v9897_v20 = vpop.f32.mrf.mxu1  ;;  %10243 = vmatpush1.bf16.msra.mxu0 %v18153_v30 }
 0x484   :  { %10218 = vmatpush2.bf16.msra.mxu1 %v18147_v7  ;;  %10244 = vmatprep.subr.bf16.mxu0 %v18161_v31  ;;  %v18203_v7 = vld [vmem:[#allocation2 + $0x2354] ss:$112 sps:$4 sm:$0xff]   ;;  %v18201_v31 = vld [vmem:[#allocation2 + $0x2350] ss:$112 sps:$4 sm:$0xff]  }
 0x485   :  { %v9898_v3 = vpop.f32.mrf.mxu1  ;;  %10283 = vmatprep.subr.bf16.mxu1 %v18158_v63 }
 0x487   :  { %10220 = vmatmul.mubr.bf16.vlgmr.msra.gmra.mxu1 %v18882_v9  ;;  %v9975_v23 = vpop.f32.mrf.mxu1  ;;  %10245 = vmatpush2.bf16.msra.mxu0 %v18159_v12  ;;  %v18209_v12 = vld [vmem:[#allocation2 + $0x147c] ss:$112 sps:$4 sm:$0xff]  }
 0x488   :  { %10284 = vmatpush1.bf16.msra.mxu1 %v18156_v15  ;;  %10301 = vmatprep.mubr.bf16.mxu1 %v18791_v16  ;;  %v18200_v15 = vld [vmem:[#allocation2 + $0x13c] ss:$112 sps:$4 sm:$0xff]  }
 0x489   :  { %v9977_v34 = vpop.f32.mrf.mxu1  ;;  %10310 = vmatprep.subr.bf16.mxu1 %v18164_v18  ;;  %10246 = vmatprep.subr.bf16.mxu0 %v18167_v37 }
 0x48b   :  { %v9979_v22 = vpop.f32.mrf.mxu1  ;;  %10247 = vmatpush2.bf16.msra.mxu0 %v18165_v61 }
 0x48c   :  { %10248 = vmatprep.subr.bf16.mxu0 %v18173_v28  ;;  %v18198_v28 = vld [vmem:[#allocation2 + $0x138] ss:$112 sps:$4 sm:$0xff]  }
 0x48d   :  { %v9980_v55 = vpop.f32.mrf.mxu1  ;;  %v18207_v22 = vld [vmem:[#allocation2 + $0x1478] ss:$112 sps:$4 sm:$0xff]  }
 0x48e   :  { %v18204_v55 = vld [vmem:[#allocation2 + $0x58] ss:$112 sps:$4 sm:$0xff]  }
 0x48f   :  { %15956 = vmatmul.mubr.msk.bf16.vlgmr.msra.gmra.mxu1 %vm8502_vm0, %v18890_v19  ;;  %10249 = vmatpush2.bf16.msra.mxu0 %v18171_v32 }
 0x490   :  { %10311 = vmatpush1.bf16.msra.mxu1 %v18162_v35  ;;  %10250 = vmatprep.subr.bf16.mxu0 %v18179_v4  ;;  %v18215_v35 = vld [vmem:[#allocation2 + $0x139c] ss:$112 sps:$4 sm:$0xff]   ;;  %v18219_v4 = vld [vmem:[#allocation2 + $0x12b8] ss:$112 sps:$4 sm:$0xff]  }
 0x491   :  { %10312 = vmatprep.subr.bf16.mxu1 %v18170_v33  ;;  %10342 = vmatprep.mubr.bf16.mxu1 %v18865_v49  ;;  %v18221_v33 = vld [vmem:[#allocation2 + $0x12bc] ss:$112 sps:$4 sm:$0xff]  }
 0x493   :  { %10251 = vmatpush2.bf16.msra.mxu0 %v18177_v44  ;;  %v18227_v44 = vld [vmem:[#allocation2 + $0x11dc] ss:$112 sps:$4 sm:$0xff]  }
 0x494   :  { %10313 = vmatpush1.bf16.msra.mxu1 %v18168_v45  ;;  %10252 = vmatprep.subr.bf16.mxu0 %v18185_v5  ;;  %v18218_v45 = vld [vmem:[#allocation2 + $0xc9c] ss:$112 sps:$4 sm:$0xff]   ;;  %v18225_v5 = vld [vmem:[#allocation2 + $0x11d8] ss:$112 sps:$4 sm:$0xff]  }
 0x495   :  { %10314 = vmatprep.subr.bf16.mxu1 %v18176_v47  ;;  %v18216_v47 = vld [vmem:[#allocation2 + $0xc98] ss:$112 sps:$4 sm:$0xff]  }
 0x497   :  { %10253 = vmatpush2.bf16.msra.mxu0 %v18183_v53  ;;  %v18233_v53 = vld [vmem:[#allocation2 + $0x10fc] ss:$112 sps:$4 sm:$0xff]  }
 0x498   :  { %10315 = vmatpush1.bf16.msra.mxu1 %v18174_v39  ;;  %10254 = vmatprep.subr.bf16.mxu0 %v18191_v27  ;;  %v18224_v39 = vld [vmem:[#allocation2 + $0xbbc] ss:$112 sps:$4 sm:$0xff]   ;;  %v18231_v27 = vld [vmem:[#allocation2 + $0x10f8] ss:$112 sps:$4 sm:$0xff]  }
 0x499   :  { %10316 = vmatprep.subr.bf16.mxu1 %v18182_v46  ;;  %v18222_v46 = vld [vmem:[#allocation2 + $0xbb8] ss:$112 sps:$4 sm:$0xff]  }
 0x49b   :  { %10255 = vmatpush2.bf16.msra.mxu0 %v18189_v57  ;;  %v18239_v57 = vld [vmem:[#allocation2 + $0x101c] ss:$112 sps:$4 sm:$0xff]  }
 0x49c   :  { %10317 = vmatpush1.bf16.msra.mxu1 %v18180_v58  ;;  %10256 = vmatprep.subr.bf16.mxu0 %v18197_v51  ;;  %v18230_v58 = vld [vmem:[#allocation2 + $0xadc] ss:$112 sps:$4 sm:$0xff]   ;;  %v18237_v51 = vld [vmem:[#allocation2 + $0x1018] ss:$112 sps:$4 sm:$0xff]  }
 0x49d   :  { %10318 = vmatprep.subr.bf16.mxu1 %v18188_v24  ;;  %v18228_v24 = vld [vmem:[#allocation2 + $0xad8] ss:$112 sps:$4 sm:$0xff]  }
 0x49e   :  { %v9934_v30 = vpop.f32.mrf.mxu0 }
 0x49f   :  { %v9935_v63 = vadd.f32 %v9934_v30, %v19195_v2  ;;  %10257 = vmatpush2.bf16.msra.mxu0 %v18195_v1  ;;  %v18206_v2 = vld [vmem:[#allocation2 + $0x5c] ss:$112 sps:$4 sm:$0xff]  }
 0x4a0   :  { %10319 = vmatpush1.bf16.msra.mxu1 %v18186_v13  ;;  %v9936_v20 = vpop.f32.mrf.mxu0  ;;  %10258 = vmatprep.subr.bf16.mxu0 %v18203_v7  ;;  %v18236_v13 = vld [vmem:[#allocation2 + $0x9fc] ss:$112 sps:$4 sm:$0xff]   ;;  %v18243_v7 = vld [vmem:[#allocation2 + $0xf38] ss:$112 sps:$4 sm:$0xff]  }
 0x4a1   :  { %10320 = vmatprep.subr.bf16.mxu1 %v18194_v25  ;;  %v19205_v3 = vadd.f32 %v9975_v23, %v9935_v63  ;;  %v9937_v18 = vadd.f32 %v9936_v20, %v19197_v56  ;;  %v18213_v23 = vld [vmem:[#allocation2 + $0x1398] ss:$112 sps:$4 sm:$0xff]   ;;  %v18212_v56 = vld [vmem:[#allocation2 + $0xd7c] ss:$112 sps:$4 sm:$0xff]  }
 0x4a2   :  { %v9938_v37 = vpop.f32.mrf.mxu0  ;;  %v18245_v1 = vld [vmem:[#allocation2 + $0xf3c] ss:$112 sps:$4 sm:$0xff]   ;;  %v18234_v25 = vld [vmem:[#allocation2 + $0x9f8] ss:$112 sps:$4 sm:$0xff]  }
 0x4a3   :  { %v19208_v61 = vadd.f32 %v9977_v34, %v9937_v18  ;;  %10259 = vmatpush2.bf16.msra.mxu0 %v18201_v31  ;;  %v18210_v34 = vld [vmem:[#allocation2 + $0xd78] ss:$112 sps:$4 sm:$0xff]   ;;  %v18242_v30 = vld [vmem:[#allocation2 + $0x91c] ss:$112 sps:$4 sm:$0xff]  }
 0x4a4   :  { %10321 = vmatpush1.bf16.msra.mxu1 %v18192_v10  ;;  %10351 = vmatprep.subr.bf16.mxu0 %v18209_v12  ;;  %v9939_v32 = vpop.f32.mrf.mxu0  ;;  %v18251_v10 = vld [vmem:[#allocation2 + $0xe5c] ss:$112 sps:$4 sm:$0xff]   ;;  %v18240_v63 = vld [vmem:[#allocation2 + $0x918] ss:$112 sps:$4 sm:$0xff]  }
 0x4a5   :  { %10322 = vmatprep.subr.bf16.mxu1 %v18200_v15  ;;  %v18249_v31 = vld [vmem:[#allocation2 + $0xe58] ss:$112 sps:$4 sm:$0xff]   ;;  %v18248_v20 = vld [vmem:[#allocation2 + $0x83c] ss:$112 sps:$4 sm:$0xff]  }
 0x4a6   :  { %10261 = vmatmul.mubr.bf16.vlgmr.msra.gmra.mxu0 %v18904_v21  ;;  %v18257_v15 = vld [vmem:[#allocation2 + $0x1b7c] ss:$112 sps:$4 sm:$0xff]   ;;  %v18246_v12 = vld [vmem:[#allocation2 + $0x838] ss:$112 sps:$4 sm:$0xff]  }
 0x4a7   :  { %10352 = vmatpush1.bf16.msra.mxu0 %v18207_v22  ;;  %10383 = vmatprep.mubr.bf16.mxu0 %v18870_v52  ;;  %v18255_v18 = vld [vmem:[#allocation2 + $0x1b78] ss:$112 sps:$4 sm:$0xff]   ;;  %v18254_v37 = vld [vmem:[#allocation2 + $0x75c] ss:$112 sps:$4 sm:$0xff]  }
 0x4a8   :  { %10323 = vmatpush1.bf16.msra.mxu1 %v18198_v28  ;;  %10353 = vmatprep.subr.bf16.mxu0 %v18215_v35  ;;  %v18263_v28 = vld [vmem:[#allocation2 + $0x1a9c] ss:$112 sps:$4 sm:$0xff]   ;;  %v18261_v35 = vld [vmem:[#allocation2 + $0x1a98] ss:$112 sps:$4 sm:$0xff]  }
 0x4a9   :  { %10324 = vmatprep.subr.bf16.mxu1 %v18206_v2  ;;  %v18252_v2 = vld [vmem:[#allocation2 + $0x758] ss:$112 sps:$4 sm:$0xff]  }
 0x4ab   :  { %10354 = vmatpush1.bf16.msra.mxu0 %v18213_v23  ;;  %v18269_v23 = vld [vmem:[#allocation2 + $0x19bc] ss:$112 sps:$4 sm:$0xff]  }
 0x4ac   :  { %10325 = vmatpush1.bf16.msra.mxu1 %v18204_v55  ;;  %10355 = vmatprep.subr.bf16.mxu0 %v18221_v33  ;;  %v18260_v55 = vld [vmem:[#allocation2 + $0x227c] ss:$112 sps:$4 sm:$0xff]   ;;  %v18258_v33 = vld [vmem:[#allocation2 + $0x2278] ss:$112 sps:$4 sm:$0xff]  }
 0x4ad   :  { %10326 = vmatprep.subr.bf16.mxu1 %v18212_v56 }
 0x4af   :  { %10356 = vmatpush1.bf16.msra.mxu0 %v18219_v4 }
 0x4b0   :  { %10327 = vmatpush2.bf16.msra.mxu1 %v18210_v34  ;;  %10357 = vmatprep.subr.bf16.mxu0 %v18227_v44  ;;  %v18267_v34 = vld [vmem:[#allocation2 + $0x19b8] ss:$112 sps:$4 sm:$0xff]   ;;  %v18275_v44 = vld [vmem:[#allocation2 + $0x18dc] ss:$112 sps:$4 sm:$0xff]  }
 0x4b1   :  { %10328 = vmatprep.subr.bf16.mxu1 %v18218_v45  ;;  %v18266_v45 = vld [vmem:[#allocation2 + $0x219c] ss:$112 sps:$4 sm:$0xff]  }
 0x4b3   :  { %10358 = vmatpush1.bf16.msra.mxu0 %v18225_v5  ;;  %v18273_v5 = vld [vmem:[#allocation2 + $0x18d8] ss:$112 sps:$4 sm:$0xff]  }
 0x4b4   :  { %10329 = vmatpush2.bf16.msra.mxu1 %v18216_v47  ;;  %10359 = vmatprep.subr.bf16.mxu0 %v18233_v53  ;;  %v18264_v47 = vld [vmem:[#allocation2 + $0x2198] ss:$112 sps:$4 sm:$0xff]   ;;  %v18281_v53 = vld [vmem:[#allocation2 + $0x17fc] ss:$112 sps:$4 sm:$0xff]  }
 0x4b5   :  { %10330 = vmatprep.subr.bf16.mxu1 %v18224_v39  ;;  %v18272_v39 = vld [vmem:[#allocation2 + $0x20bc] ss:$112 sps:$4 sm:$0xff]  }
 0x4b7   :  { %10360 = vmatpush1.bf16.msra.mxu0 %v18231_v27  ;;  %v18279_v27 = vld [vmem:[#allocation2 + $0x17f8] ss:$112 sps:$4 sm:$0xff]  }
 0x4b8   :  { %10331 = vmatpush2.bf16.msra.mxu1 %v18222_v46  ;;  %10361 = vmatprep.subr.bf16.mxu0 %v18239_v57  ;;  %v18270_v46 = vld [vmem:[#allocation2 + $0x20b8] ss:$112 sps:$4 sm:$0xff]   ;;  %v18287_v57 = vld [vmem:[#allocation2 + $0x171c] ss:$112 sps:$4 sm:$0xff]  }
 0x4b9   :  { %10332 = vmatprep.subr.bf16.mxu1 %v18230_v58  ;;  %v18278_v58 = vld [vmem:[#allocation2 + $0x1fdc] ss:$112 sps:$4 sm:$0xff]  }
 0x4bb   :  { %10362 = vmatpush1.bf16.msra.mxu0 %v18237_v51  ;;  %v18285_v51 = vld [vmem:[#allocation2 + $0x1718] ss:$112 sps:$4 sm:$0xff]  }
 0x4bc   :  { %10333 = vmatpush2.bf16.msra.mxu1 %v18228_v24  ;;  %10363 = vmatprep.subr.bf16.mxu0 %v18245_v1  ;;  %v18276_v24 = vld [vmem:[#allocation2 + $0x1fd8] ss:$112 sps:$4 sm:$0xff]   ;;  %v18293_v1 = vld [vmem:[#allocation2 + $0x163c] ss:$112 sps:$4 sm:$0xff]  }
 0x4bd   :  { %10334 = vmatprep.subr.bf16.mxu1 %v18236_v13  ;;  %v18284_v13 = vld [vmem:[#allocation2 + $0x1efc] ss:$112 sps:$4 sm:$0xff]  }
 0x4bf   :  { %10364 = vmatpush1.bf16.msra.mxu0 %v18243_v7  ;;  %v1581_v7 = vrot.slane %v19187_v17, %v18962_v11 }
 0x4c0   :  { %10335 = vmatpush2.bf16.msra.mxu1 %v18234_v25  ;;  %10365 = vmatprep.subr.bf16.mxu0 %v18251_v10  ;;  %v1577_v25 = vrot.slane %v19187_v17, %v18959_v62  ;;  %v18291_v10 = vld [vmem:[#allocation2 + $0x1638] ss:$112 sps:$4 sm:$0xff]  }
 0x4c1   :  { %10336 = vmatprep.subr.bf16.mxu1 %v18242_v30  ;;  %v18282_v30 = vld [vmem:[#allocation2 + $0x1ef8] ss:$112 sps:$4 sm:$0xff]  }
 0x4c3   :  { %10366 = vmatpush1.bf16.msra.mxu0 %v18249_v31  ;;  %v18299_v31 = vld [vmem:[#allocation2 + $0x155c] ss:$112 sps:$4 sm:$0xff]  }
 0x4c4   :  { %10337 = vmatpush2.bf16.msra.mxu1 %v18240_v63  ;;  %10367 = vmatprep.subr.bf16.mxu0 %v18257_v15  ;;  %v18290_v63 = vld [vmem:[#allocation2 + $0x1e1c] ss:$112 sps:$4 sm:$0xff]  }
 0x4c5   :  { %10338 = vmatprep.subr.bf16.mxu1 %v18248_v20 }
 0x4c7   :  { %v10016_v22 = vpop.f32.mrf.mxu1  ;;  %10368 = vmatpush2.bf16.msra.mxu0 %v18255_v18  ;;  %v18288_v18 = vld [vmem:[#allocation2 + $0x1e18] ss:$112 sps:$4 sm:$0xff]  }
 0x4c8   :  { %10339 = vmatpush2.bf16.msra.mxu1 %v18246_v12  ;;  %10369 = vmatprep.subr.bf16.mxu0 %v18263_v28  ;;  %v10017_v20 = vadd.f32 %v10016_v22, %v1577_v25  ;;  %v18297_v28 = vld [vmem:[#allocation2 + $0x1558] ss:$112 sps:$4 sm:$0xff]  }
 0x4c9   :  { %v10018_v32 = vpop.f32.mrf.mxu1  ;;  %10340 = vmatprep.subr.bf16.mxu1 %v18254_v37  ;;  %v18306_v22 = vld [vmem:[#allocation2 + $0x2a58] ss:$112 sps:$4 sm:$0xff]  }
 0x4ca   :  { %v10019_v12 = vadd.f32 %v10018_v32, %v1581_v7  ;;  %v18302_v32 = vld [vmem:[#allocation2 + $0x1c5c] ss:$112 sps:$4 sm:$0xff]   ;;  %v18315_v25 = vld [vmem:[#allocation2 + $0x27b8] ss:$112 sps:$4 sm:$0xff]   ;;  %v18324_v7 = vld [vmem:[#allocation2 + $0x4c0] ss:$112 sps:$4 sm:$0xff]  }
 0x4cb   :  { %v10020_v56 = vpop.f32.mrf.mxu1  ;;  %10370 = vmatpush2.bf16.msra.mxu0 %v18261_v35  ;;  %v18296_v35 = vld [vmem:[#allocation2 + $0x1d3c] ss:$112 sps:$4 sm:$0xff]  }
 0x4cc   :  { %10341 = vmatpush2.bf16.msra.mxu1 %v18252_v2  ;;  %10371 = vmatprep.subr.bf16.mxu0 %v18269_v23 }
 0x4cd   :  { %v10021_v4 = vpop.f32.mrf.mxu1  ;;  %10392 = vmatprep.subr.bf16.mxu1 %v18260_v55  ;;  %v18308_v55 = vld [vmem:[#allocation2 + $0x2a5c] ss:$112 sps:$4 sm:$0xff]  }
 0x4ce   :  { %v18314_v4 = vld [vmem:[#allocation2 + $0x684] ss:$112 sps:$4 sm:$0xff]  }
 0x4cf   :  { %10343 = vmatmul.mubr.bf16.vlgmr.msra.gmra.mxu1 %v18880_v8  ;;  %10372 = vmatpush2.bf16.msra.mxu0 %v18267_v34 }
 0x4d0   :  { %10393 = vmatpush1.bf16.msra.mxu1 %v18258_v33  ;;  %10373 = vmatprep.subr.bf16.mxu0 %v18275_v44  ;;  %v18294_v33 = vld [vmem:[#allocation2 + $0x1d38] ss:$112 sps:$4 sm:$0xff]  }
 0x4d1   :  { %10394 = vmatprep.subr.bf16.mxu1 %v18266_v45  ;;  %10424 = vmatprep.mubr.bf16.mxu1 %v18898_v36  ;;  %v18300_v44 = vld [vmem:[#allocation2 + $0x1c58] ss:$112 sps:$4 sm:$0xff]  }
 0x4d3   :  { %10374 = vmatpush2.bf16.msra.mxu0 %v18273_v5 }
 0x4d4   :  { %10395 = vmatpush1.bf16.msra.mxu1 %v18264_v47  ;;  %10375 = vmatprep.subr.bf16.mxu0 %v18281_v53  ;;  %v18305_v47 = vld [vmem:[#allocation2 + $0x297c] ss:$112 sps:$4 sm:$0xff]   ;;  %v18303_v53 = vld [vmem:[#allocation2 + $0x2978] ss:$112 sps:$4 sm:$0xff]  }
 0x4d5   :  { %10396 = vmatprep.subr.bf16.mxu1 %v18272_v39 }
 0x4d7   :  { %10376 = vmatpush2.bf16.msra.mxu0 %v18279_v27  ;;  %v18311_v27 = vld [vmem:[#allocation2 + $0x289c] ss:$112 sps:$4 sm:$0xff]  }
 0x4d8   :  { %10397 = vmatpush1.bf16.msra.mxu1 %v18270_v46  ;;  %10377 = vmatprep.subr.bf16.mxu0 %v18287_v57  ;;  %v18312_v46 = vld [vmem:[#allocation2 + $0x680] ss:$112 sps:$4 sm:$0xff]  }
 0x4d9   :  { %10398 = vmatprep.subr.bf16.mxu1 %v18278_v58  ;;  %v18320_v58 = vld [vmem:[#allocation2 + $0x5a4] ss:$112 sps:$4 sm:$0xff]  }
 0x4db   :  { %10378 = vmatpush2.bf16.msra.mxu0 %v18285_v51  ;;  %v18318_v51 = vld [vmem:[#allocation2 + $0x5a0] ss:$112 sps:$4 sm:$0xff]  }
 0x4dc   :  { %10399 = vmatpush1.bf16.msra.mxu1 %v18276_v24  ;;  %10379 = vmatprep.subr.bf16.mxu0 %v18293_v1  ;;  %v18309_v24 = vld [vmem:[#allocation2 + $0x2898] ss:$112 sps:$4 sm:$0xff]   ;;  %v18326_v1 = vld [vmem:[#allocation2 + $0x4c4] ss:$112 sps:$4 sm:$0xff]  }
 0x4dd   :  { %10400 = vmatprep.subr.bf16.mxu1 %v18284_v13  ;;  %v18317_v13 = vld [vmem:[#allocation2 + $0x27bc] ss:$112 sps:$4 sm:$0xff]  }
 0x4de   :  { %v10057_v15 = vpop.f32.mrf.mxu0 }
 0x4df   :  { %v19218_v37 = vadd.f32 %v10057_v15, %v10017_v20  ;;  %10380 = vmatpush2.bf16.msra.mxu0 %v18291_v10  ;;  %v18332_v10 = vld [vmem:[#allocation2 + $0x3e4] ss:$112 sps:$4 sm:$0xff]   ;;  %v18329_v20 = vld [vmem:[#allocation2 + $0x25fc] ss:$112 sps:$4 sm:$0xff]  }
 0x4e0   :  { %10401 = vmatpush1.bf16.msra.mxu1 %v18282_v30  ;;  %v10059_v2 = vpop.f32.mrf.mxu0  ;;  %10381 = vmatprep.subr.bf16.mxu0 %v18299_v31  ;;  %v18323_v30 = vld [vmem:[#allocation2 + $0x26dc] ss:$112 sps:$4 sm:$0xff]   ;;  %v18330_v31 = vld [vmem:[#allocation2 + $0x3e0] ss:$112 sps:$4 sm:$0xff]   ;;  %v18338_v15 = vld [vmem:[#allocation2 + $0x304] ss:$112 sps:$4 sm:$0xff]  }
 0x4e1   :  { %10402 = vmatprep.subr.bf16.mxu1 %v18290_v63  ;;  %v19220_v23 = vadd.f32 %v10059_v2, %v10019_v12  ;;  %v18321_v63 = vld [vmem:[#allocation2 + $0x26d8] ss:$112 sps:$4 sm:$0xff]   ;;  %v18344_v2 = vld [vmem:[#allocation2 + $0x224] ss:$112 sps:$4 sm:$0xff]  }
 0x4e2   :  { %v10061_v56 = vpop.f32.mrf.mxu0  ;;  %v18327_v12 = vld [vmem:[#allocation2 + $0x25f8] ss:$112 sps:$4 sm:$0xff]  }
 0x4e3   :  { %10382 = vmatpush2.bf16.msra.mxu0 %v18297_v28  ;;  %v18335_v28 = vld [vmem:[#allocation2 + $0x251c] ss:$112 sps:$4 sm:$0xff]  }
 0x4e4   :  { %10403 = vmatpush1.bf16.msra.mxu1 %v18288_v18  ;;  %10447 = vmatprep.subr.bf16.mxu0 %v18308_v55  ;;  %v10062_v34 = vpop.f32.mrf.mxu0  ;;  %v18336_v18 = vld [vmem:[#allocation2 + $0x300] ss:$112 sps:$4 sm:$0xff]   ;;  %v18341_v56 = vld [vmem:[#allocation2 + $0x243c] ss:$112 sps:$4 sm:$0xff]  }
 0x4e5   :  { %10404 = vmatprep.subr.bf16.mxu1 %v18296_v35  ;;  %v18333_v35 = vld [vmem:[#allocation2 + $0x2518] ss:$112 sps:$4 sm:$0xff]   ;;  %v18342_v55 = vld [vmem:[#allocation2 + $0x220] ss:$112 sps:$4 sm:$0xff]   ;;  %v18347_v34 = vld [vmem:[#allocation2 + $0x235c] ss:$112 sps:$4 sm:$0xff]  }
 0x4e6   :  { %10384 = vmatmul.mubr.bf16.vlgmr.msra.gmra.mxu0 %v18882_v9  ;;  %v19223_v45 = vpop.f32.mrf.mxu0 }
 0x4e7   :  { %10448 = vmatpush1.bf16.msra.mxu0 %v18306_v22  ;;  %10465 = vmatprep.mubr.bf16.mxu0 %v18791_v16  ;;  %v18339_v22 = vld [vmem:[#allocation2 + $0x2438] ss:$112 sps:$4 sm:$0xff]  }
 0x4e8   :  { %10405 = vmatpush1.bf16.msra.mxu1 %v18294_v33  ;;  %v19226_v5 = vpop.f32.mrf.mxu0  ;;  %10474 = vmatprep.subr.bf16.mxu0 %v18314_v4  ;;  %v18350_v33 = vld [vmem:[#allocation2 + $0x144] ss:$112 sps:$4 sm:$0xff]  }
 0x4e9   :  { %10406 = vmatprep.subr.bf16.mxu1 %v18302_v32  ;;  %v18348_v32 = vld [vmem:[#allocation2 + $0x140] ss:$112 sps:$4 sm:$0xff]   ;;  %v18353_v4 = vld [vmem:[#allocation2 + $0x64] ss:$112 sps:$4 sm:$0xff]  }
 0x4ea   :  { %v10143_v39 = vpop.f32.mrf.mxu0 }
 0x4eb   :  { %v18345_v39 = vld [vmem:[#allocation2 + $0x2358] ss:$112 sps:$4 sm:$0xff]  }
 0x4ec   :  { %10407 = vmatpush1.bf16.msra.mxu1 %v18300_v44  ;;  %v10144_v57 = vpop.f32.mrf.mxu0 }
 0x4ed   :  { %10408 = vmatprep.subr.bf16.mxu1 %v18305_v47 }
 0x4ee   :  { %15957 = vmatmul.mubr.msk.bf16.vlgmr.msra.gmra.mxu0 %vm8502_vm0, %v18890_v19 }
 0x4ef   :  { %10475 = vmatpush1.bf16.msra.mxu0 %v18312_v46  ;;  %10506 = vmatprep.mubr.bf16.mxu0 %v18865_v49 }
 0x4f0   :  { %10409 = vmatpush2.bf16.msra.mxu1 %v18303_v53  ;;  %10476 = vmatprep.subr.bf16.mxu0 %v18320_v58  ;;  %v18351_v53 = vld [vmem:[#allocation2 + $0x60] ss:$112 sps:$4 sm:$0xff]   ;;  %v18359_v58 = vld [vmem:[#allocation2 + $0xd84] ss:$112 sps:$4 sm:$0xff]  }
 0x4f1   :  { %10410 = vmatprep.subr.bf16.mxu1 %v18311_v27  ;;  %v18356_v27 = vld [vmem:[#allocation2 + $0x1484] ss:$112 sps:$4 sm:$0xff]  }
 0x4f3   :  { %10477 = vmatpush1.bf16.msra.mxu0 %v18318_v51 }
 0x4f4   :  { %10411 = vmatpush2.bf16.msra.mxu1 %v18309_v24  ;;  %10478 = vmatprep.subr.bf16.mxu0 %v18326_v1  ;;  %v18357_v1 = vld [vmem:[#allocation2 + $0xd80] ss:$112 sps:$4 sm:$0xff]  }
 0x4f5   :  { %10412 = vmatprep.subr.bf16.mxu1 %v18317_v13 }
 0x4f7   :  { %10479 = vmatpush1.bf16.msra.mxu0 %v18324_v7  ;;  %v18362_v7 = vld [vmem:[#allocation2 + $0x13a4] ss:$112 sps:$4 sm:$0xff]  }
 0x4f8   :  { %10413 = vmatpush2.bf16.msra.mxu1 %v18315_v25  ;;  %10480 = vmatprep.subr.bf16.mxu0 %v18332_v10  ;;  %v18363_v10 = vld [vmem:[#allocation2 + $0xca0] ss:$112 sps:$4 sm:$0xff]  }
 0x4f9   :  { %10414 = vmatprep.subr.bf16.mxu1 %v18323_v30  ;;  %v18365_v30 = vld [vmem:[#allocation2 + $0xca4] ss:$112 sps:$4 sm:$0xff]  }
 0x4fb   :  { %10481 = vmatpush1.bf16.msra.mxu0 %v18330_v31  ;;  %v18369_v31 = vld [vmem:[#allocation2 + $0xbc0] ss:$112 sps:$4 sm:$0xff]  }
 0x4fc   :  { %10415 = vmatpush2.bf16.msra.mxu1 %v18321_v63  ;;  %10482 = vmatprep.subr.bf16.mxu0 %v18338_v15  ;;  %v18366_v63 = vld [vmem:[#allocation2 + $0x12c0] ss:$112 sps:$4 sm:$0xff]   ;;  %v18377_v15 = vld [vmem:[#allocation2 + $0xae4] ss:$112 sps:$4 sm:$0xff]  }
 0x4fd   :  { %10416 = vmatprep.subr.bf16.mxu1 %v18329_v20  ;;  %v18374_v20 = vld [vmem:[#allocation2 + $0x11e4] ss:$112 sps:$4 sm:$0xff]  }
 0x4ff   :  { %10483 = vmatpush1.bf16.msra.mxu0 %v18336_v18  ;;  %v18375_v18 = vld [vmem:[#allocation2 + $0xae0] ss:$112 sps:$4 sm:$0xff]  }
 0x500   :  { %10417 = vmatpush2.bf16.msra.mxu1 %v18327_v12  ;;  %10484 = vmatprep.subr.bf16.mxu0 %v18344_v2  ;;  %v18372_v12 = vld [vmem:[#allocation2 + $0x11e0] ss:$112 sps:$4 sm:$0xff]   ;;  %v18383_v2 = vld [vmem:[#allocation2 + $0xa04] ss:$112 sps:$4 sm:$0xff]  }
 0x501   :  { %10418 = vmatprep.subr.bf16.mxu1 %v18335_v28  ;;  %v18380_v28 = vld [vmem:[#allocation2 + $0x1104] ss:$112 sps:$4 sm:$0xff]  }
 0x503   :  { %10485 = vmatpush1.bf16.msra.mxu0 %v18342_v55  ;;  %v18381_v55 = vld [vmem:[#allocation2 + $0xa00] ss:$112 sps:$4 sm:$0xff]  }
 0x504   :  { %10419 = vmatpush2.bf16.msra.mxu1 %v18333_v35  ;;  %10486 = vmatprep.subr.bf16.mxu0 %v18350_v33  ;;  %v18378_v35 = vld [vmem:[#allocation2 + $0x1100] ss:$112 sps:$4 sm:$0xff]   ;;  %v18389_v33 = vld [vmem:[#allocation2 + $0x924] ss:$112 sps:$4 sm:$0xff]  }
 0x505   :  { %10420 = vmatprep.subr.bf16.mxu1 %v18341_v56  ;;  %v18386_v56 = vld [vmem:[#allocation2 + $0x1024] ss:$112 sps:$4 sm:$0xff]  }
 0x507   :  { %v10098_v44 = vpop.f32.mrf.mxu1  ;;  %10487 = vmatpush1.bf16.msra.mxu0 %v18348_v32  ;;  %v18387_v32 = vld [vmem:[#allocation2 + $0x920] ss:$112 sps:$4 sm:$0xff]  }
 0x508   :  { %v10099_v47 = vadd.f32 %v10098_v44, %v19218_v37  ;;  %10421 = vmatpush2.bf16.msra.mxu1 %v18339_v22  ;;  %10488 = vmatprep.subr.bf16.mxu0 %v18353_v4  ;;  %v18354_v37 = vld [vmem:[#allocation2 + $0x1480] ss:$112 sps:$4 sm:$0xff]   ;;  %v18395_v4 = vld [vmem:[#allocation2 + $0x844] ss:$112 sps:$4 sm:$0xff]  }
 0x509   :  { %v10100_v46 = vpop.f32.mrf.mxu1  ;;  %10422 = vmatprep.subr.bf16.mxu1 %v18347_v34  ;;  %v18384_v22 = vld [vmem:[#allocation2 + $0x1020] ss:$112 sps:$4 sm:$0xff]   ;;  %v18392_v34 = vld [vmem:[#allocation2 + $0xf44] ss:$112 sps:$4 sm:$0xff]  }
 0x50a   :  { %v19233_v57 = vadd.f32 %v19223_v45, %v10099_v47  ;;  %v10101_v24 = vadd.f32 %v10100_v46, %v19220_v23  ;;  %v18360_v45 = vld [vmem:[#allocation2 + $0x13a0] ss:$112 sps:$4 sm:$0xff]   ;;  %v18368_v23 = vld [vmem:[#allocation2 + $0x12c4] ss:$112 sps:$4 sm:$0xff]  }
 0x50b   :  { %v10102_v51 = vpop.f32.mrf.mxu1  ;;  %10489 = vmatpush1.bf16.msra.mxu0 %v18351_v53  ;;  %v18390_v44 = vld [vmem:[#allocation2 + $0xf40] ss:$112 sps:$4 sm:$0xff]   ;;  %v18401_v53 = vld [vmem:[#allocation2 + $0x764] ss:$112 sps:$4 sm:$0xff]  }
 0x50c   :  { %v19237_v13 = vadd.f32 %v19226_v5, %v10101_v24  ;;  %10423 = vmatpush2.bf16.msra.mxu1 %v18345_v39  ;;  %10490 = vmatprep.subr.bf16.mxu0 %v18359_v58  ;;  %v18371_v5 = vld [vmem:[#allocation2 + $0xbc4] ss:$112 sps:$4 sm:$0xff]   ;;  %v18393_v47 = vld [vmem:[#allocation2 + $0x840] ss:$112 sps:$4 sm:$0xff]  }
 0x50d   :  { %v10103_v25 = vpop.f32.mrf.mxu1  ;;  %10515 = vmatprep.subr.bf16.mxu1 %v18356_v27  ;;  %v18398_v39 = vld [vmem:[#allocation2 + $0xe64] ss:$112 sps:$4 sm:$0xff]   ;;  %v18396_v27 = vld [vmem:[#allocation2 + $0xe60] ss:$112 sps:$4 sm:$0xff]  }
 0x50e   :  { %v18399_v58 = vld [vmem:[#allocation2 + $0x760] ss:$112 sps:$4 sm:$0xff]   ;;  %v18404_v24 = vld [vmem:[#allocation2 + $0x1b84] ss:$112 sps:$4 sm:$0xff]  }
 0x50f   :  { %10425 = vmatmul.mubr.bf16.vlgmr.msra.gmra.mxu1 %v18904_v21  ;;  %10491 = vmatpush2.bf16.msra.mxu0 %v18357_v1  ;;  %v18410_v51 = vld [vmem:[#allocation2 + $0x2284] ss:$112 sps:$4 sm:$0xff]   ;;  %v18402_v25 = vld [vmem:[#allocation2 + $0x1b80] ss:$112 sps:$4 sm:$0xff]  }
 0x510   :  { %10516 = vmatpush1.bf16.msra.mxu1 %v18354_v37  ;;  %10492 = vmatprep.subr.bf16.mxu0 %v18365_v30  ;;  %v18407_v30 = vld [vmem:[#allocation2 + $0x1aa4] ss:$112 sps:$4 sm:$0xff]  }
 0x511   :  { %10517 = vmatprep.subr.bf16.mxu1 %v18362_v7  ;;  %10547 = vmatprep.mubr.bf16.mxu1 %v18870_v52  ;;  %v18408_v7 = vld [vmem:[#allocation2 + $0x2280] ss:$112 sps:$4 sm:$0xff]  }
 0x513   :  { %10493 = vmatpush2.bf16.msra.mxu0 %v18363_v10 }
 0x514   :  { %10518 = vmatpush1.bf16.msra.mxu1 %v18360_v45  ;;  %10494 = vmatprep.subr.bf16.mxu0 %v18371_v5  ;;  %v18416_v45 = vld [vmem:[#allocation2 + $0x21a4] ss:$112 sps:$4 sm:$0xff]   ;;  %v18414_v5 = vld [vmem:[#allocation2 + $0x21a0] ss:$112 sps:$4 sm:$0xff]  }
 0x515   :  { %10519 = vmatprep.subr.bf16.mxu1 %v18368_v23  ;;  %v18405_v23 = vld [vmem:[#allocation2 + $0x1aa0] ss:$112 sps:$4 sm:$0xff]  }
 0x517   :  { %10495 = vmatpush2.bf16.msra.mxu0 %v18369_v31  ;;  %v18422_v31 = vld [vmem:[#allocation2 + $0x20c4] ss:$112 sps:$4 sm:$0xff]  }
 0x518   :  { %10520 = vmatpush1.bf16.msra.mxu1 %v18366_v63  ;;  %10496 = vmatprep.subr.bf16.mxu0 %v18377_v15  ;;  %v18413_v63 = vld [vmem:[#allocation2 + $0x19c4] ss:$112 sps:$4 sm:$0xff]   ;;  %v18420_v15 = vld [vmem:[#allocation2 + $0x20c0] ss:$112 sps:$4 sm:$0xff]  }
 0x519   :  { %10521 = vmatprep.subr.bf16.mxu1 %v18374_v20  ;;  %v18411_v20 = vld [vmem:[#allocation2 + $0x19c0] ss:$112 sps:$4 sm:$0xff]  }
 0x51b   :  { %10497 = vmatpush2.bf16.msra.mxu0 %v18375_v18  ;;  %v18428_v18 = vld [vmem:[#allocation2 + $0x1fe4] ss:$112 sps:$4 sm:$0xff]  }
 0x51c   :  { %10522 = vmatpush1.bf16.msra.mxu1 %v18372_v12  ;;  %10498 = vmatprep.subr.bf16.mxu0 %v18383_v2  ;;  %v18419_v12 = vld [vmem:[#allocation2 + $0x18e4] ss:$112 sps:$4 sm:$0xff]   ;;  %v18426_v2 = vld [vmem:[#allocation2 + $0x1fe0] ss:$112 sps:$4 sm:$0xff]  }
 0x51d   :  { %10523 = vmatprep.subr.bf16.mxu1 %v18380_v28  ;;  %v18417_v28 = vld [vmem:[#allocation2 + $0x18e0] ss:$112 sps:$4 sm:$0xff]  }
 0x51f   :  { %10499 = vmatpush2.bf16.msra.mxu0 %v18381_v55  ;;  %v18434_v55 = vld [vmem:[#allocation2 + $0x1f04] ss:$112 sps:$4 sm:$0xff]  }
 0x520   :  { %10524 = vmatpush1.bf16.msra.mxu1 %v18378_v35  ;;  %10500 = vmatprep.subr.bf16.mxu0 %v18389_v33  ;;  %v18425_v35 = vld [vmem:[#allocation2 + $0x1804] ss:$112 sps:$4 sm:$0xff]   ;;  %v18432_v33 = vld [vmem:[#allocation2 + $0x1f00] ss:$112 sps:$4 sm:$0xff]  }
 0x521   :  { %10525 = vmatprep.subr.bf16.mxu1 %v18386_v56  ;;  %v18423_v56 = vld [vmem:[#allocation2 + $0x1800] ss:$112 sps:$4 sm:$0xff]  }
 0x523   :  { %10501 = vmatpush2.bf16.msra.mxu0 %v18387_v32  ;;  %v18440_v32 = vld [vmem:[#allocation2 + $0x1e24] ss:$112 sps:$4 sm:$0xff]  }
 0x524   :  { %10526 = vmatpush1.bf16.msra.mxu1 %v18384_v22  ;;  %10502 = vmatprep.subr.bf16.mxu0 %v18395_v4  ;;  %v18431_v22 = vld [vmem:[#allocation2 + $0x1724] ss:$112 sps:$4 sm:$0xff]   ;;  %v1585_v4 = vrot.slane %v19187_v17, %v18986_v48 }
 0x525   :  { %10527 = vmatprep.subr.bf16.mxu1 %v18392_v34  ;;  %v18429_v34 = vld [vmem:[#allocation2 + $0x1720] ss:$112 sps:$4 sm:$0xff]  }
 0x526   :  { %v19241_v46 = vpop.f32.mrf.mxu0 }
 0x527   :  { %10503 = vmatpush2.bf16.msra.mxu0 %v18393_v47  ;;  %v18437_v47 = vld [vmem:[#allocation2 + $0x1644] ss:$112 sps:$4 sm:$0xff]  }
 0x528   :  { %10528 = vmatpush1.bf16.msra.mxu1 %v18390_v44  ;;  %10504 = vmatprep.subr.bf16.mxu0 %v18401_v53  ;;  %v19243_v37 = vpop.f32.mrf.mxu0  ;;  %v18438_v44 = vld [vmem:[#allocation2 + $0x1e20] ss:$112 sps:$4 sm:$0xff]   ;;  %v1589_v53 = vrot.slane %v19187_v17, %v18989_v54 }
 0x529   :  { %10529 = vmatprep.subr.bf16.mxu1 %v18398_v39  ;;  %v18446_v39 = vld [vmem:[#allocation2 + $0x1d44] ss:$112 sps:$4 sm:$0xff]  }
 0x52a   :  { %v10184_v1 = vpop.f32.mrf.mxu0 }
 0x52b   :  { %10505 = vmatpush2.bf16.msra.mxu0 %v18399_v58  ;;  %v18435_v58 = vld [vmem:[#allocation2 + $0x1640] ss:$112 sps:$4 sm:$0xff]   ;;  %v18449_v1 = vld [vmem:[#allocation2 + $0x1c64] ss:$112 sps:$4 sm:$0xff]  }
 0x52c   :  { %10530 = vmatpush1.bf16.msra.mxu1 %v18396_v27  ;;  %10556 = vmatprep.subr.bf16.mxu0 %v18410_v51  ;;  %v10185_v10 = vpop.f32.mrf.mxu0  ;;  %v10181_v27 = vadd.f32 %v19241_v46, %v1585_v4  ;;  %v18443_v51 = vld [vmem:[#allocation2 + $0x1564] ss:$112 sps:$4 sm:$0xff]   ;;  %v18462_v4 = vld [vmem:[#allocation2 + $0x5a8] ss:$112 sps:$4 sm:$0xff]  }
 0x52d   :  { %10531 = vmatprep.subr.bf16.mxu1 %v18404_v24  ;;  %v18444_v24 = vld [vmem:[#allocation2 + $0x1d40] ss:$112 sps:$4 sm:$0xff]   ;;  %v18452_v46 = vld [vmem:[#allocation2 + $0x2a64] ss:$112 sps:$4 sm:$0xff]  }
 0x52e   :  { %10507 = vmatmul.mubr.bf16.vlgmr.msra.gmra.mxu0 %v18880_v8  ;;  %v18447_v10 = vld [vmem:[#allocation2 + $0x1c60] ss:$112 sps:$4 sm:$0xff]  }
 0x52f   :  { %10557 = vmatpush1.bf16.msra.mxu0 %v18408_v7  ;;  %10588 = vmatprep.mubr.bf16.mxu0 %v18898_v36 }
 0x530   :  { %10532 = vmatpush2.bf16.msra.mxu1 %v18402_v25  ;;  %10558 = vmatprep.subr.bf16.mxu0 %v18416_v45  ;;  %v10183_v25 = vadd.f32 %v19243_v37, %v1589_v53  ;;  %v18441_v45 = vld [vmem:[#allocation2 + $0x1560] ss:$112 sps:$4 sm:$0xff]   ;;  %v18468_v53 = vld [vmem:[#allocation2 + $0x4c8] ss:$112 sps:$4 sm:$0xff]  }
 0x531   :  { %10533 = vmatprep.subr.bf16.mxu1 %v18407_v30 }
 0x533   :  { %10559 = vmatpush1.bf16.msra.mxu0 %v18414_v5 }
 0x534   :  { %10534 = vmatpush2.bf16.msra.mxu1 %v18405_v23  ;;  %10560 = vmatprep.subr.bf16.mxu0 %v18422_v31  ;;  %v18455_v23 = vld [vmem:[#allocation2 + $0x2984] ss:$112 sps:$4 sm:$0xff]   ;;  %v18450_v31 = vld [vmem:[#allocation2 + $0x2a60] ss:$112 sps:$4 sm:$0xff]  }
 0x535   :  { %10535 = vmatprep.subr.bf16.mxu1 %v18413_v63 }
 0x537   :  { %10561 = vmatpush1.bf16.msra.mxu0 %v18420_v15  ;;  %v18458_v15 = vld [vmem:[#allocation2 + $0x68c] ss:$112 sps:$4 sm:$0xff]  }
 0x538   :  { %10536 = vmatpush2.bf16.msra.mxu1 %v18411_v20  ;;  %10562 = vmatprep.subr.bf16.mxu0 %v18428_v18  ;;  %v18453_v20 = vld [vmem:[#allocation2 + $0x2980] ss:$112 sps:$4 sm:$0xff]  }
 0x539   :  { %10537 = vmatprep.subr.bf16.mxu1 %v18419_v12  ;;  %v18461_v12 = vld [vmem:[#allocation2 + $0x28a4] ss:$112 sps:$4 sm:$0xff]  }
 0x53b   :  { %10563 = vmatpush1.bf16.msra.mxu0 %v18426_v2 }
 0x53c   :  { %10538 = vmatpush2.bf16.msra.mxu1 %v18417_v28  ;;  %10564 = vmatprep.subr.bf16.mxu0 %v18434_v55  ;;  %v18459_v28 = vld [vmem:[#allocation2 + $0x28a0] ss:$112 sps:$4 sm:$0xff]  }
 0x53d   :  { %10539 = vmatprep.subr.bf16.mxu1 %v18425_v35  ;;  %v18467_v35 = vld [vmem:[#allocation2 + $0x27c4] ss:$112 sps:$4 sm:$0xff]  }
 0x53f   :  { %10565 = vmatpush1.bf16.msra.mxu0 %v18432_v33  ;;  %v18465_v33 = vld [vmem:[#allocation2 + $0x27c0] ss:$112 sps:$4 sm:$0xff]  }
 0x540   :  { %10540 = vmatpush2.bf16.msra.mxu1 %v18423_v56  ;;  %10566 = vmatprep.subr.bf16.mxu0 %v18440_v32  ;;  %v18456_v56 = vld [vmem:[#allocation2 + $0x688] ss:$112 sps:$4 sm:$0xff]   ;;  %v18464_v32 = vld [vmem:[#allocation2 + $0x5ac] ss:$112 sps:$4 sm:$0xff]  }
 0x541   :  { %10541 = vmatprep.subr.bf16.mxu1 %v18431_v22 }
 0x543   :  { %10567 = vmatpush1.bf16.msra.mxu0 %v18438_v44  ;;  %v18471_v44 = vld [vmem:[#allocation2 + $0x26e0] ss:$112 sps:$4 sm:$0xff]  }
 0x544   :  { %10542 = vmatpush2.bf16.msra.mxu1 %v18429_v34  ;;  %10568 = vmatprep.subr.bf16.mxu0 %v18446_v39  ;;  %v18473_v34 = vld [vmem:[#allocation2 + $0x26e4] ss:$112 sps:$4 sm:$0xff]  }
 0x545   :  { %10543 = vmatprep.subr.bf16.mxu1 %v18437_v47  ;;  %v18470_v47 = vld [vmem:[#allocation2 + $0x4cc] ss:$112 sps:$4 sm:$0xff]   ;;  %v18479_v39 = vld [vmem:[#allocation2 + $0x2604] ss:$112 sps:$4 sm:$0xff]  }
 0x547   :  { %v10221_v7 = vpop.f32.mrf.mxu1  ;;  %10569 = vmatpush1.bf16.msra.mxu0 %v18444_v24  ;;  %v18485_v24 = vld [vmem:[#allocation2 + $0x2524] ss:$112 sps:$4 sm:$0xff]  }
 0x548   :  { %v19253_v30 = vadd.f32 %v10221_v7, %v10181_v27  ;;  %10544 = vmatpush2.bf16.msra.mxu1 %v18435_v58  ;;  %10570 = vmatprep.subr.bf16.mxu0 %v18449_v1  ;;  %v18477_v27 = vld [vmem:[#allocation2 + $0x2600] ss:$112 sps:$4 sm:$0xff]   ;;  %v18476_v58 = vld [vmem:[#allocation2 + $0x3ec] ss:$112 sps:$4 sm:$0xff]   ;;  %v18491_v7 = vld [vmem:[#allocation2 + $0x2444] ss:$112 sps:$4 sm:$0xff]  }
 0x549   :  { %v10223_v17 = vpop.f32.mrf.mxu1  ;;  %10545 = vmatprep.subr.bf16.mxu1 %v18443_v51  ;;  %v18474_v51 = vld [vmem:[#allocation2 + $0x3e8] ss:$112 sps:$4 sm:$0xff]   ;;  %v18483_v1 = vld [vmem:[#allocation2 + $0x2520] ss:$112 sps:$4 sm:$0xff]  }
 0x54a   :  { %v19255_v5 = vadd.f32 %v10223_v17, %v10183_v25  ;;  %v18482_v25 = vld [vmem:[#allocation2 + $0x30c] ss:$112 sps:$4 sm:$0xff]   ;;  %v18497_v17 = vld [vmem:[#allocation2 + $0x2364] ss:$112 sps:$4 sm:$0xff]  }
 0x54b   :  { %v10225_v63 = vpop.f32.mrf.mxu1  ;;  %10571 = vmatpush1.bf16.msra.mxu0 %v18447_v10  ;;  %v18488_v10 = vld [vmem:[#allocation2 + $0x22c] ss:$112 sps:$4 sm:$0xff]  }
 0x54c   :  { %10546 = vmatpush2.bf16.msra.mxu1 %v18441_v45  ;;  %10572 = vmatprep.subr.bf16.mxu0 %v18455_v23  ;;  %v18480_v45 = vld [vmem:[#allocation2 + $0x308] ss:$112 sps:$4 sm:$0xff]  }
 0x54d   :  { %v10226_v37 = vpop.f32.mrf.mxu1  ;;  %10611 = vmatprep.subr.bf16.mxu1 %v18452_v46  ;;  %v18486_v23 = vld [vmem:[#allocation2 + $0x228] ss:$112 sps:$4 sm:$0xff]  }
 0x54e   :  { %v18494_v37 = vld [vmem:[#allocation2 + $0x14c] ss:$112 sps:$4 sm:$0xff]  }
 0x54f   :  { %10548 = vmatmul.mubr.bf16.vlgmr.msra.gmra.mxu1 %v18882_v9  ;;  %v10303_v18 = vpop.f32.mrf.mxu1  ;;  %10573 = vmatpush2.bf16.msra.mxu0 %v18453_v20 }
 0x550   :  { %10612 = vmatpush1.bf16.msra.mxu1 %v18450_v31  ;;  %10629 = vmatprep.mubr.bf16.mxu1 %v18791_v16  ;;  %v18495_v31 = vld [vmem:[#allocation2 + $0x2360] ss:$112 sps:$4 sm:$0xff]  }
 0x551   :  { %v10305_v2 = vpop.f32.mrf.mxu1  ;;  %10638 = vmatprep.subr.bf16.mxu1 %v18458_v15  ;;  %10574 = vmatprep.subr.bf16.mxu0 %v18461_v12  ;;  %v18503_v15 = vld [vmem:[#allocation2 + $0x148c] ss:$112 sps:$4 sm:$0xff]  }
 0x553   :  { %v10307_v55 = vpop.f32.mrf.mxu1  ;;  %10575 = vmatpush2.bf16.msra.mxu0 %v18459_v28 }
 0x554   :  { %10576 = vmatprep.subr.bf16.mxu0 %v18467_v35 }
 0x555   :  { %v10308_v22 = vpop.f32.mrf.mxu1 }
 0x556   :  { %v18500_v22 = vld [vmem:[#allocation2 + $0x6c] ss:$112 sps:$4 sm:$0xff]  }
 0x557   :  { %15958 = vmatmul.mubr.msk.bf16.vlgmr.msra.gmra.mxu1 %vm8502_vm0, %v18890_v19  ;;  %10577 = vmatpush2.bf16.msra.mxu0 %v18465_v33  ;;  %v18501_v33 = vld [vmem:[#allocation2 + $0x1488] ss:$112 sps:$4 sm:$0xff]  }
 0x558   :  { %10639 = vmatpush1.bf16.msra.mxu1 %v18456_v56  ;;  %10578 = vmatprep.subr.bf16.mxu0 %v18473_v34  ;;  %v18492_v56 = vld [vmem:[#allocation2 + $0x148] ss:$112 sps:$4 sm:$0xff]   ;;  %v10816_v34 = vmax.f32 %v19173_v41, 0.0 }
 0x559   :  { %10640 = vmatprep.subr.bf16.mxu1 %v18464_v32  ;;  %10670 = vmatprep.mubr.bf16.mxu1 %v18865_v49  ;;  %v18489_v49 = vld [vmem:[#allocation2 + $0x2440] ss:$112 sps:$4 sm:$0xff]   ;;  %v18513_v41 = vld [vmem:[#allocation2 + $0x12c8] ss:$112 sps:$4 sm:$0xff]  }
 0x55b   :  { %10579 = vmatpush2.bf16.msra.mxu0 %v18471_v44  ;;  %v18498_v44 = vld [vmem:[#allocation2 + $0x68] ss:$112 sps:$4 sm:$0xff]  }
 0x55c   :  { %10641 = vmatpush1.bf16.msra.mxu1 %v18462_v4  ;;  %10580 = vmatprep.subr.bf16.mxu0 %v18479_v39 }
 0x55d   :  { %10642 = vmatprep.subr.bf16.mxu1 %v18470_v47  ;;  %v18515_v47 = vld [vmem:[#allocation2 + $0x12cc] ss:$112 sps:$4 sm:$0xff]  }
 0x55f   :  { %10581 = vmatpush2.bf16.msra.mxu0 %v18477_v27  ;;  %v18512_v27 = vld [vmem:[#allocation2 + $0xcac] ss:$112 sps:$4 sm:$0xff]  }
 0x560   :  { %10643 = vmatpush1.bf16.msra.mxu1 %v18468_v53  ;;  %10582 = vmatprep.subr.bf16.mxu0 %v18485_v24  ;;  %v18504_v53 = vld [vmem:[#allocation2 + $0xd88] ss:$112 sps:$4 sm:$0xff]  }
 0x561   :  { %10644 = vmatprep.subr.bf16.mxu1 %v18476_v58  ;;  %v18521_v58 = vld [vmem:[#allocation2 + $0x11ec] ss:$112 sps:$4 sm:$0xff]   ;;  %v18510_v24 = vld [vmem:[#allocation2 + $0xca8] ss:$112 sps:$4 sm:$0xff]  }
 0x563   :  { %10583 = vmatpush2.bf16.msra.mxu0 %v18483_v1  ;;  %v18518_v1 = vld [vmem:[#allocation2 + $0xbcc] ss:$112 sps:$4 sm:$0xff]  }
 0x564   :  { %10645 = vmatpush1.bf16.msra.mxu1 %v18474_v51  ;;  %10584 = vmatprep.subr.bf16.mxu0 %v18491_v7  ;;  %v18519_v51 = vld [vmem:[#allocation2 + $0x11e8] ss:$112 sps:$4 sm:$0xff]   ;;  %v18524_v7 = vld [vmem:[#allocation2 + $0xaec] ss:$112 sps:$4 sm:$0xff]  }
 0x565   :  { %10646 = vmatprep.subr.bf16.mxu1 %v18482_v25  ;;  %v18527_v25 = vld [vmem:[#allocation2 + $0x110c] ss:$112 sps:$4 sm:$0xff]  }
 0x566   :  { %v10262_v46 = vpop.f32.mrf.mxu0 }
 0x567   :  { %v10263_v63 = vadd.f32 %v10262_v46, %v19253_v30  ;;  %10585 = vmatpush2.bf16.msra.mxu0 %v18489_v49  ;;  %v18509_v30 = vld [vmem:[#allocation2 + $0x13ac] ss:$112 sps:$4 sm:$0xff]   ;;  %v18522_v49 = vld [vmem:[#allocation2 + $0xae8] ss:$112 sps:$4 sm:$0xff]  }
 0x568   :  { %10647 = vmatpush1.bf16.msra.mxu1 %v18480_v45  ;;  %v10264_v20 = vpop.f32.mrf.mxu0  ;;  %10586 = vmatprep.subr.bf16.mxu0 %v18497_v17  ;;  %v18533_v45 = vld [vmem:[#allocation2 + $0x102c] ss:$112 sps:$4 sm:$0xff]  }
 0x569   :  { %10648 = vmatprep.subr.bf16.mxu1 %v18488_v10  ;;  %v19263_v12 = vadd.f32 %v10303_v18, %v10263_v63  ;;  %v10265_v28 = vadd.f32 %v10264_v20, %v19255_v5  ;;  %v18507_v5 = vld [vmem:[#allocation2 + $0x13a8] ss:$112 sps:$4 sm:$0xff]   ;;  %v18530_v17 = vld [vmem:[#allocation2 + $0xa0c] ss:$112 sps:$4 sm:$0xff]  }
 0x56a   :  { %v10266_v35 = vpop.f32.mrf.mxu0  ;;  %v18531_v10 = vld [vmem:[#allocation2 + $0x1028] ss:$112 sps:$4 sm:$0xff]   ;;  %v18539_v46 = vld [vmem:[#allocation2 + $0xf4c] ss:$112 sps:$4 sm:$0xff]  }
 0x56b   :  { %v10306_v55 = vadd.f32 %v10305_v2, %v10265_v28  ;;  %10587 = vmatpush2.bf16.msra.mxu0 %v18495_v31  ;;  %v18506_v2 = vld [vmem:[#allocation2 + $0xd8c] ss:$112 sps:$4 sm:$0xff]   ;;  %v18537_v63 = vld [vmem:[#allocation2 + $0xf48] ss:$112 sps:$4 sm:$0xff]  }
 0x56c   :  { %10649 = vmatpush1.bf16.msra.mxu1 %v18486_v23  ;;  %10679 = vmatprep.subr.bf16.mxu0 %v18503_v15  ;;  %v10267_v32 = vpop.f32.mrf.mxu0  ;;  %v18528_v23 = vld [vmem:[#allocation2 + $0xa08] ss:$112 sps:$4 sm:$0xff]   ;;  %v18536_v31 = vld [vmem:[#allocation2 + $0x92c] ss:$112 sps:$4 sm:$0xff]  }
 0x56d   :  { %10650 = vmatprep.subr.bf16.mxu1 %v18494_v37  ;;  %v10823_v4 = vmax.f32 %v10306_v55, 0.0  ;;  %v18545_v20 = vld [vmem:[#allocation2 + $0xe6c] ss:$112 sps:$4 sm:$0xff]   ;;  %v18534_v37 = vld [vmem:[#allocation2 + $0x928] ss:$112 sps:$4 sm:$0xff]  }
 0x56e   :  { %10589 = vmatmul.mubr.bf16.vlgmr.msra.gmra.mxu0 %v18904_v21  ;;  %v18543_v15 = vld [vmem:[#allocation2 + $0xe68] ss:$112 sps:$4 sm:$0xff]   ;;  %v18542_v28 = vld [vmem:[#allocation2 + $0x84c] ss:$112 sps:$4 sm:$0xff]  }
 0x56f   :  { %v10837_v18 = vmax.f32 %v10816_v34, %v10823_v4  ;;  %10680 = vmatpush1.bf16.msra.mxu0 %v18501_v33  ;;  %10711 = vmatprep.mubr.bf16.mxu0 %v18870_v52  ;;  %v18525_v52 = vld [vmem:[#allocation2 + $0x1108] ss:$112 sps:$4 sm:$0xff]   ;;  %v18551_v35 = vld [vmem:[#allocation2 + $0x1b8c] ss:$112 sps:$4 sm:$0xff]  }
 0x570   :  { %10651 = vmatpush1.bf16.msra.mxu1 %v18492_v56  ;;  %10681 = vmatprep.subr.bf16.mxu0 %v18509_v30  ;;  %v18540_v55 = vld [vmem:[#allocation2 + $0x848] ss:$112 sps:$4 sm:$0xff]   ;;  %v18548_v33 = vld [vmem:[#allocation2 + $0x76c] ss:$112 sps:$4 sm:$0xff]  }
 0x571   :  { %10652 = vmatprep.subr.bf16.mxu1 %v18500_v22  ;;  %v19269_v39 = vmax.f32 %v19042_v43, %v10837_v18  ;;  %v18516_v43 = vld [vmem:[#allocation2 + $0xbc8] ss:$112 sps:$4 sm:$0xff]   ;;  %v18557_v22 = vld [vmem:[#allocation2 + $0x1aac] ss:$112 sps:$4 sm:$0xff]  }
 0x572   :  { %v18549_v56 = vld [vmem:[#allocation2 + $0x1b88] ss:$112 sps:$4 sm:$0xff]   ;;  %v18554_v18 = vld [vmem:[#allocation2 + $0x228c] ss:$112 sps:$4 sm:$0xff]  }
 0x573   :  { %10682 = vmatpush1.bf16.msra.mxu0 %v18507_v5  ;;  %v18546_v32 = vld [vmem:[#allocation2 + $0x768] ss:$112 sps:$4 sm:$0xff]  }
 0x574   :  { %10653 = vmatpush1.bf16.msra.mxu1 %v18498_v44  ;;  %10683 = vmatprep.subr.bf16.mxu0 %v18515_v47  ;;  %v18555_v34 = vld [vmem:[#allocation2 + $0x1aa8] ss:$112 sps:$4 sm:$0xff]   ;;  %v18563_v44 = vld [vmem:[#allocation2 + $0x19cc] ss:$112 sps:$4 sm:$0xff]  }
 0x575   :  { %10654 = vmatprep.subr.bf16.mxu1 %v18506_v2  ;;  %v18552_v2 = vld [vmem:[#allocation2 + $0x2288] ss:$112 sps:$4 sm:$0xff]  }
 0x576   :  { %v18561_v47 = vld [vmem:[#allocation2 + $0x19c8] ss:$112 sps:$4 sm:$0xff]  }
 0x577   :  { %10684 = vmatpush1.bf16.msra.mxu0 %v18513_v41  ;;  %v18560_v41 = vld [vmem:[#allocation2 + $0x21ac] ss:$112 sps:$4 sm:$0xff]  }
 0x578   :  { %10655 = vmatpush2.bf16.msra.mxu1 %v18504_v53  ;;  %10685 = vmatprep.subr.bf16.mxu0 %v18521_v58  ;;  %v18558_v58 = vld [vmem:[#allocation2 + $0x21a8] ss:$112 sps:$4 sm:$0xff]  }
 0x579   :  { %10656 = vmatprep.subr.bf16.mxu1 %v18512_v27  ;;  %v18569_v27 = vld [vmem:[#allocation2 + $0x18ec] ss:$112 sps:$4 sm:$0xff]  }
 0x57b   :  { %10686 = vmatpush1.bf16.msra.mxu0 %v18519_v51  ;;  %v18566_v51 = vld [vmem:[#allocation2 + $0x20cc] ss:$112 sps:$4 sm:$0xff]  }
 0x57c   :  { %10657 = vmatpush2.bf16.msra.mxu1 %v18510_v24  ;;  %10687 = vmatprep.subr.bf16.mxu0 %v18527_v25  ;;  %v18567_v24 = vld [vmem:[#allocation2 + $0x18e8] ss:$112 sps:$4 sm:$0xff]  }
 0x57d   :  { %10658 = vmatprep.subr.bf16.mxu1 %v18518_v1  ;;  %v18575_v1 = vld [vmem:[#allocation2 + $0x180c] ss:$112 sps:$4 sm:$0xff]   ;;  %v18564_v25 = vld [vmem:[#allocation2 + $0x20c8] ss:$112 sps:$4 sm:$0xff]  }
 0x57f   :  { %10688 = vmatpush1.bf16.msra.mxu0 %v18525_v52  ;;  %v18572_v52 = vld [vmem:[#allocation2 + $0x1fec] ss:$112 sps:$4 sm:$0xff]  }
 0x580   :  { %10659 = vmatpush2.bf16.msra.mxu1 %v18516_v43  ;;  %10689 = vmatprep.subr.bf16.mxu0 %v18533_v45  ;;  %v18573_v43 = vld [vmem:[#allocation2 + $0x1808] ss:$112 sps:$4 sm:$0xff]  }
 0x581   :  { %10660 = vmatprep.subr.bf16.mxu1 %v18524_v7  ;;  %v18581_v7 = vld [vmem:[#allocation2 + $0x172c] ss:$112 sps:$4 sm:$0xff]   ;;  %v18579_v45 = vld [vmem:[#allocation2 + $0x1728] ss:$112 sps:$4 sm:$0xff]  }
 0x583   :  { %10690 = vmatpush1.bf16.msra.mxu0 %v18531_v10  ;;  %v18587_v10 = vld [vmem:[#allocation2 + $0x164c] ss:$112 sps:$4 sm:$0xff]  }
 0x584   :  { %10661 = vmatpush2.bf16.msra.mxu1 %v18522_v49  ;;  %10691 = vmatprep.subr.bf16.mxu0 %v18539_v46  ;;  %v18578_v49 = vld [vmem:[#allocation2 + $0x1f0c] ss:$112 sps:$4 sm:$0xff]   ;;  %v18576_v46 = vld [vmem:[#allocation2 + $0x1f08] ss:$112 sps:$4 sm:$0xff]  }
 0x585   :  { %10662 = vmatprep.subr.bf16.mxu1 %v18530_v17  ;;  %v19276_v17 = vld [vmem:[#allocation11 + $0x10] sm:$0xff] }
 0x587   :  { %10692 = vmatpush1.bf16.msra.mxu0 %v18537_v63  ;;  %v18584_v63 = vld [vmem:[#allocation2 + $0x1e2c] ss:$112 sps:$4 sm:$0xff]  }
 0x588   :  { %10663 = vmatpush2.bf16.msra.mxu1 %v18528_v23  ;;  %10693 = vmatprep.subr.bf16.mxu0 %v18545_v20  ;;  %v18585_v23 = vld [vmem:[#allocation2 + $0x1648] ss:$112 sps:$4 sm:$0xff]  }
 0x589   :  { %10664 = vmatprep.subr.bf16.mxu1 %v18536_v31  ;;  %v18593_v31 = vld [vmem:[#allocation2 + $0x156c] ss:$112 sps:$4 sm:$0xff]  }
 0x58b   :  { %10694 = vmatpush1.bf16.msra.mxu0 %v18543_v15  ;;  %v18582_v15 = vld [vmem:[#allocation2 + $0x1e28] ss:$112 sps:$4 sm:$0xff]  }
 0x58c   :  { %10665 = vmatpush2.bf16.msra.mxu1 %v18534_v37  ;;  %10695 = vmatprep.subr.bf16.mxu0 %v18551_v35 }
 0x58d   :  { %10666 = vmatprep.subr.bf16.mxu1 %v18542_v28  ;;  %v18591_v28 = vld [vmem:[#allocation2 + $0x1568] ss:$112 sps:$4 sm:$0xff]  }
 0x58f   :  { %v19272_v30 = vpop.f32.mrf.mxu1  ;;  %10696 = vmatpush2.bf16.msra.mxu0 %v18549_v56  ;;  %v18602_v56 = vld [vmem:[#allocation2 + $0x2a6c] ss:$112 sps:$4 sm:$0xff]  }
 0x590   :  { %10667 = vmatpush2.bf16.msra.mxu1 %v18540_v55  ;;  %10697 = vmatprep.subr.bf16.mxu0 %v18557_v22  ;;  %v18590_v55 = vld [vmem:[#allocation2 + $0x1d4c] ss:$112 sps:$4 sm:$0xff]   ;;  %v10914_v22 = vld [vmem:[#allocation5 + $0x1c0] sm:$0xff] }
 0x591   :  { %v10346_v4 = vpop.f32.mrf.mxu1  ;;  %10668 = vmatprep.subr.bf16.mxu1 %v18548_v33 }
 0x593   :  { %v10348_v5 = vpop.f32.mrf.mxu1  ;;  %10698 = vmatpush2.bf16.msra.mxu0 %v18555_v34 }
 0x594   :  { %10669 = vmatpush2.bf16.msra.mxu1 %v18546_v32  ;;  %10699 = vmatprep.subr.bf16.mxu0 %v18563_v44  ;;  %v10918_v32 = vld [vmem:[#allocation5 + $0x1e0] sm:$0xff]  ;;  %v18600_v44 = vld [vmem:[#allocation2 + $0x2a68] ss:$112 sps:$4 sm:$0xff]  }
 0x595   :  { %v10349_v53 = vpop.f32.mrf.mxu1  ;;  %10720 = vmatprep.subr.bf16.mxu1 %v18554_v18  ;;  %v18588_v18 = vld [vmem:[#allocation2 + $0x1d48] ss:$112 sps:$4 sm:$0xff]  }
 0x596   :  { %v18594_v53 = vld [vmem:[#allocation2 + $0x1c68] ss:$112 sps:$4 sm:$0xff]  }
 0x597   :  { %10671 = vmatmul.mubr.bf16.vlgmr.msra.gmra.mxu1 %v18880_v8  ;;  %10700 = vmatpush2.bf16.msra.mxu0 %v18561_v47  ;;  %v18570_v8 = vld [vmem:[#allocation2 + $0x1fe8] ss:$112 sps:$4 sm:$0xff]  }
 0x598   :  { %10721 = vmatpush1.bf16.msra.mxu1 %v18552_v2  ;;  %10701 = vmatprep.subr.bf16.mxu0 %v18569_v27  ;;  %v16017_v2 = vcombine.high %v10914_v22, %v10918_v32 }
 0x599   :  { %10722 = vmatprep.subr.bf16.mxu1 %v18560_v41  ;;  %10752 = vmatprep.mubr.bf16.mxu1 %v18898_v36  ;;  %v1597_v36 = vrot.slane %v19276_v17, %v19028_v60  ;;  %v18599_v41 = vld [vmem:[#allocation2 + $0x298c] ss:$112 sps:$4 sm:$0xff]  }
 0x59b   :  { %10702 = vmatpush2.bf16.msra.mxu0 %v18567_v24  ;;  %v10347_v37 = vadd.f32 %v10346_v4, %v1597_v36  ;;  %v18596_v4 = vld [vmem:[#allocation2 + $0x1c6c] ss:$112 sps:$4 sm:$0xff]   ;;  %v10910_v24 = vld [vmem:[#allocation5 + $0x1a0] sm:$0xff] }
 0x59c   :  { %10723 = vmatpush1.bf16.msra.mxu1 %v18558_v58  ;;  %10703 = vmatprep.subr.bf16.mxu0 %v18575_v1  ;;  %v10906_v58 = vld [vmem:[#allocation5 + $0x180] sm:$0xff]  ;;  %v18597_v1 = vld [vmem:[#allocation2 + $0x2988] ss:$112 sps:$4 sm:$0xff]  }
 0x59d   :  { %10724 = vmatprep.subr.bf16.mxu1 %v18566_v51 }
 0x59f   :  { %10704 = vmatpush2.bf16.msra.mxu0 %v18573_v43  ;;  %v16009_v43 = vcombine.high %v10906_v58, %v10910_v24 }
 0x5a0   :  { %10725 = vmatpush1.bf16.msra.mxu1 %v18564_v25  ;;  %10705 = vmatprep.subr.bf16.mxu0 %v18581_v7  ;;  %v16016_v25 = vcombine.low %v10914_v22, %v10918_v32  ;;  %v10898_v7 = vld [vmem:[#allocation5 + $0x140] sm:$0xff] }
 0x5a1   :  { %10726 = vmatprep.subr.bf16.mxu1 %v18572_v52  ;;  %v10874_v32 = vld [vmem:[#allocation5 + $0x80] sm:$0xff] }
 0x5a3   :  { %10706 = vmatpush2.bf16.msra.mxu0 %v18579_v45  ;;  %v18603_v45 = vld [vmem:[#allocation2 + $0x28a8] ss:$112 sps:$4 sm:$0xff]  }
 0x5a4   :  { %10727 = vmatpush1.bf16.msra.mxu1 %v18570_v8  ;;  %10707 = vmatprep.subr.bf16.mxu0 %v18587_v10  ;;  %v10902_v8 = vld [vmem:[#allocation5 + $0x160] sm:$0xff]  ;;  %v18608_v10 = vld [vmem:[#allocation2 + $0x27cc] ss:$112 sps:$4 sm:$0xff]  }
 0x5a5   :  { %10728 = vmatprep.subr.bf16.mxu1 %v18578_v49  ;;  %v16008_v49 = vcombine.low %v10906_v58, %v10910_v24  ;;  %v16001_v36 = vcombine.high %v10898_v7, %v10902_v8  ;;  %v18615_v58 = vld [vmem:[#allocation2 + $0x2528] ss:$112 sps:$4 sm:$0xff]  }
 0x5a6   :  { %v19280_v20 = vpop.f32.mrf.mxu0 }
 0x5a7   :  { %10708 = vmatpush2.bf16.msra.mxu0 %v18585_v23  ;;  %v10894_v23 = vld [vmem:[#allocation5 + $0x120] sm:$0xff] }
 0x5a8   :  { %10729 = vmatpush1.bf16.msra.mxu1 %v18576_v46  ;;  %v10387_v35 = vpop.f32.mrf.mxu0  ;;  %10709 = vmatprep.subr.bf16.mxu0 %v18593_v31  ;;  %v10890_v46 = vld [vmem:[#allocation5 + $0x100] sm:$0xff]  ;;  %v16000_v31 = vcombine.low %v10898_v7, %v10902_v8  ;;  %v18623_v8 = vld [vmem:[#allocation2 + $0x236c] ss:$112 sps:$4 sm:$0xff]  }
 0x5a9   :  { %10730 = vmatprep.subr.bf16.mxu1 %v18584_v63  ;;  %v19282_v33 = vadd.f32 %v10387_v35, %v10347_v37  ;;  %v18606_v63 = vld [vmem:[#allocation2 + $0x27c8] ss:$112 sps:$4 sm:$0xff]   ;;  %v18611_v37 = vld [vmem:[#allocation2 + $0x26ec] ss:$112 sps:$4 sm:$0xff]  }
 0x5aa   :  { %v10389_v34 = vpop.f32.mrf.mxu0  ;;  %v18609_v35 = vld [vmem:[#allocation2 + $0x26e8] ss:$112 sps:$4 sm:$0xff]  }
 0x5ab   :  { %10710 = vmatpush2.bf16.msra.mxu0 %v18591_v28  ;;  %v10882_v28 = vld [vmem:[#allocation5 + $0xc0] sm:$0xff] }
 0x5ac   :  { %10731 = vmatpush1.bf16.msra.mxu1 %v18582_v15  ;;  %10775 = vmatprep.subr.bf16.mxu0 %v18602_v56  ;;  %v10390_v5 = vpop.f32.mrf.mxu0  ;;  %v15993_v15 = vcombine.high %v10890_v46, %v10894_v23  ;;  %v18614_v56 = vld [vmem:[#allocation2 + $0x260c] ss:$112 sps:$4 sm:$0xff]   ;;  %v10878_v34 = vld [vmem:[#allocation5 + $0xa0] sm:$0xff] }
 0x5ad   :  { %10732 = vmatprep.subr.bf16.mxu1 %v18590_v55  ;;  %v15992_v55 = vcombine.low %v10890_v46, %v10894_v23  ;;  %v15977_v5 = vcombine.high %v10874_v32, %v10878_v34  ;;  %v15976_v24 = vcombine.low %v10874_v32, %v10878_v34  ;;  %v11046_v46 = vld [vmem:[#allocation5 + $0x5e0] sm:$0xff]  ;;  %v10817_v32 = vmax.f32 %v19177_v14, 0.0 }
 0x5ae   :  { %10712 = vmatmul.mubr.bf16.vlgmr.msra.gmra.mxu0 %v18882_v9  ;;  %v19285_v47 = vpop.f32.mrf.mxu0  ;;  %v18605_v9 = vld [vmem:[#allocation2 + $0x28ac] ss:$112 sps:$4 sm:$0xff]   ;;  %v11026_v14 = vld [vmem:[#allocation5 + $0x540] sm:$0xff] }
 0x5af   :  { %10776 = vmatpush1.bf16.msra.mxu0 %v18600_v44  ;;  %10793 = vmatprep.mubr.bf16.mxu0 %v18791_v16 }
 0x5b0   :  { %10733 = vmatpush1.bf16.msra.mxu1 %v18588_v18  ;;  %v19288_v27 = vpop.f32.mrf.mxu0  ;;  %13588 = vmatprep.subr.bf16.mxu0 %v16017_v2  ;;  %v18612_v18 = vld [vmem:[#allocation2 + $0x2608] ss:$112 sps:$4 sm:$0xff]   ;;  %v10866_v2 = vld [vmem:[#allocation5 + $0x40] sm:$0xff] }
 0x5b1   :  { %10734 = vmatprep.subr.bf16.mxu1 %v18596_v4  ;;  %v18617_v4 = vld [vmem:[#allocation2 + $0x252c] ss:$112 sps:$4 sm:$0xff]  }
 0x5b2   :  { %v10471_v51 = vpop.f32.mrf.mxu0 }
 0x5b3   :  { %v18620_v51 = vld [vmem:[#allocation2 + $0x244c] ss:$112 sps:$4 sm:$0xff]  }
 0x5b4   :  { %10735 = vmatpush1.bf16.msra.mxu1 %v18594_v53  ;;  %v10472_v52 = vpop.f32.mrf.mxu0  ;;  %v10870_v53 = vld [vmem:[#allocation5 + $0x60] sm:$0xff] }
 0x5b5   :  { %10736 = vmatprep.subr.bf16.mxu1 %v18599_v41  ;;  %v1593_v41 = vrot.slane %v19276_v17, %v19025_v59  ;;  %v18618_v52 = vld [vmem:[#allocation2 + $0x2448] ss:$112 sps:$4 sm:$0xff]   ;;  %v15968_v7 = vcombine.low %v10866_v2, %v10870_v53 }
 0x5b6   :  { %15959 = vmatmul.mubr.msk.bf16.vlgmr.msra.gmra.mxu0 %vm8502_vm0, %v18890_v19  ;;  %v10886_v19 = vld [vmem:[#allocation5 + $0xe0] sm:$0xff] }
 0x5b7   :  { %13589 = vmatpush1.bf16.msra.mxu0 %v16016_v25  ;;  %v15985_v22 = vcombine.high %v10882_v28, %v10886_v19  ;;  %v15984_v44 = vcombine.low %v10882_v28, %v10886_v19  ;;  %v10858_v25 = vld [vmem:[#allocation5] sm:$0xff] }
 0x5b8   :  { %10737 = vmatpush2.bf16.msra.mxu1 %v18597_v1  ;;  %13590 = vmatprep.subr.bf16.mxu0 %v16009_v43  ;;  %v15969_v1 = vcombine.high %v10866_v2, %v10870_v53  ;;  %v10345_v43 = vadd.f32 %v19272_v30, %v1593_v41  ;;  %v10970_v28 = vld [vmem:[#allocation5 + $0x380] sm:$0xff] }
 0x5b9   :  { %10738 = vmatprep.subr.bf16.mxu1 %v18605_v9  ;;  %v10862_v9 = vld [vmem:[#allocation5 + $0x20] sm:$0xff] }
 0x5ba   :  { %v15961_v17 = vcombine.high %v10858_v25, %v10862_v9  ;;  %v15960_v30 = vcombine.low %v10858_v25, %v10862_v9 }
 0x5bb   :  { %13591 = vmatpush1.bf16.msra.mxu0 %v16008_v49  ;;  %v10386_v49 = vadd.f32 %v19280_v20, %v10345_v43  ;;  %v10974_v20 = vld [vmem:[#allocation5 + $0x3a0] sm:$0xff] }
 0x5bc   :  { %10739 = vmatpush2.bf16.msra.mxu1 %v18603_v45  ;;  %13592 = vmatprep.subr.bf16.mxu0 %v16001_v36  ;;  %v10978_v45 = vld [vmem:[#allocation5 + $0x3c0] sm:$0xff]  ;;  %v16073_v53 = vcombine.high %v10970_v28, %v10974_v20  ;;  %v16072_v9 = vcombine.low %v10970_v28, %v10974_v20 }
 0x5bd   :  { %10740 = vmatprep.subr.bf16.mxu1 %v18608_v10  ;;  %v10982_v10 = vld [vmem:[#allocation5 + $0x3e0] sm:$0xff] }
 0x5be   :  { %v11042_v36 = vld [vmem:[#allocation5 + $0x5c0] sm:$0xff] }
 0x5bf   :  { %13593 = vmatpush1.bf16.msra.mxu0 %v16000_v31  ;;  %v18621_v31 = vld [vmem:[#allocation2 + $0x2368] ss:$112 sps:$4 sm:$0xff]   ;;  %v16145_v19 = vcombine.high %v11042_v36, %v11046_v46  ;;  %v10938_v28 = vld [vmem:[#allocation5 + $0x280] sm:$0xff] }
 0x5c0   :  { %10741 = vmatpush2.bf16.msra.mxu1 %v18606_v63  ;;  %13594 = vmatprep.subr.bf16.mxu0 %v15993_v15  ;;  %v16081_v15 = vcombine.high %v10978_v45, %v10982_v10  ;;  %v11006_v20 = vld [vmem:[#allocation5 + $0x4a0] sm:$0xff] }
 0x5c1   :  { %10742 = vmatprep.subr.bf16.mxu1 %v18611_v37 }
 0x5c3   :  { %13595 = vmatpush1.bf16.msra.mxu0 %v15992_v55 }
 0x5c4   :  { %10743 = vmatpush2.bf16.msra.mxu1 %v18609_v35  ;;  %13596 = vmatprep.subr.bf16.mxu0 %v15985_v22  ;;  %v11038_v22 = vld [vmem:[#allocation5 + $0x5a0] sm:$0xff] }
 0x5c5   :  { %10744 = vmatprep.subr.bf16.mxu1 %v18614_v56  ;;  %v11034_v56 = vld [vmem:[#allocation5 + $0x580] sm:$0xff] }
 0x5c7   :  { %13597 = vmatpush1.bf16.msra.mxu0 %v15984_v44 }
 0x5c8   :  { %10745 = vmatpush2.bf16.msra.mxu1 %v18612_v18  ;;  %13598 = vmatprep.subr.bf16.mxu0 %v15977_v5  ;;  %v16144_v5 = vcombine.low %v11042_v36, %v11046_v46  ;;  %v10946_v46 = vld [vmem:[#allocation5 + $0x2c0] sm:$0xff] }
 0x5c9   :  { %10746 = vmatprep.subr.bf16.mxu1 %v18617_v4  ;;  %v16080_v4 = vcombine.low %v10978_v45, %v10982_v10  ;;  %v11018_v45 = vld [vmem:[#allocation5 + $0x500] sm:$0xff] }
 0x5cb   :  { %13599 = vmatpush1.bf16.msra.mxu0 %v15976_v24  ;;  %v10962_v24 = vld [vmem:[#allocation5 + $0x340] sm:$0xff] }
 0x5cc   :  { %10747 = vmatpush2.bf16.msra.mxu1 %v18615_v58  ;;  %13600 = vmatprep.subr.bf16.mxu0 %v15969_v1  ;;  %v11030_v1 = vld [vmem:[#allocation5 + $0x560] sm:$0xff] }
 0x5cd   :  { %10748 = vmatprep.subr.bf16.mxu1 %v18620_v51  ;;  %v10966_v51 = vld [vmem:[#allocation5 + $0x360] sm:$0xff]  ;;  %v16128_v36 = vcombine.low %v11026_v14, %v11030_v1 }
 0x5ce   :  { %v16065_v43 = vcombine.high %v10962_v24, %v10966_v51 }
 0x5cf   :  { %v10426_v23 = vpop.f32.mrf.mxu1  ;;  %13601 = vmatpush1.bf16.msra.mxu0 %v15968_v7 }
 0x5d0   :  { %v10427_v63 = vadd.f32 %v10426_v23, %v10386_v49  ;;  %10749 = vmatpush2.bf16.msra.mxu1 %v18618_v52  ;;  %13602 = vmatprep.subr.bf16.mxu0 %v15961_v17  ;;  %v16136_v52 = vcombine.low %v11034_v56, %v11038_v22  ;;  %v10958_v17 = vld [vmem:[#allocation5 + $0x320] sm:$0xff] }
 0x5d1   :  { %v10428_v37 = vpop.f32.mrf.mxu1  ;;  %10750 = vmatprep.subr.bf16.mxu1 %v18623_v8  ;;  %v10954_v8 = vld [vmem:[#allocation5 + $0x300] sm:$0xff] }
 0x5d2   :  { %v10468_v35 = vadd.f32 %v19285_v47, %v10427_v63  ;;  %v10429_v55 = vadd.f32 %v10428_v37, %v19282_v33  ;;  %v16137_v47 = vcombine.high %v11034_v56, %v11038_v22  ;;  %v10818_v33 = vmax.f32 %v19205_v3, 0.0  ;;  %v11022_v49 = vld [vmem:[#allocation5 + $0x520] sm:$0xff] }
 0x5d3   :  { %v10430_v34 = vpop.f32.mrf.mxu1  ;;  %13603 = vmatpush1.bf16.msra.mxu0 %v15960_v30  ;;  %v16057_v10 = vcombine.high %v10954_v8, %v10958_v17  ;;  %v10950_v23 = vld [vmem:[#allocation5 + $0x2e0] sm:$0xff]  ;;  %v16056_v30 = vcombine.low %v10954_v8, %v10958_v17 }
 0x5d4   :  { %v10824_v18 = vmax.f32 %v10468_v35, 0.0  ;;  %v10470_v44 = vadd.f32 %v19288_v27, %v10429_v55  ;;  %10751 = vmatpush2.bf16.msra.mxu1 %v18621_v31  ;;  %13604 = vmatprep.subr.bf16.mxu0 %v16081_v15  ;;  %v11010_v63 = vld [vmem:[#allocation5 + $0x4c0] sm:$0xff]  ;;  %v16049_v37 = vcombine.high %v10946_v46, %v10950_v23  ;;  %v16120_v15 = vcombine.low %v11018_v45, %v11022_v49 }
 0x5d5   :  { %v10431_v2 = vpop.f32.mrf.mxu1  ;;  %13629 = vmatprep.subr.bf16.mxu1 %v16145_v19  ;;  %v11014_v31 = vld [vmem:[#allocation5 + $0x4e0] sm:$0xff]  ;;  %v16048_v56 = vcombine.low %v10946_v46, %v10950_v23 }
 0x5d6   :  { %v10838_v41 = vmax.f32 %v10817_v32, %v10824_v18  ;;  %v10825_v58 = vmax.f32 %v10470_v44, 0.0  ;;  %v10942_v19 = vld [vmem:[#allocation5 + $0x2a0] sm:$0xff]  ;;  %v16113_v35 = vcombine.high %v11010_v63, %v11014_v31  ;;  %v16112_v32 = vcombine.low %v11010_v63, %v11014_v31 }
 0x5d7   :  { %10753 = vmatmul.mubr.bf16.vlgmr.msra.gmra.mxu1 %v18904_v21  ;;  %13605 = vmatpush2.bf16.msra.mxu0 %v16080_v4  ;;  %v16129_v21 = vcombine.high %v11026_v14, %v11030_v1  ;;  %v11002_v55 = vld [vmem:[#allocation5 + $0x480] sm:$0xff]  ;;  %v16041_v22 = vcombine.high %v10938_v28, %v10942_v19  ;;  %v16040_v2 = vcombine.low %v10938_v28, %v10942_v19 }
 0x5d8   :  { %v10845_v27 = vmax.f32 %v19079_v50, %v10838_v41  ;;  %v10839_v25 = vmax.f32 %v10818_v33, %v10825_v58  ;;  %13630 = vmatpush1.bf16.msra.mxu1 %v16144_v5  ;;  %13606 = vmatprep.subr.bf16.mxu0 %v16073_v53  ;;  %v16064_v50 = vcombine.low %v10962_v24, %v10966_v51  ;;  %v10930_v34 = vld [vmem:[#allocation5 + $0x240] sm:$0xff] }
 0x5d9   :  { %13631 = vmatprep.subr.bf16.mxu1 %v16137_v47  ;;  %v10934_v18 = vld [vmem:[#allocation5 + $0x260] sm:$0xff]  ;;  %v16105_v44 = vcombine.high %v11002_v55, %v11006_v20  ;;  %v16104_v47 = vcombine.low %v11002_v55, %v11006_v20 }
 0x5da   :  { %v19304_v3 = vmax.f32 %v19082_v29, %v10839_v25  ;;  %v19306_v7 = vpack.c.bf16 %v10845_v27, %v10845_v27  ;;  %v16121_v29 = vcombine.high %v11018_v45, %v11022_v49  ;;  %v10994_v4 = vld [vmem:[#allocation5 + $0x440] sm:$0xff]  ;;  %v16033_v53 = vcombine.high %v10930_v34, %v10934_v18 }
 0x5db   :  { %13607 = vmatpush2.bf16.msra.mxu0 %v16072_v9  ;;  %v10998_v5 = vld [vmem:[#allocation5 + $0x460] sm:$0xff]  ;;  %v16032_v14 = vcombine.low %v10930_v34, %v10934_v18 }
 0x5dc   :  { %13620 = vmatprep.mubr.bf16.mxu0 %v19306_v7  ;;  %13608 = vmatprep.subr.bf16.mxu0 %v16065_v43  ;;  %v10922_v33 = vld [vmem:[#allocation5 + $0x200] sm:$0xff]  ;;  %v16097_v58 = vcombine.high %v10994_v4, %v10998_v5  ;;  %v16096_v27 = vcombine.low %v10994_v4, %v10998_v5 }
 0x5dd   :  { %13632 = vmatpush1.bf16.msra.mxu1 %v16136_v52  ;;  %v10926_v41 = vld [vmem:[#allocation5 + $0x220] sm:$0xff] }
 0x5de   :  { %13633 = vmatprep.subr.bf16.mxu1 %v16129_v21  ;;  %v10986_v24 = vld [vmem:[#allocation5 + $0x400] sm:$0xff]  ;;  %v16025_v1 = vcombine.high %v10922_v33, %v10926_v41  ;;  %v16024_v21 = vcombine.low %v10922_v33, %v10926_v41 }
 0x5df   :  { %13609 = vmatpush2.bf16.msra.mxu0 %v16064_v50  ;;  %v10990_v51 = vld [vmem:[#allocation5 + $0x420] sm:$0xff] }
 0x5e0   :  { %13610 = vmatprep.subr.bf16.mxu0 %v16057_v10  ;;  %v16089_v25 = vcombine.high %v10986_v24, %v10990_v51  ;;  %v11170_v9 = vld [vmem:[#allocation5 + $0x9c0] sm:$0xff]  ;;  %v16088_v49 = vcombine.low %v10986_v24, %v10990_v51 }
 0x5e1   :  { %13634 = vmatpush1.bf16.msra.mxu1 %v16128_v36  ;;  %v11174_v43 = vld [vmem:[#allocation5 + $0x9e0] sm:$0xff] }
 0x5e2   :  { %13635 = vmatprep.subr.bf16.mxu1 %v16121_v29  ;;  %v11106_v8 = vld [vmem:[#allocation5 + $0x7c0] sm:$0xff]  ;;  %v16273_v50 = vcombine.high %v11170_v9, %v11174_v43  ;;  %v16272_v31 = vcombine.low %v11170_v9, %v11174_v43 }
 0x5e3   :  { %13611 = vmatpush2.bf16.msra.mxu0 %v16056_v30  ;;  %v11110_v17 = vld [vmem:[#allocation5 + $0x7e0] sm:$0xff]  ;;  %v19315_v30 = vpack.c.bf16 %v19269_v39, %v19269_v39 }
 0x5e4   :  { %13612 = vmatprep.subr.bf16.mxu0 %v16049_v37  ;;  %v16209_v10 = vcombine.high %v11106_v8, %v11110_v17  ;;  %v11162_v36 = vld [vmem:[#allocation5 + $0x980] sm:$0xff] }
 0x5e5   :  { %13636 = vmatpush1.bf16.msra.mxu1 %v16120_v15  ;;  %v11166_v46 = vld [vmem:[#allocation5 + $0x9a0] sm:$0xff]  ;;  %v16208_v15 = vcombine.low %v11106_v8, %v11110_v17 }
 0x5e6   :  { %13637 = vmatprep.subr.bf16.mxu1 %v16113_v35  ;;  %v11098_v29 = vld [vmem:[#allocation5 + $0x780] sm:$0xff]  ;;  %v16265_v28 = vcombine.high %v11162_v36, %v11166_v46 }
 0x5e7   :  { %13613 = vmatpush2.bf16.msra.mxu0 %v16048_v56  ;;  %v11102_v63 = vld [vmem:[#allocation5 + $0x7a0] sm:$0xff] }
 0x5e8   :  { %13614 = vmatprep.subr.bf16.mxu0 %v16041_v22  ;;  %v16201_v19 = vcombine.high %v11098_v29, %v11102_v63  ;;  %v11154_v35 = vld [vmem:[#allocation5 + $0x940] sm:$0xff]  ;;  %v16264_v22 = vcombine.low %v11162_v36, %v11166_v46 }
 0x5e9   :  { %13638 = vmatpush1.bf16.msra.mxu1 %v16112_v32  ;;  %v11158_v55 = vld [vmem:[#allocation5 + $0x960] sm:$0xff]  ;;  %v16200_v32 = vcombine.low %v11098_v29, %v11102_v63 }
 0x5ea   :  { %13639 = vmatprep.subr.bf16.mxu1 %v16105_v44  ;;  %v11090_v20 = vld [vmem:[#allocation5 + $0x740] sm:$0xff]  ;;  %v16257_v39 = vcombine.high %v11154_v35, %v11158_v55 }
 0x5eb   :  { %13615 = vmatpush2.bf16.msra.mxu0 %v16040_v2  ;;  %v11094_v56 = vld [vmem:[#allocation5 + $0x760] sm:$0xff]  ;;  %v16256_v2 = vcombine.low %v11154_v35, %v11158_v55 }
 0x5ec   :  { %13616 = vmatprep.subr.bf16.mxu0 %v16033_v53  ;;  %v16193_v34 = vcombine.high %v11090_v20, %v11094_v56  ;;  %v11146_v18 = vld [vmem:[#allocation5 + $0x900] sm:$0xff]  ;;  %v16192_v53 = vcombine.low %v11090_v20, %v11094_v56 }
 0x5ed   :  { %13640 = vmatpush1.bf16.msra.mxu1 %v16104_v47  ;;  %v11150_v44 = vld [vmem:[#allocation5 + $0x920] sm:$0xff] }
 0x5ee   :  { %13641 = vmatprep.subr.bf16.mxu1 %v16097_v58  ;;  %v19309_v52 = vpop.f32.mrf.mxu0  ;;  %v11082_v4 = vld [vmem:[#allocation5 + $0x700] sm:$0xff]  ;;  %v16249_v47 = vcombine.high %v11146_v18, %v11150_v44 }
 0x5ef   :  { %13617 = vmatpush2.bf16.msra.mxu0 %v16032_v14  ;;  %v11086_v5 = vld [vmem:[#allocation5 + $0x720] sm:$0xff]  ;;  %v16248_v14 = vcombine.low %v11146_v18, %v11150_v44 }
 0x5f0   :  { %13618 = vmatprep.subr.bf16.mxu0 %v16025_v1  ;;  %v19311_v45 = vpop.f32.mrf.mxu0  ;;  %v16185_v33 = vcombine.high %v11082_v4, %v11086_v5  ;;  %v11138_v41 = vld [vmem:[#allocation5 + $0x8c0] sm:$0xff]  ;;  %v16184_v1 = vcombine.low %v11082_v4, %v11086_v5 }
 0x5f1   :  { %13642 = vmatpush1.bf16.msra.mxu1 %v16096_v27  ;;  %v11142_v58 = vld [vmem:[#allocation5 + $0x8e0] sm:$0xff] }
 0x5f2   :  { %13643 = vmatprep.subr.bf16.mxu1 %v16089_v25  ;;  %v10512_v23 = vpop.f32.mrf.mxu0  ;;  %v11074_v24 = vld [vmem:[#allocation5 + $0x6c0] sm:$0xff]  ;;  %v16241_v27 = vcombine.high %v11138_v41, %v11142_v58 }
 0x5f3   :  { %13619 = vmatpush2.bf16.msra.mxu0 %v16024_v21  ;;  %v11078_v51 = vld [vmem:[#allocation5 + $0x6e0] sm:$0xff]  ;;  %v16240_v21 = vcombine.low %v11138_v41, %v11142_v58 }
 0x5f4   :  { %v10513_v37 = vpop.f32.mrf.mxu0  ;;  %13670 = vmatprep.subr.bf16.mxu0 %v16273_v50  ;;  %v16177_v25 = vcombine.high %v11074_v24, %v11078_v51  ;;  %v11130_v9 = vld [vmem:[#allocation5 + $0x880] sm:$0xff] }
 0x5f5   :  { %13644 = vmatpush1.bf16.msra.mxu1 %v16088_v49  ;;  %v11134_v43 = vld [vmem:[#allocation5 + $0x8a0] sm:$0xff]  ;;  %v16176_v49 = vcombine.low %v11074_v24, %v11078_v51 }
 0x5f6   :  { %13645 = vmatprep.subr.bf16.mxu1 %v16209_v10  ;;  %13621 = vmatmul.mubr.bf16.vlgmr.msra.gmra.mxu0 %v19315_v30  ;;  %v11066_v8 = vld [vmem:[#allocation5 + $0x680] sm:$0xff]  ;;  %v16233_v50 = vcombine.high %v11130_v9, %v11134_v43  ;;  %v16232_v63 = vcombine.low %v11130_v9, %v11134_v43 }
 0x5f7   :  { %13671 = vmatpush1.bf16.msra.mxu0 %v16272_v31  ;;  %v11070_v17 = vld [vmem:[#allocation5 + $0x6a0] sm:$0xff]  ;;  %v19318_v31 = vld [vmem:[#allocation11 + $0x18] sm:$0xf] }
 0x5f8   :  { %13672 = vmatprep.subr.bf16.mxu0 %v16265_v28  ;;  %v16169_v10 = vcombine.high %v11066_v8, %v11070_v17  ;;  %v11122_v36 = vld [vmem:[#allocation5 + $0x840] sm:$0xff]  ;;  %v16168_v37 = vcombine.low %v11066_v8, %v11070_v17  ;;  %v1605_v28 = vrot.slane %v19318_v31, %v18923_v40 }
 0x5f9   :  { %13646 = vmatpush2.bf16.msra.mxu1 %v16208_v15  ;;  %v11126_v46 = vld [vmem:[#allocation5 + $0x860] sm:$0xff] }
 0x5fa   :  { %13647 = vmatprep.subr.bf16.mxu1 %v16201_v19  ;;  %v11058_v23 = vld [vmem:[#allocation5 + $0x640] sm:$0xff]  ;;  %v16225_v15 = vcombine.high %v11122_v36, %v11126_v46 }
 0x5fb   :  { %13673 = vmatpush1.bf16.msra.mxu0 %v16264_v22  ;;  %v11062_v29 = vld [vmem:[#allocation5 + $0x660] sm:$0xff]  ;;  %v16224_v22 = vcombine.low %v11122_v36, %v11126_v46 }
 0x5fc   :  { %13674 = vmatprep.subr.bf16.mxu0 %v16257_v39  ;;  %v16161_v19 = vcombine.high %v11058_v23, %v11062_v29  ;;  %v11114_v35 = vld [vmem:[#allocation5 + $0x800] sm:$0xff] }
 0x5fd   :  { %13648 = vmatpush2.bf16.msra.mxu1 %v16200_v32  ;;  %v11118_v55 = vld [vmem:[#allocation5 + $0x820] sm:$0xff]  ;;  %v16160_v32 = vcombine.low %v11058_v23, %v11062_v29 }
 0x5fe   :  { %13649 = vmatprep.subr.bf16.mxu1 %v16193_v34  ;;  %v11050_v20 = vld [vmem:[#allocation5 + $0x600] sm:$0xff]  ;;  %v16217_v39 = vcombine.high %v11114_v35, %v11118_v55  ;;  %v10511_v34 = vadd.f32 %v19311_v45, %v1605_v28 }
 0x5ff   :  { %13675 = vmatpush1.bf16.msra.mxu0 %v16256_v2  ;;  %v11054_v56 = vld [vmem:[#allocation5 + $0x620] sm:$0xff] }
 0x600   :  { %13676 = vmatprep.subr.bf16.mxu0 %v16249_v47  ;;  %v16153_v18 = vcombine.high %v11050_v20, %v11054_v56  ;;  %v11234_v44 = vld [vmem:[#allocation5 + $0xbc0] sm:$0xff]  ;;  %v16216_v47 = vcombine.low %v11114_v35, %v11118_v55  ;;  %v16152_v41 = vcombine.low %v11050_v20, %v11054_v56  ;;  %v19333_v55 = vld [vmem:[#allocation5 + $0x5c8] sm:$0xff] }
 0x601   :  { %13650 = vmatpush2.bf16.msra.mxu1 %v16192_v53  ;;  %v11238_v4 = vld [vmem:[#allocation5 + $0xbe0] sm:$0xff]  ;;  %v19335_v20 = vld [vmem:[#allocation5 + $0x5e8] sm:$0xff] }
 0x602   :  { %13651 = vmatprep.subr.bf16.mxu1 %v16185_v33  ;;  %v19325_v2 = vld [vmem:[#allocation5 + $0xdc0] sm:$0xff]  ;;  %v16337_v58 = vcombine.high %v11234_v44, %v11238_v4 }
 0x603   :  { %13677 = vmatpush1.bf16.msra.mxu0 %v16248_v14  ;;  %v19327_v53 = vld [vmem:[#allocation5 + $0xde0] sm:$0xff] }
 0x604   :  { %13678 = vmatprep.subr.bf16.mxu0 %v16241_v27  ;;  %v16401_v45 = vcombine.high %v19325_v2, %v19327_v53  ;;  %v11226_v51 = vld [vmem:[#allocation5 + $0xb80] sm:$0xff]  ;;  %v16336_v27 = vcombine.low %v11234_v44, %v11238_v4  ;;  %v1601_v4 = vrot.slane %v19318_v31, %v18920_v38 }
 0x605   :  { %13652 = vmatpush2.bf16.msra.mxu1 %v16184_v1  ;;  %v11230_v14 = vld [vmem:[#allocation5 + $0xba0] sm:$0xff] }
 0x606   :  { %13653 = vmatprep.subr.bf16.mxu1 %v16177_v25  ;;  %v16329_v9 = vcombine.high %v11226_v51, %v11230_v14  ;;  %v11218_v43 = vld [vmem:[#allocation5 + $0xb40] sm:$0xff] }
 0x607   :  { %13679 = vmatpush1.bf16.msra.mxu0 %v16240_v21  ;;  %v11222_v8 = vld [vmem:[#allocation5 + $0xb60] sm:$0xff]  ;;  %v16328_v21 = vcombine.low %v11226_v51, %v11230_v14 }
 0x608   :  { %13680 = vmatprep.subr.bf16.mxu0 %v16233_v50  ;;  %v16321_v50 = vcombine.high %v11218_v43, %v11222_v8  ;;  %v11214_v36 = vld [vmem:[#allocation5 + $0xb20] sm:$0xff]  ;;  %v16320_v23 = vcombine.low %v11218_v43, %v11222_v8 }
 0x609   :  { %13654 = vmatpush2.bf16.msra.mxu1 %v16176_v49  ;;  %v11194_v35 = vld [vmem:[#allocation5 + $0xa80] sm:$0xff] }
 0x60a   :  { %13655 = vmatprep.subr.bf16.mxu1 %v16169_v10  ;;  %v11210_v10 = vld [vmem:[#allocation5 + $0xb00] sm:$0xff] }
 0x60b   :  { %13681 = vmatpush1.bf16.msra.mxu0 %v16232_v63  ;;  %v16313_v63 = vcombine.high %v11210_v10, %v11214_v36  ;;  %v16312_v28 = vcombine.low %v11210_v10, %v11214_v36  ;;  %v11198_v56 = vld [vmem:[#allocation5 + $0xaa0] sm:$0xff] }
 0x60c   :  { %13682 = vmatprep.subr.bf16.mxu0 %v16225_v15  ;;  %v11206_v15 = vld [vmem:[#allocation5 + $0xae0] sm:$0xff]  ;;  %v16297_v44 = vcombine.high %v11194_v35, %v11198_v56 }
 0x60d   :  { %13656 = vmatpush2.bf16.msra.mxu1 %v16168_v37  ;;  %v11202_v37 = vld [vmem:[#allocation5 + $0xac0] sm:$0xff] }
 0x60e   :  { %13657 = vmatprep.subr.bf16.mxu1 %v16161_v19  ;;  %v16305_v19 = vcombine.high %v11202_v37, %v11206_v15  ;;  %v11178_v51 = vld [vmem:[#allocation5 + $0xa00] sm:$0xff] }
 0x60f   :  { %v19323_v5 = vpop.f32.mrf.mxu1  ;;  %13683 = vmatpush1.bf16.msra.mxu0 %v16224_v22  ;;  %v19337_v22 = vld [vmem:[#allocation5 + $0x1c8] sm:$0xff]  ;;  %v11182_v14 = vld [vmem:[#allocation5 + $0xa20] sm:$0xff] }
 0x610   :  { %13684 = vmatprep.subr.bf16.mxu0 %v16217_v39  ;;  %v16146_v39 = vcombine.low %v19333_v55, %v19335_v20  ;;  %v16280_v8 = vcombine.low %v11178_v51, %v11182_v14 }
 0x611   :  { %v10551_v33 = vpop.f32.mrf.mxu1  ;;  %13658 = vmatpush2.bf16.msra.mxu1 %v16160_v32  ;;  %v19339_v32 = vld [vmem:[#allocation5 + $0x1e8] sm:$0xff] }
 0x612   :  { %v19329_v24 = vadd.f32 %v10551_v33, %v10511_v34  ;;  %13659 = vmatprep.subr.bf16.mxu1 %v16153_v18  ;;  %v16304_v34 = vcombine.low %v11202_v37, %v11206_v15  ;;  %v16018_v18 = vcombine.low %v19337_v22, %v19339_v32  ;;  %v11190_v33 = vld [vmem:[#allocation5 + $0xa60] sm:$0xff] }
 0x613   :  { %v10553_v1 = vpop.f32.mrf.mxu1  ;;  %13685 = vmatpush1.bf16.msra.mxu0 %v16216_v47  ;;  %v11186_v47 = vld [vmem:[#allocation5 + $0xa40] sm:$0xff] }
 0x614   :  { %13686 = vmatprep.subr.bf16.mxu0 %v16337_v58  ;;  %v16289_v58 = vcombine.high %v11186_v47, %v11190_v33  ;;  %v16288_v1 = vcombine.low %v11186_v47, %v11190_v33  ;;  %v11278_v47 = vld [vmem:[#allocation5 + $0xd20] sm:$0xff] }
 0x615   :  { %v10554_v25 = vpop.f32.mrf.mxu1  ;;  %13660 = vmatpush2.bf16.msra.mxu1 %v16152_v41  ;;  %v16296_v41 = vcombine.low %v11194_v35, %v11198_v56  ;;  %v11290_v35 = vld [vmem:[#allocation5 + $0xd80] sm:$0xff] }
 0x616   :  { %13711 = vmatprep.subr.bf16.mxu1 %v16401_v45  ;;  %v10509_v45 = vadd.f32 %v19309_v52, %v1601_v4  ;;  %v11294_v56 = vld [vmem:[#allocation5 + $0xda0] sm:$0xff] }
 0x617   :  { %v10631_v17 = vpop.f32.mrf.mxu1  ;;  %13687 = vmatpush2.bf16.msra.mxu0 %v16336_v27  ;;  %v16281_v27 = vcombine.high %v11178_v51, %v11182_v14  ;;  %v11274_v4 = vld [vmem:[#allocation5 + $0xd00] sm:$0xff] }
 0x618   :  { %13688 = vmatprep.subr.bf16.mxu0 %v16329_v9  ;;  %v10550_v25 = vadd.f32 %v19323_v5, %v10509_v45  ;;  %v10820_v5 = vmax.f32 %v19233_v57, 0.0  ;;  %v16393_v57 = vcombine.high %v11290_v35, %v11294_v56  ;;  %v11270_v33 = vld [vmem:[#allocation5 + $0xce0] sm:$0xff] }
 0x619   :  { %v10633_v49 = vpop.f32.mrf.mxu1  ;;  %v11258_v45 = vld [vmem:[#allocation5 + $0xc80] sm:$0xff] }
 0x61a   :  { %v11262_v51 = vld [vmem:[#allocation5 + $0xca0] sm:$0xff] }
 0x61b   :  { %v10635_v46 = vpop.f32.mrf.mxu1  ;;  %13689 = vmatpush2.bf16.msra.mxu0 %v16328_v21 }
 0x61c   :  { %13690 = vmatprep.subr.bf16.mxu0 %v16321_v50  ;;  %v16147_v50 = vcombine.high %v19333_v55, %v19335_v20  ;;  %v10819_v46 = vmax.f32 %v19208_v61, 0.0  ;;  %v16400_v61 = vcombine.low %v19325_v2, %v19327_v53  ;;  %v11266_v53 = vld [vmem:[#allocation5 + $0xcc0] sm:$0xff]  ;;  %v10891_v55 = vld [vmem:[#allocation5 + $0x108] sm:$0xff] }
 0x61d   :  { %v10636_v29 = vpop.f32.mrf.mxu1  ;;  %v16368_v14 = vcombine.low %v11266_v53, %v11270_v33  ;;  %v10895_v20 = vld [vmem:[#allocation5 + $0x128] sm:$0xff] }
 0x61f   :  { %13691 = vmatpush2.bf16.msra.mxu0 %v16320_v23 }
 0x620   :  { %13692 = vmatprep.subr.bf16.mxu0 %v16313_v63 }
 0x623   :  { %13693 = vmatpush2.bf16.msra.mxu0 %v16312_v28 }
 0x624   :  { %13694 = vmatprep.subr.bf16.mxu0 %v16305_v19 }
 0x627   :  { %13695 = vmatpush2.bf16.msra.mxu0 %v16304_v34  ;;  %v11282_v34 = vld [vmem:[#allocation5 + $0xd40] sm:$0xff] }
 0x628   :  { %13696 = vmatprep.subr.bf16.mxu0 %v16297_v44  ;;  %v16392_v44 = vcombine.low %v11290_v35, %v11294_v56 }
 0x62b   :  { %13697 = vmatpush2.bf16.msra.mxu0 %v16296_v41  ;;  %v16376_v41 = vcombine.low %v11274_v4, %v11278_v47 }
 0x62c   :  { %13698 = vmatprep.subr.bf16.mxu0 %v16289_v58  ;;  %v16369_v58 = vcombine.high %v11266_v53, %v11270_v33 }
 0x62e   :  { %v10590_v9 = vpop.f32.mrf.mxu0 }
 0x62f   :  { %v10591_v43 = vadd.f32 %v10590_v9, %v10550_v25  ;;  %13699 = vmatpush2.bf16.msra.mxu0 %v16288_v1  ;;  %v16361_v1 = vcombine.high %v11258_v45, %v11262_v51  ;;  %v11254_v25 = vld [vmem:[#allocation5 + $0xc60] sm:$0xff]  ;;  %v16360_v9 = vcombine.low %v11258_v45, %v11262_v51 }
 0x630   :  { %v10592_v21 = vpop.f32.mrf.mxu0  ;;  %13700 = vmatprep.subr.bf16.mxu0 %v16281_v27  ;;  %v11250_v27 = vld [vmem:[#allocation5 + $0xc40] sm:$0xff] }
 0x631   :  { %v10632_v10 = vadd.f32 %v10631_v17, %v10591_v43  ;;  %v10593_v52 = vadd.f32 %v10592_v21, %v19329_v24  ;;  %v16353_v43 = vcombine.high %v11250_v27, %v11254_v25  ;;  %v11246_v21 = vld [vmem:[#allocation5 + $0xc20] sm:$0xff] }
 0x632   :  { %v10594_v36 = vpop.f32.mrf.mxu0 }
 0x633   :  { %v10826_v23 = vmax.f32 %v10632_v10, 0.0  ;;  %v10634_v29 = vadd.f32 %v10633_v49, %v10593_v52  ;;  %13701 = vmatpush2.bf16.msra.mxu0 %v16280_v8  ;;  %v19364_v49 = vpack.c.bf16 %v19304_v3, %v19304_v3  ;;  %v16377_v3 = vcombine.high %v11274_v4, %v11278_v47  ;;  %v11242_v8 = vld [vmem:[#allocation5 + $0xc00] sm:$0xff] }
 0x634   :  { %v10595_v63 = vpop.f32.mrf.mxu0  ;;  %13793 = vmatprep.subr.bf16.mxu0 %v16147_v50  ;;  %v16352_v50 = vcombine.low %v11250_v27, %v11254_v25  ;;  %v16345_v10 = vcombine.high %v11242_v8, %v11246_v21  ;;  %v16344_v52 = vcombine.low %v11242_v8, %v11246_v21  ;;  %v11039_v8 = vld [vmem:[#allocation5 + $0x5a8] sm:$0xff] }
 0x635   :  { %v10840_v37 = vmax.f32 %v10819_v46, %v10826_v23  ;;  %v10827_v15 = vmax.f32 %v10634_v29, 0.0  ;;  %v16019_v46 = vcombine.high %v19337_v22, %v19339_v32  ;;  %v15995_v32 = vcombine.high %v10891_v55, %v10895_v20 }
 0x637   :  { %v10847_v28 = vmax.f32 %v19110_v26, %v10840_v37  ;;  %v10841_v19 = vmax.f32 %v10820_v5, %v10827_v15  ;;  %v11286_v26 = vld [vmem:[#allocation5 + $0xd60] sm:$0xff] }
 0x638   :  { %v16384_v2 = vcombine.low %v11282_v34, %v11286_v26 }
 0x639   :  { %v19356_v17 = vmax.f32 %v19113_v6, %v10841_v19  ;;  %v19358_v24 = vpack.c.bf16 %v10847_v28, %v10847_v28  ;;  %v16385_v6 = vcombine.high %v11282_v34, %v11286_v26  ;;  %v1613_v34 = vrot.slane %v19318_v31, %v18962_v11 }
 0x63b   :  { %13661 = vmatprep.mubr.bf16.mxu1 %v19358_v24 }
 0x63c   :  { %13662 = vmatmul.mubr.bf16.vlgmr.msra.gmra.mxu1 %v19364_v49 }
 0x63d   :  { %13712 = vmatpush1.bf16.msra.mxu1 %v16400_v61  ;;  %13743 = vmatprep.mubr.bf16.mxu1 %v18791_v16 }
 0x63e   :  { %13713 = vmatprep.subr.bf16.mxu1 %v16393_v57  ;;  %v1609_v57 = vrot.slane %v19318_v31, %v18959_v62 }
 0x641   :  { %13714 = vmatpush1.bf16.msra.mxu1 %v16392_v44 }
 0x642   :  { %13715 = vmatprep.subr.bf16.mxu1 %v16385_v6 }
 0x645   :  { %13716 = vmatpush1.bf16.msra.mxu1 %v16384_v2 }
 0x646   :  { %13717 = vmatprep.subr.bf16.mxu1 %v16377_v3 }
 0x649   :  { %13718 = vmatpush1.bf16.msra.mxu1 %v16376_v41 }
 0x64a   :  { %13719 = vmatprep.subr.bf16.mxu1 %v16369_v58  ;;  %v10821_v58 = vmax.f32 %v19237_v13, 0.0  ;;  %v19383_v13 = vpack.c.bf16 %v19356_v17, %v19356_v17 }
 0x64d   :  { %13720 = vmatpush1.bf16.msra.mxu1 %v16368_v14 }
 0x64e   :  { %13721 = vmatprep.subr.bf16.mxu1 %v16361_v1  ;;  %v10822_v1 = vmax.f32 %v19263_v12, 0.0 }
 0x651   :  { %13722 = vmatpush1.bf16.msra.mxu1 %v16360_v9 }
 0x652   :  { %13723 = vmatprep.subr.bf16.mxu1 %v16353_v43  ;;  %v11035_v43 = vld [vmem:[#allocation5 + $0x588] sm:$0xff] }
 0x653   :  { %v16139_v12 = vcombine.high %v11035_v43, %v11039_v8  ;;  %v16138_v17 = vcombine.low %v11035_v43, %v11039_v8  ;;  %v10987_v43 = vld [vmem:[#allocation5 + $0x408] sm:$0xff] }
 0x654   :  { %v10991_v8 = vld [vmem:[#allocation5 + $0x428] sm:$0xff] }
 0x655   :  { %13724 = vmatpush1.bf16.msra.mxu1 %v16352_v50 }
 0x656   :  { %13725 = vmatprep.subr.bf16.mxu1 %v16345_v10  ;;  %v10907_v10 = vld [vmem:[#allocation5 + $0x188] sm:$0xff] }
 0x657   :  { %v10672_v36 = vpop.f32.mrf.mxu1 }
 0x658   :  { %v10673_v26 = vadd.f32 %v10672_v36, %v1609_v57 }
 0x659   :  { %v10674_v23 = vpop.f32.mrf.mxu1  ;;  %13726 = vmatpush1.bf16.msra.mxu1 %v16344_v52  ;;  %v10911_v52 = vld [vmem:[#allocation5 + $0x1a8] sm:$0xff] }
 0x65a   :  { %13752 = vmatprep.subr.bf16.mxu1 %v16019_v46  ;;  %v10675_v44 = vadd.f32 %v10674_v23, %v1613_v34  ;;  %v11027_v46 = vld [vmem:[#allocation5 + $0x548] sm:$0xff]  ;;  %v16011_v23 = vcombine.high %v10907_v10, %v10911_v52  ;;  %v15994_v34 = vcombine.low %v10891_v55, %v10895_v20 }
 0x65b   :  { %v10676_v29 = vpop.f32.mrf.mxu1 }
 0x65c   :  { %v10899_v29 = vld [vmem:[#allocation5 + $0x148] sm:$0xff] }
 0x65d   :  { %v10677_v63 = vpop.f32.mrf.mxu1 }
 0x65e   :  { %v16010_v63 = vcombine.low %v10907_v10, %v10911_v52  ;;  %v10859_v10 = vld [vmem:[#allocation5 + $0x8] sm:$0xff] }
 0x65f   :  { %v10863_v52 = vld [vmem:[#allocation5 + $0x28] sm:$0xff] }
 0x66e   :  { %v10713_v5 = vpop.f32.mrf.mxu0 }
 0x66f   :  { %v10714_v6 = vadd.f32 %v10713_v5, %v10673_v26 }
 0x670   :  { %v10715_v37 = vpop.f32.mrf.mxu0 }
 0x671   :  { %v10716_v47 = vadd.f32 %v10715_v37, %v10675_v44 }
 0x672   :  { %v10717_v15 = vpop.f32.mrf.mxu0 }
 0x673   :  { %v11019_v15 = vld [vmem:[#allocation5 + $0x508] sm:$0xff] }
 0x674   :  { %v10718_v28 = vpop.f32.mrf.mxu0 }
 0x675   :  { %v11023_v28 = vld [vmem:[#allocation5 + $0x528] sm:$0xff] }
 0x676   :  { %v10795_v19 = vpop.f32.mrf.mxu0  ;;  %v16123_v22 = vcombine.high %v11019_v15, %v11023_v28  ;;  %v16122_v57 = vcombine.low %v11019_v15, %v11023_v28  ;;  %v16090_v15 = vcombine.low %v10987_v43, %v10991_v8  ;;  %v15962_v28 = vcombine.low %v10859_v10, %v10863_v52 }
 0x678   :  { %v10797_v35 = vpop.f32.mrf.mxu0 }
 0x67a   :  { %v10799_v56 = vpop.f32.mrf.mxu0 }
 0x67b   :  { %v10883_v56 = vld [vmem:[#allocation5 + $0xc8] sm:$0xff] }
 0x67c   :  { %v10800_v61 = vpop.f32.mrf.mxu0 }
 0x67d   :  { %v10887_v61 = vld [vmem:[#allocation5 + $0xe8] sm:$0xff] }
 0x67e   :  { %v15987_v44 = vcombine.high %v10883_v56, %v10887_v61 }
 0x697   :  { %v10754_v4 = vpop.f32.mrf.mxu1 }
 0x698   :  { %v10755_v2 = vadd.f32 %v10754_v4, %v10714_v6  ;;  %v11003_v6 = vld [vmem:[#allocation5 + $0x488] sm:$0xff] }
 0x699   :  { %v10756_v3 = vpop.f32.mrf.mxu1  ;;  %v11007_v4 = vld [vmem:[#allocation5 + $0x4a8] sm:$0xff] }
 0x69a   :  { %v10796_v53 = vadd.f32 %v10795_v19, %v10755_v2  ;;  %v10757_v33 = vadd.f32 %v10756_v3, %v10716_v47  ;;  %v10875_v47 = vld [vmem:[#allocation5 + $0x88] sm:$0xff] }
 0x69b   :  { %v10758_v41 = vpop.f32.mrf.mxu1  ;;  %v10879_v2 = vld [vmem:[#allocation5 + $0xa8] sm:$0xff] }
 0x69c   :  { %v10828_v45 = vmax.f32 %v10796_v53, 0.0  ;;  %v10798_v51 = vadd.f32 %v10797_v35, %v10757_v33  ;;  %v11015_v35 = vld [vmem:[#allocation5 + $0x4e8] sm:$0xff]  ;;  %v15986_v53 = vcombine.low %v10883_v56, %v10887_v61  ;;  %v16107_v33 = vcombine.high %v11003_v6, %v11007_v4 }
 0x69d   :  { %v10759_v14 = vpop.f32.mrf.mxu1  ;;  %v15979_v41 = vcombine.high %v10875_v47, %v10879_v2 }
 0x69e   :  { %v10842_v27 = vmax.f32 %v10821_v58, %v10828_v45  ;;  %v10829_v25 = vmax.f32 %v10798_v51, 0.0  ;;  %v10995_v58 = vld [vmem:[#allocation5 + $0x448] sm:$0xff] }
 0x69f   :  { %v10999_v45 = vld [vmem:[#allocation5 + $0x468] sm:$0xff] }
 0x6a0   :  { %v10849_v31 = vmax.f32 %v19146_v0, %v10842_v27  ;;  %v10843_v9 = vmax.f32 %v10822_v1, %v10829_v25  ;;  %v11031_v0 = vld [vmem:[#allocation5 + $0x568] sm:$0xff]  ;;  %v16106_v1 = vcombine.low %v11003_v6, %v11007_v4  ;;  %v15978_v27 = vcombine.low %v10875_v47, %v10879_v2 }
 0x6a1   :  { %v16131_v5 = vcombine.high %v11027_v46, %v11031_v0  ;;  %v10867_v51 = vld [vmem:[#allocation5 + $0x48] sm:$0xff] }
 0x6a2   :  { %v10850_v21 = vmax.f32 %v19149_v42, %v10843_v9  ;;  %v19379_v50 = vpack.c.bf16 %v10849_v31, %v10849_v31  ;;  %v10903_v42 = vld [vmem:[#allocation5 + $0x168] sm:$0xff]  ;;  %v16099_v31 = vcombine.high %v10995_v58, %v10999_v45 }
 0x6a3   :  { %v16003_v37 = vcombine.high %v10899_v29, %v10903_v42  ;;  %v16002_v19 = vcombine.low %v10899_v29, %v10903_v42  ;;  %v10871_v14 = vld [vmem:[#allocation5 + $0x68] sm:$0xff]  ;;  %v15963_v29 = vcombine.high %v10859_v10, %v10863_v52 }
 0x6a4   :  { %v19385_v36 = vpack.c.bf16 %v10850_v21, %v10850_v21  ;;  %13702 = vmatprep.mubr.bf16.mxu0 %v19379_v50  ;;  %v15971_v9 = vcombine.high %v10867_v51, %v10871_v14  ;;  %v11107_v42 = vld [vmem:[#allocation5 + $0x7c8] sm:$0xff] }
 0x6a5   :  { %13703 = vmatmul.mubr.bf16.vlgmr.msra.gmra.mxu0 %v19383_v13 }
 0x6a6   :  { %13794 = vmatpush1.bf16.msra.mxu0 %v16146_v39  ;;  %13744 = vmatmul.mubr.bf16.vlgmr.msra.gmra.mxu1 %v19385_v36  ;;  %v16130_v39 = vcombine.low %v11027_v46, %v11031_v0  ;;  %v15970_v46 = vcombine.low %v10867_v51, %v10871_v14 }
 0x6a7   :  { %13753 = vmatpush1.bf16.msra.mxu1 %v16018_v18  ;;  %13825 = vmatprep.mubr.bf16.mxu0 %v19358_v24  ;;  %v11011_v18 = vld [vmem:[#allocation5 + $0x4c8] sm:$0xff] }
 0x6a8   :  { %13784 = vmatprep.mubr.bf16.mxu1 %v19306_v7  ;;  %13795 = vmatprep.subr.bf16.mxu0 %v16139_v12  ;;  %v16115_v26 = vcombine.high %v11011_v18, %v11015_v35  ;;  %v16114_v3 = vcombine.low %v11011_v18, %v11015_v35  ;;  %v16098_v12 = vcombine.low %v10995_v58, %v10999_v45 }
 0x6a9   :  { %13754 = vmatprep.subr.bf16.mxu1 %v16011_v23  ;;  %v16091_v23 = vcombine.high %v10987_v43, %v10991_v8 }
 0x6aa   :  { %13796 = vmatpush1.bf16.msra.mxu0 %v16138_v17  ;;  %v11111_v17 = vld [vmem:[#allocation5 + $0x7e8] sm:$0xff] }
 0x6ab   :  { %13755 = vmatpush1.bf16.msra.mxu1 %v16010_v63  ;;  %13797 = vmatprep.subr.bf16.mxu0 %v16131_v5  ;;  %v10979_v5 = vld [vmem:[#allocation5 + $0x3c8] sm:$0xff]  ;;  %v16211_v55 = vcombine.high %v11107_v42, %v11111_v17  ;;  %v16210_v18 = vcombine.low %v11107_v42, %v11111_v17 }
 0x6ac   :  { %13756 = vmatprep.subr.bf16.mxu1 %v16003_v37  ;;  %v10983_v37 = vld [vmem:[#allocation5 + $0x3e8] sm:$0xff] }
 0x6ad   :  { %v16083_v20 = vcombine.high %v10979_v5, %v10983_v37  ;;  %v16082_v35 = vcombine.low %v10979_v5, %v10983_v37  ;;  %v11059_v5 = vld [vmem:[#allocation5 + $0x648] sm:$0xff] }
 0x6ae   :  { %13798 = vmatpush1.bf16.msra.mxu0 %v16130_v39  ;;  %v11099_v39 = vld [vmem:[#allocation5 + $0x788] sm:$0xff] }
 0x6af   :  { %13757 = vmatpush1.bf16.msra.mxu1 %v16002_v19  ;;  %13799 = vmatprep.subr.bf16.mxu0 %v16123_v22  ;;  %v11103_v19 = vld [vmem:[#allocation5 + $0x7a8] sm:$0xff] }
 0x6b0   :  { %13758 = vmatprep.subr.bf16.mxu1 %v15995_v32  ;;  %v10971_v22 = vld [vmem:[#allocation5 + $0x388] sm:$0xff]  ;;  %v16203_v56 = vcombine.high %v11099_v39, %v11103_v19  ;;  %v16202_v6 = vcombine.low %v11099_v39, %v11103_v19 }
 0x6b1   :  { %v10975_v32 = vld [vmem:[#allocation5 + $0x3a8] sm:$0xff] }
 0x6b2   :  { %13800 = vmatpush1.bf16.msra.mxu0 %v16122_v57  ;;  %v16075_v61 = vcombine.high %v10971_v22, %v10975_v32  ;;  %v11091_v57 = vld [vmem:[#allocation5 + $0x748] sm:$0xff]  ;;  %v16074_v4 = vcombine.low %v10971_v22, %v10975_v32 }
 0x6b3   :  { %13759 = vmatpush1.bf16.msra.mxu1 %v15994_v34  ;;  %13801 = vmatprep.subr.bf16.mxu0 %v16115_v26  ;;  %v11095_v34 = vld [vmem:[#allocation5 + $0x768] sm:$0xff] }
 0x6b4   :  { %13760 = vmatprep.subr.bf16.mxu1 %v15987_v44  ;;  %v10963_v26 = vld [vmem:[#allocation5 + $0x348] sm:$0xff]  ;;  %v16195_v47 = vcombine.high %v11091_v57, %v11095_v34  ;;  %v16194_v58 = vcombine.low %v11091_v57, %v11095_v34 }
 0x6b5   :  { %v10967_v44 = vld [vmem:[#allocation5 + $0x368] sm:$0xff] }
 0x6b6   :  { %13802 = vmatpush1.bf16.msra.mxu0 %v16114_v3  ;;  %v19398_v25 = vpop.f32.mrf.mxu0  ;;  %v16067_v2 = vcombine.high %v10963_v26, %v10967_v44  ;;  %v11083_v3 = vld [vmem:[#allocation5 + $0x708] sm:$0xff]  ;;  %v16066_v45 = vcombine.low %v10963_v26, %v10967_v44 }
 0x6b7   :  { %13761 = vmatpush1.bf16.msra.mxu1 %v15986_v53  ;;  %13803 = vmatprep.subr.bf16.mxu0 %v16107_v33  ;;  %v11087_v53 = vld [vmem:[#allocation5 + $0x728] sm:$0xff] }
 0x6b8   :  { %13762 = vmatprep.subr.bf16.mxu1 %v15979_v41  ;;  %v19400_v21 = vpop.f32.mrf.mxu0  ;;  %v10955_v33 = vld [vmem:[#allocation5 + $0x308] sm:$0xff]  ;;  %v16187_v51 = vcombine.high %v11083_v3, %v11087_v53  ;;  %v16186_v43 = vcombine.low %v11083_v3, %v11087_v53 }
 0x6b9   :  { %v10959_v41 = vld [vmem:[#allocation5 + $0x328] sm:$0xff] }
 0x6ba   :  { %13804 = vmatpush1.bf16.msra.mxu0 %v16106_v1  ;;  %v13626_v0 = vpop.f32.mrf.mxu0  ;;  %v16059_v14 = vcombine.high %v10955_v33, %v10959_v41  ;;  %v11075_v1 = vld [vmem:[#allocation5 + $0x6c8] sm:$0xff]  ;;  %v16058_v8 = vcombine.low %v10955_v33, %v10959_v41 }
 0x6bb   :  { %13763 = vmatpush1.bf16.msra.mxu1 %v15978_v27  ;;  %13805 = vmatprep.subr.bf16.mxu0 %v16099_v31  ;;  %v11079_v27 = vld [vmem:[#allocation5 + $0x6e8] sm:$0xff] }
 0x6bc   :  { %13764 = vmatprep.subr.bf16.mxu1 %v15971_v9  ;;  %v13627_v63 = vpop.f32.mrf.mxu0  ;;  %v10947_v31 = vld [vmem:[#allocation5 + $0x2c8] sm:$0xff]  ;;  %v16179_v10 = vcombine.high %v11075_v1, %v11079_v27 }
 0x6bd   :  { %v10951_v9 = vld [vmem:[#allocation5 + $0x2e8] sm:$0xff] }
 0x6be   :  { %13806 = vmatpush1.bf16.msra.mxu0 %v16098_v12  ;;  %v16051_v52 = vcombine.high %v10947_v31, %v10951_v9  ;;  %v11067_v12 = vld [vmem:[#allocation5 + $0x688] sm:$0xff]  ;;  %v16050_v42 = vcombine.low %v10947_v31, %v10951_v9 }
 0x6bf   :  { %13765 = vmatpush1.bf16.msra.mxu1 %v15970_v46  ;;  %13807 = vmatprep.subr.bf16.mxu0 %v16091_v23  ;;  %v11071_v46 = vld [vmem:[#allocation5 + $0x6a8] sm:$0xff] }
 0x6c0   :  { %13766 = vmatprep.subr.bf16.mxu1 %v15963_v29  ;;  %v10939_v0 = vld [vmem:[#allocation5 + $0x288] sm:$0xff]  ;;  %v16178_v29 = vcombine.low %v11075_v1, %v11079_v27  ;;  %v16171_v17 = vcombine.high %v11067_v12, %v11071_v46 }
 0x6c1   :  { %v10943_v23 = vld [vmem:[#allocation5 + $0x2a8] sm:$0xff] }
 0x6c2   :  { %13808 = vmatpush1.bf16.msra.mxu0 %v16090_v15  ;;  %v16043_v63 = vcombine.high %v10939_v0, %v10943_v23  ;;  %v11063_v37 = vld [vmem:[#allocation5 + $0x668] sm:$0xff] }
 0x6c3   :  { %13767 = vmatpush1.bf16.msra.mxu1 %v15962_v28  ;;  %13809 = vmatprep.subr.bf16.mxu0 %v16211_v55  ;;  %v10931_v15 = vld [vmem:[#allocation5 + $0x248] sm:$0xff]  ;;  %v16170_v55 = vcombine.low %v11067_v12, %v11071_v46  ;;  %v16163_v39 = vcombine.high %v11059_v5, %v11063_v37 }
 0x6c4   :  { %13768 = vmatprep.subr.bf16.mxu1 %v16083_v20  ;;  %v10935_v28 = vld [vmem:[#allocation5 + $0x268] sm:$0xff]  ;;  %v16042_v20 = vcombine.low %v10939_v0, %v10943_v23 }
 0x6c5   :  { %v16035_v19 = vcombine.high %v10931_v15, %v10935_v28  ;;  %v11051_v22 = vld [vmem:[#allocation5 + $0x608] sm:$0xff] }
 0x6c6   :  { %13810 = vmatpush2.bf16.msra.mxu0 %v16210_v18  ;;  %v11055_v32 = vld [vmem:[#allocation5 + $0x628] sm:$0xff] }
 0x6c7   :  { %13769 = vmatpush2.bf16.msra.mxu1 %v16082_v35  ;;  %13811 = vmatprep.subr.bf16.mxu0 %v16203_v56  ;;  %v10923_v18 = vld [vmem:[#allocation5 + $0x208] sm:$0xff]  ;;  %v16162_v56 = vcombine.low %v11059_v5, %v11063_v37  ;;  %v16155_v57 = vcombine.high %v11051_v22, %v11055_v32 }
 0x6c8   :  { %13770 = vmatprep.subr.bf16.mxu1 %v16075_v61  ;;  %v10927_v35 = vld [vmem:[#allocation5 + $0x228] sm:$0xff]  ;;  %v16034_v61 = vcombine.low %v10931_v15, %v10935_v28 }
 0x6c9   :  { %v16027_v34 = vcombine.high %v10923_v18, %v10927_v35  ;;  %v11299_v26 = vld [vmem:[#allocation5 + $0xdc8] sm:$0xff] }
 0x6ca   :  { %13812 = vmatpush2.bf16.msra.mxu0 %v16202_v6  ;;  %v11303_v44 = vld [vmem:[#allocation5 + $0xde8] sm:$0xff] }
 0x6cb   :  { %13771 = vmatpush2.bf16.msra.mxu1 %v16074_v4  ;;  %13813 = vmatprep.subr.bf16.mxu0 %v16195_v47  ;;  %v11171_v6 = vld [vmem:[#allocation5 + $0x9c8] sm:$0xff]  ;;  %v16154_v47 = vcombine.low %v11051_v22, %v11055_v32  ;;  %v16403_v3 = vcombine.high %v11299_v26, %v11303_v44 }
 0x6cc   :  { %13772 = vmatprep.subr.bf16.mxu1 %v16067_v2  ;;  %v11175_v4 = vld [vmem:[#allocation5 + $0x9e8] sm:$0xff]  ;;  %v16026_v2 = vcombine.low %v10923_v18, %v10927_v35 }
 0x6cd   :  { %v16275_v53 = vcombine.high %v11171_v6, %v11175_v4  ;;  %v11291_v33 = vld [vmem:[#allocation5 + $0xd88] sm:$0xff] }
 0x6ce   :  { %13814 = vmatpush2.bf16.msra.mxu0 %v16194_v58  ;;  %v11295_v41 = vld [vmem:[#allocation5 + $0xda8] sm:$0xff] }
 0x6cf   :  { %13773 = vmatpush2.bf16.msra.mxu1 %v16066_v45  ;;  %13815 = vmatprep.subr.bf16.mxu0 %v16187_v51  ;;  %v11163_v58 = vld [vmem:[#allocation5 + $0x988] sm:$0xff]  ;;  %v16402_v51 = vcombine.low %v11299_v26, %v11303_v44  ;;  %v16395_v1 = vcombine.high %v11291_v33, %v11295_v41 }
 0x6d0   :  { %13774 = vmatprep.subr.bf16.mxu1 %v16059_v14  ;;  %v11167_v45 = vld [vmem:[#allocation5 + $0x9a8] sm:$0xff]  ;;  %v16274_v14 = vcombine.low %v11171_v6, %v11175_v4 }
 0x6d1   :  { %v16267_v27 = vcombine.high %v11163_v58, %v11167_v45  ;;  %v11283_v31 = vld [vmem:[#allocation5 + $0xd48] sm:$0xff] }
 0x6d2   :  { %13816 = vmatpush2.bf16.msra.mxu0 %v16186_v43  ;;  %v11287_v9 = vld [vmem:[#allocation5 + $0xd68] sm:$0xff] }
 0x6d3   :  { %13775 = vmatpush2.bf16.msra.mxu1 %v16058_v8  ;;  %13817 = vmatprep.subr.bf16.mxu0 %v16179_v10  ;;  %v11155_v43 = vld [vmem:[#allocation5 + $0x948] sm:$0xff]  ;;  %v16394_v10 = vcombine.low %v11291_v33, %v11295_v41  ;;  %v16387_v12 = vcombine.high %v11283_v31, %v11287_v9 }
 0x6d4   :  { %13776 = vmatprep.subr.bf16.mxu1 %v16051_v52  ;;  %v11159_v8 = vld [vmem:[#allocation5 + $0x968] sm:$0xff]  ;;  %v16266_v52 = vcombine.low %v11163_v58, %v11167_v45 }
 0x6d5   :  { %v16259_v46 = vcombine.high %v11155_v43, %v11159_v8  ;;  %v11275_v0 = vld [vmem:[#allocation5 + $0xd08] sm:$0xff] }
 0x6d6   :  { %13818 = vmatpush2.bf16.msra.mxu0 %v16178_v29  ;;  %v11279_v23 = vld [vmem:[#allocation5 + $0xd28] sm:$0xff] }
 0x6d7   :  { %13777 = vmatpush2.bf16.msra.mxu1 %v16050_v42  ;;  %13819 = vmatprep.subr.bf16.mxu0 %v16171_v17  ;;  %v11147_v29 = vld [vmem:[#allocation5 + $0x908] sm:$0xff]  ;;  %v16386_v17 = vcombine.low %v11283_v31, %v11287_v9  ;;  %v16379_v5 = vcombine.high %v11275_v0, %v11279_v23 }
 0x6d8   :  { %13778 = vmatprep.subr.bf16.mxu1 %v16043_v63  ;;  %v11151_v42 = vld [vmem:[#allocation5 + $0x928] sm:$0xff]  ;;  %v16258_v63 = vcombine.low %v11155_v43, %v11159_v8 }
 0x6d9   :  { %v16251_v37 = vcombine.high %v11147_v29, %v11151_v42  ;;  %v11267_v15 = vld [vmem:[#allocation5 + $0xcc8] sm:$0xff] }
 0x6da   :  { %13820 = vmatpush2.bf16.msra.mxu0 %v16170_v55  ;;  %v11271_v28 = vld [vmem:[#allocation5 + $0xce8] sm:$0xff] }
 0x6db   :  { %13779 = vmatpush2.bf16.msra.mxu1 %v16042_v20  ;;  %13821 = vmatprep.subr.bf16.mxu0 %v16163_v39  ;;  %v11139_v55 = vld [vmem:[#allocation5 + $0x8c8] sm:$0xff]  ;;  %v16378_v39 = vcombine.low %v11275_v0, %v11279_v23  ;;  %v16371_v22 = vcombine.high %v11267_v15, %v11271_v28 }
 0x6dc   :  { %13780 = vmatprep.subr.bf16.mxu1 %v16035_v19  ;;  %v11143_v20 = vld [vmem:[#allocation5 + $0x8e8] sm:$0xff]  ;;  %v16250_v19 = vcombine.low %v11147_v29, %v11151_v42 }
 0x6dd   :  { %v16243_v32 = vcombine.high %v11139_v55, %v11143_v20  ;;  %v11259_v18 = vld [vmem:[#allocation5 + $0xc88] sm:$0xff] }
 0x6de   :  { %13822 = vmatpush2.bf16.msra.mxu0 %v16162_v56  ;;  %v11263_v35 = vld [vmem:[#allocation5 + $0xca8] sm:$0xff] }
 0x6df   :  { %13781 = vmatpush2.bf16.msra.mxu1 %v16034_v61  ;;  %13823 = vmatprep.subr.bf16.mxu0 %v16155_v57  ;;  %v11131_v56 = vld [vmem:[#allocation5 + $0x888] sm:$0xff]  ;;  %v16370_v57 = vcombine.low %v11267_v15, %v11271_v28  ;;  %v16363_v26 = vcombine.high %v11259_v18, %v11263_v35  ;;  %v10908_v15 = vld [vmem:[#allocation5 + $0x190] sm:$0xff] }
 0x6e0   :  { %13782 = vmatprep.subr.bf16.mxu1 %v16027_v34  ;;  %v11135_v61 = vld [vmem:[#allocation5 + $0x8a8] sm:$0xff]  ;;  %v16242_v34 = vcombine.low %v11139_v55, %v11143_v20  ;;  %v10912_v28 = vld [vmem:[#allocation5 + $0x1b0] sm:$0xff] }
 0x6e1   :  { %v16235_v44 = vcombine.high %v11131_v56, %v11135_v61  ;;  %v11251_v6 = vld [vmem:[#allocation5 + $0xc48] sm:$0xff]  ;;  %v16234_v33 = vcombine.low %v11131_v56, %v11135_v61  ;;  %v10904_v56 = vld [vmem:[#allocation5 + $0x170] sm:$0xff] }
 0x6e2   :  { %13824 = vmatpush2.bf16.msra.mxu0 %v16154_v47  ;;  %v11255_v4 = vld [vmem:[#allocation5 + $0xc68] sm:$0xff]  ;;  %v11306_v47 = vld [vmem:[#allocation11 + $0x1c] sm:$0xff] }
 0x6e3   :  { %13783 = vmatpush2.bf16.msra.mxu1 %v16026_v2  ;;  %13875 = vmatprep.subr.bf16.mxu0 %v16403_v3  ;;  %v11123_v2 = vld [vmem:[#allocation5 + $0x848] sm:$0xff]  ;;  %v16355_v41 = vcombine.high %v11251_v6, %v11255_v4  ;;  %v11311_v58 = vrot.slane %v11306_v47, %v18920_v38  ;;  %v11315_v31 = vrot.slane %v11306_v47, %v18923_v40  ;;  %v10920_v38 = vld [vmem:[#allocation5 + $0x1f0] sm:$0xff] }
 0x6e4   :  { %13834 = vmatprep.subr.bf16.mxu1 %v16275_v53  ;;  %v11127_v3 = vld [vmem:[#allocation5 + $0x868] sm:$0xff]  ;;  %v16362_v53 = vcombine.low %v11259_v18, %v11263_v35  ;;  %v16354_v9 = vcombine.low %v11251_v6, %v11255_v4  ;;  %v10900_v35 = vld [vmem:[#allocation5 + $0x150] sm:$0xff] }
 0x6e5   :  { %13826 = vmatmul.mubr.bf16.vlgmr.msra.gmra.mxu0 %v19364_v49  ;;  %v16227_v45 = vcombine.high %v11123_v2, %v11127_v3  ;;  %v16226_v43 = vcombine.low %v11123_v2, %v11127_v3  ;;  %v11235_v0 = vld [vmem:[#allocation5 + $0xbc8] sm:$0xff]  ;;  %v13625_v29 = vadd.f32 %v19400_v21, %v11315_v31  ;;  %v10892_v4 = vld [vmem:[#allocation5 + $0x110] sm:$0xff] }
 0x6e6   :  { %13785 = vmatmul.mubr.bf16.vlgmr.msra.gmra.mxu1 %v19315_v30  ;;  %13876 = vmatpush1.bf16.msra.mxu0 %v16402_v51  ;;  %v11243_v51 = vld [vmem:[#allocation5 + $0xc08] sm:$0xff]  ;;  %v10896_v47 = vld [vmem:[#allocation5 + $0x130] sm:$0xff] }
 0x6e7   :  { %13835 = vmatpush1.bf16.msra.mxu1 %v16274_v14  ;;  %13866 = vmatprep.mubr.bf16.mxu1 %v19379_v50  ;;  %v11247_v14 = vld [vmem:[#allocation5 + $0xc28] sm:$0xff] }
 0x6e8   :  { %13877 = vmatprep.subr.bf16.mxu0 %v16395_v1  ;;  %13836 = vmatprep.subr.bf16.mxu1 %v16267_v27  ;;  %v11115_v1 = vld [vmem:[#allocation5 + $0x808] sm:$0xff]  ;;  %v16347_v8 = vcombine.high %v11243_v51, %v11247_v14  ;;  %v16346_v42 = vcombine.low %v11243_v51, %v11247_v14  ;;  %v10888_v51 = vld [vmem:[#allocation5 + $0xf0] sm:$0xff] }
 0x6e9   :  { %13907 = vmatprep.mubr.bf16.mxu0 %v18791_v16  ;;  %v11119_v27 = vld [vmem:[#allocation5 + $0x828] sm:$0xff] }
 0x6ea   :  { %13878 = vmatpush1.bf16.msra.mxu0 %v16394_v10  ;;  %v13623_v10 = vadd.f32 %v19398_v25, %v11311_v58  ;;  %v11239_v23 = vld [vmem:[#allocation5 + $0xbe8] sm:$0xff] }
 0x6eb   :  { %13837 = vmatpush1.bf16.msra.mxu1 %v16266_v52  ;;  %13879 = vmatprep.subr.bf16.mxu0 %v16387_v12  ;;  %v16219_v52 = vcombine.high %v11115_v1, %v11119_v27  ;;  %v10916_v12 = vld [vmem:[#allocation5 + $0x1d0] sm:$0xff]  ;;  %v11227_v20 = vld [vmem:[#allocation5 + $0xb88] sm:$0xff] }
 0x6ec   :  { %13838 = vmatprep.subr.bf16.mxu1 %v16259_v46  ;;  %v16020_v21 = vcombine.low %v10916_v12, %v10920_v38  ;;  %v11219_v61 = vld [vmem:[#allocation5 + $0xb48] sm:$0xff] }
 0x6ed   :  { %v11211_v2 = vld [vmem:[#allocation5 + $0xb08] sm:$0xff] }
 0x6ee   :  { %13880 = vmatpush1.bf16.msra.mxu0 %v16386_v17  ;;  %v16218_v17 = vcombine.low %v11115_v1, %v11119_v27  ;;  %v11215_v3 = vld [vmem:[#allocation5 + $0xb28] sm:$0xff]  ;;  %v15996_v27 = vcombine.low %v10892_v4, %v10896_v47 }
 0x6ef   :  { %13839 = vmatpush1.bf16.msra.mxu1 %v16258_v63  ;;  %13881 = vmatprep.subr.bf16.mxu0 %v16379_v5  ;;  %v16021_v5 = vcombine.high %v10916_v12, %v10920_v38  ;;  %v16315_v58 = vcombine.high %v11211_v2, %v11215_v3  ;;  %v11203_v14 = vld [vmem:[#allocation5 + $0xac8] sm:$0xff]  ;;  %v16314_v31 = vcombine.low %v11211_v2, %v11215_v3  ;;  %v11036_v2 = vld [vmem:[#allocation5 + $0x590] sm:$0xff] }
 0x6f0   :  { %13840 = vmatprep.subr.bf16.mxu1 %v16251_v37  ;;  %v16339_v37 = vcombine.high %v11235_v0, %v11239_v23  ;;  %v11207_v1 = vld [vmem:[#allocation5 + $0xae8] sm:$0xff]  ;;  %v11040_v3 = vld [vmem:[#allocation5 + $0x5b0] sm:$0xff] }
 0x6f1   :  { %v11199_v12 = vld [vmem:[#allocation5 + $0xaa8] sm:$0xff] }
 0x6f2   :  { %13882 = vmatpush1.bf16.msra.mxu0 %v16378_v39  ;;  %v11231_v39 = vld [vmem:[#allocation5 + $0xba8] sm:$0xff] }
 0x6f3   :  { %13841 = vmatpush1.bf16.msra.mxu1 %v16250_v19  ;;  %13883 = vmatprep.subr.bf16.mxu0 %v16371_v22  ;;  %v16338_v19 = vcombine.low %v11235_v0, %v11239_v23  ;;  %v16331_v18 = vcombine.high %v11227_v20, %v11231_v39 }
 0x6f4   :  { %13842 = vmatprep.subr.bf16.mxu1 %v16243_v32  ;;  %v16013_v32 = vcombine.high %v10908_v15, %v10912_v28 }
 0x6f6   :  { %13884 = vmatpush1.bf16.msra.mxu0 %v16370_v57  ;;  %v11223_v57 = vld [vmem:[#allocation5 + $0xb68] sm:$0xff] }
 0x6f7   :  { %13843 = vmatpush1.bf16.msra.mxu1 %v16242_v34  ;;  %13885 = vmatprep.subr.bf16.mxu0 %v16363_v26  ;;  %v16012_v34 = vcombine.low %v10908_v15, %v10912_v28  ;;  %v16330_v26 = vcombine.low %v11227_v20, %v11231_v39  ;;  %v16323_v6 = vcombine.high %v11219_v61, %v11223_v57  ;;  %v10864_v20 = vld [vmem:[#allocation5 + $0x30] sm:$0xff]  ;;  %v11179_v39 = vld [vmem:[#allocation5 + $0xa08] sm:$0xff] }
 0x6f8   :  { %13844 = vmatprep.subr.bf16.mxu1 %v16235_v44  ;;  %v16005_v44 = vcombine.high %v10900_v35, %v10904_v56 }
 0x6fa   :  { %13886 = vmatpush1.bf16.msra.mxu0 %v16362_v53  ;;  %v16004_v53 = vcombine.low %v10900_v35, %v10904_v56  ;;  %v10980_v35 = vld [vmem:[#allocation5 + $0x3d0] sm:$0xff] }
 0x6fb   :  { %13845 = vmatpush1.bf16.msra.mxu1 %v16234_v33  ;;  %13887 = vmatprep.subr.bf16.mxu0 %v16355_v41  ;;  %v16322_v33 = vcombine.low %v11219_v61, %v11223_v57  ;;  %v15997_v41 = vcombine.high %v10892_v4, %v10896_v47  ;;  %v10984_v56 = vld [vmem:[#allocation5 + $0x3f0] sm:$0xff] }
 0x6fc   :  { %13846 = vmatprep.subr.bf16.mxu1 %v16227_v45  ;;  %v13663_v46 = vpop.f32.mrf.mxu1  ;;  %v10884_v45 = vld [vmem:[#allocation5 + $0xd0] sm:$0xff] }
 0x6fd   :  { %v19410_v40 = vadd.f32 %v13663_v46, %v13623_v10  ;;  %v10880_v10 = vld [vmem:[#allocation5 + $0xb0] sm:$0xff]  ;;  %v15988_v38 = vcombine.low %v10884_v45, %v10888_v51  ;;  %v16306_v46 = vcombine.low %v11203_v14, %v11207_v1 }
 0x6fe   :  { %13888 = vmatpush1.bf16.msra.mxu0 %v16354_v9  ;;  %v13665_v63 = vpop.f32.mrf.mxu1  ;;  %v15989_v9 = vcombine.high %v10884_v45, %v10888_v51  ;;  %v11044_v61 = vld [vmem:[#allocation5 + $0x5d0] sm:$0xff] }
 0x6ff   :  { %13847 = vmatpush1.bf16.msra.mxu1 %v16226_v43  ;;  %13889 = vmatprep.subr.bf16.mxu0 %v16347_v8  ;;  %v19412_v25 = vadd.f32 %v13665_v63, %v13625_v29  ;;  %v16307_v43 = vcombine.high %v11203_v14, %v11207_v1  ;;  %v10876_v8 = vld [vmem:[#allocation5 + $0x90] sm:$0xff]  ;;  %v11191_v63 = vld [vmem:[#allocation5 + $0xa68] sm:$0xff] }
 0x700   :  { %13848 = vmatprep.subr.bf16.mxu1 %v16219_v52  ;;  %v13667_v55 = vpop.f32.mrf.mxu1  ;;  %v11195_v52 = vld [vmem:[#allocation5 + $0xa88] sm:$0xff]  ;;  %v15981_v0 = vcombine.high %v10876_v8, %v10880_v10  ;;  %v10868_v29 = vld [vmem:[#allocation5 + $0x50] sm:$0xff] }
 0x701   :  { %v16299_v23 = vcombine.high %v11195_v52, %v11199_v12  ;;  %v10860_v55 = vld [vmem:[#allocation5 + $0x10] sm:$0xff] }
 0x702   :  { %13890 = vmatpush1.bf16.msra.mxu0 %v16346_v42  ;;  %v13668_v22 = vpop.f32.mrf.mxu1  ;;  %v10872_v42 = vld [vmem:[#allocation5 + $0x70] sm:$0xff] }
 0x703   :  { %13849 = vmatpush1.bf16.msra.mxu1 %v16218_v17  ;;  %13916 = vmatprep.subr.bf16.mxu0 %v16021_v5  ;;  %v11187_v17 = vld [vmem:[#allocation5 + $0xa48] sm:$0xff]  ;;  %v15980_v5 = vcombine.low %v10876_v8, %v10880_v10  ;;  %v15973_v15 = vcombine.high %v10868_v29, %v10872_v42  ;;  %v11048_v57 = vld [vmem:[#allocation5 + $0x5f0] sm:$0xff] }
 0x704   :  { %13850 = vmatprep.subr.bf16.mxu1 %v16339_v37  ;;  %v16298_v37 = vcombine.low %v11195_v52, %v11199_v12  ;;  %v16291_v28 = vcombine.high %v11187_v17, %v11191_v63  ;;  %v16290_v22 = vcombine.low %v11187_v17, %v11191_v63  ;;  %v10972_v4 = vld [vmem:[#allocation5 + $0x390] sm:$0xff] }
 0x705   :  { %13908 = vmatmul.mubr.bf16.vlgmr.msra.gmra.mxu0 %v19385_v36  ;;  %v10976_v47 = vld [vmem:[#allocation5 + $0x3b0] sm:$0xff] }
 0x706   :  { %13917 = vmatpush1.bf16.msra.mxu0 %v16020_v21  ;;  %13948 = vmatprep.mubr.bf16.mxu0 %v19306_v7  ;;  %v11183_v21 = vld [vmem:[#allocation5 + $0xa28] sm:$0xff]  ;;  %v10964_v45 = vld [vmem:[#allocation5 + $0x350] sm:$0xff] }
 0x707   :  { %13851 = vmatpush2.bf16.msra.mxu1 %v16338_v19  ;;  %13918 = vmatprep.subr.bf16.mxu0 %v16013_v32  ;;  %v15972_v19 = vcombine.low %v10868_v29, %v10872_v42  ;;  %v15965_v32 = vcombine.high %v10860_v55, %v10864_v20  ;;  %v10968_v51 = vld [vmem:[#allocation5 + $0x370] sm:$0xff] }
 0x708   :  { %13852 = vmatprep.subr.bf16.mxu1 %v16331_v18  ;;  %v16283_v18 = vcombine.high %v11179_v39, %v11183_v21  ;;  %v11028_v14 = vld [vmem:[#allocation5 + $0x550] sm:$0xff] }
 0x709   :  { %v11032_v1 = vld [vmem:[#allocation5 + $0x570] sm:$0xff] }
 0x70a   :  { %13919 = vmatpush1.bf16.msra.mxu0 %v16012_v34  ;;  %v15964_v34 = vcombine.low %v10860_v55, %v10864_v20  ;;  %v10956_v8 = vld [vmem:[#allocation5 + $0x310] sm:$0xff] }
 0x70b   :  { %13853 = vmatpush2.bf16.msra.mxu1 %v16330_v26  ;;  %13920 = vmatprep.subr.bf16.mxu0 %v16005_v44  ;;  %v16282_v26 = vcombine.low %v11179_v39, %v11183_v21  ;;  %v16085_v44 = vcombine.high %v10980_v35, %v10984_v56  ;;  %v10960_v10 = vld [vmem:[#allocation5 + $0x330] sm:$0xff] }
 0x70c   :  { %13854 = vmatprep.subr.bf16.mxu1 %v16323_v6  ;;  %v16149_v6 = vcombine.high %v11044_v61, %v11048_v57  ;;  %v11020_v52 = vld [vmem:[#allocation5 + $0x510] sm:$0xff] }
 0x70d   :  { %v11024_v12 = vld [vmem:[#allocation5 + $0x530] sm:$0xff] }
 0x70e   :  { %13921 = vmatpush1.bf16.msra.mxu0 %v16004_v53  ;;  %v16084_v53 = vcombine.low %v10980_v35, %v10984_v56  ;;  %v10948_v29 = vld [vmem:[#allocation5 + $0x2d0] sm:$0xff] }
 0x70f   :  { %13855 = vmatpush2.bf16.msra.mxu1 %v16322_v33  ;;  %13922 = vmatprep.subr.bf16.mxu0 %v15997_v41  ;;  %v16148_v33 = vcombine.low %v11044_v61, %v11048_v57  ;;  %v16077_v41 = vcombine.high %v10972_v4, %v10976_v47  ;;  %v10952_v42 = vld [vmem:[#allocation5 + $0x2f0] sm:$0xff] }
 0x710   :  { %13856 = vmatprep.subr.bf16.mxu1 %v16315_v58  ;;  %v16141_v58 = vcombine.high %v11036_v2, %v11040_v3  ;;  %v11012_v17 = vld [vmem:[#allocation5 + $0x4d0] sm:$0xff] }
 0x711   :  { %v11016_v63 = vld [vmem:[#allocation5 + $0x4f0] sm:$0xff] }
 0x712   :  { %13923 = vmatpush1.bf16.msra.mxu0 %v15996_v27  ;;  %v16076_v27 = vcombine.low %v10972_v4, %v10976_v47  ;;  %v10940_v55 = vld [vmem:[#allocation5 + $0x290] sm:$0xff] }
 0x713   :  { %13857 = vmatpush2.bf16.msra.mxu1 %v16314_v31  ;;  %13924 = vmatprep.subr.bf16.mxu0 %v15989_v9  ;;  %v16140_v31 = vcombine.low %v11036_v2, %v11040_v3  ;;  %v16069_v9 = vcombine.high %v10964_v45, %v10968_v51  ;;  %v10944_v20 = vld [vmem:[#allocation5 + $0x2b0] sm:$0xff] }
 0x714   :  { %13858 = vmatprep.subr.bf16.mxu1 %v16307_v43  ;;  %v16133_v43 = vcombine.high %v11028_v14, %v11032_v1  ;;  %v11004_v39 = vld [vmem:[#allocation5 + $0x490] sm:$0xff] }
 0x715   :  { %v11008_v21 = vld [vmem:[#allocation5 + $0x4b0] sm:$0xff] }
 0x716   :  { %13925 = vmatpush1.bf16.msra.mxu0 %v15988_v38  ;;  %v16068_v38 = vcombine.low %v10964_v45, %v10968_v51  ;;  %v10932_v35 = vld [vmem:[#allocation5 + $0x250] sm:$0xff] }
 0x717   :  { %13859 = vmatpush2.bf16.msra.mxu1 %v16306_v46  ;;  %13926 = vmatprep.subr.bf16.mxu0 %v15981_v0  ;;  %v16132_v46 = vcombine.low %v11028_v14, %v11032_v1  ;;  %v16061_v0 = vcombine.high %v10956_v8, %v10960_v10  ;;  %v10936_v56 = vld [vmem:[#allocation5 + $0x270] sm:$0xff] }
 0x718   :  { %13860 = vmatprep.subr.bf16.mxu1 %v16299_v23  ;;  %v16125_v23 = vcombine.high %v11020_v52, %v11024_v12  ;;  %v10996_v61 = vld [vmem:[#allocation5 + $0x450] sm:$0xff] }
 0x719   :  { %v11000_v57 = vld [vmem:[#allocation5 + $0x470] sm:$0xff] }
 0x71a   :  { %13927 = vmatpush1.bf16.msra.mxu0 %v15980_v5  ;;  %v16060_v5 = vcombine.low %v10956_v8, %v10960_v10  ;;  %v10924_v4 = vld [vmem:[#allocation5 + $0x210] sm:$0xff] }
 0x71b   :  { %13861 = vmatpush2.bf16.msra.mxu1 %v16298_v37  ;;  %13928 = vmatprep.subr.bf16.mxu0 %v15973_v15  ;;  %v16124_v37 = vcombine.low %v11020_v52, %v11024_v12  ;;  %v16053_v15 = vcombine.high %v10948_v29, %v10952_v42  ;;  %v10928_v47 = vld [vmem:[#allocation5 + $0x230] sm:$0xff] }
 0x71c   :  { %13862 = vmatprep.subr.bf16.mxu1 %v16291_v28  ;;  %v16117_v28 = vcombine.high %v11012_v17, %v11016_v63  ;;  %v10988_v2 = vld [vmem:[#allocation5 + $0x410] sm:$0xff] }
 0x71d   :  { %v10992_v3 = vld [vmem:[#allocation5 + $0x430] sm:$0xff] }
 0x71e   :  { %13929 = vmatpush1.bf16.msra.mxu0 %v15972_v19  ;;  %v16052_v19 = vcombine.low %v10948_v29, %v10952_v42  ;;  %v11172_v45 = vld [vmem:[#allocation5 + $0x9d0] sm:$0xff] }
 0x71f   :  { %13863 = vmatpush2.bf16.msra.mxu1 %v16290_v22  ;;  %13930 = vmatprep.subr.bf16.mxu0 %v15965_v32  ;;  %v16116_v22 = vcombine.low %v11012_v17, %v11016_v63  ;;  %v16045_v32 = vcombine.high %v10940_v55, %v10944_v20  ;;  %v11176_v51 = vld [vmem:[#allocation5 + $0x9f0] sm:$0xff] }
 0x720   :  { %13864 = vmatprep.subr.bf16.mxu1 %v16283_v18  ;;  %v16109_v18 = vcombine.high %v11004_v39, %v11008_v21  ;;  %v11108_v14 = vld [vmem:[#allocation5 + $0x7d0] sm:$0xff] }
 0x721   :  { %v11112_v1 = vld [vmem:[#allocation5 + $0x7f0] sm:$0xff] }
 0x722   :  { %13931 = vmatpush1.bf16.msra.mxu0 %v15964_v34  ;;  %v16044_v34 = vcombine.low %v10940_v55, %v10944_v20  ;;  %v11164_v8 = vld [vmem:[#allocation5 + $0x990] sm:$0xff] }
 0x723   :  { %13865 = vmatpush2.bf16.msra.mxu1 %v16282_v26  ;;  %13932 = vmatprep.subr.bf16.mxu0 %v16085_v44  ;;  %v16108_v26 = vcombine.low %v11004_v39, %v11008_v21  ;;  %v16037_v44 = vcombine.high %v10932_v35, %v10936_v56  ;;  %v11168_v10 = vld [vmem:[#allocation5 + $0x9b0] sm:$0xff] }
 0x724   :  { %13957 = vmatprep.subr.bf16.mxu1 %v16149_v6  ;;  %v16101_v6 = vcombine.high %v10996_v61, %v11000_v57  ;;  %v11100_v52 = vld [vmem:[#allocation5 + $0x790] sm:$0xff] }
 0x725   :  { %v11104_v12 = vld [vmem:[#allocation5 + $0x7b0] sm:$0xff] }
 0x726   :  { %13867 = vmatmul.mubr.bf16.vlgmr.msra.gmra.mxu1 %v19383_v13  ;;  %13933 = vmatpush2.bf16.msra.mxu0 %v16084_v53  ;;  %v16036_v53 = vcombine.low %v10932_v35, %v10936_v56  ;;  %v11156_v29 = vld [vmem:[#allocation5 + $0x950] sm:$0xff] }
 0x727   :  { %13958 = vmatpush1.bf16.msra.mxu1 %v16148_v33  ;;  %13989 = vmatprep.mubr.bf16.mxu1 %v19358_v24  ;;  %v16100_v33 = vcombine.low %v10996_v61, %v11000_v57  ;;  %v11160_v42 = vld [vmem:[#allocation5 + $0x970] sm:$0xff] }
 0x728   :  { %13934 = vmatprep.subr.bf16.mxu0 %v16077_v41  ;;  %13959 = vmatprep.subr.bf16.mxu1 %v16141_v58  ;;  %v16029_v41 = vcombine.high %v10924_v4, %v10928_v47  ;;  %v16093_v58 = vcombine.high %v10988_v2, %v10992_v3  ;;  %v11092_v17 = vld [vmem:[#allocation5 + $0x750] sm:$0xff] }
 0x729   :  { %v11096_v63 = vld [vmem:[#allocation5 + $0x770] sm:$0xff] }
 0x72a   :  { %13935 = vmatpush2.bf16.msra.mxu0 %v16076_v27  ;;  %v16028_v27 = vcombine.low %v10924_v4, %v10928_v47  ;;  %v11148_v55 = vld [vmem:[#allocation5 + $0x910] sm:$0xff] }
 0x72b   :  { %13960 = vmatpush1.bf16.msra.mxu1 %v16140_v31  ;;  %13936 = vmatprep.subr.bf16.mxu0 %v16069_v9  ;;  %v16092_v31 = vcombine.low %v10988_v2, %v10992_v3  ;;  %v16277_v9 = vcombine.high %v11172_v45, %v11176_v51  ;;  %v11152_v20 = vld [vmem:[#allocation5 + $0x930] sm:$0xff] }
 0x72c   :  { %13961 = vmatprep.subr.bf16.mxu1 %v16133_v43  ;;  %v16213_v43 = vcombine.high %v11108_v14, %v11112_v1  ;;  %v11084_v39 = vld [vmem:[#allocation5 + $0x710] sm:$0xff] }
 0x72d   :  { %v11088_v21 = vld [vmem:[#allocation5 + $0x730] sm:$0xff] }
 0x72e   :  { %13937 = vmatpush2.bf16.msra.mxu0 %v16068_v38  ;;  %v16276_v38 = vcombine.low %v11172_v45, %v11176_v51  ;;  %v11140_v35 = vld [vmem:[#allocation5 + $0x8d0] sm:$0xff] }
 0x72f   :  { %13962 = vmatpush1.bf16.msra.mxu1 %v16132_v46  ;;  %13938 = vmatprep.subr.bf16.mxu0 %v16061_v0  ;;  %v16212_v46 = vcombine.low %v11108_v14, %v11112_v1  ;;  %v16269_v0 = vcombine.high %v11164_v8, %v11168_v10  ;;  %v11144_v56 = vld [vmem:[#allocation5 + $0x8f0] sm:$0xff] }
 0x730   :  { %13963 = vmatprep.subr.bf16.mxu1 %v16125_v23  ;;  %v16205_v23 = vcombine.high %v11100_v52, %v11104_v12  ;;  %v11076_v61 = vld [vmem:[#allocation5 + $0x6d0] sm:$0xff] }
 0x731   :  { %v11080_v57 = vld [vmem:[#allocation5 + $0x6f0] sm:$0xff] }
 0x732   :  { %13939 = vmatpush2.bf16.msra.mxu0 %v16060_v5  ;;  %v16268_v5 = vcombine.low %v11164_v8, %v11168_v10  ;;  %v11132_v4 = vld [vmem:[#allocation5 + $0x890] sm:$0xff] }
 0x733   :  { %13964 = vmatpush1.bf16.msra.mxu1 %v16124_v37  ;;  %13940 = vmatprep.subr.bf16.mxu0 %v16053_v15  ;;  %v16204_v37 = vcombine.low %v11100_v52, %v11104_v12  ;;  %v16261_v15 = vcombine.high %v11156_v29, %v11160_v42  ;;  %v11136_v47 = vld [vmem:[#allocation5 + $0x8b0] sm:$0xff] }
 0x734   :  { %13965 = vmatprep.subr.bf16.mxu1 %v16117_v28  ;;  %v16197_v28 = vcombine.high %v11092_v17, %v11096_v63  ;;  %v11068_v2 = vld [vmem:[#allocation5 + $0x690] sm:$0xff] }
 0x735   :  { %v11072_v3 = vld [vmem:[#allocation5 + $0x6b0] sm:$0xff] }
 0x736   :  { %13941 = vmatpush2.bf16.msra.mxu0 %v16052_v19  ;;  %v16260_v19 = vcombine.low %v11156_v29, %v11160_v42  ;;  %v11124_v45 = vld [vmem:[#allocation5 + $0x850] sm:$0xff] }
 0x737   :  { %13966 = vmatpush1.bf16.msra.mxu1 %v16116_v22  ;;  %13942 = vmatprep.subr.bf16.mxu0 %v16045_v32  ;;  %v16196_v22 = vcombine.low %v11092_v17, %v11096_v63  ;;  %v16253_v32 = vcombine.high %v11148_v55, %v11152_v20  ;;  %v11128_v51 = vld [vmem:[#allocation5 + $0x870] sm:$0xff] }
 0x738   :  { %13967 = vmatprep.subr.bf16.mxu1 %v16109_v18  ;;  %v16189_v18 = vcombine.high %v11084_v39, %v11088_v21  ;;  %v11060_v14 = vld [vmem:[#allocation5 + $0x650] sm:$0xff] }
 0x739   :  { %v11064_v1 = vld [vmem:[#allocation5 + $0x670] sm:$0xff] }
 0x73a   :  { %13943 = vmatpush2.bf16.msra.mxu0 %v16044_v34  ;;  %v16252_v34 = vcombine.low %v11148_v55, %v11152_v20  ;;  %v11116_v8 = vld [vmem:[#allocation5 + $0x810] sm:$0xff] }
 0x73b   :  { %13968 = vmatpush1.bf16.msra.mxu1 %v16108_v26  ;;  %13944 = vmatprep.subr.bf16.mxu0 %v16037_v44  ;;  %v16188_v26 = vcombine.low %v11084_v39, %v11088_v21  ;;  %v16245_v44 = vcombine.high %v11140_v35, %v11144_v56  ;;  %v11120_v10 = vld [vmem:[#allocation5 + $0x830] sm:$0xff] }
 0x73c   :  { %13969 = vmatprep.subr.bf16.mxu1 %v16101_v6  ;;  %v16181_v6 = vcombine.high %v11076_v61, %v11080_v57  ;;  %v11052_v52 = vld [vmem:[#allocation5 + $0x610] sm:$0xff] }
 0x73d   :  { %v11056_v12 = vld [vmem:[#allocation5 + $0x630] sm:$0xff] }
 0x73e   :  { %13945 = vmatpush2.bf16.msra.mxu0 %v16036_v53  ;;  %v16244_v53 = vcombine.low %v11140_v35, %v11144_v56  ;;  %v11236_v29 = vld [vmem:[#allocation5 + $0xbd0] sm:$0xff] }
 0x73f   :  { %13970 = vmatpush1.bf16.msra.mxu1 %v16100_v33  ;;  %13946 = vmatprep.subr.bf16.mxu0 %v16029_v41  ;;  %v16180_v33 = vcombine.low %v11076_v61, %v11080_v57  ;;  %v16237_v41 = vcombine.high %v11132_v4, %v11136_v47  ;;  %v11240_v42 = vld [vmem:[#allocation5 + $0xbf0] sm:$0xff] }
 0x740   :  { %13971 = vmatprep.subr.bf16.mxu1 %v16093_v58  ;;  %v16173_v58 = vcombine.high %v11068_v2, %v11072_v3  ;;  %v11300_v17 = vld [vmem:[#allocation5 + $0xdd0] sm:$0xff] }
 0x741   :  { %v11304_v63 = vld [vmem:[#allocation5 + $0xdf0] sm:$0xff] }
 0x742   :  { %13947 = vmatpush2.bf16.msra.mxu0 %v16028_v27  ;;  %v16236_v27 = vcombine.low %v11132_v4, %v11136_v47  ;;  %v11228_v55 = vld [vmem:[#allocation5 + $0xb90] sm:$0xff] }
 0x743   :  { %13972 = vmatpush1.bf16.msra.mxu1 %v16092_v31  ;;  %13998 = vmatprep.subr.bf16.mxu0 %v16277_v9  ;;  %v16172_v31 = vcombine.low %v11068_v2, %v11072_v3  ;;  %v16229_v9 = vcombine.high %v11124_v45, %v11128_v51  ;;  %v11232_v20 = vld [vmem:[#allocation5 + $0xbb0] sm:$0xff] }
 0x744   :  { %13973 = vmatprep.subr.bf16.mxu1 %v16213_v43  ;;  %v16165_v43 = vcombine.high %v11060_v14, %v11064_v1  ;;  %v11292_v39 = vld [vmem:[#allocation5 + $0xd90] sm:$0xff] }
 0x745   :  { %13949 = vmatmul.mubr.bf16.vlgmr.msra.gmra.mxu0 %v19315_v30  ;;  %v11296_v21 = vld [vmem:[#allocation5 + $0xdb0] sm:$0xff] }
 0x746   :  { %13999 = vmatpush1.bf16.msra.mxu0 %v16276_v38  ;;  %14030 = vmatprep.mubr.bf16.mxu0 %v19379_v50  ;;  %v16228_v38 = vcombine.low %v11124_v45, %v11128_v51  ;;  %v11220_v35 = vld [vmem:[#allocation5 + $0xb50] sm:$0xff]  ;;  %v16396_v47 = vcombine.low %v11292_v39, %v11296_v21 }
 0x747   :  { %13974 = vmatpush2.bf16.msra.mxu1 %v16212_v46  ;;  %14000 = vmatprep.subr.bf16.mxu0 %v16269_v0  ;;  %v16164_v46 = vcombine.low %v11060_v14, %v11064_v1  ;;  %v16221_v0 = vcombine.high %v11116_v8, %v11120_v10  ;;  %v11224_v56 = vld [vmem:[#allocation5 + $0xb70] sm:$0xff] }
 0x748   :  { %13975 = vmatprep.subr.bf16.mxu1 %v16205_v23  ;;  %v16157_v23 = vcombine.high %v11052_v52, %v11056_v12  ;;  %v11284_v57 = vld [vmem:[#allocation5 + $0xd50] sm:$0xff]  ;;  %v16325_v2 = vcombine.high %v11220_v35, %v11224_v56 }
 0x749   :  { %v11216_v45 = vld [vmem:[#allocation5 + $0xb30] sm:$0xff] }
 0x74a   :  { %14001 = vmatpush1.bf16.msra.mxu0 %v16268_v5  ;;  %v16220_v5 = vcombine.low %v11116_v8, %v11120_v10  ;;  %v11276_v51 = vld [vmem:[#allocation5 + $0xd10] sm:$0xff] }
 0x74b   :  { %13976 = vmatpush2.bf16.msra.mxu1 %v16204_v37  ;;  %14002 = vmatprep.subr.bf16.mxu0 %v16261_v15  ;;  %v16156_v37 = vcombine.low %v11052_v52, %v11056_v12  ;;  %v16341_v15 = vcombine.high %v11236_v29, %v11240_v42  ;;  %v11280_v14 = vld [vmem:[#allocation5 + $0xd30] sm:$0xff] }
 0x74c   :  { %13977 = vmatprep.subr.bf16.mxu1 %v16197_v28  ;;  %v16405_v28 = vcombine.high %v11300_v17, %v11304_v63  ;;  %v16381_v10 = vcombine.high %v11276_v51, %v11280_v14  ;;  %v11204_v52 = vld [vmem:[#allocation5 + $0xad0] sm:$0xff] }
 0x74d   :  { %v11208_v12 = vld [vmem:[#allocation5 + $0xaf0] sm:$0xff] }
 0x74e   :  { %14003 = vmatpush1.bf16.msra.mxu0 %v16260_v19  ;;  %v16340_v19 = vcombine.low %v11236_v29, %v11240_v42  ;;  %v16309_v29 = vcombine.high %v11204_v52, %v11208_v12 }
 0x74f   :  { %13978 = vmatpush2.bf16.msra.mxu1 %v16196_v22  ;;  %14004 = vmatprep.subr.bf16.mxu0 %v16253_v32  ;;  %v16404_v22 = vcombine.low %v11300_v17, %v11304_v63  ;;  %v16333_v32 = vcombine.high %v11228_v55, %v11232_v20  ;;  %v11196_v17 = vld [vmem:[#allocation5 + $0xa90] sm:$0xff] }
 0x750   :  { %13979 = vmatprep.subr.bf16.mxu1 %v16189_v18  ;;  %v16397_v18 = vcombine.high %v11292_v39, %v11296_v21  ;;  %v11200_v63 = vld [vmem:[#allocation5 + $0xab0] sm:$0xff] }
 0x751   :  { %v11188_v39 = vld [vmem:[#allocation5 + $0xa50] sm:$0xff] }
 0x752   :  { %14005 = vmatpush1.bf16.msra.mxu0 %v16252_v34  ;;  %v11288_v34 = vld [vmem:[#allocation5 + $0xd70] sm:$0xff] }
 0x753   :  { %13980 = vmatpush2.bf16.msra.mxu1 %v16188_v26  ;;  %14006 = vmatprep.subr.bf16.mxu0 %v16245_v44  ;;  %v11192_v21 = vld [vmem:[#allocation5 + $0xa70] sm:$0xff] }
 0x754   :  { %13981 = vmatprep.subr.bf16.mxu1 %v16181_v6  ;;  %v16332_v6 = vcombine.low %v11228_v55, %v11232_v20  ;;  %v16301_v55 = vcombine.high %v11196_v17, %v11200_v63 }
 0x756   :  { %14007 = vmatpush1.bf16.msra.mxu0 %v16244_v53 }
 0x757   :  { %13982 = vmatpush2.bf16.msra.mxu1 %v16180_v33  ;;  %14008 = vmatprep.subr.bf16.mxu0 %v16237_v41  ;;  %v16389_v41 = vcombine.high %v11284_v57, %v11288_v34 }
 0x758   :  { %13983 = vmatprep.subr.bf16.mxu1 %v16173_v58  ;;  %v11212_v58 = vld [vmem:[#allocation5 + $0xb10] sm:$0xff] }
 0x75a   :  { %14009 = vmatpush1.bf16.msra.mxu0 %v16236_v27 }
 0x75b   :  { %13984 = vmatpush2.bf16.msra.mxu1 %v16172_v31  ;;  %14010 = vmatprep.subr.bf16.mxu0 %v16229_v9  ;;  %v16324_v31 = vcombine.low %v11220_v35, %v11224_v56  ;;  %v16293_v35 = vcombine.high %v11188_v39, %v11192_v21 }
 0x75c   :  { %13985 = vmatprep.subr.bf16.mxu1 %v16165_v43  ;;  %v16388_v43 = vcombine.low %v11284_v57, %v11288_v34  ;;  %v11184_v57 = vld [vmem:[#allocation5 + $0xa30] sm:$0xff] }
 0x75d   :  { %v11244_v34 = vld [vmem:[#allocation5 + $0xc10] sm:$0xff] }
 0x75e   :  { %14011 = vmatpush1.bf16.msra.mxu0 %v16228_v38  ;;  %v11268_v38 = vld [vmem:[#allocation5 + $0xcd0] sm:$0xff] }
 0x75f   :  { %13986 = vmatpush2.bf16.msra.mxu1 %v16164_v46  ;;  %14012 = vmatprep.subr.bf16.mxu0 %v16221_v0  ;;  %v11272_v46 = vld [vmem:[#allocation5 + $0xcf0] sm:$0xff]  ;;  %v16316_v0 = vcombine.low %v11212_v58, %v11216_v45 }
 0x760   :  { %13987 = vmatprep.subr.bf16.mxu1 %v16157_v23  ;;  %v16380_v23 = vcombine.low %v11276_v51, %v11280_v14  ;;  %v16373_v42 = vcombine.high %v11268_v38, %v11272_v46  ;;  %v11037_v14 = vld [vmem:[#allocation5 + $0x598] sm:$0xff] }
 0x762   :  { %14013 = vmatpush1.bf16.msra.mxu0 %v16220_v5  ;;  %v11260_v5 = vld [vmem:[#allocation5 + $0xc90] sm:$0xff] }
 0x763   :  { %13988 = vmatpush2.bf16.msra.mxu1 %v16156_v37  ;;  %14014 = vmatprep.subr.bf16.mxu0 %v16341_v15  ;;  %v11264_v37 = vld [vmem:[#allocation5 + $0xcb0] sm:$0xff]  ;;  %v16308_v15 = vcombine.low %v11204_v52, %v11208_v12  ;;  %v11033_v52 = vld [vmem:[#allocation5 + $0x578] sm:$0xff] }
 0x764   :  { %14039 = vmatprep.subr.bf16.mxu1 %v16405_v28  ;;  %v16372_v28 = vcombine.low %v11268_v38, %v11272_v46  ;;  %v16365_v20 = vcombine.high %v11260_v5, %v11264_v37  ;;  %v10901_v38 = vld [vmem:[#allocation5 + $0x158] sm:$0xff] }
 0x765   :  { %v13704_v61 = vpop.f32.mrf.mxu0  ;;  %v10905_v46 = vld [vmem:[#allocation5 + $0x178] sm:$0xff] }
 0x766   :  { %v13705_v26 = vadd.f32 %v13704_v61, %v19410_v40  ;;  %13990 = vmatmul.mubr.bf16.vlgmr.msra.gmra.mxu1 %v19364_v49  ;;  %14015 = vmatpush2.bf16.msra.mxu0 %v16340_v19  ;;  %v13745_v44 = vpop.f32.mrf.mxu1  ;;  %v11252_v19 = vld [vmem:[#allocation5 + $0xc50] sm:$0xff] }
 0x767   :  { %14040 = vmatpush1.bf16.msra.mxu1 %v16404_v22  ;;  %v13706_v4 = vpop.f32.mrf.mxu0  ;;  %14016 = vmatprep.subr.bf16.mxu0 %v16333_v32  ;;  %v11256_v22 = vld [vmem:[#allocation5 + $0xc70] sm:$0xff]  ;;  %v16300_v32 = vcombine.low %v11196_v17, %v11200_v63  ;;  %v11021_v17 = vld [vmem:[#allocation5 + $0x518] sm:$0xff] }
 0x768   :  { %v19422_v3 = vadd.f32 %v13745_v44, %v13705_v26  ;;  %v13707_v53 = vadd.f32 %v13706_v4, %v19412_v25  ;;  %v13747_v33 = vpop.f32.mrf.mxu1  ;;  %14041 = vmatprep.subr.bf16.mxu1 %v16397_v18  ;;  %14071 = vmatprep.mubr.bf16.mxu1 %v18791_v16  ;;  %v16317_v25 = vcombine.high %v11212_v58, %v11216_v45  ;;  %v11180_v61 = vld [vmem:[#allocation5 + $0xa10] sm:$0xff]  ;;  %v11025_v63 = vld [vmem:[#allocation5 + $0x538] sm:$0xff] }
 0x769   :  { %v13708_v40 = vpop.f32.mrf.mxu0  ;;  %v16364_v18 = vcombine.low %v11260_v5, %v11264_v37  ;;  %v16357_v56 = vcombine.high %v11252_v19, %v11256_v22  ;;  %v11248_v26 = vld [vmem:[#allocation5 + $0xc30] sm:$0xff]  ;;  %v16292_v44 = vcombine.low %v11188_v39, %v11192_v21  ;;  %v16285_v4 = vcombine.high %v11180_v61, %v11184_v57  ;;  %v10893_v5 = vld [vmem:[#allocation5 + $0x118] sm:$0xff] }
 0x76a   :  { %v19426_v1 = vadd.f32 %v13747_v33, %v13707_v53  ;;  %14017 = vmatpush2.bf16.msra.mxu0 %v16332_v6  ;;  %v13749_v27 = vpop.f32.mrf.mxu1  ;;  %v16356_v6 = vcombine.low %v11252_v19, %v11256_v22  ;;  %v11049_v53 = vld [vmem:[#allocation5 + $0x5f8] sm:$0xff]  ;;  %v16284_v58 = vcombine.low %v11180_v61, %v11184_v57  ;;  %v16348_v45 = vcombine.low %v11244_v34, %v11248_v26 }
 0x76b   :  { %14042 = vmatpush1.bf16.msra.mxu1 %v16396_v47  ;;  %v13709_v9 = vpop.f32.mrf.mxu0  ;;  %14018 = vmatprep.subr.bf16.mxu0 %v16325_v2  ;;  %v16349_v47 = vcombine.high %v11244_v34, %v11248_v26  ;;  %v11045_v2 = vld [vmem:[#allocation5 + $0x5d8] sm:$0xff] }
 0x76c   :  { %v13750_v8 = vpop.f32.mrf.mxu1  ;;  %14043 = vmatprep.subr.bf16.mxu1 %v16389_v41  ;;  %v10917_v33 = vld [vmem:[#allocation5 + $0x1d8] sm:$0xff]  ;;  %v16151_v40 = vcombine.high %v11045_v2, %v11049_v53 }
 0x76d   :  { %v10921_v41 = vld [vmem:[#allocation5 + $0x1f8] sm:$0xff] }
 0x76e   :  { %14019 = vmatpush2.bf16.msra.mxu0 %v16324_v31  ;;  %v16023_v51 = vcombine.high %v10917_v33, %v10921_v41  ;;  %v11041_v27 = vld [vmem:[#allocation5 + $0x5b8] sm:$0xff]  ;;  %v16150_v31 = vcombine.low %v11045_v2, %v11049_v53 }
 0x76f   :  { %14044 = vmatpush1.bf16.msra.mxu1 %v16388_v43  ;;  %14020 = vmatprep.subr.bf16.mxu0 %v16317_v25  ;;  %v10909_v9 = vld [vmem:[#allocation5 + $0x198] sm:$0xff]  ;;  %v16022_v25 = vcombine.low %v10917_v33, %v10921_v41  ;;  %v16143_v8 = vcombine.high %v11037_v14, %v11041_v27 }
 0x770   :  { %14045 = vmatprep.subr.bf16.mxu1 %v16381_v10  ;;  %v10913_v43 = vld [vmem:[#allocation5 + $0x1b8] sm:$0xff] }
 0x771   :  { %v11029_v10 = vld [vmem:[#allocation5 + $0x558] sm:$0xff]  ;;  %v16015_v12 = vcombine.high %v10909_v9, %v10913_v43 }
 0x772   :  { %14021 = vmatpush2.bf16.msra.mxu0 %v16316_v0  ;;  %v16142_v0 = vcombine.low %v11037_v14, %v11041_v27  ;;  %v10897_v37 = vld [vmem:[#allocation5 + $0x138] sm:$0xff] }
 0x773   :  { %14046 = vmatpush1.bf16.msra.mxu1 %v16380_v23  ;;  %14022 = vmatprep.subr.bf16.mxu0 %v16309_v29  ;;  %v16014_v23 = vcombine.low %v10909_v9, %v10913_v43  ;;  %v16135_v29 = vcombine.high %v11029_v10, %v11033_v52  ;;  %v11017_v39 = vld [vmem:[#allocation5 + $0x4f8] sm:$0xff]  ;;  %v15998_v22 = vcombine.low %v10893_v5, %v10897_v37 }
 0x774   :  { %14047 = vmatprep.subr.bf16.mxu1 %v16373_v42  ;;  %v16007_v42 = vcombine.high %v10901_v38, %v10905_v46  ;;  %v10885_v21 = vld [vmem:[#allocation5 + $0xd8] sm:$0xff] }
 0x775   :  { %v10889_v19 = vld [vmem:[#allocation5 + $0xf8] sm:$0xff] }
 0x776   :  { %14023 = vmatpush2.bf16.msra.mxu0 %v16308_v15  ;;  %v16134_v15 = vcombine.low %v11029_v10, %v11033_v52  ;;  %v10877_v61 = vld [vmem:[#allocation5 + $0x98] sm:$0xff]  ;;  %v15990_v26 = vcombine.low %v10885_v21, %v10889_v19 }
 0x777   :  { %14048 = vmatpush1.bf16.msra.mxu1 %v16372_v28  ;;  %14024 = vmatprep.subr.bf16.mxu0 %v16301_v55  ;;  %v16006_v28 = vcombine.low %v10901_v38, %v10905_v46  ;;  %v16127_v55 = vcombine.high %v11021_v17, %v11025_v63  ;;  %v10881_v57 = vld [vmem:[#allocation5 + $0xb8] sm:$0xff] }
 0x778   :  { %14049 = vmatprep.subr.bf16.mxu1 %v16365_v20  ;;  %v11013_v20 = vld [vmem:[#allocation5 + $0x4d8] sm:$0xff]  ;;  %v15982_v41 = vcombine.low %v10877_v61, %v10881_v57 }
 0x779   :  { %v16118_v34 = vcombine.low %v11013_v20, %v11017_v39  ;;  %v10869_v2 = vld [vmem:[#allocation5 + $0x58] sm:$0xff] }
 0x77a   :  { %14025 = vmatpush2.bf16.msra.mxu0 %v16300_v32  ;;  %v16119_v32 = vcombine.high %v11013_v20, %v11017_v39  ;;  %v10873_v53 = vld [vmem:[#allocation5 + $0x78] sm:$0xff] }
 0x77b   :  { %14050 = vmatpush1.bf16.msra.mxu1 %v16364_v18  ;;  %14026 = vmatprep.subr.bf16.mxu0 %v16293_v35  ;;  %v15991_v18 = vcombine.high %v10885_v21, %v10889_v19  ;;  %v11005_v35 = vld [vmem:[#allocation5 + $0x498] sm:$0xff]  ;;  %v15974_v9 = vcombine.low %v10869_v2, %v10873_v53 }
 0x77c   :  { %14051 = vmatprep.subr.bf16.mxu1 %v16357_v56  ;;  %v11009_v56 = vld [vmem:[#allocation5 + $0x4b8] sm:$0xff] }
 0x77d   :  { %v16110_v33 = vcombine.low %v11005_v35, %v11009_v56  ;;  %v10861_v14 = vld [vmem:[#allocation5 + $0x18] sm:$0xff] }
 0x77e   :  { %14027 = vmatpush2.bf16.msra.mxu0 %v16292_v44  ;;  %v16111_v44 = vcombine.high %v11005_v35, %v11009_v56  ;;  %v10865_v27 = vld [vmem:[#allocation5 + $0x38] sm:$0xff] }
 0x77f   :  { %14052 = vmatpush1.bf16.msra.mxu1 %v16356_v6  ;;  %14028 = vmatprep.subr.bf16.mxu0 %v16285_v4  ;;  %v15983_v6 = vcombine.high %v10877_v61, %v10881_v57  ;;  %v10997_v4 = vld [vmem:[#allocation5 + $0x458] sm:$0xff]  ;;  %v15966_v46 = vcombine.low %v10861_v14, %v10865_v27 }
 0x780   :  { %14053 = vmatprep.subr.bf16.mxu1 %v16349_v47  ;;  %v11001_v47 = vld [vmem:[#allocation5 + $0x478] sm:$0xff] }
 0x781   :  { %v11113_v10 = vld [vmem:[#allocation5 + $0x7f8] sm:$0xff] }
 0x782   :  { %14029 = vmatpush2.bf16.msra.mxu0 %v16284_v58  ;;  %v16103_v58 = vcombine.high %v10997_v4, %v11001_v47  ;;  %v10981_v52 = vld [vmem:[#allocation5 + $0x3d8] sm:$0xff] }
 0x783   :  { %14054 = vmatpush1.bf16.msra.mxu1 %v16348_v45  ;;  %14121 = vmatprep.subr.bf16.mxu0 %v16151_v40  ;;  %v15975_v45 = vcombine.high %v10869_v2, %v10873_v53  ;;  %v10989_v40 = vld [vmem:[#allocation5 + $0x418] sm:$0xff] }
 0x784   :  { %14080 = vmatprep.subr.bf16.mxu1 %v16023_v51  ;;  %v10993_v51 = vld [vmem:[#allocation5 + $0x438] sm:$0xff] }
 0x785   :  { %14031 = vmatmul.mubr.bf16.vlgmr.msra.gmra.mxu0 %v19383_v13  ;;  %v16095_v43 = vcombine.high %v10989_v40, %v10993_v51  ;;  %v16094_v38 = vcombine.low %v10989_v40, %v10993_v51  ;;  %v11093_v20 = vld [vmem:[#allocation5 + $0x758] sm:$0xff] }
 0x786   :  { %14072 = vmatmul.mubr.bf16.vlgmr.msra.gmra.mxu1 %v19385_v36  ;;  %14122 = vmatpush1.bf16.msra.mxu0 %v16150_v31  ;;  %v16102_v31 = vcombine.low %v10997_v4, %v11001_v47  ;;  %v11097_v39 = vld [vmem:[#allocation5 + $0x778] sm:$0xff] }
 0x787   :  { %14153 = vmatprep.mubr.bf16.mxu0 %v19358_v24  ;;  %14081 = vmatpush1.bf16.msra.mxu1 %v16022_v25  ;;  %v15999_v24 = vcombine.high %v10893_v5, %v10897_v37  ;;  %v15967_v25 = vcombine.high %v10861_v14, %v10865_v27  ;;  %v19432_v37 = vld [vmem:[#allocation11 + $0x1c] sm:$0xff]  ;;  %v16199_v61 = vcombine.high %v11093_v20, %v11097_v39 }
 0x788   :  { %14112 = vmatprep.mubr.bf16.mxu1 %v19306_v7  ;;  %14123 = vmatprep.subr.bf16.mxu0 %v16143_v8  ;;  %v16126_v7 = vcombine.low %v11021_v17, %v11025_v63  ;;  %v11109_v8 = vld [vmem:[#allocation5 + $0x7d8] sm:$0xff]  ;;  %v11323_v19 = vrot.slane %v19432_v37, %v18962_v11 }
 0x789   :  { %14082 = vmatprep.subr.bf16.mxu1 %v16015_v12  ;;  %v10985_v12 = vld [vmem:[#allocation5 + $0x3f8] sm:$0xff]  ;;  %v16214_v5 = vcombine.low %v11109_v8, %v11113_v10 }
 0x78a   :  { %14124 = vmatpush1.bf16.msra.mxu0 %v16142_v0  ;;  %v16215_v0 = vcombine.high %v11109_v8, %v11113_v10  ;;  %v10973_v17 = vld [vmem:[#allocation5 + $0x398] sm:$0xff] }
 0x78b   :  { %14083 = vmatpush1.bf16.msra.mxu1 %v16014_v23  ;;  %14125 = vmatprep.subr.bf16.mxu0 %v16135_v29  ;;  %v16087_v23 = vcombine.high %v10981_v52, %v10985_v12  ;;  %v11101_v29 = vld [vmem:[#allocation5 + $0x798] sm:$0xff] }
 0x78c   :  { %14084 = vmatprep.subr.bf16.mxu1 %v16007_v42  ;;  %v11105_v42 = vld [vmem:[#allocation5 + $0x7b8] sm:$0xff] }
 0x78d   :  { %v10977_v63 = vld [vmem:[#allocation5 + $0x3b8] sm:$0xff] }
 0x78e   :  { %14126 = vmatpush1.bf16.msra.mxu0 %v16134_v15  ;;  %v11319_v15 = vrot.slane %v19432_v37, %v18959_v62  ;;  %v16078_v62 = vcombine.low %v10973_v17, %v10977_v63  ;;  %v10957_v47 = vld [vmem:[#allocation5 + $0x318] sm:$0xff] }
 0x78f   :  { %14085 = vmatpush1.bf16.msra.mxu1 %v16006_v28  ;;  %14127 = vmatprep.subr.bf16.mxu0 %v16127_v55  ;;  %v16086_v28 = vcombine.low %v10981_v52, %v10985_v12  ;;  %v16207_v55 = vcombine.high %v11101_v29, %v11105_v42  ;;  %v10961_v11 = vld [vmem:[#allocation5 + $0x338] sm:$0xff] }
 0x790   :  { %14086 = vmatprep.subr.bf16.mxu1 %v15999_v24  ;;  %v16079_v24 = vcombine.high %v10973_v17, %v10977_v63  ;;  %v16063_v14 = vcombine.high %v10957_v47, %v10961_v11  ;;  %v11077_v27 = vld [vmem:[#allocation5 + $0x6d8] sm:$0xff]  ;;  %v16062_v8 = vcombine.low %v10957_v47, %v10961_v11 }
 0x791   :  { %v11069_v12 = vld [vmem:[#allocation5 + $0x698] sm:$0xff] }
 0x792   :  { %14128 = vmatpush1.bf16.msra.mxu0 %v16126_v7  ;;  %v10965_v7 = vld [vmem:[#allocation5 + $0x358] sm:$0xff] }
 0x793   :  { %14087 = vmatpush1.bf16.msra.mxu1 %v15998_v22  ;;  %14129 = vmatprep.subr.bf16.mxu0 %v16119_v32  ;;  %v10969_v22 = vld [vmem:[#allocation5 + $0x378] sm:$0xff] }
 0x794   :  { %14088 = vmatprep.subr.bf16.mxu1 %v15991_v18  ;;  %v16206_v18 = vcombine.low %v11101_v29, %v11105_v42  ;;  %v11061_v63 = vld [vmem:[#allocation5 + $0x658] sm:$0xff] }
 0x795   :  { %v11293_v47 = vld [vmem:[#allocation5 + $0xd98] sm:$0xff] }
 0x796   :  { %14130 = vmatpush1.bf16.msra.mxu0 %v16118_v34  ;;  %v16071_v34 = vcombine.high %v10965_v7, %v10969_v22  ;;  %v11297_v11 = vld [vmem:[#allocation5 + $0xdb8] sm:$0xff] }
 0x797   :  { %14089 = vmatpush1.bf16.msra.mxu1 %v15990_v26  ;;  %14131 = vmatprep.subr.bf16.mxu0 %v16111_v44  ;;  %v11085_v26 = vld [vmem:[#allocation5 + $0x718] sm:$0xff] }
 0x798   :  { %14090 = vmatprep.subr.bf16.mxu1 %v15983_v6  ;;  %v11089_v44 = vld [vmem:[#allocation5 + $0x738] sm:$0xff] }
 0x79a   :  { %14132 = vmatpush1.bf16.msra.mxu0 %v16110_v33  ;;  %v16198_v33 = vcombine.low %v11093_v20, %v11097_v39 }
 0x79b   :  { %14091 = vmatpush1.bf16.msra.mxu1 %v15982_v41  ;;  %14133 = vmatprep.subr.bf16.mxu0 %v16103_v58  ;;  %v16070_v58 = vcombine.low %v10965_v7, %v10969_v22  ;;  %v10925_v7 = vld [vmem:[#allocation5 + $0x218] sm:$0xff] }
 0x79c   :  { %14092 = vmatprep.subr.bf16.mxu1 %v15975_v45  ;;  %v16191_v45 = vcombine.high %v11085_v26, %v11089_v44  ;;  %v10929_v22 = vld [vmem:[#allocation5 + $0x238] sm:$0xff] }
 0x79e   :  { %14134 = vmatpush1.bf16.msra.mxu0 %v16102_v31  ;;  %v11081_v31 = vld [vmem:[#allocation5 + $0x6f8] sm:$0xff] }
 0x79f   :  { %14093 = vmatpush1.bf16.msra.mxu1 %v15974_v9  ;;  %14135 = vmatprep.subr.bf16.mxu0 %v16095_v43  ;;  %v10949_v9 = vld [vmem:[#allocation5 + $0x2d8] sm:$0xff]  ;;  %v16183_v10 = vcombine.high %v11077_v27, %v11081_v31 }
 0x7a0   :  { %14094 = vmatprep.subr.bf16.mxu1 %v15967_v25  ;;  %v10953_v43 = vld [vmem:[#allocation5 + $0x2f8] sm:$0xff]  ;;  %v16190_v25 = vcombine.low %v11085_v26, %v11089_v44  ;;  %v16030_v44 = vcombine.low %v10925_v7, %v10929_v22 }
 0x7a1   :  { %v16055_v52 = vcombine.high %v10949_v9, %v10953_v43  ;;  %v16054_v29 = vcombine.low %v10949_v9, %v10953_v43  ;;  %v11157_v9 = vld [vmem:[#allocation5 + $0x958] sm:$0xff] }
 0x7a2   :  { %14136 = vmatpush1.bf16.msra.mxu0 %v16094_v38  ;;  %v11073_v38 = vld [vmem:[#allocation5 + $0x6b8] sm:$0xff] }
 0x7a3   :  { %14095 = vmatpush1.bf16.msra.mxu1 %v15966_v46  ;;  %14137 = vmatprep.subr.bf16.mxu0 %v16215_v0  ;;  %v10941_v46 = vld [vmem:[#allocation5 + $0x298] sm:$0xff]  ;;  %v16175_v42 = vcombine.high %v11069_v12, %v11073_v38 }
 0x7a4   :  { %14096 = vmatprep.subr.bf16.mxu1 %v16087_v23  ;;  %v10945_v0 = vld [vmem:[#allocation5 + $0x2b8] sm:$0xff]  ;;  %v16182_v23 = vcombine.low %v11077_v27, %v11081_v31 }
 0x7a5   :  { %v13827_v21 = vpop.f32.mrf.mxu0  ;;  %v16047_v17 = vcombine.high %v10941_v46, %v10945_v0  ;;  %v11289_v27 = vld [vmem:[#allocation5 + $0xd78] sm:$0xff] }
 0x7a6   :  { %v13786_v32 = vpop.f32.mrf.mxu1  ;;  %14138 = vmatpush2.bf16.msra.mxu0 %v16214_v5  ;;  %v11065_v5 = vld [vmem:[#allocation5 + $0x678] sm:$0xff] }
 0x7a7   :  { %v13787_v35 = vadd.f32 %v13786_v32, %v11319_v15  ;;  %v13829_v56 = vpop.f32.mrf.mxu0  ;;  %14097 = vmatpush2.bf16.msra.mxu1 %v16086_v28  ;;  %14139 = vmatprep.subr.bf16.mxu0 %v16207_v55  ;;  %v10933_v15 = vld [vmem:[#allocation5 + $0x258] sm:$0xff]  ;;  %v16174_v55 = vcombine.low %v11069_v12, %v11073_v38  ;;  %v16167_v20 = vcombine.high %v11061_v63, %v11065_v5 }
 0x7a8   :  { %v13788_v57 = vpop.f32.mrf.mxu1  ;;  %14098 = vmatprep.subr.bf16.mxu1 %v16079_v24  ;;  %v10937_v28 = vld [vmem:[#allocation5 + $0x278] sm:$0xff]  ;;  %v16046_v24 = vcombine.low %v10941_v46, %v10945_v0  ;;  %v16166_v32 = vcombine.low %v11061_v63, %v11065_v5 }
 0x7a9   :  { %v13789_v6 = vadd.f32 %v13788_v57, %v11323_v19  ;;  %v13831_v4 = vpop.f32.mrf.mxu0  ;;  %v19438_v2 = vadd.f32 %v13827_v21, %v13787_v35  ;;  %v16039_v39 = vcombine.high %v10933_v15, %v10937_v28  ;;  %v11053_v21 = vld [vmem:[#allocation5 + $0x618] sm:$0xff] }
 0x7aa   :  { %v13790_v53 = vpop.f32.mrf.mxu1  ;;  %14140 = vmatpush2.bf16.msra.mxu0 %v16206_v18  ;;  %v11057_v19 = vld [vmem:[#allocation5 + $0x638] sm:$0xff]  ;;  %v16038_v18 = vcombine.low %v10933_v15, %v10937_v28 }
 0x7ab   :  { %v13832_v41 = vpop.f32.mrf.mxu0  ;;  %14099 = vmatpush2.bf16.msra.mxu1 %v16078_v62  ;;  %14141 = vmatprep.subr.bf16.mxu0 %v16199_v61  ;;  %v19440_v40 = vadd.f32 %v13829_v56, %v13789_v6  ;;  %v16159_v35 = vcombine.high %v11053_v21, %v11057_v19  ;;  %v16031_v56 = vcombine.high %v10925_v7, %v10929_v22  ;;  %v11301_v62 = vld [vmem:[#allocation5 + $0xdd8] sm:$0xff] }
 0x7ac   :  { %v13791_v51 = vpop.f32.mrf.mxu1  ;;  %14100 = vmatprep.subr.bf16.mxu1 %v16071_v34  ;;  %v11305_v61 = vld [vmem:[#allocation5 + $0xdf8] sm:$0xff]  ;;  %v16158_v26 = vcombine.low %v11053_v21, %v11057_v19 }
 0x7ad   :  { %v11173_v57 = vld [vmem:[#allocation5 + $0x9d8] sm:$0xff]  ;;  %v16407_v6 = vcombine.high %v11301_v62, %v11305_v61  ;;  %v16406_v41 = vcombine.low %v11301_v62, %v11305_v61 }
 0x7ae   :  { %14142 = vmatpush2.bf16.msra.mxu0 %v16198_v33  ;;  %v11177_v34 = vld [vmem:[#allocation5 + $0x9f8] sm:$0xff] }
 0x7af   :  { %14101 = vmatpush2.bf16.msra.mxu1 %v16070_v58  ;;  %14143 = vmatprep.subr.bf16.mxu0 %v16191_v45  ;;  %v16279_v4 = vcombine.high %v11173_v57, %v11177_v34  ;;  %v11165_v53 = vld [vmem:[#allocation5 + $0x998] sm:$0xff]  ;;  %v16278_v58 = vcombine.low %v11173_v57, %v11177_v34  ;;  %v16399_v45 = vcombine.high %v11293_v47, %v11297_v11 }
 0x7b0   :  { %14102 = vmatprep.subr.bf16.mxu1 %v16063_v14  ;;  %v11169_v33 = vld [vmem:[#allocation5 + $0x9b8] sm:$0xff] }
 0x7b1   :  { %v16271_v51 = vcombine.high %v11165_v53, %v11169_v33  ;;  %v11285_v14 = vld [vmem:[#allocation5 + $0xd58] sm:$0xff] }
 0x7b2   :  { %14144 = vmatpush2.bf16.msra.mxu0 %v16190_v25  ;;  %v11161_v43 = vld [vmem:[#allocation5 + $0x978] sm:$0xff]  ;;  %v16398_v25 = vcombine.low %v11293_v47, %v11297_v11 }
 0x7b3   :  { %14103 = vmatpush2.bf16.msra.mxu1 %v16062_v8  ;;  %14145 = vmatprep.subr.bf16.mxu0 %v16183_v10  ;;  %v16270_v10 = vcombine.low %v11165_v53, %v11169_v33  ;;  %v16263_v12 = vcombine.high %v11157_v9, %v11161_v43  ;;  %v11277_v38 = vld [vmem:[#allocation5 + $0xd18] sm:$0xff] }
 0x7b4   :  { %14104 = vmatprep.subr.bf16.mxu1 %v16055_v52  ;;  %v16391_v52 = vcombine.high %v11285_v14, %v11289_v27  ;;  %v11281_v46 = vld [vmem:[#allocation5 + $0xd38] sm:$0xff] }
 0x7b5   :  { %v11269_v63 = vld [vmem:[#allocation5 + $0xcd8] sm:$0xff] }
 0x7b6   :  { %14146 = vmatpush2.bf16.msra.mxu0 %v16182_v23  ;;  %v11153_v23 = vld [vmem:[#allocation5 + $0x938] sm:$0xff] }
 0x7b7   :  { %14105 = vmatpush2.bf16.msra.mxu1 %v16054_v29  ;;  %14147 = vmatprep.subr.bf16.mxu0 %v16175_v42  ;;  %v16262_v42 = vcombine.low %v11157_v9, %v11161_v43  ;;  %v11273_v5 = vld [vmem:[#allocation5 + $0xcf8] sm:$0xff] }
 0x7b8   :  { %14106 = vmatprep.subr.bf16.mxu1 %v16047_v17  ;;  %v16383_v17 = vcombine.high %v11277_v38, %v11281_v46  ;;  %v11141_v15 = vld [vmem:[#allocation5 + $0x8d8] sm:$0xff]  ;;  %v16374_v22 = vcombine.low %v11269_v63, %v11273_v5 }
 0x7b9   :  { %v11145_v28 = vld [vmem:[#allocation5 + $0x8f8] sm:$0xff] }
 0x7ba   :  { %14148 = vmatpush2.bf16.msra.mxu0 %v16174_v55  ;;  %v16382_v55 = vcombine.low %v11277_v38, %v11281_v46  ;;  %v11265_v21 = vld [vmem:[#allocation5 + $0xcb8] sm:$0xff] }
 0x7bb   :  { %14107 = vmatpush2.bf16.msra.mxu1 %v16046_v24  ;;  %14149 = vmatprep.subr.bf16.mxu0 %v16167_v20  ;;  %v16375_v20 = vcombine.high %v11269_v63, %v11273_v5  ;;  %v11133_v19 = vld [vmem:[#allocation5 + $0x898] sm:$0xff] }
 0x7bc   :  { %14108 = vmatprep.subr.bf16.mxu1 %v16039_v39  ;;  %v11261_v39 = vld [vmem:[#allocation5 + $0xc98] sm:$0xff] }
 0x7bd   :  { %v11137_v7 = vld [vmem:[#allocation5 + $0x8b8] sm:$0xff]  ;;  %v16366_v34 = vcombine.low %v11261_v39, %v11265_v21 }
 0x7be   :  { %14150 = vmatpush2.bf16.msra.mxu0 %v16166_v32  ;;  %v16246_v32 = vcombine.low %v11141_v15, %v11145_v28  ;;  %v11257_v62 = vld [vmem:[#allocation5 + $0xc78] sm:$0xff] }
 0x7bf   :  { %14109 = vmatpush2.bf16.msra.mxu1 %v16038_v18  ;;  %14151 = vmatprep.subr.bf16.mxu0 %v16159_v35  ;;  %v16367_v18 = vcombine.high %v11261_v39, %v11265_v21  ;;  %v16239_v35 = vcombine.high %v11133_v19, %v11137_v7  ;;  %v11125_v61 = vld [vmem:[#allocation5 + $0x858] sm:$0xff] }
 0x7c0   :  { %14110 = vmatprep.subr.bf16.mxu1 %v16031_v56  ;;  %v11253_v56 = vld [vmem:[#allocation5 + $0xc58] sm:$0xff] }
 0x7c1   :  { %v11129_v57 = vld [vmem:[#allocation5 + $0x878] sm:$0xff]  ;;  %v16358_v33 = vcombine.low %v11253_v56, %v11257_v62 }
 0x7c2   :  { %14152 = vmatpush2.bf16.msra.mxu0 %v16158_v26  ;;  %v16238_v26 = vcombine.low %v11133_v19, %v11137_v7  ;;  %v11249_v47 = vld [vmem:[#allocation5 + $0xc38] sm:$0xff] }
 0x7c3   :  { %14111 = vmatpush2.bf16.msra.mxu1 %v16030_v44  ;;  %14203 = vmatprep.subr.bf16.mxu0 %v16407_v6  ;;  %v16359_v44 = vcombine.high %v11253_v56, %v11257_v62  ;;  %v16231_v6 = vcombine.high %v11125_v61, %v11129_v57  ;;  %v11117_v11 = vld [vmem:[#allocation5 + $0x818] sm:$0xff] }
 0x7c4   :  { %14162 = vmatprep.subr.bf16.mxu1 %v16279_v4  ;;  %v11245_v4 = vld [vmem:[#allocation5 + $0xc18] sm:$0xff] }
 0x7c5   :  { %v19442_v31 = vpop.f32.mrf.mxu0  ;;  %14154 = vmatmul.mubr.bf16.vlgmr.msra.gmra.mxu0 %v19364_v49  ;;  %v11149_v49 = vld [vmem:[#allocation5 + $0x918] sm:$0xff] }
 0x7c6   :  { %14113 = vmatmul.mubr.bf16.vlgmr.msra.gmra.mxu1 %v19315_v30  ;;  %14204 = vmatpush1.bf16.msra.mxu0 %v16406_v41  ;;  %v16390_v30 = vcombine.low %v11285_v14, %v11289_v27  ;;  %v16254_v24 = vcombine.low %v11149_v49, %v11153_v23  ;;  %v11121_v53 = vld [vmem:[#allocation5 + $0x838] sm:$0xff]  ;;  %v16230_v41 = vcombine.low %v11125_v61, %v11129_v57 }
 0x7c7   :  { %v19446_v8 = vpop.f32.mrf.mxu0  ;;  %14163 = vmatpush1.bf16.msra.mxu1 %v16278_v58  ;;  %14194 = vmatprep.mubr.bf16.mxu1 %v19379_v50  ;;  %v16255_v50 = vcombine.high %v11149_v49, %v11153_v23  ;;  %v16351_v58 = vcombine.high %v11245_v4, %v11249_v47  ;;  %v11241_v14 = vld [vmem:[#allocation5 + $0xbf8] sm:$0xff]  ;;  %v16350_v27 = vcombine.low %v11245_v4, %v11249_v47 }
 0x7c8   :  { %14205 = vmatprep.subr.bf16.mxu0 %v16399_v45  ;;  %14164 = vmatprep.subr.bf16.mxu1 %v16271_v51  ;;  %v16223_v45 = vcombine.high %v11117_v11, %v11121_v53  ;;  %v11237_v51 = vld [vmem:[#allocation5 + $0xbd8] sm:$0xff]  ;;  %v16222_v9 = vcombine.low %v11117_v11, %v11121_v53  ;;  %v11327_v11 = vrot.slane %v19432_v37, %v18986_v48  ;;  %v14271_v48 = vld [vmem:[#allocation7 + $0x68] sm:$0xff] }
 0x7c9   :  { %v13913_v0 = vpop.f32.mrf.mxu0  ;;  %14235 = vmatprep.mubr.bf16.mxu0 %v18791_v16  ;;  %v16247_v16 = vcombine.high %v11141_v15, %v11145_v28  ;;  %v16343_v43 = vcombine.high %v11237_v51, %v11241_v14  ;;  %v11221_v38 = vld [vmem:[#allocation5 + $0xb58] sm:$0xff]  ;;  %v14244_v15 = vmax.f32 %v19422_v3, 0.0  ;;  %v11331_v53 = vrot.slane %v19432_v37, %v18989_v54  ;;  %v14270_v54 = vld [vmem:[#allocation7 + $0x60] sm:$0xff] }
 0x7ca   :  { %14206 = vmatpush1.bf16.msra.mxu0 %v16398_v25  ;;  %v11229_v25 = vld [vmem:[#allocation5 + $0xb98] sm:$0xff] }
 0x7cb   :  { %v13914_v29 = vpop.f32.mrf.mxu0  ;;  %14165 = vmatpush1.bf16.msra.mxu1 %v16270_v10  ;;  %14207 = vmatprep.subr.bf16.mxu0 %v16391_v52  ;;  %v11233_v10 = vld [vmem:[#allocation5 + $0xbb8] sm:$0xff]  ;;  %v16342_v52 = vcombine.low %v11237_v51, %v11241_v14 }
 0x7cc   :  { %14166 = vmatprep.subr.bf16.mxu1 %v16263_v12  ;;  %v16335_v12 = vcombine.high %v11229_v25, %v11233_v10  ;;  %v11225_v46 = vld [vmem:[#allocation5 + $0xb78] sm:$0xff]  ;;  %v16334_v23 = vcombine.low %v11229_v25, %v11233_v10  ;;  %v14288_v25 = vld [vmem:[#allocation7 + $0xf0] sm:$0xff] }
 0x7cd   :  { %v16327_v29 = vcombine.high %v11221_v38, %v11225_v46  ;;  %v11217_v63 = vld [vmem:[#allocation5 + $0xb38] sm:$0xff]  ;;  %v14272_v10 = vld [vmem:[#allocation7 + $0x70] sm:$0xff] }
 0x7ce   :  { %14208 = vmatpush1.bf16.msra.mxu0 %v16390_v30  ;;  %v11205_v39 = vld [vmem:[#allocation5 + $0xad8] sm:$0xff] }
 0x7cf   :  { %14167 = vmatpush1.bf16.msra.mxu1 %v16262_v42  ;;  %14209 = vmatprep.subr.bf16.mxu0 %v16383_v17  ;;  %v11197_v7 = vld [vmem:[#allocation5 + $0xa98] sm:$0xff] }
 0x7d0   :  { %14168 = vmatprep.subr.bf16.mxu1 %v16255_v50  ;;  %v11213_v50 = vld [vmem:[#allocation5 + $0xb18] sm:$0xff] }
 0x7d1   :  { %v16318_v19 = vcombine.low %v11213_v50, %v11217_v63  ;;  %v11181_v62 = vld [vmem:[#allocation5 + $0xa18] sm:$0xff] }
 0x7d2   :  { %14210 = vmatpush1.bf16.msra.mxu0 %v16382_v55  ;;  %v16326_v55 = vcombine.low %v11221_v38, %v11225_v46  ;;  %v11185_v61 = vld [vmem:[#allocation5 + $0xa38] sm:$0xff] }
 0x7d3   :  { %14169 = vmatpush1.bf16.msra.mxu1 %v16254_v24  ;;  %14211 = vmatprep.subr.bf16.mxu0 %v16375_v20  ;;  %v16319_v24 = vcombine.high %v11213_v50, %v11217_v63  ;;  %v14245_v20 = vmax.f32 %v19426_v1, 0.0  ;;  %v14285_v38 = vld [vmem:[#allocation7 + $0xd8] sm:$0xff] }
 0x7d4   :  { %14170 = vmatprep.subr.bf16.mxu1 %v16247_v16  ;;  %v14269_v46 = vld [vmem:[#allocation7 + $0x58] sm:$0xff] }
 0x7d5   :  { %v14265_v50 = vld [vmem:[#allocation7 + $0x38] sm:$0xff] }
 0x7d6   :  { %14212 = vmatpush1.bf16.msra.mxu0 %v16374_v22 }
 0x7d7   :  { %14171 = vmatpush1.bf16.msra.mxu1 %v16246_v32  ;;  %14213 = vmatprep.subr.bf16.mxu0 %v16367_v18  ;;  %v11189_v18 = vld [vmem:[#allocation5 + $0xa58] sm:$0xff] }
 0x7d8   :  { %14172 = vmatprep.subr.bf16.mxu1 %v16239_v35  ;;  %v11193_v35 = vld [vmem:[#allocation5 + $0xa78] sm:$0xff] }
 0x7d9   :  { %v16295_v56 = vcombine.high %v11189_v18, %v11193_v35  ;;  %v16294_v57 = vcombine.low %v11189_v18, %v11193_v35  ;;  %v14277_v18 = vld [vmem:[#allocation7 + $0x98] sm:$0xff] }
 0x7da   :  { %14214 = vmatpush1.bf16.msra.mxu0 %v16366_v34  ;;  %v16287_v34 = vcombine.high %v11181_v62, %v11185_v61  ;;  %v14261_v35 = vld [vmem:[#allocation7 + $0x18] sm:$0xff] }
 0x7db   :  { %14173 = vmatpush1.bf16.msra.mxu1 %v16238_v26  ;;  %14215 = vmatprep.subr.bf16.mxu0 %v16359_v44  ;;  %v16286_v26 = vcombine.low %v11181_v62, %v11185_v61  ;;  %v14275_v62 = vld [vmem:[#allocation7 + $0x88] sm:$0xff] }
 0x7dc   :  { %14174 = vmatprep.subr.bf16.mxu1 %v16231_v6  ;;  %v14259_v61 = vld [vmem:[#allocation7 + $0x8] sm:$0xff] }
 0x7de   :  { %14216 = vmatpush1.bf16.msra.mxu0 %v16358_v33 }
 0x7df   :  { %14175 = vmatpush1.bf16.msra.mxu1 %v16230_v41  ;;  %14217 = vmatprep.subr.bf16.mxu0 %v16351_v58 }
 0x7e0   :  { %14176 = vmatprep.subr.bf16.mxu1 %v16223_v45 }
 0x7e2   :  { %14218 = vmatpush1.bf16.msra.mxu0 %v16350_v27 }
 0x7e3   :  { %14177 = vmatpush1.bf16.msra.mxu1 %v16222_v9  ;;  %v14289_v9 = vld [vmem:[#allocation7 + $0xf8] sm:$0xff] }
 0x7e4   :  { %14178 = vmatprep.subr.bf16.mxu1 %v16343_v43  ;;  %v14273_v43 = vld [vmem:[#allocation7 + $0x78] sm:$0xff]  ;;  %16411 = vmatprep.subr.mxu0 %v14289_v9 }
 0x7e5   :  { %14236 = vmatmul.mubr.bf16.vlgmr.msra.gmra.mxu0 %v19385_v36 }
 0x7e6   :  { %v13868_v0 = vpop.f32.mrf.mxu1  ;;  %16412 = vmatpush3.msra.mxu0 %v14273_v43 }
 0x7e7   :  { %v13869_v49 = vadd.f32 %v13868_v0, %v19438_v2  ;;  %14179 = vmatpush2.bf16.msra.mxu1 %v16342_v52  ;;  %v14287_v52 = vld [vmem:[#allocation7 + $0xe8] sm:$0xff]  ;;  %16413 = vmatprep.subr.mxu0 %v14288_v25  ;;  %v14284_v0 = vld [vmem:[#allocation7 + $0xd0] sm:$0xff] }
 0x7e8   :  { %v13870_v30 = vpop.f32.mrf.mxu1  ;;  %14180 = vmatprep.subr.bf16.mxu1 %v16335_v12  ;;  %16414 = vmatpush3.msra.mxu0 %v14272_v10  ;;  %v14286_v12 = vld [vmem:[#allocation7 + $0xe0] sm:$0xff] }
 0x7e9   :  { %v13910_v42 = vadd.f32 %v19442_v31, %v13869_v49  ;;  %v13871_v17 = vadd.f32 %v13870_v30, %v19440_v40  ;;  %v11209_v40 = vld [vmem:[#allocation5 + $0xaf8] sm:$0xff]  ;;  %16415 = vmatprep.subr.mxu0 %v14287_v52  ;;  %v14268_v49 = vld [vmem:[#allocation7 + $0x50] sm:$0xff]  ;;  %v14267_v30 = vld [vmem:[#allocation7 + $0x48] sm:$0xff] }
 0x7ea   :  { %v13872_v5 = vpop.f32.mrf.mxu1  ;;  %v16311_v3 = vcombine.high %v11205_v39, %v11209_v40  ;;  %v16310_v22 = vcombine.low %v11205_v39, %v11209_v40  ;;  %16416 = vmatpush3.msra.mxu0 %v14271_v48  ;;  %v14263_v40 = vld [vmem:[#allocation7 + $0x28] sm:$0xff] }
 0x7eb   :  { %v14246_v36 = vmax.f32 %v13910_v42, 0.0  ;;  %v13912_v28 = vadd.f32 %v19446_v8, %v13871_v17  ;;  %14181 = vmatpush2.bf16.msra.mxu1 %v16334_v23  ;;  %v11201_v8 = vld [vmem:[#allocation5 + $0xab8] sm:$0xff]  ;;  %16417 = vmatprep.subr.mxu0 %v14286_v12  ;;  %v14283_v23 = vld [vmem:[#allocation7 + $0xc8] sm:$0xff]  ;;  %v14266_v42 = vld [vmem:[#allocation7 + $0x40] sm:$0xff] }
 0x7ec   :  { %v13873_v2 = vpop.f32.mrf.mxu1  ;;  %14182 = vmatprep.subr.bf16.mxu1 %v16327_v29  ;;  %v16303_v32 = vcombine.high %v11197_v7, %v11201_v8  ;;  %v16302_v1 = vcombine.low %v11197_v7, %v11201_v8  ;;  %16418 = vmatpush3.msra.mxu0 %v14270_v54  ;;  %v14282_v29 = vld [vmem:[#allocation7 + $0xc0] sm:$0xff]  ;;  %v14281_v17 = vld [vmem:[#allocation7 + $0xb8] sm:$0xff] }
 0x7ed   :  { %v19457_v16 = vmax.f32 %v14244_v15, %v14246_v36  ;;  %v14247_v31 = vmax.f32 %v13912_v28, 0.0  ;;  %16419 = vmatprep.subr.mxu0 %v14285_v38  ;;  %v14280_v36 = vld [vmem:[#allocation7 + $0xb0] sm:$0xff]  ;;  %v14278_v7 = vld [vmem:[#allocation7 + $0xa0] sm:$0xff] }
 0x7ee   :  { %16420 = vmatpush3.msra.mxu0 %v14269_v46  ;;  %v11335_v46 = vrot.slane %v19432_v37, %v19025_v59 }
 0x7ef   :  { %v19459_v21 = vmax.f32 %v14245_v20, %v14247_v31  ;;  %14183 = vmatpush2.bf16.msra.mxu1 %v16326_v55  ;;  %16421 = vmatprep.subr.mxu0 %v14284_v0  ;;  %v14264_v55 = vld [vmem:[#allocation7 + $0x30] sm:$0xff]  ;;  %v14279_v31 = vld [vmem:[#allocation7 + $0xa8] sm:$0xff]  ;;  %v11339_v0 = vrot.slane %v19432_v37, %v19028_v60 }
 0x7f0   :  { %14184 = vmatprep.subr.bf16.mxu1 %v16319_v24  ;;  %16422 = vmatpush3.msra.mxu0 %v14268_v49 }
 0x7f1   :  { %16423 = vmatprep.subr.mxu0 %v14283_v23 }
 0x7f2   :  { %16424 = vmatpush3.msra.mxu0 %v14267_v30 }
 0x7f3   :  { %14185 = vmatpush2.bf16.msra.mxu1 %v16318_v19  ;;  %16425 = vmatprep.subr.mxu0 %v14282_v29 }
 0x7f4   :  { %14186 = vmatprep.subr.bf16.mxu1 %v16311_v3  ;;  %16426 = vmatpush3.msra.mxu0 %v14266_v42 }
 0x7f5   :  { %16427 = vmatprep.subr.mxu0 %v14281_v17 }
 0x7f6   :  { %16428 = vmatpush3.msra.mxu0 %v14265_v50 }
 0x7f7   :  { %14187 = vmatpush2.bf16.msra.mxu1 %v16310_v22  ;;  %16429 = vmatprep.subr.mxu0 %v14280_v36  ;;  %v14262_v22 = vld [vmem:[#allocation7 + $0x20] sm:$0xff] }
 0x7f8   :  { %14188 = vmatprep.subr.bf16.mxu1 %v16303_v32  ;;  %16430 = vmatpush3.msra.mxu0 %v14264_v55 }
 0x7f9   :  { %16431 = vmatprep.subr.mxu0 %v14279_v31 }
 0x7fa   :  { %16432 = vmatpush3.msra.mxu0 %v14263_v40  ;;  %v14372_v40 = vld [vmem:[#allocation8 + $0x20] sm:$0xff] }
 0x7fb   :  { %14189 = vmatpush2.bf16.msra.mxu1 %v16302_v1  ;;  %16433 = vmatprep.subr.mxu0 %v14278_v7  ;;  %v14276_v1 = vld [vmem:[#allocation7 + $0x90] sm:$0xff] }
 0x7fc   :  { %14190 = vmatprep.subr.bf16.mxu1 %v16295_v56  ;;  %16434 = vmatpush3.msra.mxu0 %v14262_v22  ;;  %v14260_v56 = vld [vmem:[#allocation7 + $0x10] sm:$0xff]  ;;  %v14474_v22 = vld [vmem:[#allocation10 + $0x60] sm:$0xff] }
 0x7fd   :  { %16435 = vmatprep.subr.mxu0 %v14277_v18  ;;  %v14476_v7 = vld [vmem:[#allocation10 + $0x70] sm:$0xff] }
 0x7fe   :  { %16436 = vmatpush3.msra.mxu0 %v14261_v35  ;;  %v14472_v18 = vld [vmem:[#allocation10 + $0x50] sm:$0xff]  ;;  %v14471_v35 = vld [vmem:[#allocation10 + $0x48] sm:$0xff] }
 0x7ff   :  { %14191 = vmatpush2.bf16.msra.mxu1 %v16294_v57  ;;  %16437 = vmatprep.subr.mxu0 %v14276_v1  ;;  %v14274_v57 = vld [vmem:[#allocation7 + $0x80] sm:$0xff] }
 0x800   :  { %14192 = vmatprep.subr.bf16.mxu1 %v16287_v34  ;;  %16438 = vmatpush3.msra.mxu0 %v14260_v56  ;;  %v14258_v34 = vld [vmem:[#allocation7] sm:$0xff]  ;;  %v14469_v56 = vld [vmem:[#allocation10 + $0x38] sm:$0xff] }
 0x801   :  { %16439 = vmatprep.subr.mxu0 %v14275_v62  ;;  %v14470_v1 = vld [vmem:[#allocation10 + $0x40] sm:$0xff]  ;;  %v14468_v62 = vld [vmem:[#allocation10 + $0x30] sm:$0xff] }
 0x802   :  { %16440 = vmatpush3.msra.mxu0 %v14259_v61  ;;  %v14467_v61 = vld [vmem:[#allocation10 + $0x28] sm:$0xff] }
 0x803   :  { %14193 = vmatpush2.bf16.msra.mxu1 %v16286_v26  ;;  %16441 = vmatprep.subr.mxu0 %v14274_v57  ;;  %v14383_v26 = vld [vmem:[#allocation8 + $0x78] sm:$0xff]  ;;  %v14466_v57 = vld [vmem:[#allocation10 + $0x20] sm:$0xff] }
 0x804   :  { %16442 = vmatpush3.msra.mxu0 %v14258_v34  ;;  %v14465_v34 = vld [vmem:[#allocation10 + $0x18] sm:$0xff] }
 0x805   :  { %v13950_v44 = vpop.f32.mrf.mxu0 }
 0x806   :  { %14195 = vmatmul.mubr.bf16.vlgmr.msra.gmra.mxu1 %v19383_v13  ;;  %v13951_v33 = vadd.f32 %v13950_v44, %v11327_v11  ;;  %v18792_v44 = vmov 0.0   ;;  %v14379_v11 = vld [vmem:[#allocation8 + $0x58] sm:$0xff] }
 0x807   :  { %v13952_v6 = vpop.f32.mrf.mxu0  ;;  %16480 = vmatprep.subr.mxu1 %v18792_v44  ;;  %16515 = vmatprep.subr.mxu0 %v18792_v44 }
 0x808   :  { %v13953_v58 = vadd.f32 %v13952_v6, %v11331_v53  ;;  %v14382_v6 = vld [vmem:[#allocation8 + $0x70] sm:$0xff]  ;;  %16481 = vmatpush3.msra.mxu1 %v14383_v26  ;;  %16512 = vmatprep.mubr.msk.f32.mxu1 %vm18793_vm1, %v18792_v44 }
 0x809   :  { %v13954_v4 = vpop.f32.mrf.mxu0  ;;  %16482 = vmatprep.subr.mxu1 %v18792_v44  ;;  %v14378_v53 = vld [vmem:[#allocation8 + $0x50] sm:$0xff] }
 0x80a   :  { %v14381_v4 = vld [vmem:[#allocation8 + $0x68] sm:$0xff]  ;;  %16483 = vmatpush3.msra.mxu1 %v14382_v6  ;;  %v16408_v6 = vld [vmem:[#allocation11 + $0x24] ss:$0 sm:$0xff] }
 0x80b   :  { %v13955_v47 = vpop.f32.mrf.mxu0  ;;  %16484 = vmatprep.subr.mxu1 %v18792_v44 }
 0x80c   :  { %v14380_v47 = vld [vmem:[#allocation8 + $0x60] sm:$0xff]  ;;  %16485 = vmatpush3.msra.mxu1 %v14381_v4 }
 0x80d   :  { %16486 = vmatprep.subr.mxu1 %v18792_v44 }
 0x80e   :  { %16487 = vmatpush3.msra.mxu1 %v14380_v47 }
 0x80f   :  { %16488 = vmatprep.subr.mxu1 %v18792_v44 }
 0x810   :  { %16489 = vmatpush3.msra.mxu1 %v14379_v11 }
 0x811   :  { %16490 = vmatprep.subr.mxu1 %v18792_v44 }
 0x812   :  { %16491 = vmatpush3.msra.mxu1 %v14378_v53 }
 0x813   :  { %16492 = vmatprep.subr.mxu1 %v18792_v44 }
 0x826   :  { %v13991_v41 = vpop.f32.mrf.mxu1 }
 0x827   :  { %v13992_v45 = vadd.f32 %v13991_v41, %v13951_v33  ;;  %v14377_v33 = vld [vmem:[#allocation8 + $0x48] sm:$0xff]  ;;  %v14376_v41 = vld [vmem:[#allocation8 + $0x40] sm:$0xff] }
 0x828   :  { %v13993_v51 = vpop.f32.mrf.mxu1  ;;  %16493 = vmatpush3.msra.mxu1 %v14377_v33  ;;  %v14464_v33 = vld [vmem:[#allocation10 + $0x10] sm:$0xff] }
 0x829   :  { %v13994_v14 = vadd.f32 %v13993_v51, %v13953_v58  ;;  %16494 = vmatprep.subr.mxu1 %v18792_v44  ;;  %v14375_v58 = vld [vmem:[#allocation8 + $0x38] sm:$0xff]  ;;  %v14373_v51 = vld [vmem:[#allocation8 + $0x28] sm:$0xff] }
 0x82a   :  { %v13995_v27 = vpop.f32.mrf.mxu1  ;;  %16495 = vmatpush3.msra.mxu1 %v14376_v41  ;;  %v14463_v41 = vld [vmem:[#allocation10 + $0x8] sm:$0xff] }
 0x82b   :  { %16496 = vmatprep.subr.mxu1 %v18792_v44 }
 0x82c   :  { %v13996_v13 = vpop.f32.mrf.mxu1  ;;  %16497 = vmatpush3.msra.mxu1 %v14375_v58  ;;  %v14462_v58 = vld [vmem:[#allocation10] sm:$0xff] }
 0x82d   :  { %16498 = vmatprep.subr.mxu1 %v18792_v44 }
 0x845   :  { %v14032_v63 = vpop.f32.mrf.mxu0 }
 0x846   :  { %v14033_v5 = vadd.f32 %v14032_v63, %v13992_v45  ;;  %v14073_v15 = vpop.f32.mrf.mxu1  ;;  %v14374_v45 = vld [vmem:[#allocation8 + $0x30] sm:$0xff] }
 0x847   :  { %v14034_v28 = vpop.f32.mrf.mxu0  ;;  %16499 = vmatpush3.msra.mxu1 %v14374_v45  ;;  %v16409_v45 = vld [vmem:[#allocation11 + $0x25] ss:$0 sm:$0xff] }
 0x848   :  { %v19466_v2 = vadd.f32 %v14073_v15, %v14033_v5  ;;  %v14035_v24 = vadd.f32 %v14034_v28, %v13994_v14  ;;  %v14075_v20 = vpop.f32.mrf.mxu1  ;;  %16500 = vmatprep.subr.mxu1 %v18792_v44 }
 0x849   :  { %v14036_v39 = vpop.f32.mrf.mxu0  ;;  %16501 = vmatpush3.msra.mxu1 %v14373_v51 }
 0x84a   :  { %v19468_v19 = vadd.f32 %v14075_v20, %v14035_v24  ;;  %v14077_v3 = vpop.f32.mrf.mxu1  ;;  %16502 = vmatprep.subr.mxu1 %v18792_v44  ;;  %v14248_v36 = vmax.f32 %v19466_v2, 0.0  ;;  %v14370_v2 = vld [vmem:[#allocation8 + $0x10] sm:$0xff] }
 0x84b   :  { %v14037_v8 = vpop.f32.mrf.mxu0  ;;  %16503 = vmatpush3.msra.mxu1 %v14372_v40  ;;  %v14371_v3 = vld [vmem:[#allocation8 + $0x18] sm:$0xff] }
 0x84c   :  { %v14078_v32 = vpop.f32.mrf.mxu1  ;;  %v14249_v59 = vmax.f32 %v19468_v19, 0.0  ;;  %16504 = vmatprep.subr.mxu1 %v18792_v44  ;;  %v14369_v19 = vld [vmem:[#allocation8 + $0x8] sm:$0xff] }
 0x84d   :  { %16505 = vmatpush3.msra.mxu1 %v14371_v3  ;;  %v14475_v8 = vld [vmem:[#allocation10 + $0x68] sm:$0xff]  ;;  %v14473_v32 = vld [vmem:[#allocation10 + $0x58] sm:$0xff] }
 0x84e   :  { %16506 = vmatprep.subr.mxu1 %v18792_v44 }
 0x84f   :  { %16507 = vmatpush3.msra.mxu1 %v14370_v2 }
 0x850   :  { %16508 = vmatprep.subr.mxu1 %v18792_v44 }
 0x851   :  { %16509 = vmatpush3.msra.mxu1 %v14369_v19 }
 0x852   :  { %16510 = vmatprep.subr.mxu1 %v18792_v44 }
 0x885   :  { %v14155_v14 = vpop.f32.mrf.mxu0 }
 0x886   :  { %v14114_v27 = vpop.f32.mrf.mxu1 }
 0x887   :  { %v14157_v9 = vpop.f32.mrf.mxu0  ;;  %v14115_v49 = vadd.f32 %v14114_v27, %v11335_v46 }
 0x888   :  { %v14116_v43 = vpop.f32.mrf.mxu1 }
 0x889   :  { %v14159_v25 = vpop.f32.mrf.mxu0  ;;  %v14117_v23 = vadd.f32 %v14116_v43, %v11339_v0  ;;  %v14156_v30 = vadd.f32 %v14155_v14, %v14115_v49  ;;  %v16410_v43 = vld [vmem:[#allocation11 + $0x26] ss:$0 sm:$0xff] }
 0x88a   :  { %v14118_v13 = vpop.f32.mrf.mxu1 }
 0x88b   :  { %v14160_v10 = vpop.f32.mrf.mxu0  ;;  %v14158_v17 = vadd.f32 %v14157_v9, %v14117_v23 }
 0x88c   :  { %v14119_v52 = vpop.f32.mrf.mxu1 }
 0x8a5   :  { %v14237_v48 = vpop.f32.mrf.mxu0 }
 0x8a7   :  { %v14239_v12 = vpop.f32.mrf.mxu0 }
 0x8a9   :  { %v14241_v54 = vpop.f32.mrf.mxu0 }
 0x8ab   :  { %v14242_v38 = vpop.f32.mrf.mxu0 }
 0x8c6   :  { %v14196_v29 = vpop.f32.mrf.mxu1 }
 0x8c7   :  { %v14197_v42 = vadd.f32 %v14196_v29, %v14156_v30 }
 0x8c8   :  { %v14198_v50 = vpop.f32.mrf.mxu1 }
 0x8c9   :  { %v14238_v63 = vadd.f32 %v14237_v48, %v14197_v42  ;;  %v14199_v5 = vadd.f32 %v14198_v50, %v14158_v17 }
 0x8ca   :  { %v14200_v15 = vpop.f32.mrf.mxu1 }
 0x8cb   :  { %v14250_v28 = vmax.f32 %v14238_v63, 0.0  ;;  %v14240_v55 = vadd.f32 %v14239_v12, %v14199_v5 }
 0x8cc   :  { %v14201_v24 = vpop.f32.mrf.mxu1 }
 0x8cd   :  { %v14254_v20 = vmax.f32 %v14248_v36, %v14250_v28  ;;  %v14251_v31 = vmax.f32 %v14240_v55, 0.0 }
 0x8cf   :  { %v14256_v60 = vmax.f32 %v19457_v16, %v14254_v20  ;;  %v14255_v37 = vmax.f32 %v14249_v59, %v14251_v31  ;;  %v14368_v16 = vld [vmem:[#allocation8] sm:$0xff] }
 0x8d0   :  { %16511 = vmatpush3.msra.mxu1 %v14368_v16 }
 0x8d1   :  { %v14257_v39 = vmax.f32 %v19459_v21, %v14255_v37  ;;  %v14477_v21 = vld [vmem:[#allocation10 + $0x78] sm:$0xff] }
 0x8d3   :  { %14361 = vmatprep.mubr.f32.mxu0 %v14257_v39 }
 0x8d4   :  { %14362 = vmatmul.mubr.f32.vlgmr.msra.gmra.mxu0 %v14256_v60 }
 0x8d5   :  { %16547 = vmatprep.mubr.msk.f32.mxu0 %vm18793_vm1, %v18792_v44  ;;  %16516 = vmatpush3.msra.mxu0 %v14477_v21 }
 0x8d6   :  { %16517 = vmatprep.subr.mxu0 %v18792_v44 }
 0x8d7   :  { %16518 = vmatpush3.msra.mxu0 %v14476_v7 }
 0x8d8   :  { %16519 = vmatprep.subr.mxu0 %v18792_v44 }
 0x8d9   :  { %16520 = vmatpush3.msra.mxu0 %v14475_v8 }
 0x8da   :  { %16521 = vmatprep.subr.mxu0 %v18792_v44 }
 0x8db   :  { %16522 = vmatpush3.msra.mxu0 %v14474_v22 }
 0x8dc   :  { %16523 = vmatprep.subr.mxu0 %v18792_v44 }
 0x8dd   :  { %16524 = vmatpush3.msra.mxu0 %v14473_v32 }
 0x8de   :  { %16525 = vmatprep.subr.mxu0 %v18792_v44 }
 0x8df   :  { %16526 = vmatpush3.msra.mxu0 %v14472_v18 }
 0x8e0   :  { %16527 = vmatprep.subr.mxu0 %v18792_v44 }
 0x8e1   :  { %16528 = vmatpush3.msra.mxu0 %v14471_v35 }
 0x8e2   :  { %16529 = vmatprep.subr.mxu0 %v18792_v44 }
 0x8e3   :  { %16530 = vmatpush3.msra.mxu0 %v14470_v1 }
 0x8e4   :  { %16531 = vmatprep.subr.mxu0 %v18792_v44 }
 0x8e5   :  { %16532 = vmatpush3.msra.mxu0 %v14469_v56 }
 0x8e6   :  { %16533 = vmatprep.subr.mxu0 %v18792_v44 }
 0x8e7   :  { %16534 = vmatpush3.msra.mxu0 %v14468_v62 }
 0x8e8   :  { %16535 = vmatprep.subr.mxu0 %v18792_v44 }
 0x8e9   :  { %16536 = vmatpush3.msra.mxu0 %v14467_v61 }
 0x8ea   :  { %16537 = vmatprep.subr.mxu0 %v18792_v44 }
 0x8eb   :  { %16538 = vmatpush3.msra.mxu0 %v14466_v57 }
 0x8ec   :  { %16539 = vmatprep.subr.mxu0 %v18792_v44 }
 0x8ed   :  { %16540 = vmatpush3.msra.mxu0 %v14465_v34 }
 0x8ee   :  { %16541 = vmatprep.subr.mxu0 %v18792_v44 }
 0x8ef   :  { %16542 = vmatpush3.msra.mxu0 %v14464_v33 }
 0x8f0   :  { %16543 = vmatprep.subr.mxu0 %v18792_v44 }
 0x8f1   :  { %16544 = vmatpush3.msra.mxu0 %v14463_v41 }
 0x8f2   :  { %16545 = vmatprep.subr.mxu0 %v18792_v44 }
 0x8f3   :  { %16546 = vmatpush3.msra.mxu0 %v14462_v58 }
 0x994   :  { %v16443_v26 = vpop.f32.mrf.mxu0 }
 0x996   :  { %v16444_v4 = vpop.f32.mrf.mxu0 }
 0x997   :  { %v16445_v47 = vadd.f32 %v16444_v4, %v16443_v26 }
 0x999   :  { %v14364_v11 = vadd.f32 %v16445_v47, %v16408_v6 }
 0x99b   :  { %v14367_v53 = vmax.f32 %v14364_v11, 0.0 }
 0x99d   :  { %16513 = vmatmul.mubr.f32.vlgmr.msra.gmra.mxu1 %v14367_v53 }
 0xa5d   :  { %v14457_v51 = vpop.f32.mrf.mxu1 }
 0xa5e   :  { %v14458_v14 = vadd.f32 %v16409_v45, %v14457_v51 }
 0xa5f   :  { %v16514_v27 = vpop.f32.mrf.mxu1 }
 0xa60   :  { %v14461_v9 = vmax.f32 %v14458_v14, 0.0 }
 0xa62   :  { %16548 = vmatmul.mubr.f32.vlgmr.msra.gmra.mxu0 %v14461_v9 }
 0xb22   :  { %v14551_v25 = vpop.f32.mrf.mxu0 }
 0xb23   :  { %v14552_v13 = vadd.f32 %v16410_v43, %v14551_v25 }
 0xb24   :  { %v16549_v10 = vpop.f32.mrf.mxu0 }
 0xb25   :  { %14555 = vst [vmem:[#allocation13] sm:$0xff] %v14552_v13 }
 0xb26   :  { %18760 = shalt.err (!%p18757_p6)
}
 0xb27   :  { %14565 = dma.vmem_to_hbm [thread:$0]  %s14563_s22, 128, %s19522_s7, [#allocation4]  }
 0xb28   :  { %18777 = dma.done.wait [#allocation4], 128  }
 0xb29   :  { %18778 = vsyncadd [#allocation4], 4294967168 }
 0xb2a   :  { %14569 = vsyncpa [#allocation3], 1 }
 0xb2b   :  { %14570 = vsyncpa [#allocation6], 1 }
 0xb2c   :  { %14571 = vsyncpa [#allocation9], 1 }
 0xb2d   :  { %14572 = vsyncpa [#allocation12], 1 }
 0xb2e   :  { %14573 = vsyncpa [#allocation4], 1 }

</bundles_post_ra>
